<compile_context>
chip_gen: v6e
topology: v6e:2x2x1
jax: 0.10.0
libtpu: 0.0.40
codegen_flags: <defaults>
</compile_context>

<pallas_src>
from functools import partial

import jax
import jax.numpy as jnp
from jax.experimental import pallas as pl
from jax.experimental.pallas import tpu as pltpu


def _decoder_kernel(num_layers, steps_per_block,
                    # inputs
                    emb_ref, ctx_hbm, h0_hbm, c0_hbm,
                    w_ih_hbm, w_hh_hbm, b_hbm, w_a_hbm, w_oc_hbm, w_oh_hbm,
                    # outputs
                    out_ref, attn_ref, hN_ref, cN_ref,
                    # scratch
                    h_s, c_s, ctx_v, w_ih_v, w_hh_v, b_v, w_a_v, w_oc_v, w_oh_v):
    """Processes `steps_per_block` tgt time-steps per grid iteration."""
    g = pl.program_id(0)
    H = h_s.shape[-1]

    # Load all grid-invariant operands once into single-buffered VMEM scratch
    # (replaces default double-buffered BlockSpecs for resident weights/ctx),
    # and initialize the recurrent state from the encoder hidden state.
    @pl.when(g == 0)
    def _load_invariants():
        pltpu.sync_copy(ctx_hbm, ctx_v)
        pltpu.sync_copy(w_ih_hbm, w_ih_v)
        pltpu.sync_copy(w_hh_hbm, w_hh_v)
        pltpu.sync_copy(b_hbm, b_v)
        pltpu.sync_copy(w_a_hbm, w_a_v)
        pltpu.sync_copy(w_oc_hbm, w_oc_v)
        pltpu.sync_copy(w_oh_hbm, w_oh_v)
        pltpu.sync_copy(h0_hbm, h_s)
        pltpu.sync_copy(c0_hbm, c_s)

    ctx = ctx_v[...]                                   # (B, S, H) bf16 (resident)

    for i in range(steps_per_block):                   # static unroll over time chunk
        x = emb_ref[i]                                 # (B, E) bf16

        # ---- stacked LSTM (PyTorch gate order i, f, g, o); f32 accumulate ----
        for l in range(num_layers):
            gates = (jnp.dot(x, w_ih_v[l], preferred_element_type=jnp.float32)
                     + jnp.dot(h_s[l].astype(jnp.bfloat16), w_hh_v[l],
                               preferred_element_type=jnp.float32)
                     + b_v[l])                         # (B, 4H) f32
            i_g = jax.nn.sigmoid(gates[:, 0 * H:1 * H])
            f_g = jax.nn.sigmoid(gates[:, 1 * H:2 * H])
            g_g = jnp.tanh(gates[:, 2 * H:3 * H])
            o_g = jax.nn.sigmoid(gates[:, 3 * H:4 * H])
            c_new = f_g * c_s[l] + i_g * g_g
            h_new = o_g * jnp.tanh(c_new)
            c_s[l] = c_new
            h_s[l] = h_new
            x = h_new.astype(jnp.bfloat16)

        h_top = x                                      # (B, H) bf16 (top-layer h_t)

        # ---- GlobalAttention 'general' on the MXU ----
        q = jnp.dot(h_top, w_a_v[...],
                    preferred_element_type=jnp.float32)                 # (B, H)
        scores = jnp.einsum("bqh,bsh->bqs",
                            q[:, None, :].astype(jnp.bfloat16), ctx,
                            preferred_element_type=jnp.float32)[:, 0, :]  # (B, S)
        m = jnp.max(scores, axis=-1, keepdims=True)
        e = jnp.exp(scores - m)
        denom = jnp.sum(e, axis=-1, keepdims=True)
        align = e * pl.reciprocal(denom, approx=True)                   # (B, S)
        cvec = jnp.einsum("bqs,bsh->bqh",
                          align[:, None, :].astype(jnp.bfloat16), ctx,
                          preferred_element_type=jnp.float32)[:, 0, :]  # (B, H)

        # linear_out split into two (H,H) matmuls -> no concatenate.
        attn_h = jnp.tanh(
            jnp.dot(cvec.astype(jnp.bfloat16), w_oc_v[...],
                    preferred_element_type=jnp.float32)
            + jnp.dot(h_top, w_oh_v[...],
                      preferred_element_type=jnp.float32))              # (B, H)

        out_ref[i] = attn_h
        attn_ref[i] = align

    # Final hidden state written back only once.
    @pl.when(g == pl.num_programs(0) - 1)
    def _final_state():
        hN_ref[...] = h_s[...]
        cN_ref[...] = c_s[...]


def rnn_decoder_forward(tokens, context, h0, c0, params, *, steps_per_block=4):
    """Pallas-backed RNNDecoderBase.forward.

    tokens  : int32 [T, B, 1]      (padded tgt token ids)
    context : f32   [S, B, H]      (encoder outputs, time-major)
    h0, c0  : f32   [L, B, H]      (decoder initial state)
    returns : outputs [T,B,H], (h_final, c_final), {"std": attns [T,B,S]}
    """
    T, B, _ = tokens.shape
    S = context.shape[0]
    L, _, H = h0.shape
    E = params["embedding"].shape[-1]
    TQ = steps_per_block
    assert T % TQ == 0, "tgt_len must be a multiple of steps_per_block"

    # Glue (embedding gather + layout transpose + dtype casts) stays in XLA.
    emb = params["embedding"][tokens[:, :, 0]].astype(jnp.bfloat16)     # (T, B, E)
    ctx_b = jnp.transpose(context, (1, 0, 2)).astype(jnp.bfloat16)      # (B, S, H)
    w_ih = params["w_ih_t"].astype(jnp.bfloat16)                        # (L, E, 4H)
    w_hh = params["w_hh_t"].astype(jnp.bfloat16)                        # (L, H, 4H)
    bias = params["b"].astype(jnp.float32)                              # (L, 1, 4H)
    w_a = params["w_a_t"].astype(jnp.bfloat16)                          # (H, H)
    w_oc = params["w_out_t"][:H].astype(jnp.bfloat16)                   # (H, H) (cvec half)
    w_oh = params["w_out_t"][H:].astype(jnp.bfloat16)                   # (H, H) (h_top half)

    kernel = partial(_decoder_kernel, L, TQ)

    outputs, attns, h_final, c_final = pl.pallas_call(
        kernel,
        out_shape=(
            jax.ShapeDtypeStruct((T, B, H), jnp.float32),
            jax.ShapeDtypeStruct((T, B, S), jnp.float32),
            jax.ShapeDtypeStruct((L, B, H), jnp.float32),
            jax.ShapeDtypeStruct((L, B, H), jnp.float32),
        ),
        grid_spec=pltpu.PrefetchScalarGridSpec(
            num_scalar_prefetch=0,
            grid=(T // TQ,),
            in_specs=[
                pl.BlockSpec((TQ, B, E), lambda g: (g, 0, 0)),   # emb time chunk (pipelined)
                pl.BlockSpec(memory_space=pl.ANY),               # context  (loaded once)
                pl.BlockSpec(memory_space=pl.ANY),               # h0
                pl.BlockSpec(memory_space=pl.ANY),               # c0
                pl.BlockSpec(memory_space=pl.ANY),               # W_ih^T
                pl.BlockSpec(memory_space=pl.ANY),               # W_hh^T
                pl.BlockSpec(memory_space=pl.ANY),               # b_ih + b_hh
                pl.BlockSpec(memory_space=pl.ANY),               # W_a^T (linear_in)
                pl.BlockSpec(memory_space=pl.ANY),               # W_out^T[:H]
                pl.BlockSpec(memory_space=pl.ANY),               # W_out^T[H:]
            ],
            out_specs=[
                pl.BlockSpec((TQ, B, H), lambda g: (g, 0, 0)),   # outputs chunk
                pl.BlockSpec((TQ, B, S), lambda g: (g, 0, 0)),   # attns chunk
                pl.BlockSpec((L, B, H), lambda g: (0, 0, 0)),    # final h (resident)
                pl.BlockSpec((L, B, H), lambda g: (0, 0, 0)),    # final c (resident)
            ],
            scratch_shapes=[
                pltpu.VMEM((L, B, H), jnp.float32),              # h state
                pltpu.VMEM((L, B, H), jnp.float32),              # c state
                pltpu.VMEM((B, S, H), jnp.bfloat16),             # context (single copy)
                pltpu.VMEM((L, E, 4 * H), jnp.bfloat16),         # W_ih^T
                pltpu.VMEM((L, H, 4 * H), jnp.bfloat16),         # W_hh^T
                pltpu.VMEM((L, 1, 4 * H), jnp.float32),          # bias
                pltpu.VMEM((H, H), jnp.bfloat16),                # W_a^T
                pltpu.VMEM((H, H), jnp.bfloat16),                # W_out^T[:H]
                pltpu.VMEM((H, H), jnp.bfloat16),                # W_out^T[H:]
            ],
        ),
        compiler_params=pltpu.CompilerParams(
            dimension_semantics=("arbitrary",)),     # time chunks are sequential
    )(emb, ctx_b, h0, c0, w_ih, w_hh, bias, w_a, w_oc, w_oh)

    # TODO(synk): on v7x, add a leading "parallel" batch-chunk grid axis so the
    # two TensorCores each run an independent batch shard of the recurrence.
    return outputs, (h_final, c_final), {"std": attns}


def reference_forward(tokens, context, h0, c0, params):
    """Pure-JAX f32 reference mirroring StdRNNDecoder._run_forward_pass."""
    emb = params["embedding"][tokens[:, :, 0]]
    ctx_b = jnp.transpose(context, (1, 0, 2))
    T = emb.shape[0]
    L, _, H = h0.shape
    h, c = h0, c0
    outs, attns = [], []
    for t in range(T):
        x = emb[t]
        hs, cs = [], []
        for l in range(L):
            gates = (x @ params["w_ih_t"][l] + h[l] @ params["w_hh_t"][l]
                     + params["b"][l])
            i = jax.nn.sigmoid(gates[:, 0:H])
            f = jax.nn.sigmoid(gates[:, H:2 * H])
            g = jnp.tanh(gates[:, 2 * H:3 * H])
            o = jax.nn.sigmoid(gates[:, 3 * H:4 * H])
            cn = f * c[l] + i * g
            hn = o * jnp.tanh(cn)
            hs.append(hn)
            cs.append(cn)
            x = hn
        h, c = jnp.stack(hs), jnp.stack(cs)
        q = x @ params["w_a_t"]
        scores = jnp.einsum("bh,bsh->bs", q, ctx_b)
        align = jax.nn.softmax(scores, axis=-1)
        cvec = jnp.einsum("bs,bsh->bh", align, ctx_b)
        attn_h = jnp.tanh(jnp.concatenate([cvec, x], axis=-1) @ params["w_out_t"])
        outs.append(attn_h)
        attns.append(align)
    return jnp.stack(outs), (h, c), {"std": jnp.stack(attns)}


def init_params(key, vocab, emb_dim, hidden, num_layers):
    # _input_size == embedding size; emb_dim == hidden keeps the stacked-layer
    # W_ih tensor uniform in shape.
    assert emb_dim == hidden
    ks = jax.random.split(key, 6)
    u = lambda k, shape: jax.random.uniform(k, shape, jnp.float32, -0.1, 0.1)
    return {
        "embedding": u(ks[0], (vocab, emb_dim)),
        "w_ih_t": u(ks[1], (num_layers, emb_dim, 4 * hidden)),
        "w_hh_t": u(ks[2], (num_layers, hidden, 4 * hidden)),
        "b": u(ks[3], (num_layers, 1, 4 * hidden)),
        "w_a_t": u(ks[4], (hidden, hidden)),          # GlobalAttention linear_in (no bias)
        "w_out_t": u(ks[5], (2 * hidden, hidden)),    # GlobalAttention linear_out (no bias)
    }


if __name__ == "__main__":
    # Lane/sublane-aligned toy shapes: H = S = 128 lanes, B = 8 sublanes.
    T, S, B, H, L, V = 8, 128, 8, 128, 2, 64
    key = jax.random.PRNGKey(0)
    k_tok, k_ctx, k_h, k_c, k_par = jax.random.split(key, 5)

    tokens = jax.random.randint(k_tok, (T, B, 1), 0, V, dtype=jnp.int32)
    context = jax.random.normal(k_ctx, (S, B, H), jnp.float32)
    h0 = 0.1 * jax.random.normal(k_h, (L, B, H), jnp.float32)
    c0 = 0.1 * jax.random.normal(k_c, (L, B, H), jnp.float32)
    params = init_params(k_par, V, H, H, L)

    outputs, (h_f, c_f), attns = jax.block_until_ready(
        rnn_decoder_forward(tokens, context, h0, c0, params, steps_per_block=4))

    ref_out, (ref_h, ref_c), ref_attns = reference_forward(
        tokens, context, h0, c0, params)

    assert outputs.shape == (T, B, H)
    assert attns["std"].shape == (T, B, S)
    assert h_f.shape == (L, B, H) and c_f.shape == (L, B, H)
    # bf16 matmul operands (f32 accumulation) vs. the pure-f32 reference.
    assert jnp.allclose(outputs, ref_out, atol=2e-2, rtol=2e-2)
    assert jnp.allclose(attns["std"], ref_attns["std"], atol=2e-2, rtol=2e-2)
    assert jnp.allclose(h_f, ref_h, atol=2e-2, rtol=2e-2)
    assert jnp.allclose(c_f, ref_c, atol=2e-2, rtol=2e-2)

    # TODO(synk): context_lengths softmax masking, coverage attn, context gate,
    # and copy attn are omitted (defaults in the module are None/False).
    print("KERNEL_OK")
</pallas_src>

<mosaic_0001>
module attributes {stable_mosaic.version = 11 : i64} {
  func.func @_decoder_kernel(%arg0: i32, %arg1: memref<4x8x128xbf16, #tpu.memory_space<vmem>>, %arg2: memref<8x128x128xbf16, #tpu.memory_space<any>>, %arg3: memref<2x8x128xf32, #tpu.memory_space<any>>, %arg4: memref<2x8x128xf32, #tpu.memory_space<any>>, %arg5: memref<2x128x512xbf16, #tpu.memory_space<any>>, %arg6: memref<2x128x512xbf16, #tpu.memory_space<any>>, %arg7: memref<2x1x512xf32, #tpu.memory_space<any>>, %arg8: memref<128x128xbf16, #tpu.memory_space<any>>, %arg9: memref<128x128xbf16, #tpu.memory_space<any>>, %arg10: memref<128x128xbf16, #tpu.memory_space<any>>, %arg11: memref<4x8x128xf32, #tpu.memory_space<vmem>>, %arg12: memref<4x8x128xf32, #tpu.memory_space<vmem>>, %arg13: memref<2x8x128xf32, #tpu.memory_space<vmem>>, %arg14: memref<2x8x128xf32, #tpu.memory_space<vmem>>, %arg15: memref<2x8x128xf32, #tpu.memory_space<vmem>>, %arg16: memref<2x8x128xf32, #tpu.memory_space<vmem>>, %arg17: memref<8x128x128xbf16, #tpu.memory_space<vmem>>, %arg18: memref<2x128x512xbf16, #tpu.memory_space<vmem>>, %arg19: memref<2x128x512xbf16, #tpu.memory_space<vmem>>, %arg20: memref<2x1x512xf32, #tpu.memory_space<vmem>>, %arg21: memref<128x128xbf16, #tpu.memory_space<vmem>>, %arg22: memref<128x128xbf16, #tpu.memory_space<vmem>>, %arg23: memref<128x128xbf16, #tpu.memory_space<vmem>>) attributes {dimension_semantics = [#tpu.dimension_semantics<arbitrary>], iteration_bounds = array<i64: 2>, scalar_prefetch = 0 : i64, scratch_operands = 9 : i64, tpu.core_type = #tpu.core_type<tc>, window_params = [{transform_indices = @transform_0, window_bounds = array<i64: 4, 8, 128>}, {}, {}, {}, {}, {}, {}, {}, {}, {}, {transform_indices = @transform_10, window_bounds = array<i64: 4, 8, 128>}, {transform_indices = @transform_11, window_bounds = array<i64: 4, 8, 128>}, {pipeline_mode = #tpu.pipeline_mode<synchronous>, transform_indices = @transform_12, window_bounds = array<i64: 2, 8, 128>}, {pipeline_mode = #tpu.pipeline_mode<synchronous>, transform_indices = @transform_13, window_bounds = array<i64: 2, 8, 128>}]} {
    %c0_i32 = arith.constant 0 : i32
    %0 = arith.cmpi eq, %arg0, %c0_i32 : i32
    %1 = arith.extui %0 : i1 to i32
    %c0_i32_0 = arith.constant 0 : i32
    %2 = arith.cmpi ne, %1, %c0_i32_0 : i32
    scf.if %2 {
      "tpu.region"() ({
        %531 = tpu.sem_alloc : memref<!tpu.dma_semaphore, #tpu.memory_space<semaphore_mem>>
        tpu.enqueue_dma source(%arg2 : memref<8x128x128xbf16, #tpu.memory_space<any>>) target(%arg17 : memref<8x128x128xbf16, #tpu.memory_space<vmem>>) target_semaphore(%531 : memref<!tpu.dma_semaphore, #tpu.memory_space<semaphore_mem>>)
        tpu.wait_dma2 semaphore(%531 : memref<!tpu.dma_semaphore, #tpu.memory_space<semaphore_mem>>) src(%arg2 : memref<8x128x128xbf16, #tpu.memory_space<any>>) dst(%arg17 : memref<8x128x128xbf16, #tpu.memory_space<vmem>>)
        tpu.yield
      }) : () -> ()
      "tpu.region"() ({
        %531 = tpu.sem_alloc : memref<!tpu.dma_semaphore, #tpu.memory_space<semaphore_mem>>
        tpu.enqueue_dma source(%arg5 : memref<2x128x512xbf16, #tpu.memory_space<any>>) target(%arg18 : memref<2x128x512xbf16, #tpu.memory_space<vmem>>) target_semaphore(%531 : memref<!tpu.dma_semaphore, #tpu.memory_space<semaphore_mem>>)
        tpu.wait_dma2 semaphore(%531 : memref<!tpu.dma_semaphore, #tpu.memory_space<semaphore_mem>>) src(%arg5 : memref<2x128x512xbf16, #tpu.memory_space<any>>) dst(%arg18 : memref<2x128x512xbf16, #tpu.memory_space<vmem>>)
        tpu.yield
      }) : () -> ()
      "tpu.region"() ({
        %531 = tpu.sem_alloc : memref<!tpu.dma_semaphore, #tpu.memory_space<semaphore_mem>>
        tpu.enqueue_dma source(%arg6 : memref<2x128x512xbf16, #tpu.memory_space<any>>) target(%arg19 : memref<2x128x512xbf16, #tpu.memory_space<vmem>>) target_semaphore(%531 : memref<!tpu.dma_semaphore, #tpu.memory_space<semaphore_mem>>)
        tpu.wait_dma2 semaphore(%531 : memref<!tpu.dma_semaphore, #tpu.memory_space<semaphore_mem>>) src(%arg6 : memref<2x128x512xbf16, #tpu.memory_space<any>>) dst(%arg19 : memref<2x128x512xbf16, #tpu.memory_space<vmem>>)
        tpu.yield
      }) : () -> ()
      "tpu.region"() ({
        %531 = tpu.sem_alloc : memref<!tpu.dma_semaphore, #tpu.memory_space<semaphore_mem>>
        tpu.enqueue_dma source(%arg7 : memref<2x1x512xf32, #tpu.memory_space<any>>) target(%arg20 : memref<2x1x512xf32, #tpu.memory_space<vmem>>) target_semaphore(%531 : memref<!tpu.dma_semaphore, #tpu.memory_space<semaphore_mem>>)
        tpu.wait_dma2 semaphore(%531 : memref<!tpu.dma_semaphore, #tpu.memory_space<semaphore_mem>>) src(%arg7 : memref<2x1x512xf32, #tpu.memory_space<any>>) dst(%arg20 : memref<2x1x512xf32, #tpu.memory_space<vmem>>)
        tpu.yield
      }) : () -> ()
      "tpu.region"() ({
        %531 = tpu.sem_alloc : memref<!tpu.dma_semaphore, #tpu.memory_space<semaphore_mem>>
        tpu.enqueue_dma source(%arg8 : memref<128x128xbf16, #tpu.memory_space<any>>) target(%arg21 : memref<128x128xbf16, #tpu.memory_space<vmem>>) target_semaphore(%531 : memref<!tpu.dma_semaphore, #tpu.memory_space<semaphore_mem>>)
        tpu.wait_dma2 semaphore(%531 : memref<!tpu.dma_semaphore, #tpu.memory_space<semaphore_mem>>) src(%arg8 : memref<128x128xbf16, #tpu.memory_space<any>>) dst(%arg21 : memref<128x128xbf16, #tpu.memory_space<vmem>>)
        tpu.yield
      }) : () -> ()
      "tpu.region"() ({
        %531 = tpu.sem_alloc : memref<!tpu.dma_semaphore, #tpu.memory_space<semaphore_mem>>
        tpu.enqueue_dma source(%arg9 : memref<128x128xbf16, #tpu.memory_space<any>>) target(%arg22 : memref<128x128xbf16, #tpu.memory_space<vmem>>) target_semaphore(%531 : memref<!tpu.dma_semaphore, #tpu.memory_space<semaphore_mem>>)
        tpu.wait_dma2 semaphore(%531 : memref<!tpu.dma_semaphore, #tpu.memory_space<semaphore_mem>>) src(%arg9 : memref<128x128xbf16, #tpu.memory_space<any>>) dst(%arg22 : memref<128x128xbf16, #tpu.memory_space<vmem>>)
        tpu.yield
      }) : () -> ()
      "tpu.region"() ({
        %531 = tpu.sem_alloc : memref<!tpu.dma_semaphore, #tpu.memory_space<semaphore_mem>>
        tpu.enqueue_dma source(%arg10 : memref<128x128xbf16, #tpu.memory_space<any>>) target(%arg23 : memref<128x128xbf16, #tpu.memory_space<vmem>>) target_semaphore(%531 : memref<!tpu.dma_semaphore, #tpu.memory_space<semaphore_mem>>)
        tpu.wait_dma2 semaphore(%531 : memref<!tpu.dma_semaphore, #tpu.memory_space<semaphore_mem>>) src(%arg10 : memref<128x128xbf16, #tpu.memory_space<any>>) dst(%arg23 : memref<128x128xbf16, #tpu.memory_space<vmem>>)
        tpu.yield
      }) : () -> ()
      "tpu.region"() ({
        %531 = tpu.sem_alloc : memref<!tpu.dma_semaphore, #tpu.memory_space<semaphore_mem>>
        tpu.enqueue_dma source(%arg3 : memref<2x8x128xf32, #tpu.memory_space<any>>) target(%arg15 : memref<2x8x128xf32, #tpu.memory_space<vmem>>) target_semaphore(%531 : memref<!tpu.dma_semaphore, #tpu.memory_space<semaphore_mem>>)
        tpu.wait_dma2 semaphore(%531 : memref<!tpu.dma_semaphore, #tpu.memory_space<semaphore_mem>>) src(%arg3 : memref<2x8x128xf32, #tpu.memory_space<any>>) dst(%arg15 : memref<2x8x128xf32, #tpu.memory_space<vmem>>)
        tpu.yield
      }) : () -> ()
      "tpu.region"() ({
        %531 = tpu.sem_alloc : memref<!tpu.dma_semaphore, #tpu.memory_space<semaphore_mem>>
        tpu.enqueue_dma source(%arg4 : memref<2x8x128xf32, #tpu.memory_space<any>>) target(%arg16 : memref<2x8x128xf32, #tpu.memory_space<vmem>>) target_semaphore(%531 : memref<!tpu.dma_semaphore, #tpu.memory_space<semaphore_mem>>)
        tpu.wait_dma2 semaphore(%531 : memref<!tpu.dma_semaphore, #tpu.memory_space<semaphore_mem>>) src(%arg4 : memref<2x8x128xf32, #tpu.memory_space<any>>) dst(%arg16 : memref<2x8x128xf32, #tpu.memory_space<vmem>>)
        tpu.yield
      }) : () -> ()
    } else {
    }
    %c0 = arith.constant 0 : index
    %c0_1 = arith.constant 0 : index
    %c0_2 = arith.constant 0 : index
    %3 = vector.load %arg17[%c0, %c0_1, %c0_2] : memref<8x128x128xbf16, #tpu.memory_space<vmem>>, vector<8x128x128xbf16>
    %c0_3 = arith.constant 0 : index
    %c0_4 = arith.constant 0 : index
    %c0_5 = arith.constant 0 : index
    %4 = vector.load %arg1[%c0_3, %c0_4, %c0_5] : memref<4x8x128xbf16, #tpu.memory_space<vmem>>, vector<1x8x128xbf16>
    %5 = vector.shape_cast %4 : vector<1x8x128xbf16> to vector<8x128xbf16>
    %c0_6 = arith.constant 0 : index
    %c0_7 = arith.constant 0 : index
    %c0_8 = arith.constant 0 : index
    %6 = vector.load %arg18[%c0_6, %c0_7, %c0_8] : memref<2x128x512xbf16, #tpu.memory_space<vmem>>, vector<1x128x512xbf16>
    %7 = vector.shape_cast %6 : vector<1x128x512xbf16> to vector<128x512xbf16>
    %cst = arith.constant dense<0.000000e+00> : vector<8x512xf32>
    %8 = tpu.matmul %5, %7, %cst {dimension_numbers = #tpu.dot_dimension_numbers<[1], [0], [0], [1], [0, 0, 1, 1], [], []>} : vector<8x128xbf16>, vector<128x512xbf16>, vector<8x512xf32> -> vector<8x512xf32>
    %c0_9 = arith.constant 0 : index
    %c0_10 = arith.constant 0 : index
    %c0_11 = arith.constant 0 : index
    %9 = vector.load %arg15[%c0_9, %c0_10, %c0_11] : memref<2x8x128xf32, #tpu.memory_space<vmem>>, vector<1x8x128xf32>
    %10 = vector.shape_cast %9 : vector<1x8x128xf32> to vector<8x128xf32>
    %11 = arith.truncf %10 : vector<8x128xf32> to vector<8x128xbf16>
    %c0_12 = arith.constant 0 : index
    %c0_13 = arith.constant 0 : index
    %c0_14 = arith.constant 0 : index
    %12 = vector.load %arg19[%c0_12, %c0_13, %c0_14] : memref<2x128x512xbf16, #tpu.memory_space<vmem>>, vector<1x128x512xbf16>
    %13 = vector.shape_cast %12 : vector<1x128x512xbf16> to vector<128x512xbf16>
    %cst_15 = arith.constant dense<0.000000e+00> : vector<8x512xf32>
    %14 = tpu.matmul %11, %13, %cst_15 {dimension_numbers = #tpu.dot_dimension_numbers<[1], [0], [0], [1], [0, 0, 1, 1], [], []>} : vector<8x128xbf16>, vector<128x512xbf16>, vector<8x512xf32> -> vector<8x512xf32>
    %15 = arith.addf %8, %14 : vector<8x512xf32>
    %c0_16 = arith.constant 0 : index
    %c0_17 = arith.constant 0 : index
    %c0_18 = arith.constant 0 : index
    %16 = vector.load %arg20[%c0_16, %c0_17, %c0_18] : memref<2x1x512xf32, #tpu.memory_space<vmem>>, vector<1x1x512xf32>
    %17 = vector.shape_cast %16 : vector<1x1x512xf32> to vector<1x512xf32>
    %18 = vector.broadcast %17 : vector<1x512xf32> to vector<8x512xf32>
    %19 = arith.addf %15, %18 : vector<8x512xf32>
    %20 = vector.extract_strided_slice %19 {offsets = [0, 0], sizes = [8, 128], strides = [1, 1]} : vector<8x512xf32> to vector<8x128xf32>
    %21 = arith.negf %20 : vector<8x128xf32>
    %22 = math.exp %21 : vector<8x128xf32>
    %cst_19 = arith.constant 1.000000e+00 : f32
    %23 = vector.broadcast %cst_19 : f32 to vector<8x128xf32>
    %24 = arith.addf %23, %22 : vector<8x128xf32>
    %25 = arith.divf %23, %24 : vector<8x128xf32>
    %26 = vector.extract_strided_slice %19 {offsets = [0, 128], sizes = [8, 128], strides = [1, 1]} : vector<8x512xf32> to vector<8x128xf32>
    %27 = arith.negf %26 : vector<8x128xf32>
    %28 = math.exp %27 : vector<8x128xf32>
    %cst_20 = arith.constant 1.000000e+00 : f32
    %29 = vector.broadcast %cst_20 : f32 to vector<8x128xf32>
    %30 = arith.addf %29, %28 : vector<8x128xf32>
    %31 = arith.divf %29, %30 : vector<8x128xf32>
    %32 = vector.extract_strided_slice %19 {offsets = [0, 256], sizes = [8, 128], strides = [1, 1]} : vector<8x512xf32> to vector<8x128xf32>
    %33 = math.tanh %32 : vector<8x128xf32>
    %34 = vector.extract_strided_slice %19 {offsets = [0, 384], sizes = [8, 128], strides = [1, 1]} : vector<8x512xf32> to vector<8x128xf32>
    %35 = arith.negf %34 : vector<8x128xf32>
    %36 = math.exp %35 : vector<8x128xf32>
    %cst_21 = arith.constant 1.000000e+00 : f32
    %37 = vector.broadcast %cst_21 : f32 to vector<8x128xf32>
    %38 = arith.addf %37, %36 : vector<8x128xf32>
    %39 = arith.divf %37, %38 : vector<8x128xf32>
    %c0_22 = arith.constant 0 : index
    %c0_23 = arith.constant 0 : index
    %c0_24 = arith.constant 0 : index
    %40 = vector.load %arg16[%c0_22, %c0_23, %c0_24] : memref<2x8x128xf32, #tpu.memory_space<vmem>>, vector<1x8x128xf32>
    %41 = vector.shape_cast %40 : vector<1x8x128xf32> to vector<8x128xf32>
    %42 = arith.mulf %31, %41 : vector<8x128xf32>
    %43 = arith.mulf %25, %33 : vector<8x128xf32>
    %44 = arith.addf %42, %43 : vector<8x128xf32>
    %45 = math.tanh %44 : vector<8x128xf32>
    %46 = arith.mulf %39, %45 : vector<8x128xf32>
    %c0_25 = arith.constant 0 : index
    %c0_26 = arith.constant 0 : index
    %c0_27 = arith.constant 0 : index
    %47 = vector.load %arg16[%c0_25, %c0_26, %c0_27] : memref<2x8x128xf32, #tpu.memory_space<vmem>>, vector<1x8x128xf32>
    %48 = vector.shape_cast %47 : vector<1x8x128xf32> to vector<8x128xf32>
    %49 = vector.shape_cast %44 : vector<8x128xf32> to vector<1x8x128xf32>
    tpu.vector_store %arg16[%c0_25, %c0_26, %c0_27], %49 {strides = array<i32>} : memref<2x8x128xf32, #tpu.memory_space<vmem>>, vector<1x8x128xf32>,
    %c0_28 = arith.constant 0 : index
    %c0_29 = arith.constant 0 : index
    %c0_30 = arith.constant 0 : index
    %50 = vector.load %arg15[%c0_28, %c0_29, %c0_30] : memref<2x8x128xf32, #tpu.memory_space<vmem>>, vector<1x8x128xf32>
    %51 = vector.shape_cast %50 : vector<1x8x128xf32> to vector<8x128xf32>
    %52 = vector.shape_cast %46 : vector<8x128xf32> to vector<1x8x128xf32>
    tpu.vector_store %arg15[%c0_28, %c0_29, %c0_30], %52 {strides = array<i32>} : memref<2x8x128xf32, #tpu.memory_space<vmem>>, vector<1x8x128xf32>,
    %53 = arith.truncf %46 : vector<8x128xf32> to vector<8x128xbf16>
    %c1 = arith.constant 1 : index
    %c0_31 = arith.constant 0 : index
    %c0_32 = arith.constant 0 : index
    %54 = vector.load %arg18[%c1, %c0_31, %c0_32] : memref<2x128x512xbf16, #tpu.memory_space<vmem>>, vector<1x128x512xbf16>
    %55 = vector.shape_cast %54 : vector<1x128x512xbf16> to vector<128x512xbf16>
    %cst_33 = arith.constant dense<0.000000e+00> : vector<8x512xf32>
    %56 = tpu.matmul %53, %55, %cst_33 {dimension_numbers = #tpu.dot_dimension_numbers<[1], [0], [0], [1], [0, 0, 1, 1], [], []>} : vector<8x128xbf16>, vector<128x512xbf16>, vector<8x512xf32> -> vector<8x512xf32>
    %c1_34 = arith.constant 1 : index
    %c0_35 = arith.constant 0 : index
    %c0_36 = arith.constant 0 : index
    %57 = vector.load %arg15[%c1_34, %c0_35, %c0_36] : memref<2x8x128xf32, #tpu.memory_space<vmem>>, vector<1x8x128xf32>
    %58 = vector.shape_cast %57 : vector<1x8x128xf32> to vector<8x128xf32>
    %59 = arith.truncf %58 : vector<8x128xf32> to vector<8x128xbf16>
    %c1_37 = arith.constant 1 : index
    %c0_38 = arith.constant 0 : index
    %c0_39 = arith.constant 0 : index
    %60 = vector.load %arg19[%c1_37, %c0_38, %c0_39] : memref<2x128x512xbf16, #tpu.memory_space<vmem>>, vector<1x128x512xbf16>
    %61 = vector.shape_cast %60 : vector<1x128x512xbf16> to vector<128x512xbf16>
    %cst_40 = arith.constant dense<0.000000e+00> : vector<8x512xf32>
    %62 = tpu.matmul %59, %61, %cst_40 {dimension_numbers = #tpu.dot_dimension_numbers<[1], [0], [0], [1], [0, 0, 1, 1], [], []>} : vector<8x128xbf16>, vector<128x512xbf16>, vector<8x512xf32> -> vector<8x512xf32>
    %63 = arith.addf %56, %62 : vector<8x512xf32>
    %c1_41 = arith.constant 1 : index
    %c0_42 = arith.constant 0 : index
    %c0_43 = arith.constant 0 : index
    %64 = vector.load %arg20[%c1_41, %c0_42, %c0_43] : memref<2x1x512xf32, #tpu.memory_space<vmem>>, vector<1x1x512xf32>
    %65 = vector.shape_cast %64 : vector<1x1x512xf32> to vector<1x512xf32>
    %66 = vector.broadcast %65 : vector<1x512xf32> to vector<8x512xf32>
    %67 = arith.addf %63, %66 : vector<8x512xf32>
    %68 = vector.extract_strided_slice %67 {offsets = [0, 0], sizes = [8, 128], strides = [1, 1]} : vector<8x512xf32> to vector<8x128xf32>
    %69 = arith.negf %68 : vector<8x128xf32>
    %70 = math.exp %69 : vector<8x128xf32>
    %cst_44 = arith.constant 1.000000e+00 : f32
    %71 = vector.broadcast %cst_44 : f32 to vector<8x128xf32>
    %72 = arith.addf %71, %70 : vector<8x128xf32>
    %73 = arith.divf %71, %72 : vector<8x128xf32>
    %74 = vector.extract_strided_slice %67 {offsets = [0, 128], sizes = [8, 128], strides = [1, 1]} : vector<8x512xf32> to vector<8x128xf32>
    %75 = arith.negf %74 : vector<8x128xf32>
    %76 = math.exp %75 : vector<8x128xf32>
    %cst_45 = arith.constant 1.000000e+00 : f32
    %77 = vector.broadcast %cst_45 : f32 to vector<8x128xf32>
    %78 = arith.addf %77, %76 : vector<8x128xf32>
    %79 = arith.divf %77, %78 : vector<8x128xf32>
    %80 = vector.extract_strided_slice %67 {offsets = [0, 256], sizes = [8, 128], strides = [1, 1]} : vector<8x512xf32> to vector<8x128xf32>
    %81 = math.tanh %80 : vector<8x128xf32>
    %82 = vector.extract_strided_slice %67 {offsets = [0, 384], sizes = [8, 128], strides = [1, 1]} : vector<8x512xf32> to vector<8x128xf32>
    %83 = arith.negf %82 : vector<8x128xf32>
    %84 = math.exp %83 : vector<8x128xf32>
    %cst_46 = arith.constant 1.000000e+00 : f32
    %85 = vector.broadcast %cst_46 : f32 to vector<8x128xf32>
    %86 = arith.addf %85, %84 : vector<8x128xf32>
    %87 = arith.divf %85, %86 : vector<8x128xf32>
    %c1_47 = arith.constant 1 : index
    %c0_48 = arith.constant 0 : index
    %c0_49 = arith.constant 0 : index
    %88 = vector.load %arg16[%c1_47, %c0_48, %c0_49] : memref<2x8x128xf32, #tpu.memory_space<vmem>>, vector<1x8x128xf32>
    %89 = vector.shape_cast %88 : vector<1x8x128xf32> to vector<8x128xf32>
    %90 = arith.mulf %79, %89 : vector<8x128xf32>
    %91 = arith.mulf %73, %81 : vector<8x128xf32>
    %92 = arith.addf %90, %91 : vector<8x128xf32>
    %93 = math.tanh %92 : vector<8x128xf32>
    %94 = arith.mulf %87, %93 : vector<8x128xf32>
    %c1_50 = arith.constant 1 : index
    %c0_51 = arith.constant 0 : index
    %c0_52 = arith.constant 0 : index
    %95 = vector.load %arg16[%c1_50, %c0_51, %c0_52] : memref<2x8x128xf32, #tpu.memory_space<vmem>>, vector<1x8x128xf32>
    %96 = vector.shape_cast %95 : vector<1x8x128xf32> to vector<8x128xf32>
    %97 = vector.shape_cast %92 : vector<8x128xf32> to vector<1x8x128xf32>
    tpu.vector_store %arg16[%c1_50, %c0_51, %c0_52], %97 {strides = array<i32>} : memref<2x8x128xf32, #tpu.memory_space<vmem>>, vector<1x8x128xf32>,
    %c1_53 = arith.constant 1 : index
    %c0_54 = arith.constant 0 : index
    %c0_55 = arith.constant 0 : index
    %98 = vector.load %arg15[%c1_53, %c0_54, %c0_55] : memref<2x8x128xf32, #tpu.memory_space<vmem>>, vector<1x8x128xf32>
    %99 = vector.shape_cast %98 : vector<1x8x128xf32> to vector<8x128xf32>
    %100 = vector.shape_cast %94 : vector<8x128xf32> to vector<1x8x128xf32>
    tpu.vector_store %arg15[%c1_53, %c0_54, %c0_55], %100 {strides = array<i32>} : memref<2x8x128xf32, #tpu.memory_space<vmem>>, vector<1x8x128xf32>,
    %101 = arith.truncf %94 : vector<8x128xf32> to vector<8x128xbf16>
    %c0_56 = arith.constant 0 : index
    %c0_57 = arith.constant 0 : index
    %102 = vector.load %arg21[%c0_56, %c0_57] : memref<128x128xbf16, #tpu.memory_space<vmem>>, vector<128x128xbf16>
    %cst_58 = arith.constant dense<0.000000e+00> : vector<8x128xf32>
    %103 = tpu.matmul %101, %102, %cst_58 {dimension_numbers = #tpu.dot_dimension_numbers<[1], [0], [0], [1], [0, 0, 1, 1], [], []>} : vector<8x128xbf16>, vector<128x128xbf16>, vector<8x128xf32> -> vector<8x128xf32>
    %104 = vector.shape_cast %103 : vector<8x128xf32> to vector<8x1x128xf32>
    %105 = arith.truncf %104 : vector<8x1x128xf32> to vector<8x1x128xbf16>
    "tpu.trace_start"() <{level = 10 : i32, message = "bqh,bsh->bqs"}> : () -> ()
    %cst_59 = arith.constant dense<0.000000e+00> : vector<8x1x128xf32>
    %106 = tpu.matmul %105, %3, %cst_59 {dimension_numbers = #tpu.dot_dimension_numbers<[2], [2], [1], [1], [0, 0, 0, 1, 1, 1], [0], [0]>} : vector<8x1x128xbf16>, vector<8x128x128xbf16>, vector<8x1x128xf32> -> vector<8x1x128xf32>
    "tpu.trace_stop"() : () -> ()
    %107 = vector.shape_cast %106 : vector<8x1x128xf32> to vector<8x128xf32>
    %cst_60 = arith.constant dense<0xFF800000> : vector<8xf32>
    %108 = vector.multi_reduction <maximumf>, %107, %cst_60 [1] : vector<8x128xf32> to vector<8xf32>
    %109 = vector.shape_cast %108 : vector<8xf32> to vector<8x1xf32>
    %110 = vector.broadcast %109 : vector<8x1xf32> to vector<8x128xf32>
    %111 = arith.subf %107, %110 : vector<8x128xf32>
    %112 = math.exp %111 : vector<8x128xf32>
    %cst_61 = arith.constant dense<0.000000e+00> : vector<8xf32>
    %113 = vector.multi_reduction <add>, %112, %cst_61 [1] : vector<8x128xf32> to vector<8xf32>
    %114 = vector.shape_cast %113 : vector<8xf32> to vector<8x1xf32>
    %115 = tpu.reciprocal %114 {approx = true} : vector<8x1xf32> -> vector<8x1xf32>
    %116 = vector.broadcast %115 : vector<8x1xf32> to vector<8x128xf32>
    %117 = arith.mulf %112, %116 : vector<8x128xf32>
    %118 = vector.shape_cast %117 : vector<8x128xf32> to vector<8x1x128xf32>
    %119 = arith.truncf %118 : vector<8x1x128xf32> to vector<8x1x128xbf16>
    "tpu.trace_start"() <{level = 10 : i32, message = "bqs,bsh->bqh"}> : () -> ()
    %cst_62 = arith.constant dense<0.000000e+00> : vector<8x1x128xf32>
    %120 = tpu.matmul %119, %3, %cst_62 {dimension_numbers = #tpu.dot_dimension_numbers<[2], [1], [1], [2], [0, 0, 0, 1, 1, 2], [0], [0]>} : vector<8x1x128xbf16>, vector<8x128x128xbf16>, vector<8x1x128xf32> -> vector<8x1x128xf32>
    "tpu.trace_stop"() : () -> ()
    %121 = vector.shape_cast %120 : vector<8x1x128xf32> to vector<8x128xf32>
    %122 = arith.truncf %121 : vector<8x128xf32> to vector<8x128xbf16>
    %c0_63 = arith.constant 0 : index
    %c0_64 = arith.constant 0 : index
    %123 = vector.load %arg22[%c0_63, %c0_64] : memref<128x128xbf16, #tpu.memory_space<vmem>>, vector<128x128xbf16>
    %cst_65 = arith.constant dense<0.000000e+00> : vector<8x128xf32>
    %124 = tpu.matmul %122, %123, %cst_65 {dimension_numbers = #tpu.dot_dimension_numbers<[1], [0], [0], [1], [0, 0, 1, 1], [], []>} : vector<8x128xbf16>, vector<128x128xbf16>, vector<8x128xf32> -> vector<8x128xf32>
    %c0_66 = arith.constant 0 : index
    %c0_67 = arith.constant 0 : index
    %125 = vector.load %arg23[%c0_66, %c0_67] : memref<128x128xbf16, #tpu.memory_space<vmem>>, vector<128x128xbf16>
    %cst_68 = arith.constant dense<0.000000e+00> : vector<8x128xf32>
    %126 = tpu.matmul %101, %125, %cst_68 {dimension_numbers = #tpu.dot_dimension_numbers<[1], [0], [0], [1], [0, 0, 1, 1], [], []>} : vector<8x128xbf16>, vector<128x128xbf16>, vector<8x128xf32> -> vector<8x128xf32>
    %127 = arith.addf %124, %126 : vector<8x128xf32>
    %128 = math.tanh %127 : vector<8x128xf32>
    %c0_69 = arith.constant 0 : index
    %c0_70 = arith.constant 0 : index
    %c0_71 = arith.constant 0 : index
    %129 = vector.load %arg11[%c0_69, %c0_70, %c0_71] : memref<4x8x128xf32, #tpu.memory_space<vmem>>, vector<1x8x128xf32>
    %130 = vector.shape_cast %129 : vector<1x8x128xf32> to vector<8x128xf32>
    %131 = vector.shape_cast %128 : vector<8x128xf32> to vector<1x8x128xf32>
    tpu.vector_store %arg11[%c0_69, %c0_70, %c0_71], %131 {strides = array<i32>} : memref<4x8x128xf32, #tpu.memory_space<vmem>>, vector<1x8x128xf32>,
    %c0_72 = arith.constant 0 : index
    %c0_73 = arith.constant 0 : index
    %c0_74 = arith.constant 0 : index
    %132 = vector.load %arg12[%c0_72, %c0_73, %c0_74] : memref<4x8x128xf32, #tpu.memory_space<vmem>>, vector<1x8x128xf32>
    %133 = vector.shape_cast %132 : vector<1x8x128xf32> to vector<8x128xf32>
    %134 = vector.shape_cast %117 : vector<8x128xf32> to vector<1x8x128xf32>
    tpu.vector_store %arg12[%c0_72, %c0_73, %c0_74], %134 {strides = array<i32>} : memref<4x8x128xf32, #tpu.memory_space<vmem>>, vector<1x8x128xf32>,
    %c1_75 = arith.constant 1 : index
    %c0_76 = arith.constant 0 : index
    %c0_77 = arith.constant 0 : index
    %135 = vector.load %arg1[%c1_75, %c0_76, %c0_77] : memref<4x8x128xbf16, #tpu.memory_space<vmem>>, vector<1x8x128xbf16>
    %136 = vector.shape_cast %135 : vector<1x8x128xbf16> to vector<8x128xbf16>
    %c0_78 = arith.constant 0 : index
    %c0_79 = arith.constant 0 : index
    %c0_80 = arith.constant 0 : index
    %137 = vector.load %arg18[%c0_78, %c0_79, %c0_80] : memref<2x128x512xbf16, #tpu.memory_space<vmem>>, vector<1x128x512xbf16>
    %138 = vector.shape_cast %137 : vector<1x128x512xbf16> to vector<128x512xbf16>
    %cst_81 = arith.constant dense<0.000000e+00> : vector<8x512xf32>
    %139 = tpu.matmul %136, %138, %cst_81 {dimension_numbers = #tpu.dot_dimension_numbers<[1], [0], [0], [1], [0, 0, 1, 1], [], []>} : vector<8x128xbf16>, vector<128x512xbf16>, vector<8x512xf32> -> vector<8x512xf32>
    %c0_82 = arith.constant 0 : index
    %c0_83 = arith.constant 0 : index
    %c0_84 = arith.constant 0 : index
    %140 = vector.load %arg15[%c0_82, %c0_83, %c0_84] : memref<2x8x128xf32, #tpu.memory_space<vmem>>, vector<1x8x128xf32>
    %141 = vector.shape_cast %140 : vector<1x8x128xf32> to vector<8x128xf32>
    %142 = arith.truncf %141 : vector<8x128xf32> to vector<8x128xbf16>
    %c0_85 = arith.constant 0 : index
    %c0_86 = arith.constant 0 : index
    %c0_87 = arith.constant 0 : index
    %143 = vector.load %arg19[%c0_85, %c0_86, %c0_87] : memref<2x128x512xbf16, #tpu.memory_space<vmem>>, vector<1x128x512xbf16>
    %144 = vector.shape_cast %143 : vector<1x128x512xbf16> to vector<128x512xbf16>
    %cst_88 = arith.constant dense<0.000000e+00> : vector<8x512xf32>
    %145 = tpu.matmul %142, %144, %cst_88 {dimension_numbers = #tpu.dot_dimension_numbers<[1], [0], [0], [1], [0, 0, 1, 1], [], []>} : vector<8x128xbf16>, vector<128x512xbf16>, vector<8x512xf32> -> vector<8x512xf32>
    %146 = arith.addf %139, %145 : vector<8x512xf32>
    %c0_89 = arith.constant 0 : index
    %c0_90 = arith.constant 0 : index
    %c0_91 = arith.constant 0 : index
    %147 = vector.load %arg20[%c0_89, %c0_90, %c0_91] : memref<2x1x512xf32, #tpu.memory_space<vmem>>, vector<1x1x512xf32>
    %148 = vector.shape_cast %147 : vector<1x1x512xf32> to vector<1x512xf32>
    %149 = vector.broadcast %148 : vector<1x512xf32> to vector<8x512xf32>
    %150 = arith.addf %146, %149 : vector<8x512xf32>
    %151 = vector.extract_strided_slice %150 {offsets = [0, 0], sizes = [8, 128], strides = [1, 1]} : vector<8x512xf32> to vector<8x128xf32>
    %152 = arith.negf %151 : vector<8x128xf32>
    %153 = math.exp %152 : vector<8x128xf32>
    %cst_92 = arith.constant 1.000000e+00 : f32
    %154 = vector.broadcast %cst_92 : f32 to vector<8x128xf32>
    %155 = arith.addf %154, %153 : vector<8x128xf32>
    %156 = arith.divf %154, %155 : vector<8x128xf32>
    %157 = vector.extract_strided_slice %150 {offsets = [0, 128], sizes = [8, 128], strides = [1, 1]} : vector<8x512xf32> to vector<8x128xf32>
    %158 = arith.negf %157 : vector<8x128xf32>
    %159 = math.exp %158 : vector<8x128xf32>
    %cst_93 = arith.constant 1.000000e+00 : f32
    %160 = vector.broadcast %cst_93 : f32 to vector<8x128xf32>
    %161 = arith.addf %160, %159 : vector<8x128xf32>
    %162 = arith.divf %160, %161 : vector<8x128xf32>
    %163 = vector.extract_strided_slice %150 {offsets = [0, 256], sizes = [8, 128], strides = [1, 1]} : vector<8x512xf32> to vector<8x128xf32>
    %164 = math.tanh %163 : vector<8x128xf32>
    %165 = vector.extract_strided_slice %150 {offsets = [0, 384], sizes = [8, 128], strides = [1, 1]} : vector<8x512xf32> to vector<8x128xf32>
    %166 = arith.negf %165 : vector<8x128xf32>
    %167 = math.exp %166 : vector<8x128xf32>
    %cst_94 = arith.constant 1.000000e+00 : f32
    %168 = vector.broadcast %cst_94 : f32 to vector<8x128xf32>
    %169 = arith.addf %168, %167 : vector<8x128xf32>
    %170 = arith.divf %168, %169 : vector<8x128xf32>
    %c0_95 = arith.constant 0 : index
    %c0_96 = arith.constant 0 : index
    %c0_97 = arith.constant 0 : index
    %171 = vector.load %arg16[%c0_95, %c0_96, %c0_97] : memref<2x8x128xf32, #tpu.memory_space<vmem>>, vector<1x8x128xf32>
    %172 = vector.shape_cast %171 : vector<1x8x128xf32> to vector<8x128xf32>
    %173 = arith.mulf %162, %172 : vector<8x128xf32>
    %174 = arith.mulf %156, %164 : vector<8x128xf32>
    %175 = arith.addf %173, %174 : vector<8x128xf32>
    %176 = math.tanh %175 : vector<8x128xf32>
    %177 = arith.mulf %170, %176 : vector<8x128xf32>
    %c0_98 = arith.constant 0 : index
    %c0_99 = arith.constant 0 : index
    %c0_100 = arith.constant 0 : index
    %178 = vector.load %arg16[%c0_98, %c0_99, %c0_100] : memref<2x8x128xf32, #tpu.memory_space<vmem>>, vector<1x8x128xf32>
    %179 = vector.shape_cast %178 : vector<1x8x128xf32> to vector<8x128xf32>
    %180 = vector.shape_cast %175 : vector<8x128xf32> to vector<1x8x128xf32>
    tpu.vector_store %arg16[%c0_98, %c0_99, %c0_100], %180 {strides = array<i32>} : memref<2x8x128xf32, #tpu.memory_space<vmem>>, vector<1x8x128xf32>,
    %c0_101 = arith.constant 0 : index
    %c0_102 = arith.constant 0 : index
    %c0_103 = arith.constant 0 : index
    %181 = vector.load %arg15[%c0_101, %c0_102, %c0_103] : memref<2x8x128xf32, #tpu.memory_space<vmem>>, vector<1x8x128xf32>
    %182 = vector.shape_cast %181 : vector<1x8x128xf32> to vector<8x128xf32>
    %183 = vector.shape_cast %177 : vector<8x128xf32> to vector<1x8x128xf32>
    tpu.vector_store %arg15[%c0_101, %c0_102, %c0_103], %183 {strides = array<i32>} : memref<2x8x128xf32, #tpu.memory_space<vmem>>, vector<1x8x128xf32>,
    %184 = arith.truncf %177 : vector<8x128xf32> to vector<8x128xbf16>
    %c1_104 = arith.constant 1 : index
    %c0_105 = arith.constant 0 : index
    %c0_106 = arith.constant 0 : index
    %185 = vector.load %arg18[%c1_104, %c0_105, %c0_106] : memref<2x128x512xbf16, #tpu.memory_space<vmem>>, vector<1x128x512xbf16>
    %186 = vector.shape_cast %185 : vector<1x128x512xbf16> to vector<128x512xbf16>
    %cst_107 = arith.constant dense<0.000000e+00> : vector<8x512xf32>
    %187 = tpu.matmul %184, %186, %cst_107 {dimension_numbers = #tpu.dot_dimension_numbers<[1], [0], [0], [1], [0, 0, 1, 1], [], []>} : vector<8x128xbf16>, vector<128x512xbf16>, vector<8x512xf32> -> vector<8x512xf32>
    %c1_108 = arith.constant 1 : index
    %c0_109 = arith.constant 0 : index
    %c0_110 = arith.constant 0 : index
    %188 = vector.load %arg15[%c1_108, %c0_109, %c0_110] : memref<2x8x128xf32, #tpu.memory_space<vmem>>, vector<1x8x128xf32>
    %189 = vector.shape_cast %188 : vector<1x8x128xf32> to vector<8x128xf32>
    %190 = arith.truncf %189 : vector<8x128xf32> to vector<8x128xbf16>
    %c1_111 = arith.constant 1 : index
    %c0_112 = arith.constant 0 : index
    %c0_113 = arith.constant 0 : index
    %191 = vector.load %arg19[%c1_111, %c0_112, %c0_113] : memref<2x128x512xbf16, #tpu.memory_space<vmem>>, vector<1x128x512xbf16>
    %192 = vector.shape_cast %191 : vector<1x128x512xbf16> to vector<128x512xbf16>
    %cst_114 = arith.constant dense<0.000000e+00> : vector<8x512xf32>
    %193 = tpu.matmul %190, %192, %cst_114 {dimension_numbers = #tpu.dot_dimension_numbers<[1], [0], [0], [1], [0, 0, 1, 1], [], []>} : vector<8x128xbf16>, vector<128x512xbf16>, vector<8x512xf32> -> vector<8x512xf32>
    %194 = arith.addf %187, %193 : vector<8x512xf32>
    %c1_115 = arith.constant 1 : index
    %c0_116 = arith.constant 0 : index
    %c0_117 = arith.constant 0 : index
    %195 = vector.load %arg20[%c1_115, %c0_116, %c0_117] : memref<2x1x512xf32, #tpu.memory_space<vmem>>, vector<1x1x512xf32>
    %196 = vector.shape_cast %195 : vector<1x1x512xf32> to vector<1x512xf32>
    %197 = vector.broadcast %196 : vector<1x512xf32> to vector<8x512xf32>
    %198 = arith.addf %194, %197 : vector<8x512xf32>
    %199 = vector.extract_strided_slice %198 {offsets = [0, 0], sizes = [8, 128], strides = [1, 1]} : vector<8x512xf32> to vector<8x128xf32>
    %200 = arith.negf %199 : vector<8x128xf32>
    %201 = math.exp %200 : vector<8x128xf32>
    %cst_118 = arith.constant 1.000000e+00 : f32
    %202 = vector.broadcast %cst_118 : f32 to vector<8x128xf32>
    %203 = arith.addf %202, %201 : vector<8x128xf32>
    %204 = arith.divf %202, %203 : vector<8x128xf32>
    %205 = vector.extract_strided_slice %198 {offsets = [0, 128], sizes = [8, 128], strides = [1, 1]} : vector<8x512xf32> to vector<8x128xf32>
    %206 = arith.negf %205 : vector<8x128xf32>
    %207 = math.exp %206 : vector<8x128xf32>
    %cst_119 = arith.constant 1.000000e+00 : f32
    %208 = vector.broadcast %cst_119 : f32 to vector<8x128xf32>
    %209 = arith.addf %208, %207 : vector<8x128xf32>
    %210 = arith.divf %208, %209 : vector<8x128xf32>
    %211 = vector.extract_strided_slice %198 {offsets = [0, 256], sizes = [8, 128], strides = [1, 1]} : vector<8x512xf32> to vector<8x128xf32>
    %212 = math.tanh %211 : vector<8x128xf32>
    %213 = vector.extract_strided_slice %198 {offsets = [0, 384], sizes = [8, 128], strides = [1, 1]} : vector<8x512xf32> to vector<8x128xf32>
    %214 = arith.negf %213 : vector<8x128xf32>
    %215 = math.exp %214 : vector<8x128xf32>
    %cst_120 = arith.constant 1.000000e+00 : f32
    %216 = vector.broadcast %cst_120 : f32 to vector<8x128xf32>
    %217 = arith.addf %216, %215 : vector<8x128xf32>
    %218 = arith.divf %216, %217 : vector<8x128xf32>
    %c1_121 = arith.constant 1 : index
    %c0_122 = arith.constant 0 : index
    %c0_123 = arith.constant 0 : index
    %219 = vector.load %arg16[%c1_121, %c0_122, %c0_123] : memref<2x8x128xf32, #tpu.memory_space<vmem>>, vector<1x8x128xf32>
    %220 = vector.shape_cast %219 : vector<1x8x128xf32> to vector<8x128xf32>
    %221 = arith.mulf %210, %220 : vector<8x128xf32>
    %222 = arith.mulf %204, %212 : vector<8x128xf32>
    %223 = arith.addf %221, %222 : vector<8x128xf32>
    %224 = math.tanh %223 : vector<8x128xf32>
    %225 = arith.mulf %218, %224 : vector<8x128xf32>
    %c1_124 = arith.constant 1 : index
    %c0_125 = arith.constant 0 : index
    %c0_126 = arith.constant 0 : index
    %226 = vector.load %arg16[%c1_124, %c0_125, %c0_126] : memref<2x8x128xf32, #tpu.memory_space<vmem>>, vector<1x8x128xf32>
    %227 = vector.shape_cast %226 : vector<1x8x128xf32> to vector<8x128xf32>
    %228 = vector.shape_cast %223 : vector<8x128xf32> to vector<1x8x128xf32>
    tpu.vector_store %arg16[%c1_124, %c0_125, %c0_126], %228 {strides = array<i32>} : memref<2x8x128xf32, #tpu.memory_space<vmem>>, vector<1x8x128xf32>,
    %c1_127 = arith.constant 1 : index
    %c0_128 = arith.constant 0 : index
    %c0_129 = arith.constant 0 : index
    %229 = vector.load %arg15[%c1_127, %c0_128, %c0_129] : memref<2x8x128xf32, #tpu.memory_space<vmem>>, vector<1x8x128xf32>
    %230 = vector.shape_cast %229 : vector<1x8x128xf32> to vector<8x128xf32>
    %231 = vector.shape_cast %225 : vector<8x128xf32> to vector<1x8x128xf32>
    tpu.vector_store %arg15[%c1_127, %c0_128, %c0_129], %231 {strides = array<i32>} : memref<2x8x128xf32, #tpu.memory_space<vmem>>, vector<1x8x128xf32>,
    %232 = arith.truncf %225 : vector<8x128xf32> to vector<8x128xbf16>
    %c0_130 = arith.constant 0 : index
    %c0_131 = arith.constant 0 : index
    %233 = vector.load %arg21[%c0_130, %c0_131] : memref<128x128xbf16, #tpu.memory_space<vmem>>, vector<128x128xbf16>
    %cst_132 = arith.constant dense<0.000000e+00> : vector<8x128xf32>
    %234 = tpu.matmul %232, %233, %cst_132 {dimension_numbers = #tpu.dot_dimension_numbers<[1], [0], [0], [1], [0, 0, 1, 1], [], []>} : vector<8x128xbf16>, vector<128x128xbf16>, vector<8x128xf32> -> vector<8x128xf32>
    %235 = vector.shape_cast %234 : vector<8x128xf32> to vector<8x1x128xf32>
    %236 = arith.truncf %235 : vector<8x1x128xf32> to vector<8x1x128xbf16>
    "tpu.trace_start"() <{level = 10 : i32, message = "bqh,bsh->bqs"}> : () -> ()
    %cst_133 = arith.constant dense<0.000000e+00> : vector<8x1x128xf32>
    %237 = tpu.matmul %236, %3, %cst_133 {dimension_numbers = #tpu.dot_dimension_numbers<[2], [2], [1], [1], [0, 0, 0, 1, 1, 1], [0], [0]>} : vector<8x1x128xbf16>, vector<8x128x128xbf16>, vector<8x1x128xf32> -> vector<8x1x128xf32>
    "tpu.trace_stop"() : () -> ()
    %238 = vector.shape_cast %237 : vector<8x1x128xf32> to vector<8x128xf32>
    %cst_134 = arith.constant dense<0xFF800000> : vector<8xf32>
    %239 = vector.multi_reduction <maximumf>, %238, %cst_134 [1] : vector<8x128xf32> to vector<8xf32>
    %240 = vector.shape_cast %239 : vector<8xf32> to vector<8x1xf32>
    %241 = vector.broadcast %240 : vector<8x1xf32> to vector<8x128xf32>
    %242 = arith.subf %238, %241 : vector<8x128xf32>
    %243 = math.exp %242 : vector<8x128xf32>
    %cst_135 = arith.constant dense<0.000000e+00> : vector<8xf32>
    %244 = vector.multi_reduction <add>, %243, %cst_135 [1] : vector<8x128xf32> to vector<8xf32>
    %245 = vector.shape_cast %244 : vector<8xf32> to vector<8x1xf32>
    %246 = tpu.reciprocal %245 {approx = true} : vector<8x1xf32> -> vector<8x1xf32>
    %247 = vector.broadcast %246 : vector<8x1xf32> to vector<8x128xf32>
    %248 = arith.mulf %243, %247 : vector<8x128xf32>
    %249 = vector.shape_cast %248 : vector<8x128xf32> to vector<8x1x128xf32>
    %250 = arith.truncf %249 : vector<8x1x128xf32> to vector<8x1x128xbf16>
    "tpu.trace_start"() <{level = 10 : i32, message = "bqs,bsh->bqh"}> : () -> ()
    %cst_136 = arith.constant dense<0.000000e+00> : vector<8x1x128xf32>
    %251 = tpu.matmul %250, %3, %cst_136 {dimension_numbers = #tpu.dot_dimension_numbers<[2], [1], [1], [2], [0, 0, 0, 1, 1, 2], [0], [0]>} : vector<8x1x128xbf16>, vector<8x128x128xbf16>, vector<8x1x128xf32> -> vector<8x1x128xf32>
    "tpu.trace_stop"() : () -> ()
    %252 = vector.shape_cast %251 : vector<8x1x128xf32> to vector<8x128xf32>
    %253 = arith.truncf %252 : vector<8x128xf32> to vector<8x128xbf16>
    %c0_137 = arith.constant 0 : index
    %c0_138 = arith.constant 0 : index
    %254 = vector.load %arg22[%c0_137, %c0_138] : memref<128x128xbf16, #tpu.memory_space<vmem>>, vector<128x128xbf16>
    %cst_139 = arith.constant dense<0.000000e+00> : vector<8x128xf32>
    %255 = tpu.matmul %253, %254, %cst_139 {dimension_numbers = #tpu.dot_dimension_numbers<[1], [0], [0], [1], [0, 0, 1, 1], [], []>} : vector<8x128xbf16>, vector<128x128xbf16>, vector<8x128xf32> -> vector<8x128xf32>
    %c0_140 = arith.constant 0 : index
    %c0_141 = arith.constant 0 : index
    %256 = vector.load %arg23[%c0_140, %c0_141] : memref<128x128xbf16, #tpu.memory_space<vmem>>, vector<128x128xbf16>
    %cst_142 = arith.constant dense<0.000000e+00> : vector<8x128xf32>
    %257 = tpu.matmul %232, %256, %cst_142 {dimension_numbers = #tpu.dot_dimension_numbers<[1], [0], [0], [1], [0, 0, 1, 1], [], []>} : vector<8x128xbf16>, vector<128x128xbf16>, vector<8x128xf32> -> vector<8x128xf32>
    %258 = arith.addf %255, %257 : vector<8x128xf32>
    %259 = math.tanh %258 : vector<8x128xf32>
    %c1_143 = arith.constant 1 : index
    %c0_144 = arith.constant 0 : index
    %c0_145 = arith.constant 0 : index
    %260 = vector.load %arg11[%c1_143, %c0_144, %c0_145] : memref<4x8x128xf32, #tpu.memory_space<vmem>>, vector<1x8x128xf32>
    %261 = vector.shape_cast %260 : vector<1x8x128xf32> to vector<8x128xf32>
    %262 = vector.shape_cast %259 : vector<8x128xf32> to vector<1x8x128xf32>
    tpu.vector_store %arg11[%c1_143, %c0_144, %c0_145], %262 {strides = array<i32>} : memref<4x8x128xf32, #tpu.memory_space<vmem>>, vector<1x8x128xf32>,
    %c1_146 = arith.constant 1 : index
    %c0_147 = arith.constant 0 : index
    %c0_148 = arith.constant 0 : index
    %263 = vector.load %arg12[%c1_146, %c0_147, %c0_148] : memref<4x8x128xf32, #tpu.memory_space<vmem>>, vector<1x8x128xf32>
    %264 = vector.shape_cast %263 : vector<1x8x128xf32> to vector<8x128xf32>
    %265 = vector.shape_cast %248 : vector<8x128xf32> to vector<1x8x128xf32>
    tpu.vector_store %arg12[%c1_146, %c0_147, %c0_148], %265 {strides = array<i32>} : memref<4x8x128xf32, #tpu.memory_space<vmem>>, vector<1x8x128xf32>,
    %c2 = arith.constant 2 : index
    %c0_149 = arith.constant 0 : index
    %c0_150 = arith.constant 0 : index
    %266 = vector.load %arg1[%c2, %c0_149, %c0_150] : memref<4x8x128xbf16, #tpu.memory_space<vmem>>, vector<1x8x128xbf16>
    %267 = vector.shape_cast %266 : vector<1x8x128xbf16> to vector<8x128xbf16>
    %c0_151 = arith.constant 0 : index
    %c0_152 = arith.constant 0 : index
    %c0_153 = arith.constant 0 : index
    %268 = vector.load %arg18[%c0_151, %c0_152, %c0_153] : memref<2x128x512xbf16, #tpu.memory_space<vmem>>, vector<1x128x512xbf16>
    %269 = vector.shape_cast %268 : vector<1x128x512xbf16> to vector<128x512xbf16>
    %cst_154 = arith.constant dense<0.000000e+00> : vector<8x512xf32>
    %270 = tpu.matmul %267, %269, %cst_154 {dimension_numbers = #tpu.dot_dimension_numbers<[1], [0], [0], [1], [0, 0, 1, 1], [], []>} : vector<8x128xbf16>, vector<128x512xbf16>, vector<8x512xf32> -> vector<8x512xf32>
    %c0_155 = arith.constant 0 : index
    %c0_156 = arith.constant 0 : index
    %c0_157 = arith.constant 0 : index
    %271 = vector.load %arg15[%c0_155, %c0_156, %c0_157] : memref<2x8x128xf32, #tpu.memory_space<vmem>>, vector<1x8x128xf32>
    %272 = vector.shape_cast %271 : vector<1x8x128xf32> to vector<8x128xf32>
    %273 = arith.truncf %272 : vector<8x128xf32> to vector<8x128xbf16>
    %c0_158 = arith.constant 0 : index
    %c0_159 = arith.constant 0 : index
    %c0_160 = arith.constant 0 : index
    %274 = vector.load %arg19[%c0_158, %c0_159, %c0_160] : memref<2x128x512xbf16, #tpu.memory_space<vmem>>, vector<1x128x512xbf16>
    %275 = vector.shape_cast %274 : vector<1x128x512xbf16> to vector<128x512xbf16>
    %cst_161 = arith.constant dense<0.000000e+00> : vector<8x512xf32>
    %276 = tpu.matmul %273, %275, %cst_161 {dimension_numbers = #tpu.dot_dimension_numbers<[1], [0], [0], [1], [0, 0, 1, 1], [], []>} : vector<8x128xbf16>, vector<128x512xbf16>, vector<8x512xf32> -> vector<8x512xf32>
    %277 = arith.addf %270, %276 : vector<8x512xf32>
    %c0_162 = arith.constant 0 : index
    %c0_163 = arith.constant 0 : index
    %c0_164 = arith.constant 0 : index
    %278 = vector.load %arg20[%c0_162, %c0_163, %c0_164] : memref<2x1x512xf32, #tpu.memory_space<vmem>>, vector<1x1x512xf32>
    %279 = vector.shape_cast %278 : vector<1x1x512xf32> to vector<1x512xf32>
    %280 = vector.broadcast %279 : vector<1x512xf32> to vector<8x512xf32>
    %281 = arith.addf %277, %280 : vector<8x512xf32>
    %282 = vector.extract_strided_slice %281 {offsets = [0, 0], sizes = [8, 128], strides = [1, 1]} : vector<8x512xf32> to vector<8x128xf32>
    %283 = arith.negf %282 : vector<8x128xf32>
    %284 = math.exp %283 : vector<8x128xf32>
    %cst_165 = arith.constant 1.000000e+00 : f32
    %285 = vector.broadcast %cst_165 : f32 to vector<8x128xf32>
    %286 = arith.addf %285, %284 : vector<8x128xf32>
    %287 = arith.divf %285, %286 : vector<8x128xf32>
    %288 = vector.extract_strided_slice %281 {offsets = [0, 128], sizes = [8, 128], strides = [1, 1]} : vector<8x512xf32> to vector<8x128xf32>
    %289 = arith.negf %288 : vector<8x128xf32>
    %290 = math.exp %289 : vector<8x128xf32>
    %cst_166 = arith.constant 1.000000e+00 : f32
    %291 = vector.broadcast %cst_166 : f32 to vector<8x128xf32>
    %292 = arith.addf %291, %290 : vector<8x128xf32>
    %293 = arith.divf %291, %292 : vector<8x128xf32>
    %294 = vector.extract_strided_slice %281 {offsets = [0, 256], sizes = [8, 128], strides = [1, 1]} : vector<8x512xf32> to vector<8x128xf32>
    %295 = math.tanh %294 : vector<8x128xf32>
    %296 = vector.extract_strided_slice %281 {offsets = [0, 384], sizes = [8, 128], strides = [1, 1]} : vector<8x512xf32> to vector<8x128xf32>
    %297 = arith.negf %296 : vector<8x128xf32>
    %298 = math.exp %297 : vector<8x128xf32>
    %cst_167 = arith.constant 1.000000e+00 : f32
    %299 = vector.broadcast %cst_167 : f32 to vector<8x128xf32>
    %300 = arith.addf %299, %298 : vector<8x128xf32>
    %301 = arith.divf %299, %300 : vector<8x128xf32>
    %c0_168 = arith.constant 0 : index
    %c0_169 = arith.constant 0 : index
    %c0_170 = arith.constant 0 : index
    %302 = vector.load %arg16[%c0_168, %c0_169, %c0_170] : memref<2x8x128xf32, #tpu.memory_space<vmem>>, vector<1x8x128xf32>
    %303 = vector.shape_cast %302 : vector<1x8x128xf32> to vector<8x128xf32>
    %304 = arith.mulf %293, %303 : vector<8x128xf32>
    %305 = arith.mulf %287, %295 : vector<8x128xf32>
    %306 = arith.addf %304, %305 : vector<8x128xf32>
    %307 = math.tanh %306 : vector<8x128xf32>
    %308 = arith.mulf %301, %307 : vector<8x128xf32>
    %c0_171 = arith.constant 0 : index
    %c0_172 = arith.constant 0 : index
    %c0_173 = arith.constant 0 : index
    %309 = vector.load %arg16[%c0_171, %c0_172, %c0_173] : memref<2x8x128xf32, #tpu.memory_space<vmem>>, vector<1x8x128xf32>
    %310 = vector.shape_cast %309 : vector<1x8x128xf32> to vector<8x128xf32>
    %311 = vector.shape_cast %306 : vector<8x128xf32> to vector<1x8x128xf32>
    tpu.vector_store %arg16[%c0_171, %c0_172, %c0_173], %311 {strides = array<i32>} : memref<2x8x128xf32, #tpu.memory_space<vmem>>, vector<1x8x128xf32>,
    %c0_174 = arith.constant 0 : index
    %c0_175 = arith.constant 0 : index
    %c0_176 = arith.constant 0 : index
    %312 = vector.load %arg15[%c0_174, %c0_175, %c0_176] : memref<2x8x128xf32, #tpu.memory_space<vmem>>, vector<1x8x128xf32>
    %313 = vector.shape_cast %312 : vector<1x8x128xf32> to vector<8x128xf32>
    %314 = vector.shape_cast %308 : vector<8x128xf32> to vector<1x8x128xf32>
    tpu.vector_store %arg15[%c0_174, %c0_175, %c0_176], %314 {strides = array<i32>} : memref<2x8x128xf32, #tpu.memory_space<vmem>>, vector<1x8x128xf32>,
    %315 = arith.truncf %308 : vector<8x128xf32> to vector<8x128xbf16>
    %c1_177 = arith.constant 1 : index
    %c0_178 = arith.constant 0 : index
    %c0_179 = arith.constant 0 : index
    %316 = vector.load %arg18[%c1_177, %c0_178, %c0_179] : memref<2x128x512xbf16, #tpu.memory_space<vmem>>, vector<1x128x512xbf16>
    %317 = vector.shape_cast %316 : vector<1x128x512xbf16> to vector<128x512xbf16>
    %cst_180 = arith.constant dense<0.000000e+00> : vector<8x512xf32>
    %318 = tpu.matmul %315, %317, %cst_180 {dimension_numbers = #tpu.dot_dimension_numbers<[1], [0], [0], [1], [0, 0, 1, 1], [], []>} : vector<8x128xbf16>, vector<128x512xbf16>, vector<8x512xf32> -> vector<8x512xf32>
    %c1_181 = arith.constant 1 : index
    %c0_182 = arith.constant 0 : index
    %c0_183 = arith.constant 0 : index
    %319 = vector.load %arg15[%c1_181, %c0_182, %c0_183] : memref<2x8x128xf32, #tpu.memory_space<vmem>>, vector<1x8x128xf32>
    %320 = vector.shape_cast %319 : vector<1x8x128xf32> to vector<8x128xf32>
    %321 = arith.truncf %320 : vector<8x128xf32> to vector<8x128xbf16>
    %c1_184 = arith.constant 1 : index
    %c0_185 = arith.constant 0 : index
    %c0_186 = arith.constant 0 : index
    %322 = vector.load %arg19[%c1_184, %c0_185, %c0_186] : memref<2x128x512xbf16, #tpu.memory_space<vmem>>, vector<1x128x512xbf16>
    %323 = vector.shape_cast %322 : vector<1x128x512xbf16> to vector<128x512xbf16>
    %cst_187 = arith.constant dense<0.000000e+00> : vector<8x512xf32>
    %324 = tpu.matmul %321, %323, %cst_187 {dimension_numbers = #tpu.dot_dimension_numbers<[1], [0], [0], [1], [0, 0, 1, 1], [], []>} : vector<8x128xbf16>, vector<128x512xbf16>, vector<8x512xf32> -> vector<8x512xf32>
    %325 = arith.addf %318, %324 : vector<8x512xf32>
    %c1_188 = arith.constant 1 : index
    %c0_189 = arith.constant 0 : index
    %c0_190 = arith.constant 0 : index
    %326 = vector.load %arg20[%c1_188, %c0_189, %c0_190] : memref<2x1x512xf32, #tpu.memory_space<vmem>>, vector<1x1x512xf32>
    %327 = vector.shape_cast %326 : vector<1x1x512xf32> to vector<1x512xf32>
    %328 = vector.broadcast %327 : vector<1x512xf32> to vector<8x512xf32>
    %329 = arith.addf %325, %328 : vector<8x512xf32>
    %330 = vector.extract_strided_slice %329 {offsets = [0, 0], sizes = [8, 128], strides = [1, 1]} : vector<8x512xf32> to vector<8x128xf32>
    %331 = arith.negf %330 : vector<8x128xf32>
    %332 = math.exp %331 : vector<8x128xf32>
    %cst_191 = arith.constant 1.000000e+00 : f32
    %333 = vector.broadcast %cst_191 : f32 to vector<8x128xf32>
    %334 = arith.addf %333, %332 : vector<8x128xf32>
    %335 = arith.divf %333, %334 : vector<8x128xf32>
    %336 = vector.extract_strided_slice %329 {offsets = [0, 128], sizes = [8, 128], strides = [1, 1]} : vector<8x512xf32> to vector<8x128xf32>
    %337 = arith.negf %336 : vector<8x128xf32>
    %338 = math.exp %337 : vector<8x128xf32>
    %cst_192 = arith.constant 1.000000e+00 : f32
    %339 = vector.broadcast %cst_192 : f32 to vector<8x128xf32>
    %340 = arith.addf %339, %338 : vector<8x128xf32>
    %341 = arith.divf %339, %340 : vector<8x128xf32>
    %342 = vector.extract_strided_slice %329 {offsets = [0, 256], sizes = [8, 128], strides = [1, 1]} : vector<8x512xf32> to vector<8x128xf32>
    %343 = math.tanh %342 : vector<8x128xf32>
    %344 = vector.extract_strided_slice %329 {offsets = [0, 384], sizes = [8, 128], strides = [1, 1]} : vector<8x512xf32> to vector<8x128xf32>
    %345 = arith.negf %344 : vector<8x128xf32>
    %346 = math.exp %345 : vector<8x128xf32>
    %cst_193 = arith.constant 1.000000e+00 : f32
    %347 = vector.broadcast %cst_193 : f32 to vector<8x128xf32>
    %348 = arith.addf %347, %346 : vector<8x128xf32>
    %349 = arith.divf %347, %348 : vector<8x128xf32>
    %c1_194 = arith.constant 1 : index
    %c0_195 = arith.constant 0 : index
    %c0_196 = arith.constant 0 : index
    %350 = vector.load %arg16[%c1_194, %c0_195, %c0_196] : memref<2x8x128xf32, #tpu.memory_space<vmem>>, vector<1x8x128xf32>
    %351 = vector.shape_cast %350 : vector<1x8x128xf32> to vector<8x128xf32>
    %352 = arith.mulf %341, %351 : vector<8x128xf32>
    %353 = arith.mulf %335, %343 : vector<8x128xf32>
    %354 = arith.addf %352, %353 : vector<8x128xf32>
    %355 = math.tanh %354 : vector<8x128xf32>
    %356 = arith.mulf %349, %355 : vector<8x128xf32>
    %c1_197 = arith.constant 1 : index
    %c0_198 = arith.constant 0 : index
    %c0_199 = arith.constant 0 : index
    %357 = vector.load %arg16[%c1_197, %c0_198, %c0_199] : memref<2x8x128xf32, #tpu.memory_space<vmem>>, vector<1x8x128xf32>
    %358 = vector.shape_cast %357 : vector<1x8x128xf32> to vector<8x128xf32>
    %359 = vector.shape_cast %354 : vector<8x128xf32> to vector<1x8x128xf32>
    tpu.vector_store %arg16[%c1_197, %c0_198, %c0_199], %359 {strides = array<i32>} : memref<2x8x128xf32, #tpu.memory_space<vmem>>, vector<1x8x128xf32>,
    %c1_200 = arith.constant 1 : index
    %c0_201 = arith.constant 0 : index
    %c0_202 = arith.constant 0 : index
    %360 = vector.load %arg15[%c1_200, %c0_201, %c0_202] : memref<2x8x128xf32, #tpu.memory_space<vmem>>, vector<1x8x128xf32>
    %361 = vector.shape_cast %360 : vector<1x8x128xf32> to vector<8x128xf32>
    %362 = vector.shape_cast %356 : vector<8x128xf32> to vector<1x8x128xf32>
    tpu.vector_store %arg15[%c1_200, %c0_201, %c0_202], %362 {strides = array<i32>} : memref<2x8x128xf32, #tpu.memory_space<vmem>>, vector<1x8x128xf32>,
    %363 = arith.truncf %356 : vector<8x128xf32> to vector<8x128xbf16>
    %c0_203 = arith.constant 0 : index
    %c0_204 = arith.constant 0 : index
    %364 = vector.load %arg21[%c0_203, %c0_204] : memref<128x128xbf16, #tpu.memory_space<vmem>>, vector<128x128xbf16>
    %cst_205 = arith.constant dense<0.000000e+00> : vector<8x128xf32>
    %365 = tpu.matmul %363, %364, %cst_205 {dimension_numbers = #tpu.dot_dimension_numbers<[1], [0], [0], [1], [0, 0, 1, 1], [], []>} : vector<8x128xbf16>, vector<128x128xbf16>, vector<8x128xf32> -> vector<8x128xf32>
    %366 = vector.shape_cast %365 : vector<8x128xf32> to vector<8x1x128xf32>
    %367 = arith.truncf %366 : vector<8x1x128xf32> to vector<8x1x128xbf16>
    "tpu.trace_start"() <{level = 10 : i32, message = "bqh,bsh->bqs"}> : () -> ()
    %cst_206 = arith.constant dense<0.000000e+00> : vector<8x1x128xf32>
    %368 = tpu.matmul %367, %3, %cst_206 {dimension_numbers = #tpu.dot_dimension_numbers<[2], [2], [1], [1], [0, 0, 0, 1, 1, 1], [0], [0]>} : vector<8x1x128xbf16>, vector<8x128x128xbf16>, vector<8x1x128xf32> -> vector<8x1x128xf32>
    "tpu.trace_stop"() : () -> ()
    %369 = vector.shape_cast %368 : vector<8x1x128xf32> to vector<8x128xf32>
    %cst_207 = arith.constant dense<0xFF800000> : vector<8xf32>
    %370 = vector.multi_reduction <maximumf>, %369, %cst_207 [1] : vector<8x128xf32> to vector<8xf32>
    %371 = vector.shape_cast %370 : vector<8xf32> to vector<8x1xf32>
    %372 = vector.broadcast %371 : vector<8x1xf32> to vector<8x128xf32>
    %373 = arith.subf %369, %372 : vector<8x128xf32>
    %374 = math.exp %373 : vector<8x128xf32>
    %cst_208 = arith.constant dense<0.000000e+00> : vector<8xf32>
    %375 = vector.multi_reduction <add>, %374, %cst_208 [1] : vector<8x128xf32> to vector<8xf32>
    %376 = vector.shape_cast %375 : vector<8xf32> to vector<8x1xf32>
    %377 = tpu.reciprocal %376 {approx = true} : vector<8x1xf32> -> vector<8x1xf32>
    %378 = vector.broadcast %377 : vector<8x1xf32> to vector<8x128xf32>
    %379 = arith.mulf %374, %378 : vector<8x128xf32>
    %380 = vector.shape_cast %379 : vector<8x128xf32> to vector<8x1x128xf32>
    %381 = arith.truncf %380 : vector<8x1x128xf32> to vector<8x1x128xbf16>
    "tpu.trace_start"() <{level = 10 : i32, message = "bqs,bsh->bqh"}> : () -> ()
    %cst_209 = arith.constant dense<0.000000e+00> : vector<8x1x128xf32>
    %382 = tpu.matmul %381, %3, %cst_209 {dimension_numbers = #tpu.dot_dimension_numbers<[2], [1], [1], [2], [0, 0, 0, 1, 1, 2], [0], [0]>} : vector<8x1x128xbf16>, vector<8x128x128xbf16>, vector<8x1x128xf32> -> vector<8x1x128xf32>
    "tpu.trace_stop"() : () -> ()
    %383 = vector.shape_cast %382 : vector<8x1x128xf32> to vector<8x128xf32>
    %384 = arith.truncf %383 : vector<8x128xf32> to vector<8x128xbf16>
    %c0_210 = arith.constant 0 : index
    %c0_211 = arith.constant 0 : index
    %385 = vector.load %arg22[%c0_210, %c0_211] : memref<128x128xbf16, #tpu.memory_space<vmem>>, vector<128x128xbf16>
    %cst_212 = arith.constant dense<0.000000e+00> : vector<8x128xf32>
    %386 = tpu.matmul %384, %385, %cst_212 {dimension_numbers = #tpu.dot_dimension_numbers<[1], [0], [0], [1], [0, 0, 1, 1], [], []>} : vector<8x128xbf16>, vector<128x128xbf16>, vector<8x128xf32> -> vector<8x128xf32>
    %c0_213 = arith.constant 0 : index
    %c0_214 = arith.constant 0 : index
    %387 = vector.load %arg23[%c0_213, %c0_214] : memref<128x128xbf16, #tpu.memory_space<vmem>>, vector<128x128xbf16>
    %cst_215 = arith.constant dense<0.000000e+00> : vector<8x128xf32>
    %388 = tpu.matmul %363, %387, %cst_215 {dimension_numbers = #tpu.dot_dimension_numbers<[1], [0], [0], [1], [0, 0, 1, 1], [], []>} : vector<8x128xbf16>, vector<128x128xbf16>, vector<8x128xf32> -> vector<8x128xf32>
    %389 = arith.addf %386, %388 : vector<8x128xf32>
    %390 = math.tanh %389 : vector<8x128xf32>
    %c2_216 = arith.constant 2 : index
    %c0_217 = arith.constant 0 : index
    %c0_218 = arith.constant 0 : index
    %391 = vector.load %arg11[%c2_216, %c0_217, %c0_218] : memref<4x8x128xf32, #tpu.memory_space<vmem>>, vector<1x8x128xf32>
    %392 = vector.shape_cast %391 : vector<1x8x128xf32> to vector<8x128xf32>
    %393 = vector.shape_cast %390 : vector<8x128xf32> to vector<1x8x128xf32>
    tpu.vector_store %arg11[%c2_216, %c0_217, %c0_218], %393 {strides = array<i32>} : memref<4x8x128xf32, #tpu.memory_space<vmem>>, vector<1x8x128xf32>,
    %c2_219 = arith.constant 2 : index
    %c0_220 = arith.constant 0 : index
    %c0_221 = arith.constant 0 : index
    %394 = vector.load %arg12[%c2_219, %c0_220, %c0_221] : memref<4x8x128xf32, #tpu.memory_space<vmem>>, vector<1x8x128xf32>
    %395 = vector.shape_cast %394 : vector<1x8x128xf32> to vector<8x128xf32>
    %396 = vector.shape_cast %379 : vector<8x128xf32> to vector<1x8x128xf32>
    tpu.vector_store %arg12[%c2_219, %c0_220, %c0_221], %396 {strides = array<i32>} : memref<4x8x128xf32, #tpu.memory_space<vmem>>, vector<1x8x128xf32>,
    %c3 = arith.constant 3 : index
    %c0_222 = arith.constant 0 : index
    %c0_223 = arith.constant 0 : index
    %397 = vector.load %arg1[%c3, %c0_222, %c0_223] : memref<4x8x128xbf16, #tpu.memory_space<vmem>>, vector<1x8x128xbf16>
    %398 = vector.shape_cast %397 : vector<1x8x128xbf16> to vector<8x128xbf16>
    %c0_224 = arith.constant 0 : index
    %c0_225 = arith.constant 0 : index
    %c0_226 = arith.constant 0 : index
    %399 = vector.load %arg18[%c0_224, %c0_225, %c0_226] : memref<2x128x512xbf16, #tpu.memory_space<vmem>>, vector<1x128x512xbf16>
    %400 = vector.shape_cast %399 : vector<1x128x512xbf16> to vector<128x512xbf16>
    %cst_227 = arith.constant dense<0.000000e+00> : vector<8x512xf32>
    %401 = tpu.matmul %398, %400, %cst_227 {dimension_numbers = #tpu.dot_dimension_numbers<[1], [0], [0], [1], [0, 0, 1, 1], [], []>} : vector<8x128xbf16>, vector<128x512xbf16>, vector<8x512xf32> -> vector<8x512xf32>
    %c0_228 = arith.constant 0 : index
    %c0_229 = arith.constant 0 : index
    %c0_230 = arith.constant 0 : index
    %402 = vector.load %arg15[%c0_228, %c0_229, %c0_230] : memref<2x8x128xf32, #tpu.memory_space<vmem>>, vector<1x8x128xf32>
    %403 = vector.shape_cast %402 : vector<1x8x128xf32> to vector<8x128xf32>
    %404 = arith.truncf %403 : vector<8x128xf32> to vector<8x128xbf16>
    %c0_231 = arith.constant 0 : index
    %c0_232 = arith.constant 0 : index
    %c0_233 = arith.constant 0 : index
    %405 = vector.load %arg19[%c0_231, %c0_232, %c0_233] : memref<2x128x512xbf16, #tpu.memory_space<vmem>>, vector<1x128x512xbf16>
    %406 = vector.shape_cast %405 : vector<1x128x512xbf16> to vector<128x512xbf16>
    %cst_234 = arith.constant dense<0.000000e+00> : vector<8x512xf32>
    %407 = tpu.matmul %404, %406, %cst_234 {dimension_numbers = #tpu.dot_dimension_numbers<[1], [0], [0], [1], [0, 0, 1, 1], [], []>} : vector<8x128xbf16>, vector<128x512xbf16>, vector<8x512xf32> -> vector<8x512xf32>
    %408 = arith.addf %401, %407 : vector<8x512xf32>
    %c0_235 = arith.constant 0 : index
    %c0_236 = arith.constant 0 : index
    %c0_237 = arith.constant 0 : index
    %409 = vector.load %arg20[%c0_235, %c0_236, %c0_237] : memref<2x1x512xf32, #tpu.memory_space<vmem>>, vector<1x1x512xf32>
    %410 = vector.shape_cast %409 : vector<1x1x512xf32> to vector<1x512xf32>
    %411 = vector.broadcast %410 : vector<1x512xf32> to vector<8x512xf32>
    %412 = arith.addf %408, %411 : vector<8x512xf32>
    %413 = vector.extract_strided_slice %412 {offsets = [0, 0], sizes = [8, 128], strides = [1, 1]} : vector<8x512xf32> to vector<8x128xf32>
    %414 = arith.negf %413 : vector<8x128xf32>
    %415 = math.exp %414 : vector<8x128xf32>
    %cst_238 = arith.constant 1.000000e+00 : f32
    %416 = vector.broadcast %cst_238 : f32 to vector<8x128xf32>
    %417 = arith.addf %416, %415 : vector<8x128xf32>
    %418 = arith.divf %416, %417 : vector<8x128xf32>
    %419 = vector.extract_strided_slice %412 {offsets = [0, 128], sizes = [8, 128], strides = [1, 1]} : vector<8x512xf32> to vector<8x128xf32>
    %420 = arith.negf %419 : vector<8x128xf32>
    %421 = math.exp %420 : vector<8x128xf32>
    %cst_239 = arith.constant 1.000000e+00 : f32
    %422 = vector.broadcast %cst_239 : f32 to vector<8x128xf32>
    %423 = arith.addf %422, %421 : vector<8x128xf32>
    %424 = arith.divf %422, %423 : vector<8x128xf32>
    %425 = vector.extract_strided_slice %412 {offsets = [0, 256], sizes = [8, 128], strides = [1, 1]} : vector<8x512xf32> to vector<8x128xf32>
    %426 = math.tanh %425 : vector<8x128xf32>
    %427 = vector.extract_strided_slice %412 {offsets = [0, 384], sizes = [8, 128], strides = [1, 1]} : vector<8x512xf32> to vector<8x128xf32>
    %428 = arith.negf %427 : vector<8x128xf32>
    %429 = math.exp %428 : vector<8x128xf32>
    %cst_240 = arith.constant 1.000000e+00 : f32
    %430 = vector.broadcast %cst_240 : f32 to vector<8x128xf32>
    %431 = arith.addf %430, %429 : vector<8x128xf32>
    %432 = arith.divf %430, %431 : vector<8x128xf32>
    %c0_241 = arith.constant 0 : index
    %c0_242 = arith.constant 0 : index
    %c0_243 = arith.constant 0 : index
    %433 = vector.load %arg16[%c0_241, %c0_242, %c0_243] : memref<2x8x128xf32, #tpu.memory_space<vmem>>, vector<1x8x128xf32>
    %434 = vector.shape_cast %433 : vector<1x8x128xf32> to vector<8x128xf32>
    %435 = arith.mulf %424, %434 : vector<8x128xf32>
    %436 = arith.mulf %418, %426 : vector<8x128xf32>
    %437 = arith.addf %435, %436 : vector<8x128xf32>
    %438 = math.tanh %437 : vector<8x128xf32>
    %439 = arith.mulf %432, %438 : vector<8x128xf32>
    %c0_244 = arith.constant 0 : index
    %c0_245 = arith.constant 0 : index
    %c0_246 = arith.constant 0 : index
    %440 = vector.load %arg16[%c0_244, %c0_245, %c0_246] : memref<2x8x128xf32, #tpu.memory_space<vmem>>, vector<1x8x128xf32>
    %441 = vector.shape_cast %440 : vector<1x8x128xf32> to vector<8x128xf32>
    %442 = vector.shape_cast %437 : vector<8x128xf32> to vector<1x8x128xf32>
    tpu.vector_store %arg16[%c0_244, %c0_245, %c0_246], %442 {strides = array<i32>} : memref<2x8x128xf32, #tpu.memory_space<vmem>>, vector<1x8x128xf32>,
    %c0_247 = arith.constant 0 : index
    %c0_248 = arith.constant 0 : index
    %c0_249 = arith.constant 0 : index
    %443 = vector.load %arg15[%c0_247, %c0_248, %c0_249] : memref<2x8x128xf32, #tpu.memory_space<vmem>>, vector<1x8x128xf32>
    %444 = vector.shape_cast %443 : vector<1x8x128xf32> to vector<8x128xf32>
    %445 = vector.shape_cast %439 : vector<8x128xf32> to vector<1x8x128xf32>
    tpu.vector_store %arg15[%c0_247, %c0_248, %c0_249], %445 {strides = array<i32>} : memref<2x8x128xf32, #tpu.memory_space<vmem>>, vector<1x8x128xf32>,
    %446 = arith.truncf %439 : vector<8x128xf32> to vector<8x128xbf16>
    %c1_250 = arith.constant 1 : index
    %c0_251 = arith.constant 0 : index
    %c0_252 = arith.constant 0 : index
    %447 = vector.load %arg18[%c1_250, %c0_251, %c0_252] : memref<2x128x512xbf16, #tpu.memory_space<vmem>>, vector<1x128x512xbf16>
    %448 = vector.shape_cast %447 : vector<1x128x512xbf16> to vector<128x512xbf16>
    %cst_253 = arith.constant dense<0.000000e+00> : vector<8x512xf32>
    %449 = tpu.matmul %446, %448, %cst_253 {dimension_numbers = #tpu.dot_dimension_numbers<[1], [0], [0], [1], [0, 0, 1, 1], [], []>} : vector<8x128xbf16>, vector<128x512xbf16>, vector<8x512xf32> -> vector<8x512xf32>
    %c1_254 = arith.constant 1 : index
    %c0_255 = arith.constant 0 : index
    %c0_256 = arith.constant 0 : index
    %450 = vector.load %arg15[%c1_254, %c0_255, %c0_256] : memref<2x8x128xf32, #tpu.memory_space<vmem>>, vector<1x8x128xf32>
    %451 = vector.shape_cast %450 : vector<1x8x128xf32> to vector<8x128xf32>
    %452 = arith.truncf %451 : vector<8x128xf32> to vector<8x128xbf16>
    %c1_257 = arith.constant 1 : index
    %c0_258 = arith.constant 0 : index
    %c0_259 = arith.constant 0 : index
    %453 = vector.load %arg19[%c1_257, %c0_258, %c0_259] : memref<2x128x512xbf16, #tpu.memory_space<vmem>>, vector<1x128x512xbf16>
    %454 = vector.shape_cast %453 : vector<1x128x512xbf16> to vector<128x512xbf16>
    %cst_260 = arith.constant dense<0.000000e+00> : vector<8x512xf32>
    %455 = tpu.matmul %452, %454, %cst_260 {dimension_numbers = #tpu.dot_dimension_numbers<[1], [0], [0], [1], [0, 0, 1, 1], [], []>} : vector<8x128xbf16>, vector<128x512xbf16>, vector<8x512xf32> -> vector<8x512xf32>
    %456 = arith.addf %449, %455 : vector<8x512xf32>
    %c1_261 = arith.constant 1 : index
    %c0_262 = arith.constant 0 : index
    %c0_263 = arith.constant 0 : index
    %457 = vector.load %arg20[%c1_261, %c0_262, %c0_263] : memref<2x1x512xf32, #tpu.memory_space<vmem>>, vector<1x1x512xf32>
    %458 = vector.shape_cast %457 : vector<1x1x512xf32> to vector<1x512xf32>
    %459 = vector.broadcast %458 : vector<1x512xf32> to vector<8x512xf32>
    %460 = arith.addf %456, %459 : vector<8x512xf32>
    %461 = vector.extract_strided_slice %460 {offsets = [0, 0], sizes = [8, 128], strides = [1, 1]} : vector<8x512xf32> to vector<8x128xf32>
    %462 = arith.negf %461 : vector<8x128xf32>
    %463 = math.exp %462 : vector<8x128xf32>
    %cst_264 = arith.constant 1.000000e+00 : f32
    %464 = vector.broadcast %cst_264 : f32 to vector<8x128xf32>
    %465 = arith.addf %464, %463 : vector<8x128xf32>
    %466 = arith.divf %464, %465 : vector<8x128xf32>
    %467 = vector.extract_strided_slice %460 {offsets = [0, 128], sizes = [8, 128], strides = [1, 1]} : vector<8x512xf32> to vector<8x128xf32>
    %468 = arith.negf %467 : vector<8x128xf32>
    %469 = math.exp %468 : vector<8x128xf32>
    %cst_265 = arith.constant 1.000000e+00 : f32
    %470 = vector.broadcast %cst_265 : f32 to vector<8x128xf32>
    %471 = arith.addf %470, %469 : vector<8x128xf32>
    %472 = arith.divf %470, %471 : vector<8x128xf32>
    %473 = vector.extract_strided_slice %460 {offsets = [0, 256], sizes = [8, 128], strides = [1, 1]} : vector<8x512xf32> to vector<8x128xf32>
    %474 = math.tanh %473 : vector<8x128xf32>
    %475 = vector.extract_strided_slice %460 {offsets = [0, 384], sizes = [8, 128], strides = [1, 1]} : vector<8x512xf32> to vector<8x128xf32>
    %476 = arith.negf %475 : vector<8x128xf32>
    %477 = math.exp %476 : vector<8x128xf32>
    %cst_266 = arith.constant 1.000000e+00 : f32
    %478 = vector.broadcast %cst_266 : f32 to vector<8x128xf32>
    %479 = arith.addf %478, %477 : vector<8x128xf32>
    %480 = arith.divf %478, %479 : vector<8x128xf32>
    %c1_267 = arith.constant 1 : index
    %c0_268 = arith.constant 0 : index
    %c0_269 = arith.constant 0 : index
    %481 = vector.load %arg16[%c1_267, %c0_268, %c0_269] : memref<2x8x128xf32, #tpu.memory_space<vmem>>, vector<1x8x128xf32>
    %482 = vector.shape_cast %481 : vector<1x8x128xf32> to vector<8x128xf32>
    %483 = arith.mulf %472, %482 : vector<8x128xf32>
    %484 = arith.mulf %466, %474 : vector<8x128xf32>
    %485 = arith.addf %483, %484 : vector<8x128xf32>
    %486 = math.tanh %485 : vector<8x128xf32>
    %487 = arith.mulf %480, %486 : vector<8x128xf32>
    %c1_270 = arith.constant 1 : index
    %c0_271 = arith.constant 0 : index
    %c0_272 = arith.constant 0 : index
    %488 = vector.load %arg16[%c1_270, %c0_271, %c0_272] : memref<2x8x128xf32, #tpu.memory_space<vmem>>, vector<1x8x128xf32>
    %489 = vector.shape_cast %488 : vector<1x8x128xf32> to vector<8x128xf32>
    %490 = vector.shape_cast %485 : vector<8x128xf32> to vector<1x8x128xf32>
    tpu.vector_store %arg16[%c1_270, %c0_271, %c0_272], %490 {strides = array<i32>} : memref<2x8x128xf32, #tpu.memory_space<vmem>>, vector<1x8x128xf32>,
    %c1_273 = arith.constant 1 : index
    %c0_274 = arith.constant 0 : index
    %c0_275 = arith.constant 0 : index
    %491 = vector.load %arg15[%c1_273, %c0_274, %c0_275] : memref<2x8x128xf32, #tpu.memory_space<vmem>>, vector<1x8x128xf32>
    %492 = vector.shape_cast %491 : vector<1x8x128xf32> to vector<8x128xf32>
    %493 = vector.shape_cast %487 : vector<8x128xf32> to vector<1x8x128xf32>
    tpu.vector_store %arg15[%c1_273, %c0_274, %c0_275], %493 {strides = array<i32>} : memref<2x8x128xf32, #tpu.memory_space<vmem>>, vector<1x8x128xf32>,
    %494 = arith.truncf %487 : vector<8x128xf32> to vector<8x128xbf16>
    %c0_276 = arith.constant 0 : index
    %c0_277 = arith.constant 0 : index
    %495 = vector.load %arg21[%c0_276, %c0_277] : memref<128x128xbf16, #tpu.memory_space<vmem>>, vector<128x128xbf16>
    %cst_278 = arith.constant dense<0.000000e+00> : vector<8x128xf32>
    %496 = tpu.matmul %494, %495, %cst_278 {dimension_numbers = #tpu.dot_dimension_numbers<[1], [0], [0], [1], [0, 0, 1, 1], [], []>} : vector<8x128xbf16>, vector<128x128xbf16>, vector<8x128xf32> -> vector<8x128xf32>
    %497 = vector.shape_cast %496 : vector<8x128xf32> to vector<8x1x128xf32>
    %498 = arith.truncf %497 : vector<8x1x128xf32> to vector<8x1x128xbf16>
    "tpu.trace_start"() <{level = 10 : i32, message = "bqh,bsh->bqs"}> : () -> ()
    %cst_279 = arith.constant dense<0.000000e+00> : vector<8x1x128xf32>
    %499 = tpu.matmul %498, %3, %cst_279 {dimension_numbers = #tpu.dot_dimension_numbers<[2], [2], [1], [1], [0, 0, 0, 1, 1, 1], [0], [0]>} : vector<8x1x128xbf16>, vector<8x128x128xbf16>, vector<8x1x128xf32> -> vector<8x1x128xf32>
    "tpu.trace_stop"() : () -> ()
    %500 = vector.shape_cast %499 : vector<8x1x128xf32> to vector<8x128xf32>
    %cst_280 = arith.constant dense<0xFF800000> : vector<8xf32>
    %501 = vector.multi_reduction <maximumf>, %500, %cst_280 [1] : vector<8x128xf32> to vector<8xf32>
    %502 = vector.shape_cast %501 : vector<8xf32> to vector<8x1xf32>
    %503 = vector.broadcast %502 : vector<8x1xf32> to vector<8x128xf32>
    %504 = arith.subf %500, %503 : vector<8x128xf32>
    %505 = math.exp %504 : vector<8x128xf32>
    %cst_281 = arith.constant dense<0.000000e+00> : vector<8xf32>
    %506 = vector.multi_reduction <add>, %505, %cst_281 [1] : vector<8x128xf32> to vector<8xf32>
    %507 = vector.shape_cast %506 : vector<8xf32> to vector<8x1xf32>
    %508 = tpu.reciprocal %507 {approx = true} : vector<8x1xf32> -> vector<8x1xf32>
    %509 = vector.broadcast %508 : vector<8x1xf32> to vector<8x128xf32>
    %510 = arith.mulf %505, %509 : vector<8x128xf32>
    %511 = vector.shape_cast %510 : vector<8x128xf32> to vector<8x1x128xf32>
    %512 = arith.truncf %511 : vector<8x1x128xf32> to vector<8x1x128xbf16>
    "tpu.trace_start"() <{level = 10 : i32, message = "bqs,bsh->bqh"}> : () -> ()
    %cst_282 = arith.constant dense<0.000000e+00> : vector<8x1x128xf32>
    %513 = tpu.matmul %512, %3, %cst_282 {dimension_numbers = #tpu.dot_dimension_numbers<[2], [1], [1], [2], [0, 0, 0, 1, 1, 2], [0], [0]>} : vector<8x1x128xbf16>, vector<8x128x128xbf16>, vector<8x1x128xf32> -> vector<8x1x128xf32>
    "tpu.trace_stop"() : () -> ()
    %514 = vector.shape_cast %513 : vector<8x1x128xf32> to vector<8x128xf32>
    %515 = arith.truncf %514 : vector<8x128xf32> to vector<8x128xbf16>
    %c0_283 = arith.constant 0 : index
    %c0_284 = arith.constant 0 : index
    %516 = vector.load %arg22[%c0_283, %c0_284] : memref<128x128xbf16, #tpu.memory_space<vmem>>, vector<128x128xbf16>
    %cst_285 = arith.constant dense<0.000000e+00> : vector<8x128xf32>
    %517 = tpu.matmul %515, %516, %cst_285 {dimension_numbers = #tpu.dot_dimension_numbers<[1], [0], [0], [1], [0, 0, 1, 1], [], []>} : vector<8x128xbf16>, vector<128x128xbf16>, vector<8x128xf32> -> vector<8x128xf32>
    %c0_286 = arith.constant 0 : index
    %c0_287 = arith.constant 0 : index
    %518 = vector.load %arg23[%c0_286, %c0_287] : memref<128x128xbf16, #tpu.memory_space<vmem>>, vector<128x128xbf16>
    %cst_288 = arith.constant dense<0.000000e+00> : vector<8x128xf32>
    %519 = tpu.matmul %494, %518, %cst_288 {dimension_numbers = #tpu.dot_dimension_numbers<[1], [0], [0], [1], [0, 0, 1, 1], [], []>} : vector<8x128xbf16>, vector<128x128xbf16>, vector<8x128xf32> -> vector<8x128xf32>
    %520 = arith.addf %517, %519 : vector<8x128xf32>
    %521 = math.tanh %520 : vector<8x128xf32>
    %c3_289 = arith.constant 3 : index
    %c0_290 = arith.constant 0 : index
    %c0_291 = arith.constant 0 : index
    %522 = vector.load %arg11[%c3_289, %c0_290, %c0_291] : memref<4x8x128xf32, #tpu.memory_space<vmem>>, vector<1x8x128xf32>
    %523 = vector.shape_cast %522 : vector<1x8x128xf32> to vector<8x128xf32>
    %524 = vector.shape_cast %521 : vector<8x128xf32> to vector<1x8x128xf32>
    tpu.vector_store %arg11[%c3_289, %c0_290, %c0_291], %524 {strides = array<i32>} : memref<4x8x128xf32, #tpu.memory_space<vmem>>, vector<1x8x128xf32>,
    %c3_292 = arith.constant 3 : index
    %c0_293 = arith.constant 0 : index
    %c0_294 = arith.constant 0 : index
    %525 = vector.load %arg12[%c3_292, %c0_293, %c0_294] : memref<4x8x128xf32, #tpu.memory_space<vmem>>, vector<1x8x128xf32>
    %526 = vector.shape_cast %525 : vector<1x8x128xf32> to vector<8x128xf32>
    %527 = vector.shape_cast %510 : vector<8x128xf32> to vector<1x8x128xf32>
    tpu.vector_store %arg12[%c3_292, %c0_293, %c0_294], %527 {strides = array<i32>} : memref<4x8x128xf32, #tpu.memory_space<vmem>>, vector<1x8x128xf32>,
    %c1_i32 = arith.constant 1 : i32
    %528 = arith.cmpi eq, %arg0, %c1_i32 : i32
    %529 = arith.extui %528 : i1 to i32
    %c0_i32_295 = arith.constant 0 : i32
    %530 = arith.cmpi ne, %529, %c0_i32_295 : i32
    scf.if %530 {
      %c0_296 = arith.constant 0 : index
      %c0_297 = arith.constant 0 : index
      %c0_298 = arith.constant 0 : index
      %531 = vector.load %arg15[%c0_296, %c0_297, %c0_298] : memref<2x8x128xf32, #tpu.memory_space<vmem>>, vector<2x8x128xf32>
      %c0_299 = arith.constant 0 : index
      %c0_300 = arith.constant 0 : index
      %c0_301 = arith.constant 0 : index
      %532 = vector.load %arg13[%c0_299, %c0_300, %c0_301] : memref<2x8x128xf32, #tpu.memory_space<vmem>>, vector<2x8x128xf32>
      tpu.vector_store %arg13[%c0_299, %c0_300, %c0_301], %531 {strides = array<i32>} : memref<2x8x128xf32, #tpu.memory_space<vmem>>, vector<2x8x128xf32>,
      %c0_302 = arith.constant 0 : index
      %c0_303 = arith.constant 0 : index
      %c0_304 = arith.constant 0 : index
      %533 = vector.load %arg16[%c0_302, %c0_303, %c0_304] : memref<2x8x128xf32, #tpu.memory_space<vmem>>, vector<2x8x128xf32>
      %c0_305 = arith.constant 0 : index
      %c0_306 = arith.constant 0 : index
      %c0_307 = arith.constant 0 : index
      %534 = vector.load %arg14[%c0_305, %c0_306, %c0_307] : memref<2x8x128xf32, #tpu.memory_space<vmem>>, vector<2x8x128xf32>
      tpu.vector_store %arg14[%c0_305, %c0_306, %c0_307], %533 {strides = array<i32>} : memref<2x8x128xf32, #tpu.memory_space<vmem>>, vector<2x8x128xf32>,
    } else {
    }
    return
  }
  func.func @transform_0(%arg0: i32) -> (i32, i32, i32) {
    %c0_i32 = arith.constant 0 : i32
    %c0_i32_0 = arith.constant 0 : i32
    %c0_i32_1 = arith.constant 0 : i32
    return %arg0, %c0_i32, %c0_i32_0 : i32, i32, i32
  }
  func.func @transform_10(%arg0: i32) -> (i32, i32, i32) {
    %c0_i32 = arith.constant 0 : i32
    %c0_i32_0 = arith.constant 0 : i32
    %c0_i32_1 = arith.constant 0 : i32
    return %arg0, %c0_i32, %c0_i32_0 : i32, i32, i32
  }
  func.func @transform_11(%arg0: i32) -> (i32, i32, i32) {
    %c0_i32 = arith.constant 0 : i32
    %c0_i32_0 = arith.constant 0 : i32
    %c0_i32_1 = arith.constant 0 : i32
    return %arg0, %c0_i32, %c0_i32_0 : i32, i32, i32
  }
  func.func @transform_12(%arg0: i32) -> (i32, i32, i32) {
    %c0_i32 = arith.constant 0 : i32
    %c0_i32_0 = arith.constant 0 : i32
    %c0_i32_1 = arith.constant 0 : i32
    %c0_i32_2 = arith.constant 0 : i32
    return %c0_i32, %c0_i32_0, %c0_i32_1 : i32, i32, i32
  }
  func.func @transform_13(%arg0: i32) -> (i32, i32, i32) {
    %c0_i32 = arith.constant 0 : i32
    %c0_i32_0 = arith.constant 0 : i32
    %c0_i32_1 = arith.constant 0 : i32
    %c0_i32_2 = arith.constant 0 : i32
    return %c0_i32, %c0_i32_0, %c0_i32_1 : i32, i32, i32
  }
}

</mosaic_0001>

<bundles_post_ra>
// kernel: tpu_custom_call.1
= control target key start
LH: loop header
LB: loop body
LE: loop exit
PB: predicated region body
PF: predicated region fallthrough
CT: control target
= control target key end

     0   :  { %s18143_s0 = inlined_call_operand.hbm [shape: bf16[8,8,128], index: 0, kind: input, shape index: {}]   ;;  %s18144_s1 = inlined_call_operand.hbm [shape: bf16[8,128,128], index: 1, kind: input, shape index: {}]   ;;  %s18145_s2 = inlined_call_operand.hbm [shape: f32[2,8,128], index: 2, kind: input, shape index: {}]   ;;  %s18146_s3 = inlined_call_operand.hbm [shape: f32[2,8,128], index: 3, kind: input, shape index: {}]   ;;  %s18147_s4 = inlined_call_operand.hbm [shape: bf16[2,128,512], index: 4, kind: input, shape index: {}]   ;;  %s18148_s5 = inlined_call_operand.hbm [shape: bf16[2,128,512], index: 5, kind: input, shape index: {}]   ;;  %s18149_s6 = inlined_call_operand.vmem [shape: f32[2,1,512], index: 6, kind: input, shape index: {}]   ;;  %s18150_s7 = inlined_call_operand.hbm [shape: bf16[128,128], index: 7, kind: input, shape index: {}]   ;;  %s18151_s8 = inlined_call_operand.hbm [shape: bf16[128,128], index: 8, kind: input, shape index: {}]   ;;  %s18152_s9 = inlined_call_operand.hbm [shape: bf16[128,128], index: 9, kind: input, shape index: {}]   ;;  %s18153_s10 = inlined_call_operand.hbm [shape: f32[8,8,128], index: 10, kind: output, shape index: {0}]   ;;  %s18154_s11 = inlined_call_operand.hbm [shape: f32[8,8,128], index: 11, kind: output, shape index: {1}]   ;;  %s18155_s12 = inlined_call_operand.hbm [shape: f32[2,8,128], index: 12, kind: output, shape index: {2}]   ;;  %s18156_s13 = inlined_call_operand.hbm [shape: f32[2,8,128], index: 13, kind: output, shape index: {3}]  }
   0x1   :  { %18259 = sst [smem:[#allocation89_spill]] %s18143_s0 }
   0x2   :  { %18260 = sst [smem:[#allocation90_spill]] %s18144_s1 }
   0x3   :  { %18261 = sst [smem:[#allocation91_spill]] %s18156_s13 }
   0x4   :  { %19 = vsyncpa [#allocation12], 0 }
   0x5   :  { %21 = vsyncpa [#allocation12 + $0x1], 0 }
   0x6   :  { %22 = vsyncpa [#allocation13], 0 }
   0x7   :  { %24 = vsyncpa [#allocation13 + $0x1], 0 }
   0x8   :  { %25 = vsyncpa [#allocation16], 0 }
   0x9   :  { %27 = vsyncpa [#allocation16 + $0x1], 0 }
   0xa   :  { %28 = vsyncpa [#allocation19], 0  ;;  %s15607_s25 = smov 0   ;;  %s15609_s26 = smov 0  }
   0xb   :  { %s15611_s27 = smov 0   ;;  %s15613_s28 = smov 0  }
   0xc LB: > { %18262 = sst [smem:[#allocation62_spill]] %s15502_s25  ;;  %s15628_s29 = sadd.s32 4294967295, %s15514_s28   ;;  %s15514_s28 = sphi %s15613_s28, %s18448_s28   ;;  %s15510_s27 = sphi %s15611_s27, %s18450_s27   ;;  %s15506_s26 = sphi %s15609_s26, %s18452_s26   ;;  %s15502_s25 = sphi %s15607_s25, %s18451_s25  }
   0xd   : > { %18263 = sst [smem:[#allocation63_spill]] %s15510_s27  ;;  %s18157_s30 = sadd.s32 4294967294, %s15514_s28  }
   0xe   : > { %s15632_s14 = sadd.s32 1, %s15514_s28   ;;  %s41_s15 = sadd.s32 1, %s15510_s27 }
   0xf   : > { %18264 = sst [smem:[#allocation64_spill]] %s15632_s14  ;;  %s38_s16 = ssub.s32 %s15514_s28, %s15632_s14 }
  0x10   : > { %p48_p0 = scmp.ne.s32.totalorder %s15510_s27, %s15506_s26  ;;  %p39_p1 = scmp.eq.s32.totalorder %s38_s16, 0 }
  0x11   : > { %p49_p2 = scmp.eq.s32.totalorder %s15514_s28, 0  ;;  %p54_p3 = scmp.ne.s32.totalorder %s15506_s26, %s15502_s25 }
  0x12   : > { %p55_p4 = scmp.eq.s32.totalorder %s15628_s29, 0  ;;  %p18163_p7 = scmp.eq.s32.totalorder %s15628_s29, 1 }
  0x13   : > { %s15644_s17 = scalar_select %p39_p1, %s15510_s27, %s41_s15  }
  0x14   : > { %p15646_p5 = por %p49_p2, %p48_p0  ;;  %p15650_p6 = por %p55_p4, %p54_p3 }
  0x15   : > { %18265 = sst [smem:[#allocation65_spill]] %s15644_s17  ;;  %p84_p8 = scmp.eq.s32.totalorder %s18157_s30, 1 }
  0x16   : > { %s18267_s19 = scalar_select %p15650_p6, 1, 0 }
  0x17   : > { %p13774_p10 = scmp.lt.s32.totalorder %s15514_s28, 2  ;;  %p15661_p11 = por %p18163_p7, %p48_p0 }
  0x18   : > { %p15665_p12 = por %p84_p8, %p54_p3  ;;  %s172_s22 = sand.u32 1, %s15510_s27  }
  0x19   : > { %s18268_s20 = scalar_select %p15661_p11, 1, 0 }
  0x1a   : > { %s18269_s21 = scalar_select %p15665_p12, 1, 0 }
  0x1b   : > { %s11542_s23 = sshll.u32 %s15514_s28, 8  ;;  %s10816_s24 = sshll.u32 %s172_s22, 4 }
  0x1c   : > { %18270 = sst [smem:[#allocation66_spill]] %s18269_s21  ;;  %s176_s30 = scalar_lea.vmem [#allocation11], %s10816_s24 }
  0x1d   : > { %s18271_s0 = sld [smem:[#allocation89_spill]]  ;;  %s183_s14 = sshll.u32 %s176_s30, 4  ;;  %s15682_s14 = int_to_ptr.vmem [resolvable:$true] %s183_s14 }
  0x1e   : > { %p15678_p13 = pnand %p13774_p10, %p15646_p5  ;;  %s15684_s27 = scalar_lea.sflag [#allocation12], %s172_s22 }
  0x20   : > { %p15160_p1 = pneg %p15678_p13 }
  0x23   : > { %s15674_s17 = scalar_lea.hbm %s18271_s0, %s11542_s23  ;;  %s15163_s30 = scalar_lea.hbm %s18271_s0, 512 }
  0x24   : > { %s15158_s21 = scalar_lea.hbm %s15674_s17, 256  ;;  %p15164_p4 = scmp.lt.s32.totalorder %s15674_s17, %s18271_s0 }
  0x25   : > { %p15159_p0 = scmp.ne.s32.totalorder %s15674_s17, %s15158_s21  ;;  %p15165_p5 = scmp.lt.s32.totalorder %s15163_s30, %s15158_s21 }
  0x27   : > { %p15161_p2 = pnand %p15160_p1, %p15159_p0  ;;  %p15166_p8 = por %p15165_p5, %p15164_p4 }
  0x29   : > { %p15162_p3 = pneg %p15161_p2 }
  0x2b   : > { %p15167_p10 = pnand %p15166_p8, %p15162_p3 }
  0x2d   : > { %15170 = shalt.err (!%p15167_p10)
}
  0x2e   : > { %s15171_s22 = scalar_lea.vmem %s15682_s14, 256  ;;  %s15516_s16 = smov [#allocation11]  }
  0x2f   : > { %p15172_p9 = scmp.ne.s32.totalorder %s15682_s14, %s15171_s22  ;;  %s15176_s13 = sshll.u32 %s15516_s16, 4  ;;  %s15177_s13 = int_to_ptr.vmem [resolvable:$false] %s15176_s13 }
  0x30   : > { %s15178_s23 = scalar_lea.vmem %s15177_s13, 512  ;;  %p15179_p2 = scmp.lt.s32.totalorder %s15682_s14, %s15177_s13 }
  0x31   : > { %p15174_p7 = pnand %p15172_p9, %p15160_p1  ;;  %p15180_p12 = scmp.lt.s32.totalorder %s15178_s23, %s15171_s22 }
  0x33   : > { %p15175_p0 = pneg %p15174_p7  ;;  %p15181_p11 = por %p15180_p12, %p15179_p2 }
  0x35   : > { %p15182_p6 = pnand %p15181_p11, %p15175_p0 }
  0x37   : > { %15185 = shalt.err (!%p15182_p6)
}
  0x38   : > { %s15517_s21 = smov 64   ;;  %s15518_s15 = smov 4  }
  0x39   : > { %13766 = dma.hbm_to_vmem [thread:$0]  (!%p15678_p13), %s15674_s17, 256, %s15682_s14, %s15684_s27, %s15517_s21, %s15517_s21, %s15518_s15  }
  0x3a   : > { %p10819_p7 = scmp.ge.s32.totalorder %s15514_s28, 1  ;;  %p191_p9 = scmp.lt.s32.totalorder %s15514_s28, 3 }
  0x3c   : > { %p192_p1 = pnand %p10819_p7, %p191_p9 }
  0x3e   : > { %195 = sbr.rel (%p192_p1) target bundleno = 7567 (0x1d8f), region = 24 }
  0x43   : > { %s15708_s13 = sand.u32 1, %s15506_s26   ;;  %p18273_p6 = scmp.ne.s32.totalorder %s18267_s19, 0 }
  0x44   : > { %s10820_s30 = sshll.u32 %s15708_s13, 4  ;;  %s198_s18 = scalar_lea.sflag [#allocation12], %s15708_s13 }
  0x45   : > { %s15712_s24 = scalar_lea.vmem [#allocation11], %s10820_s30 }
  0x46   : > { %15463 = dma.done.wait (%p18273_p6), %s198_s18, 256  }
  0x47   : > { %15465 = vsyncadd (%p18273_p6), %s198_s18, 4294967040  ;;  %s10821_s25 = sshll.u32 %s15708_s13, 5  ;;  %p10823_p11 = scmp.ne.s32.totalorder %s15628_s29, 0 }
  0x48   : > { %s15719_s27 = scalar_lea.vmem [#allocation14], %s10821_s25  ;;  %s15721_s14 = scalar_lea.vmem [#allocation15], %s10821_s25 }
  0x49   : > { %238 = sbr.rel (%p10823_p11) target bundleno = 193 (0xc1), region = 32 }
  0x4e   : > { %s15519_s17 = smov [#allocation4]  }
  0x4f   : > { %s246_s22 = sshll.u32 %s15519_s17, 4  ;;  %s247_s22 = int_to_ptr.vmem [resolvable:$true] %s246_s22 }
  0x50   : > { %s15194_s16 = scalar_lea.vmem %s247_s22, 8192  ;;  %p15199_p13 = scmp.lt.s32.totalorder %s247_s22, %s247_s22 }
  0x51   : > { %p15195_p12 = scmp.ne.s32.totalorder %s247_s22, %s15194_s16  ;;  %p15200_p3 = scmp.lt.s32.totalorder %s15194_s16, %s15194_s16 }
  0x53   : > { %p15201_p4 = por %p15200_p3, %p15199_p13 }
  0x55   : > { %p15202_p5 = pnand %p15201_p4, %p15195_p12 }
  0x57   : > { %15205 = shalt.err (!%p15202_p5)  }
  0x58   : > { %s18274_s1 = sld [smem:[#allocation90_spill]] }
  0x5e   : > { %249 = dma.hbm_to_vmem [thread:$0]  %s18274_s1, 8192, %s247_s22, [#allocation20] }
  0x5f   : > { %15466 = dma.done.wait [#allocation20], 8192 }
  0x60   : > { %15467 = vsyncadd [#allocation20], 4294959104 }
  0x61   : > { %s15520_s21 = smov [#allocation5]  }
  0x62   : > { %s262_s15 = sshll.u32 %s15520_s21, 4  ;;  %s263_s15 = int_to_ptr.vmem [resolvable:$true] %s262_s15 }
  0x63   : > { %s15214_s30 = scalar_lea.vmem %s263_s15, 8192  ;;  %p15219_p10 = scmp.lt.s32.totalorder %s263_s15, %s263_s15 }
  0x64   : > { %p15215_p8 = scmp.ne.s32.totalorder %s263_s15, %s15214_s30  ;;  %p15220_p0 = scmp.lt.s32.totalorder %s15214_s30, %s15214_s30 }
  0x66   : > { %p15221_p2 = por %p15220_p0, %p15219_p10 }
  0x68   : > { %p15222_p7 = pnand %p15221_p2, %p15215_p8 }
  0x6a   : > { %15225 = shalt.err (!%p15222_p7)  }
  0x6b   : > { %265 = dma.hbm_to_vmem [thread:$0]  %s18147_s4, 8192, %s263_s15, [#allocation25] }
  0x6c   : > { %15468 = dma.done.wait [#allocation25], 8192 }
  0x6d   : > { %15469 = vsyncadd [#allocation25], 4294959104 }
  0x6e   : > { %s15521_s17 = smov [#allocation6]  }
  0x6f   : > { %s278_s22 = sshll.u32 %s15521_s17, 4  ;;  %s279_s22 = int_to_ptr.vmem [resolvable:$true] %s278_s22 }
  0x70   : > { %s15234_s16 = scalar_lea.vmem %s279_s22, 8192  ;;  %p15239_p1 = scmp.lt.s32.totalorder %s279_s22, %s279_s22 }
  0x71   : > { %p15235_p9 = scmp.ne.s32.totalorder %s279_s22, %s15234_s16  ;;  %p15240_p6 = scmp.lt.s32.totalorder %s15234_s16, %s15234_s16 }
  0x73   : > { %p15241_p11 = por %p15240_p6, %p15239_p1 }
  0x75   : > { %p15242_p12 = pnand %p15241_p11, %p15235_p9 }
  0x77   : > { %15245 = shalt.err (!%p15242_p12)  }
  0x78   : > { %281 = dma.hbm_to_vmem [thread:$0]  %s18148_s5, 8192, %s279_s22, [#allocation28] }
  0x79   : > { %15470 = dma.done.wait [#allocation28], 8192 }
  0x7a   : > { %15471 = vsyncadd [#allocation28], 4294959104 }
  0x7b   : > { %v320_v0 = vld [vmem:[%s18149_s6] sm:$0xff] }
  0x7c   : > { %321 = vst [vmem:[#allocation7] sm:$0xff] %v320_v0 }
  0x7d   : > { %329 = vsyncadd [#allocation31], 128 }
  0x7e   : > { %15472 = dma.done.wait [#allocation31], 128 }
  0x7f   : > { %15473 = vsyncadd [#allocation31], 4294967168 }
  0x80   : > { %s15522_s30 = smov [#allocation8]  }
  0x81   : > { %s341_s18 = sshll.u32 %s15522_s30, 4  ;;  %s342_s18 = int_to_ptr.vmem [resolvable:$true] %s341_s18 }
  0x82   : > { %s15254_s25 = scalar_lea.vmem %s342_s18, 1024  ;;  %p15259_p3 = scmp.lt.s32.totalorder %s342_s18, %s342_s18 }
  0x83   : > { %p15255_p13 = scmp.ne.s32.totalorder %s342_s18, %s15254_s25  ;;  %p15260_p4 = scmp.lt.s32.totalorder %s15254_s25, %s15254_s25 }
  0x85   : > { %p15261_p5 = por %p15260_p4, %p15259_p3 }
  0x87   : > { %p15262_p8 = pnand %p15261_p5, %p15255_p13 }
  0x89   : > { %15265 = shalt.err (!%p15262_p8)  }
  0x8a   : > { %344 = dma.hbm_to_vmem [thread:$0]  %s18150_s7, 1024, %s342_s18, [#allocation33] }
  0x8b   : > { %15474 = dma.done.wait [#allocation33], 1024 }
  0x8c   : > { %15475 = vsyncadd [#allocation33], 4294966272 }
  0x8d   : > { %s15523_s16 = smov [#allocation9]  }
  0x8e   : > { %s356_s19 = sshll.u32 %s15523_s16, 4  ;;  %s357_s19 = int_to_ptr.vmem [resolvable:$true] %s356_s19 }
  0x8f   : > { %s15274_s23 = scalar_lea.vmem %s357_s19, 1024  ;;  %p15279_p0 = scmp.lt.s32.totalorder %s357_s19, %s357_s19 }
  0x90   : > { %p15275_p10 = scmp.ne.s32.totalorder %s357_s19, %s15274_s23  ;;  %p15280_p2 = scmp.lt.s32.totalorder %s15274_s23, %s15274_s23 }
  0x92   : > { %p15281_p7 = por %p15280_p2, %p15279_p0 }
  0x94   : > { %p15282_p9 = pnand %p15281_p7, %p15275_p10 }
  0x96   : > { %15285 = shalt.err (!%p15282_p9)  }
  0x97   : > { %359 = dma.hbm_to_vmem [thread:$0]  %s18151_s8, 1024, %s357_s19, [#allocation36] }
  0x98   : > { %15476 = dma.done.wait [#allocation36], 1024 }
  0x99   : > { %15477 = vsyncadd [#allocation36], 4294966272 }
  0x9a   : > { %s15524_s30 = smov [#allocation10]  }
  0x9b   : > { %s371_s18 = sshll.u32 %s15524_s30, 4  ;;  %s372_s18 = int_to_ptr.vmem [resolvable:$true] %s371_s18 }
  0x9c   : > { %s15294_s25 = scalar_lea.vmem %s372_s18, 1024  ;;  %p15299_p6 = scmp.lt.s32.totalorder %s372_s18, %s372_s18 }
  0x9d   : > { %p15295_p1 = scmp.ne.s32.totalorder %s372_s18, %s15294_s25  ;;  %p15300_p11 = scmp.lt.s32.totalorder %s15294_s25, %s15294_s25 }
  0x9f   : > { %p15301_p12 = por %p15300_p11, %p15299_p6 }
  0xa1   : > { %p15302_p13 = pnand %p15301_p12, %p15295_p1 }
  0xa3   : > { %15305 = shalt.err (!%p15302_p13)  }
  0xa4   : > { %374 = dma.hbm_to_vmem [thread:$0]  %s18152_s9, 1024, %s372_s18, [#allocation39] }
  0xa5   : > { %15478 = dma.done.wait [#allocation39], 1024 }
  0xa6   : > { %15479 = vsyncadd [#allocation39], 4294966272 }
  0xa7   : > { %s15525_s16 = smov [#allocation2]  }
  0xa8   : > { %s386_s19 = sshll.u32 %s15525_s16, 4  ;;  %s387_s19 = int_to_ptr.vmem [resolvable:$true] %s386_s19 }
  0xa9   : > { %s15314_s23 = scalar_lea.vmem %s387_s19, 256  ;;  %p15319_p4 = scmp.lt.s32.totalorder %s387_s19, %s387_s19 }
  0xaa   : > { %p15315_p3 = scmp.ne.s32.totalorder %s387_s19, %s15314_s23  ;;  %p15320_p5 = scmp.lt.s32.totalorder %s15314_s23, %s15314_s23 }
  0xac   : > { %p15321_p8 = por %p15320_p5, %p15319_p4 }
  0xae   : > { %p15322_p10 = pnand %p15321_p8, %p15315_p3 }
  0xb0   : > { %15325 = shalt.err (!%p15322_p10)  }
  0xb1   : > { %389 = dma.hbm_to_vmem [thread:$0]  %s18145_s2, 256, %s387_s19, [#allocation42] }
  0xb2   : > { %15480 = dma.done.wait [#allocation42], 256 }
  0xb3   : > { %15481 = vsyncadd [#allocation42], 4294967040 }
  0xb4   : > { %s15526_s30 = smov [#allocation3]  }
  0xb5   : > { %s401_s18 = sshll.u32 %s15526_s30, 4  ;;  %s402_s18 = int_to_ptr.vmem [resolvable:$true] %s401_s18 }
  0xb6   : > { %s15334_s25 = scalar_lea.vmem %s402_s18, 256  ;;  %p15339_p2 = scmp.lt.s32.totalorder %s402_s18, %s402_s18 }
  0xb7   : > { %p15335_p0 = scmp.ne.s32.totalorder %s402_s18, %s15334_s25  ;;  %p15340_p7 = scmp.lt.s32.totalorder %s15334_s25, %s15334_s25 }
  0xb9   : > { %p15341_p9 = por %p15340_p7, %p15339_p2 }
  0xbb   : > { %p15342_p1 = pnand %p15341_p9, %p15335_p0 }
  0xbd   : > { %15345 = shalt.err (!%p15342_p1)  }
  0xbe   : > { %404 = dma.hbm_to_vmem [thread:$0]  %s18146_s3, 256, %s402_s18, [#allocation45] }
  0xbf   : > { %15482 = dma.done.wait [#allocation45], 256 }
  0xc0   : > { %15483 = vsyncadd [#allocation45], 4294967040 }
  0xc1 PF: > { %v13830_v1 = vld [vmem:[#allocation6 + $0xe4] ss:$16 sps:$4 sm:$0xff]   ;;  %v13832_v2 = vld [vmem:[#allocation6 + $0xec] ss:$16 sps:$4 sm:$0xff]   ;;  %v18166_v3 = vmov 0   ;;  %vm15529_vm0 = vmmov 0  }
  0xc2   : > { %796 = vmatprep.mubr.bf16.mxu0 %v18166_v3  ;;  %837 = vmatprep.mubr.bf16.mxu1 %v18166_v3  ;;  %v13834_v4 = vld [vmem:[#allocation6 + $0xe0] ss:$16 sps:$4 sm:$0xff]   ;;  %v13835_v5 = vld [vmem:[#allocation6 + $0xe8] ss:$16 sps:$4 sm:$0xff]   ;;  %v13836_v6 = vld [vmem:[#allocation6 + $0xc4] ss:$16 sps:$4 sm:$0xff]  }
  0xc3   : > { %764 = vmatprep.subr.bf16.mxu0 %v13830_v1  ;;  %805 = vmatprep.subr.bf16.mxu1 %v13832_v2  ;;  %v13838_v7 = vld [vmem:[#allocation6 + $0xcc] ss:$16 sps:$4 sm:$0xff]   ;;  %v13840_v8 = vld [vmem:[#allocation6 + $0xc0] ss:$16 sps:$4 sm:$0xff]   ;;  %v13841_v9 = vld [vmem:[#allocation6 + $0xc8] ss:$16 sps:$4 sm:$0xff]  }
  0xc4   : > { %765 = vmatpush1.bf16.msra.mxu0 %v13834_v4  ;;  %806 = vmatpush1.bf16.msra.mxu1 %v13835_v5  ;;  %v13842_v10 = vld [vmem:[#allocation6 + $0xa4] ss:$16 sps:$4 sm:$0xff]   ;;  %v13844_v11 = vld [vmem:[#allocation6 + $0xac] ss:$16 sps:$4 sm:$0xff]   ;;  %v13846_v12 = vld [vmem:[#allocation6 + $0xa0] ss:$16 sps:$4 sm:$0xff]  }
  0xc5   : > { %766 = vmatprep.subr.bf16.mxu0 %v13836_v6  ;;  %807 = vmatprep.subr.bf16.mxu1 %v13838_v7  ;;  %v13847_v13 = vld [vmem:[#allocation6 + $0xa8] ss:$16 sps:$4 sm:$0xff]   ;;  %v13848_v14 = vld [vmem:[#allocation6 + $0x84] ss:$16 sps:$4 sm:$0xff]   ;;  %v13850_v15 = vld [vmem:[#allocation6 + $0x8c] ss:$16 sps:$4 sm:$0xff]  }
  0xc6   : > { %v13852_v16 = vld [vmem:[#allocation6 + $0x80] ss:$16 sps:$4 sm:$0xff]   ;;  %v13853_v17 = vld [vmem:[#allocation6 + $0x88] ss:$16 sps:$4 sm:$0xff]   ;;  %v13854_v18 = vld [vmem:[#allocation6 + $0x64] ss:$16 sps:$4 sm:$0xff]  }
  0xc7   : > { %v13856_v19 = vld [vmem:[#allocation6 + $0x6c] ss:$16 sps:$4 sm:$0xff]   ;;  %v13858_v20 = vld [vmem:[#allocation6 + $0x60] ss:$16 sps:$4 sm:$0xff]   ;;  %v13859_v21 = vld [vmem:[#allocation6 + $0x68] ss:$16 sps:$4 sm:$0xff]  }
  0xc8   : > { %767 = vmatpush1.bf16.msra.mxu0 %v13840_v8  ;;  %808 = vmatpush1.bf16.msra.mxu1 %v13841_v9  ;;  %v13860_v22 = vld [vmem:[#allocation6 + $0x44] ss:$16 sps:$4 sm:$0xff]   ;;  %v13862_v23 = vld [vmem:[#allocation6 + $0x4c] ss:$16 sps:$4 sm:$0xff]   ;;  %v13864_v24 = vld [vmem:[#allocation6 + $0x40] ss:$16 sps:$4 sm:$0xff]  }
  0xc9   : > { %768 = vmatprep.subr.bf16.mxu0 %v13842_v10  ;;  %809 = vmatprep.subr.bf16.mxu1 %v13844_v11  ;;  %v13865_v25 = vld [vmem:[#allocation6 + $0x48] ss:$16 sps:$4 sm:$0xff]   ;;  %v13866_v26 = vld [vmem:[#allocation6 + $0x24] ss:$16 sps:$4 sm:$0xff]   ;;  %v13868_v27 = vld [vmem:[#allocation6 + $0x2c] ss:$16 sps:$4 sm:$0xff]  }
  0xca   : > { %v13870_v28 = vld [vmem:[#allocation6 + $0x20] ss:$16 sps:$4 sm:$0xff]   ;;  %v13871_v29 = vld [vmem:[#allocation6 + $0x28] ss:$16 sps:$4 sm:$0xff]   ;;  %v13872_v30 = vld [vmem:[#allocation6 + $0x4] ss:$16 sps:$4 sm:$0xff]  }
  0xcb   : > { %v13874_v31 = vld [vmem:[#allocation6 + $0xc] ss:$16 sps:$4 sm:$0xff]   ;;  %v13876_v32 = vld [vmem:[#allocation6] ss:$16 sps:$4 sm:$0xff]   ;;  %v13877_v33 = vld [vmem:[#allocation6 + $0x8] ss:$16 sps:$4 sm:$0xff]  }
  0xcc   : > { %769 = vmatpush1.bf16.msra.mxu0 %v13846_v12  ;;  %810 = vmatpush1.bf16.msra.mxu1 %v13847_v13  ;;  %v570_v34 = vld [vmem:[#allocation2] sm:$0xff]  ;;  %v13883_v36 = vld [vmem:[#allocation5 + $0xec] ss:$16 sps:$4 sm:$0xff]   ;;  %v13881_v39 = vld [vmem:[#allocation5 + $0xe8] ss:$16 sps:$4 sm:$0xff]   ;;  %vm2634_vm1 = vcmask 1041409  }
  0xcd   : > { %770 = vmatprep.subr.bf16.mxu0 %v13848_v14  ;;  %811 = vmatprep.subr.bf16.mxu1 %v13850_v15  ;;  %v13880_v35 = vld [vmem:[#allocation5 + $0xe4] ss:$16 sps:$4 sm:$0xff]   ;;  %v571_v37 = vpack.c.bf16 %v570_v34, %v570_v34  ;;  %v13878_v38 = vld [vmem:[#allocation5 + $0xe0] ss:$16 sps:$4 sm:$0xff]   ;;  %v13889_v41 = vld [vmem:[#allocation5 + $0xcc] ss:$16 sps:$4 sm:$0xff]  }
  0xce   : > { %v13886_v40 = vld [vmem:[#allocation5 + $0xc4] ss:$16 sps:$4 sm:$0xff]   ;;  %v13884_v42 = vld [vmem:[#allocation5 + $0xc0] ss:$16 sps:$4 sm:$0xff]   ;;  %v13887_v43 = vld [vmem:[#allocation5 + $0xc8] ss:$16 sps:$4 sm:$0xff]  }
  0xcf   : > { %v13892_v44 = vld [vmem:[#allocation5 + $0xa4] ss:$16 sps:$4 sm:$0xff]   ;;  %v13895_v45 = vld [vmem:[#allocation5 + $0xac] ss:$16 sps:$4 sm:$0xff]   ;;  %v13890_v46 = vld [vmem:[#allocation5 + $0xa0] ss:$16 sps:$4 sm:$0xff]  }
  0xd0   : > { %771 = vmatpush1.bf16.msra.mxu0 %v13852_v16  ;;  %812 = vmatpush1.bf16.msra.mxu1 %v13853_v17  ;;  %v13893_v47 = vld [vmem:[#allocation5 + $0xa8] ss:$16 sps:$4 sm:$0xff]   ;;  %v13898_v48 = vld [vmem:[#allocation5 + $0x84] ss:$16 sps:$4 sm:$0xff]   ;;  %v13901_v49 = vld [vmem:[#allocation5 + $0x8c] ss:$16 sps:$4 sm:$0xff]  }
  0xd1   : > { %772 = vmatprep.subr.bf16.mxu0 %v13854_v18  ;;  %813 = vmatprep.subr.bf16.mxu1 %v13856_v19  ;;  %v13896_v50 = vld [vmem:[#allocation5 + $0x80] ss:$16 sps:$4 sm:$0xff]   ;;  %v13899_v51 = vld [vmem:[#allocation5 + $0x88] ss:$16 sps:$4 sm:$0xff]   ;;  %v13904_v52 = vld [vmem:[#allocation5 + $0x64] ss:$16 sps:$4 sm:$0xff]  }
  0xd2   : > { %v13907_v53 = vld [vmem:[#allocation5 + $0x6c] ss:$16 sps:$4 sm:$0xff]   ;;  %v13902_v54 = vld [vmem:[#allocation5 + $0x60] ss:$16 sps:$4 sm:$0xff]   ;;  %v13905_v55 = vld [vmem:[#allocation5 + $0x68] ss:$16 sps:$4 sm:$0xff]  }
  0xd3   : > { %v13910_v56 = vld [vmem:[#allocation5 + $0x44] ss:$16 sps:$4 sm:$0xff]   ;;  %v13913_v57 = vld [vmem:[#allocation5 + $0x4c] ss:$16 sps:$4 sm:$0xff]   ;;  %v13908_v58 = vld [vmem:[#allocation5 + $0x40] ss:$16 sps:$4 sm:$0xff]  }
  0xd4   : > { %773 = vmatpush1.bf16.msra.mxu0 %v13858_v20  ;;  %814 = vmatpush1.bf16.msra.mxu1 %v13859_v21  ;;  %v13911_v59 = vld [vmem:[#allocation5 + $0x48] ss:$16 sps:$4 sm:$0xff]   ;;  %v13916_v60 = vld [vmem:[#allocation5 + $0x24] ss:$16 sps:$4 sm:$0xff]   ;;  %v13919_v61 = vld [vmem:[#allocation5 + $0x2c] ss:$16 sps:$4 sm:$0xff]  }
  0xd5   : > { %774 = vmatprep.subr.bf16.mxu0 %v13860_v22  ;;  %815 = vmatprep.subr.bf16.mxu1 %v13862_v23  ;;  %v13914_v62 = vld [vmem:[#allocation5 + $0x20] ss:$16 sps:$4 sm:$0xff]   ;;  %v13917_v63 = vld [vmem:[#allocation5 + $0x28] ss:$16 sps:$4 sm:$0xff]   ;;  %v13922_v0 = vld [vmem:[#allocation5 + $0x4] ss:$16 sps:$4 sm:$0xff]  }
  0xd6   : > { %v13925_v1 = vld [vmem:[#allocation5 + $0xc] ss:$16 sps:$4 sm:$0xff]   ;;  %v13920_v2 = vld [vmem:[#allocation5] ss:$16 sps:$4 sm:$0xff]   ;;  %v13923_v4 = vld [vmem:[#allocation5 + $0x8] ss:$16 sps:$4 sm:$0xff]  }
  0xd7   : > { %v537_v5 = vld [vmem:[%s15712_s24] sm:$0xf]  ;;  %v13926_v6 = vld [vmem:[#allocation6 + $0x1e0] ss:$16 sps:$4 sm:$0xff]   ;;  %v13928_v7 = vld [vmem:[#allocation6 + $0x1e4] ss:$16 sps:$4 sm:$0xff]  }
  0xd8   : > { %775 = vmatpush1.bf16.msra.mxu0 %v13864_v24  ;;  %816 = vmatpush1.bf16.msra.mxu1 %v13865_v25  ;;  %v13929_v8 = vld [vmem:[#allocation6 + $0x1c0] ss:$16 sps:$4 sm:$0xff]   ;;  %v13931_v9 = vld [vmem:[#allocation6 + $0x1c4] ss:$16 sps:$4 sm:$0xff]   ;;  %v13932_v10 = vld [vmem:[#allocation6 + $0x1e8] ss:$16 sps:$4 sm:$0xff]  }
  0xd9   : > { %776 = vmatprep.subr.bf16.mxu0 %v13866_v26  ;;  %817 = vmatprep.subr.bf16.mxu1 %v13868_v27  ;;  %v13934_v11 = vld [vmem:[#allocation6 + $0x1ec] ss:$16 sps:$4 sm:$0xff]   ;;  %v13937_v12 = vld [vmem:[#allocation6 + $0x1a4] ss:$16 sps:$4 sm:$0xff]   ;;  %v13935_v13 = vld [vmem:[#allocation6 + $0x1a0] ss:$16 sps:$4 sm:$0xff]  }
  0xda   : > { %v13940_v14 = vld [vmem:[#allocation6 + $0x1cc] ss:$16 sps:$4 sm:$0xff]   ;;  %v13938_v15 = vld [vmem:[#allocation6 + $0x1c8] ss:$16 sps:$4 sm:$0xff]   ;;  %v13943_v16 = vld [vmem:[#allocation6 + $0x184] ss:$16 sps:$4 sm:$0xff]  }
  0xdb   : > { %v13941_v17 = vld [vmem:[#allocation6 + $0x180] ss:$16 sps:$4 sm:$0xff]   ;;  %v13946_v18 = vld [vmem:[#allocation6 + $0x1ac] ss:$16 sps:$4 sm:$0xff]   ;;  %v13944_v19 = vld [vmem:[#allocation6 + $0x1a8] ss:$16 sps:$4 sm:$0xff]  }
  0xdc   : > { %777 = vmatpush1.bf16.msra.mxu0 %v13870_v28  ;;  %818 = vmatpush1.bf16.msra.mxu1 %v13871_v29  ;;  %v13949_v20 = vld [vmem:[#allocation6 + $0x164] ss:$16 sps:$4 sm:$0xff]   ;;  %v13947_v21 = vld [vmem:[#allocation6 + $0x160] ss:$16 sps:$4 sm:$0xff]   ;;  %v13952_v22 = vld [vmem:[#allocation6 + $0x18c] ss:$16 sps:$4 sm:$0xff]  }
  0xdd   : > { %778 = vmatprep.subr.bf16.mxu0 %v13872_v30  ;;  %819 = vmatprep.subr.bf16.mxu1 %v13874_v31  ;;  %v13950_v23 = vld [vmem:[#allocation6 + $0x188] ss:$16 sps:$4 sm:$0xff]   ;;  %v13955_v24 = vld [vmem:[#allocation6 + $0x144] ss:$16 sps:$4 sm:$0xff]   ;;  %v13953_v25 = vld [vmem:[#allocation6 + $0x140] ss:$16 sps:$4 sm:$0xff]  }
  0xde   : > { %v13958_v26 = vld [vmem:[#allocation6 + $0x16c] ss:$16 sps:$4 sm:$0xff]   ;;  %v13956_v27 = vld [vmem:[#allocation6 + $0x168] ss:$16 sps:$4 sm:$0xff]   ;;  %v13961_v28 = vld [vmem:[#allocation6 + $0x124] ss:$16 sps:$4 sm:$0xff]  }
  0xdf   : > { %v13959_v29 = vld [vmem:[#allocation6 + $0x120] ss:$16 sps:$4 sm:$0xff]   ;;  %v13964_v30 = vld [vmem:[#allocation6 + $0x14c] ss:$16 sps:$4 sm:$0xff]   ;;  %v13962_v31 = vld [vmem:[#allocation6 + $0x148] ss:$16 sps:$4 sm:$0xff]  }
  0xe0   : > { %779 = vmatpush1.bf16.msra.mxu0 %v13876_v32  ;;  %820 = vmatpush1.bf16.msra.mxu1 %v13877_v33  ;;  %v13967_v32 = vld [vmem:[#allocation6 + $0x104] ss:$16 sps:$4 sm:$0xff]   ;;  %v13965_v33 = vld [vmem:[#allocation6 + $0x100] ss:$16 sps:$4 sm:$0xff]   ;;  %v13970_v34 = vld [vmem:[#allocation6 + $0x12c] ss:$16 sps:$4 sm:$0xff]  }
  0xe1   : > { %1006 = vmatprep.subr.bf16.mxu0 %v13880_v35  ;;  %1047 = vmatprep.subr.bf16.mxu1 %v13883_v36  ;;  %v13968_v35 = vld [vmem:[#allocation6 + $0x128] ss:$16 sps:$4 sm:$0xff]   ;;  %vm2637_vm2 = vcmask 1042434   ;;  %vm2640_vm3 = vcmask 1043459   ;;  %vm2643_vm4 = vcmask 1044484   ;;  %vm2646_vm5 = vcmask 1045509  }
  0xe2   : > { %v1176_v36 = vld [vmem:[#allocation2 + $0x8] sm:$0xff]  ;;  %vm2649_vm6 = vcmask 1046534   ;;  %vm2652_vm7 = vcmask 1047559   ;;  %p11529_p6 = scmp.ne.s32.totalorder %s15628_s29, 1 }
  0xe3   : > { %797 = vmatmul.mubr.bf16.vlgmr.msra.gmra.mxu0 %v571_v37  ;;  %838 = vmatmul.mubr.bf16.vlgmr.msra.gmra.mxu1 %v571_v37  ;;  %v1177_v37 = vpack.c.bf16 %v1176_v36, %v1176_v36 }
  0xe4   : > { %1007 = vmatpush1.bf16.msra.mxu0 %v13878_v38  ;;  %1048 = vmatpush1.bf16.msra.mxu1 %v13881_v39  ;;  %v13973_v38 = vld [vmem:[#allocation6 + $0x10c] ss:$16 sps:$4 sm:$0xff]   ;;  %v13971_v39 = vld [vmem:[#allocation6 + $0x108] ss:$16 sps:$4 sm:$0xff]  }
  0xe5   : > { %1008 = vmatprep.subr.bf16.mxu0 %v13886_v40  ;;  %1049 = vmatprep.subr.bf16.mxu1 %v13889_v41  ;;  %v13976_v40 = vld [vmem:[#allocation5 + $0x1e4] ss:$16 sps:$4 sm:$0xff]   ;;  %v13979_v41 = vld [vmem:[#allocation5 + $0x1ec] ss:$16 sps:$4 sm:$0xff]  }
  0xe6   : > { %1038 = vmatprep.mubr.bf16.mxu0 %v18166_v3  ;;  %1079 = vmatprep.mubr.bf16.mxu1 %v18166_v3 }
  0xe8   : > { %1009 = vmatpush1.bf16.msra.mxu0 %v13884_v42  ;;  %1050 = vmatpush1.bf16.msra.mxu1 %v13887_v43  ;;  %v13974_v42 = vld [vmem:[#allocation5 + $0x1e0] ss:$16 sps:$4 sm:$0xff]   ;;  %v13977_v43 = vld [vmem:[#allocation5 + $0x1e8] ss:$16 sps:$4 sm:$0xff]  }
  0xe9   : > { %1010 = vmatprep.subr.bf16.mxu0 %v13892_v44  ;;  %1051 = vmatprep.subr.bf16.mxu1 %v13895_v45  ;;  %v13982_v44 = vld [vmem:[#allocation5 + $0x1c4] ss:$16 sps:$4 sm:$0xff]   ;;  %v13985_v45 = vld [vmem:[#allocation5 + $0x1cc] ss:$16 sps:$4 sm:$0xff]  }
  0xec   : > { %1011 = vmatpush1.bf16.msra.mxu0 %v13890_v46  ;;  %1052 = vmatpush1.bf16.msra.mxu1 %v13893_v47  ;;  %v13980_v46 = vld [vmem:[#allocation5 + $0x1c0] ss:$16 sps:$4 sm:$0xff]   ;;  %v13983_v47 = vld [vmem:[#allocation5 + $0x1c8] ss:$16 sps:$4 sm:$0xff]  }
  0xed   : > { %1012 = vmatprep.subr.bf16.mxu0 %v13898_v48  ;;  %1053 = vmatprep.subr.bf16.mxu1 %v13901_v49  ;;  %v13988_v48 = vld [vmem:[#allocation5 + $0x1a4] ss:$16 sps:$4 sm:$0xff]   ;;  %v13991_v49 = vld [vmem:[#allocation5 + $0x1ac] ss:$16 sps:$4 sm:$0xff]  }
  0xf0   : > { %1013 = vmatpush1.bf16.msra.mxu0 %v13896_v50  ;;  %1054 = vmatpush1.bf16.msra.mxu1 %v13899_v51  ;;  %v13986_v50 = vld [vmem:[#allocation5 + $0x1a0] ss:$16 sps:$4 sm:$0xff]   ;;  %v13989_v51 = vld [vmem:[#allocation5 + $0x1a8] ss:$16 sps:$4 sm:$0xff]  }
  0xf1   : > { %1014 = vmatprep.subr.bf16.mxu0 %v13904_v52  ;;  %1055 = vmatprep.subr.bf16.mxu1 %v13907_v53  ;;  %v13994_v52 = vld [vmem:[#allocation5 + $0x184] ss:$16 sps:$4 sm:$0xff]   ;;  %v13997_v53 = vld [vmem:[#allocation5 + $0x18c] ss:$16 sps:$4 sm:$0xff]  }
  0xf4   : > { %1015 = vmatpush1.bf16.msra.mxu0 %v13902_v54  ;;  %1056 = vmatpush1.bf16.msra.mxu1 %v13905_v55  ;;  %v13992_v54 = vld [vmem:[#allocation5 + $0x180] ss:$16 sps:$4 sm:$0xff]   ;;  %v13995_v55 = vld [vmem:[#allocation5 + $0x188] ss:$16 sps:$4 sm:$0xff]  }
  0xf5   : > { %1016 = vmatprep.subr.bf16.mxu0 %v13910_v56  ;;  %1057 = vmatprep.subr.bf16.mxu1 %v13913_v57  ;;  %v13998_v56 = vld [vmem:[#allocation5 + $0x160] ss:$16 sps:$4 sm:$0xff]   ;;  %v14000_v57 = vld [vmem:[#allocation5 + $0x164] ss:$16 sps:$4 sm:$0xff]  }
  0xf8   : > { %1017 = vmatpush1.bf16.msra.mxu0 %v13908_v58  ;;  %1058 = vmatpush1.bf16.msra.mxu1 %v13911_v59  ;;  %v14001_v58 = vld [vmem:[#allocation5 + $0x168] ss:$16 sps:$4 sm:$0xff]   ;;  %v14003_v59 = vld [vmem:[#allocation5 + $0x16c] ss:$16 sps:$4 sm:$0xff]  }
  0xf9   : > { %1018 = vmatprep.subr.bf16.mxu0 %v13916_v60  ;;  %1059 = vmatprep.subr.bf16.mxu1 %v13919_v61  ;;  %v14006_v60 = vld [vmem:[#allocation5 + $0x144] ss:$16 sps:$4 sm:$0xff]   ;;  %v14009_v61 = vld [vmem:[#allocation5 + $0x14c] ss:$16 sps:$4 sm:$0xff]  }
  0xfc   : > { %1019 = vmatpush1.bf16.msra.mxu0 %v13914_v62  ;;  %1060 = vmatpush1.bf16.msra.mxu1 %v13917_v63  ;;  %v14004_v62 = vld [vmem:[#allocation5 + $0x140] ss:$16 sps:$4 sm:$0xff]   ;;  %v14007_v63 = vld [vmem:[#allocation5 + $0x148] ss:$16 sps:$4 sm:$0xff]  }
  0xfd   : > { %1020 = vmatprep.subr.bf16.mxu0 %v13922_v0  ;;  %1061 = vmatprep.subr.bf16.mxu1 %v13925_v1  ;;  %v14012_v0 = vld [vmem:[#allocation5 + $0x124] ss:$16 sps:$4 sm:$0xff]   ;;  %v14015_v1 = vld [vmem:[#allocation5 + $0x12c] ss:$16 sps:$4 sm:$0xff]  }
 0x100   : > { %1021 = vmatpush1.bf16.msra.mxu0 %v13920_v2  ;;  %1062 = vmatpush1.bf16.msra.mxu1 %v13923_v4  ;;  %v14010_v2 = vld [vmem:[#allocation5 + $0x120] ss:$16 sps:$4 sm:$0xff]   ;;  %v14013_v4 = vld [vmem:[#allocation5 + $0x128] ss:$16 sps:$4 sm:$0xff]  }
 0x101   : > { %1371 = vmatprep.subr.bf16.mxu0 %v13928_v7  ;;  %1412 = vmatprep.subr.bf16.mxu1 %v13934_v11  ;;  %v14016_v7 = vld [vmem:[#allocation5 + $0x100] ss:$16 sps:$4 sm:$0xff]  }
 0x103   : > { %1039 = vmatmul.mubr.bf16.vlgmr.msra.gmra.mxu0 %v537_v5  ;;  %1080 = vmatmul.mubr.bf16.vlgmr.msra.gmra.mxu1 %v537_v5  ;;  %v14018_v5 = vld [vmem:[#allocation5 + $0x104] ss:$16 sps:$4 sm:$0xff]  }
 0x104   : > { %1403 = vmatprep.mubr.bf16.mxu0 %v18166_v3  ;;  %1444 = vmatprep.mubr.bf16.mxu1 %v18166_v3 }
 0x105   : > { %1372 = vmatpush1.bf16.msra.mxu0 %v13926_v6  ;;  %1413 = vmatpush1.bf16.msra.mxu1 %v13932_v10  ;;  %v14021_v6 = vld [vmem:[#allocation5 + $0x10c] ss:$16 sps:$4 sm:$0xff]  }
 0x106   : > { %1373 = vmatprep.subr.bf16.mxu0 %v13931_v9  ;;  %1414 = vmatprep.subr.bf16.mxu1 %v13940_v14 }
 0x109   : > { %1374 = vmatpush1.bf16.msra.mxu0 %v13929_v8  ;;  %1415 = vmatpush1.bf16.msra.mxu1 %v13938_v15  ;;  %v14019_v8 = vld [vmem:[#allocation5 + $0x108] ss:$16 sps:$4 sm:$0xff]  }
 0x10a   : > { %1375 = vmatprep.subr.bf16.mxu0 %v13937_v12  ;;  %1416 = vmatprep.subr.bf16.mxu1 %v13946_v18 }
 0x10d   : > { %1376 = vmatpush1.bf16.msra.mxu0 %v13935_v13  ;;  %1417 = vmatpush1.bf16.msra.mxu1 %v13944_v19 }
 0x10e   : > { %1377 = vmatprep.subr.bf16.mxu0 %v13943_v16  ;;  %1418 = vmatprep.subr.bf16.mxu1 %v13952_v22 }
 0x111   : > { %1378 = vmatpush1.bf16.msra.mxu0 %v13941_v17  ;;  %1419 = vmatpush1.bf16.msra.mxu1 %v13950_v23  ;;  %v1090_v17 = vlaneseq }
 0x112   : > { %1379 = vmatprep.subr.bf16.mxu0 %v13949_v20  ;;  %1420 = vmatprep.subr.bf16.mxu1 %v13958_v26 }
 0x113   : > { %v15760_v18 = vshrl.u32 %v1090_v17, 7  ;;  %v14029_v17 = vld [vmem:[#allocation8] sm:$0xff]  }
 0x115   : > { %1380 = vmatpush1.bf16.msra.mxu0 %v13947_v21  ;;  %1421 = vmatpush1.bf16.msra.mxu1 %v13956_v27  ;;  %v15763_v19 = vsub.s32 0, %v15760_v18  ;;  %v15766_v20 = vsub.s32 1, %v15760_v18  ;;  %v1088_v21 = vld [vmem:[#allocation7] sm:$0xf] }
 0x116   : > { %1381 = vmatprep.subr.bf16.mxu0 %v13955_v24  ;;  %1422 = vmatprep.subr.bf16.mxu1 %v13964_v30 }
 0x117   : > { %18275 = vst [vmem:[#allocation67_spill] sm:$0xff] %v15763_v19  ;;  %18276 = vst [vmem:[#allocation68_spill] sm:$0xff] %v15766_v20  ;;  %v1093_v22 = vrot.slane %v1088_v21, %v15763_v19  ;;  %v1097_v26 = vrot.slane %v1088_v21, %v15766_v20 }
 0x119   : > { %1382 = vmatpush1.bf16.msra.mxu0 %v13953_v25  ;;  %1423 = vmatpush1.bf16.msra.mxu1 %v13962_v31 }
 0x11a   : > { %1383 = vmatprep.subr.bf16.mxu0 %v13961_v28  ;;  %1424 = vmatprep.subr.bf16.mxu1 %v13970_v34 }
 0x11d   : > { %1384 = vmatpush1.bf16.msra.mxu0 %v13959_v29  ;;  %1425 = vmatpush1.bf16.msra.mxu1 %v13968_v35  ;;  %v15771_v29 = vsub.s32 3, %v15760_v18 }
 0x11e   : > { %1385 = vmatprep.subr.bf16.mxu0 %v13967_v32  ;;  %1426 = vmatprep.subr.bf16.mxu1 %v13973_v38 }
 0x11f   : > { %18277 = vst [vmem:[#allocation69_spill] sm:$0xff] %v15771_v29 }
 0x121   : > { %1386 = vmatpush1.bf16.msra.mxu0 %v13965_v33  ;;  %1427 = vmatpush1.bf16.msra.mxu1 %v13971_v39 }
 0x122   : > { %1613 = vmatprep.subr.bf16.mxu0 %v13976_v40  ;;  %1654 = vmatprep.subr.bf16.mxu1 %v13979_v41 }
 0x124   : > { %1404 = vmatmul.mubr.bf16.vlgmr.msra.gmra.mxu0 %v1177_v37  ;;  %1445 = vmatmul.mubr.bf16.vlgmr.msra.gmra.mxu1 %v1177_v37  ;;  %v1105_v37 = vrot.slane %v1088_v21, %v15771_v29 }
 0x125   : > { %1645 = vmatprep.mubr.bf16.mxu0 %v18166_v3  ;;  %1614 = vmatpush1.bf16.msra.mxu0 %v13974_v42  ;;  %v15775_v42 = vsub.s32 2, %v15760_v18 }
 0x126   : > { %1655 = vmatpush1.bf16.msra.mxu1 %v13977_v43  ;;  %1686 = vmatprep.mubr.bf16.mxu1 %v18166_v3  ;;  %v16055_v3 = vld [vmem:[#allocation4 + $0x1a0] sm:$0xff]  }
 0x127   : > { %1615 = vmatprep.subr.bf16.mxu0 %v13982_v44  ;;  %1656 = vmatprep.subr.bf16.mxu1 %v13985_v45  ;;  %18278 = vst [vmem:[#allocation70_spill] sm:$0xff] %v15775_v42  ;;  %v1101_v45 = vrot.slane %v1088_v21, %v15775_v42  ;;  %v15800_v21 = vld [vmem:[#allocation4 + $0x38] sm:$0xff]   ;;  %18286 = vst [vmem:[#allocation78_spill] sm:$0xff] %v16055_v3 }
 0x129   : > { %1616 = vmatpush1.bf16.msra.mxu0 %v13980_v46 }
 0x12a   : > { %1657 = vmatpush1.bf16.msra.mxu1 %v13983_v47  ;;  %1617 = vmatprep.subr.bf16.mxu0 %v13988_v48 }
 0x12b   : > { %1658 = vmatprep.subr.bf16.mxu1 %v13991_v49 }
 0x12d   : > { %1618 = vmatpush1.bf16.msra.mxu0 %v13986_v50 }
 0x12e   : > { %1659 = vmatpush1.bf16.msra.mxu1 %v13989_v51  ;;  %1619 = vmatprep.subr.bf16.mxu0 %v13994_v52  ;;  %v1133_v51 = vld [vmem:[#allocation3] sm:$0xff] }
 0x12f   : > { %1660 = vmatprep.subr.bf16.mxu1 %v13997_v53 }
 0x131   : > { %1620 = vmatpush1.bf16.msra.mxu0 %v13992_v54 }
 0x132   : > { %1661 = vmatpush1.bf16.msra.mxu1 %v13995_v55  ;;  %1621 = vmatprep.subr.bf16.mxu0 %v14000_v57 }
 0x133   : > { %1662 = vmatprep.subr.bf16.mxu1 %v14003_v59 }
 0x135   : > { %1622 = vmatpush1.bf16.msra.mxu0 %v13998_v56 }
 0x136   : > { %1663 = vmatpush1.bf16.msra.mxu1 %v14001_v58  ;;  %1623 = vmatprep.subr.bf16.mxu0 %v14006_v60 }
 0x137   : > { %1664 = vmatprep.subr.bf16.mxu1 %v14009_v61 }
 0x139   : > { %1624 = vmatpush1.bf16.msra.mxu0 %v14004_v62 }
 0x13a   : > { %1665 = vmatpush1.bf16.msra.mxu1 %v14007_v63  ;;  %1625 = vmatprep.subr.bf16.mxu0 %v14012_v0 }
 0x13b   : > { %1666 = vmatprep.subr.bf16.mxu1 %v14015_v1 }
 0x13d   : > { %1626 = vmatpush1.bf16.msra.mxu0 %v14010_v2 }
 0x13e   : > { %1667 = vmatpush1.bf16.msra.mxu1 %v14013_v4  ;;  %1627 = vmatprep.subr.bf16.mxu0 %v14018_v5 }
 0x13f   : > { %1668 = vmatprep.subr.bf16.mxu1 %v14021_v6 }
 0x141   : > { %1628 = vmatpush1.bf16.msra.mxu0 %v14016_v7 }
 0x142   : > { %1669 = vmatpush1.bf16.msra.mxu1 %v14019_v8 }
 0x1a3   : > { %v798_v9 = vpop.f32.mrf.mxu0  ;;  %v839_v10 = vpop.f32.mrf.mxu1 }
 0x1a5   : > { %v800_v11 = vpop.f32.mrf.mxu0  ;;  %v841_v12 = vpop.f32.mrf.mxu1 }
 0x1a7   : > { %v802_v13 = vpop.f32.mrf.mxu0  ;;  %v843_v14 = vpop.f32.mrf.mxu1 }
 0x1a8   : > { %v14025_v13 = vld [vmem:[#allocation8 + $0x20] sm:$0xff]   ;;  %v14026_v14 = vld [vmem:[#allocation8 + $0x18] sm:$0xff]  }
 0x1a9   : > { %v803_v15 = vpop.f32.mrf.mxu0  ;;  %v844_v16 = vpop.f32.mrf.mxu1 }
 0x1aa   : > { %v14027_v15 = vld [vmem:[#allocation8 + $0x10] sm:$0xff]   ;;  %v14028_v16 = vld [vmem:[#allocation8 + $0x8] sm:$0xff]  }
 0x1c3   : > { %v1040_v23 = vpop.f32.mrf.mxu0  ;;  %v1081_v24 = vpop.f32.mrf.mxu1 }
 0x1c4   : > { %v1041_v25 = vadd.f32 %v1040_v23, %v798_v9  ;;  %v1082_v44 = vadd.f32 %v1081_v24, %v839_v10  ;;  %v14022_v9 = vld [vmem:[#allocation8 + $0x38] sm:$0xff]   ;;  %v18188_v10 = vmov 0.0   ;;  %v15808_v23 = vld [vmem:[#allocation4 + $0x28] sm:$0xff]  }
 0x1c5   : > { %v1042_v27 = vpop.f32.mrf.mxu0  ;;  %v1083_v28 = vpop.f32.mrf.mxu1  ;;  %12229 = vmatprep.subr.bf16.mxu0 %v18188_v10  ;;  %12249 = vmatprep.subr.bf16.mxu1 %v18188_v10  ;;  %v15812_v24 = vld [vmem:[#allocation4 + $0x20] sm:$0xff]  }
 0x1c6   : > { %v1110_v30 = vadd.f32 %v1093_v22, %v1041_v25  ;;  %v1043_v31 = vadd.f32 %v1042_v27, %v800_v11  ;;  %v1084_v36 = vadd.f32 %v1083_v28, %v841_v12  ;;  %v1112_v47 = vadd.f32 %v1101_v45, %v1082_v44  ;;  %v14023_v11 = vld [vmem:[#allocation8 + $0x30] sm:$0xff]   ;;  %v14024_v12 = vld [vmem:[#allocation8 + $0x28] sm:$0xff]   ;;  %v15824_v27 = vld [vmem:[#allocation4 + $0x8] sm:$0xff]  }
 0x1c7   : > { %v1044_v32 = vpop.f32.mrf.mxu0  ;;  %v1085_v33 = vpop.f32.mrf.mxu1  ;;  %v15804_v22 = vld [vmem:[#allocation4 + $0x30] sm:$0xff]   ;;  %v15816_v25 = vld [vmem:[#allocation4 + $0x18] sm:$0xff]   ;;  %v15828_v28 = vld [vmem:[#allocation4] sm:$0xff]  }
 0x1c8   : > { %v10888_v34 = vmul.f32 -1.442695, %v1110_v30  ;;  %v1111_v35 = vadd.f32 %v1097_v26, %v1043_v31  ;;  %v1113_v41 = vadd.f32 %v1105_v37, %v1084_v36  ;;  %v15820_v26 = vld [vmem:[#allocation4 + $0x10] sm:$0xff]   ;;  %v1696_v30 = vld [vmem:[#allocation7 + $0x4] sm:$0xf] }
 0x1c9   : > { %v1045_v38 = vpop.f32.mrf.mxu0  ;;  %v1086_v39 = vpop.f32.mrf.mxu1  ;;  %v1701_v31 = vrot.slane %v1696_v30, %v15763_v19  ;;  %v16071_v19 = vld [vmem:[#allocation4 + $0x190] sm:$0xff]  }
 0x1ca   : > { %14758 = vpow2.f32 %v10888_v34  ;;  %v10889_v40 = vmul.f32 -1.442695, %v1111_v35  ;;  %v10890_v43 = vmul.f32 -1.442695, %v1113_v41  ;;  %v1705_v35 = vrot.slane %v1696_v30, %v15766_v20  ;;  %18290 = vst [vmem:[#allocation82_spill] sm:$0xff] %v16071_v19  ;;  %v16073_v20 = vld [vmem:[#allocation4 + $0x1d0] sm:$0xff]  }
 0x1cb   : > { %18291 = vst [vmem:[#allocation83_spill] sm:$0xff] %v16073_v20 }
 0x1cc   : > { %14760 = vpow2.f32 %v10889_v40 }
 0x1cd   : > { %14762 = vpow2.f32 %v10890_v43 }
 0x1d7   : > { %v14759_v46 = vpop.eup %14758 }
 0x1d8   : > { %v1117_v48 = vadd.f32 1.0, %v14759_v46 }
 0x1d9   : > { %v14761_v49 = vpop.eup %14760 }
 0x1da   : > { %14764 = vrcp.f32 %v1117_v48  ;;  %v1123_v50 = vadd.f32 1.0, %v14761_v49  ;;  %v14763_v52 = vpop.eup %14762  ;;  %v1713_v49 = vrot.slane %v1696_v30, %v15771_v29  ;;  %v16063_v29 = vld [vmem:[#allocation4 + $0x198] sm:$0xff]  }
 0x1db   : > { %14766 = vtanh.f32 %v1112_v47  ;;  %v1130_v56 = vadd.f32 1.0, %v14763_v52  ;;  %v1709_v52 = vrot.slane %v1696_v30, %v15775_v42  ;;  %v15530_v30 = vmov 1966171168   ;;  %18288 = vst [vmem:[#allocation80_spill] sm:$0xff] %v16063_v29  ;;  %v16065_v42 = vld [vmem:[#allocation4 + $0x1d8] sm:$0xff]  }
 0x1dc   : > { %14768 = vrcp.f32 %v1123_v50  ;;  %18289 = vst [vmem:[#allocation81_spill] sm:$0xff] %v16065_v42 }
 0x1dd   : > { %14770 = vrcp.f32 %v1130_v56 }
 0x1e4   : > { %v15778_v0 = vpop.f32.mrf.mxu0  ;;  %v15782_v5 = vpop.f32.mrf.mxu1 }
 0x1e6   : > { %v15780_v1 = vpop.f32.mrf.mxu0  ;;  %v15784_v6 = vpop.f32.mrf.mxu1 }
 0x1e7   : > { %v14765_v53 = vpop.eup %14764 }
 0x1e8   : > { %v14767_v54 = vpop.eup %14766  ;;  %v1409_v2 = vpop.f32.mrf.mxu0 }
 0x1e9   : > { %v14769_v55 = vpop.eup %14768  ;;  %v1135_v57 = vmul.f32 %v14767_v54, %v14765_v53  ;;  %v1450_v7 = vpop.f32.mrf.mxu1 }
 0x1ea   : > { %v1134_v58 = vmul.f32 %v14769_v55, %v1133_v51  ;;  %v14771_v60 = vpop.eup %14770  ;;  %v1410_v4 = vpop.f32.mrf.mxu0 }
 0x1eb   : > { %v1451_v8 = vpop.f32.mrf.mxu1 }
 0x1ec   : > { %v1136_v59 = vadd.f32 %v1135_v57, %v1134_v58  ;;  %v15840_v8 = vld [vmem:[#allocation4 + $0x78] sm:$0xff]  }
 0x1ee   : > { %1139 = vst [vmem:[#allocation3] sm:$0xff] %v1136_v59  ;;  %14772 = vtanh.f32 %v1136_v59 }
 0x1fb   : > { %v14773_v61 = vpop.eup %14772 }
 0x1fc   : > { %v1138_v62 = vmul.f32 %v14773_v61, %v14771_v60  ;;  %v1742_v61 = vld [vmem:[#allocation3 + $0x8] sm:$0xff] }
 0x1fe   : > { %1140 = vst [vmem:[#allocation2] sm:$0xff] %v1138_v62  ;;  %v1141_v63 = vpack.c.bf16 %v1138_v62, %v1138_v62 }
 0x200   : > { %1646 = vmatmul.mubr.bf16.vlgmr.msra.gmra.mxu0 %v1141_v63  ;;  %1687 = vmatmul.mubr.bf16.vlgmr.msra.gmra.mxu1 %v1141_v63 }
 0x201   : > { %12230 = vmatpush3.bf16.msra.mxu0 %v14022_v9  ;;  %12245 = vmatprep.mubr.msk.bf16.mxu0 %vm15529_vm0, %v18188_v10 }
 0x202   : > { %12231 = vmatprep.subr.bf16.mxu0 %v18188_v10  ;;  %12265 = vmatprep.mubr.msk.bf16.mxu1 %vm15529_vm0, %v18188_v10 }
 0x203   : > { %12250 = vmatpush3.bf16.xpose.msra.mxu1 %v15800_v21 }
 0x204   : > { %12251 = vmatprep.subr.bf16.mxu1 %v18188_v10 }
 0x205   : > { %12232 = vmatpush3.bf16.msra.mxu0 %v14023_v11  ;;  %v15849_v11 = vld [vmem:[#allocation4 + $0x70] sm:$0xff]  }
 0x206   : > { %12233 = vmatprep.subr.bf16.mxu0 %v18188_v10 }
 0x209   : > { %12234 = vmatpush3.bf16.msra.mxu0 %v14024_v12  ;;  %v15853_v12 = vld [vmem:[#allocation4 + $0x68] sm:$0xff]  }
 0x20a   : > { %12235 = vmatprep.subr.bf16.mxu0 %v18188_v10 }
 0x20b   : > { %12252 = vmatpush3.bf16.xpose.msra.mxu1 %v15804_v22 }
 0x20c   : > { %12253 = vmatprep.subr.bf16.mxu1 %v18188_v10 }
 0x20d   : > { %12236 = vmatpush3.bf16.msra.mxu0 %v14025_v13  ;;  %v15857_v13 = vld [vmem:[#allocation4 + $0x60] sm:$0xff]  }
 0x20e   : > { %12237 = vmatprep.subr.bf16.mxu0 %v18188_v10 }
 0x211   : > { %12238 = vmatpush3.bf16.msra.mxu0 %v14026_v14  ;;  %v15861_v14 = vld [vmem:[#allocation4 + $0x58] sm:$0xff]  }
 0x212   : > { %12239 = vmatprep.subr.bf16.mxu0 %v18188_v10 }
 0x213   : > { %12254 = vmatpush3.bf16.xpose.msra.mxu1 %v15808_v23 }
 0x214   : > { %12255 = vmatprep.subr.bf16.mxu1 %v18188_v10 }
 0x215   : > { %12240 = vmatpush3.bf16.msra.mxu0 %v14027_v15  ;;  %v15865_v15 = vld [vmem:[#allocation4 + $0x50] sm:$0xff]  }
 0x216   : > { %12241 = vmatprep.subr.bf16.mxu0 %v18188_v10 }
 0x219   : > { %12242 = vmatpush3.bf16.msra.mxu0 %v14028_v16  ;;  %v15869_v16 = vld [vmem:[#allocation4 + $0x48] sm:$0xff]  }
 0x21a   : > { %12243 = vmatprep.subr.bf16.mxu0 %v18188_v10 }
 0x21b   : > { %12256 = vmatpush3.bf16.xpose.msra.mxu1 %v15812_v24 }
 0x21c   : > { %12257 = vmatprep.subr.bf16.mxu1 %v18188_v10 }
 0x21d   : > { %12244 = vmatpush3.bf16.msra.mxu0 %v14029_v17  ;;  %v15873_v17 = vld [vmem:[#allocation4 + $0x40] sm:$0xff]  }
 0x21e   : > { %12269 = vmatprep.subr.bf16.mxu0 %v18188_v10 }
 0x223   : > { %12258 = vmatpush3.bf16.xpose.msra.mxu1 %v15816_v25 }
 0x224   : > { %12259 = vmatprep.subr.bf16.mxu1 %v18188_v10 }
 0x22b   : > { %12260 = vmatpush3.bf16.xpose.msra.mxu1 %v15820_v26 }
 0x22c   : > { %12261 = vmatprep.subr.bf16.mxu1 %v18188_v10 }
 0x233   : > { %12262 = vmatpush3.bf16.xpose.msra.mxu1 %v15824_v27 }
 0x234   : > { %12263 = vmatprep.subr.bf16.mxu1 %v18188_v10 }
 0x23b   : > { %12264 = vmatpush3.bf16.xpose.msra.mxu1 %v15828_v28 }
 0x23c   : > { %12289 = vmatprep.subr.bf16.mxu1 %v18188_v10 }
 0x2c0   : > { %v1647_v32 = vpop.f32.mrf.mxu0  ;;  %v1688_v33 = vpop.f32.mrf.mxu1 }
 0x2c1   : > { %v1648_v34 = vadd.f32 %v1647_v32, %v15778_v0  ;;  %v1689_v51 = vadd.f32 %v1688_v33, %v15782_v5 }
 0x2c2   : > { %v1649_v36 = vpop.f32.mrf.mxu0  ;;  %v1690_v37 = vpop.f32.mrf.mxu1 }
 0x2c3   : > { %v1718_v38 = vadd.f32 %v1701_v31, %v1648_v34  ;;  %v1650_v39 = vadd.f32 %v1649_v36, %v15780_v1  ;;  %v1691_v48 = vadd.f32 %v1690_v37, %v15784_v6  ;;  %v1720_v55 = vadd.f32 %v1709_v52, %v1689_v51  ;;  %v15916_v51 = vld [vmem:[#allocation4 + $0xe0] sm:$0xff]   ;;  %v15922_v52 = vld [vmem:[#allocation4 + $0x98] sm:$0xff]  }
 0x2c4   : > { %v1651_v40 = vpop.f32.mrf.mxu0  ;;  %v1692_v41 = vpop.f32.mrf.mxu1  ;;  %v1858_v31 = vunpack.c.l.s4 %v15530_v30  ;;  %v15984_v30 = vld [vmem:[#allocation4 + $0x160] sm:$0xff]  }
 0x2c5   : > { %v10955_v43 = vmul.f32 -1.442695, %v1718_v38  ;;  %v1719_v44 = vadd.f32 %v1705_v35, %v1650_v39  ;;  %v1721_v50 = vadd.f32 %v1713_v49, %v1691_v48  ;;  %v15886_v41 = vld [vmem:[#allocation4 + $0xb8] sm:$0xff]   ;;  %v15906_v48 = vld [vmem:[#allocation4 + $0xa8] sm:$0xff]  }
 0x2c6   : > { %v1652_v45 = vpop.f32.mrf.mxu0  ;;  %v1693_v46 = vpop.f32.mrf.mxu1  ;;  %v1859_v32 = vunpack.c.0.s8 %v1858_v31  ;;  %v15908_v49 = vld [vmem:[#allocation4 + $0xe8] sm:$0xff]   ;;  %v15990_v31 = vld [vmem:[#allocation4 + $0x118] sm:$0xff]  }
 0x2c7   : > { %14774 = vpow2.f32 %v10955_v43  ;;  %v10956_v47 = vmul.f32 -1.442695, %v1719_v44  ;;  %v10957_v53 = vmul.f32 -1.442695, %v1721_v50  ;;  %v15888_v45 = vld [vmem:[#allocation4 + $0xf8] sm:$0xff]   ;;  %v15898_v46 = vld [vmem:[#allocation4 + $0xb0] sm:$0xff]  }
 0x2c8   : > { %v15878_v33 = vsub.s32 %v1859_v32, %v15760_v18  ;;  %v15914_v50 = vld [vmem:[#allocation4 + $0xa0] sm:$0xff]   ;;  %v15992_v32 = vld [vmem:[#allocation4 + $0x158] sm:$0xff]  }
 0x2c9   : > { %14776 = vpow2.f32 %v10956_v47  ;;  %v15900_v47 = vld [vmem:[#allocation4 + $0xf0] sm:$0xff]  }
 0x2ca   : > { %14778 = vpow2.f32 %v10957_v53  ;;  %18280 = vst [vmem:[#allocation72_spill] sm:$0xff] %v15878_v33  ;;  %v15924_v53 = vld [vmem:[#allocation4 + $0xd8] sm:$0xff]  }
 0x2d4   : > { %v14775_v54 = vpop.eup %14774 }
 0x2d5   : > { %v1725_v56 = vadd.f32 1.0, %v14775_v54  ;;  %v15930_v54 = vld [vmem:[#allocation4 + $0x90] sm:$0xff]  }
 0x2d6   : > { %v14777_v57 = vpop.eup %14776 }
 0x2d7   : > { %14780 = vrcp.f32 %v1725_v56  ;;  %v1731_v58 = vadd.f32 1.0, %v14777_v57  ;;  %v14779_v59 = vpop.eup %14778  ;;  %v15938_v56 = vld [vmem:[#allocation4 + $0x88] sm:$0xff]  }
 0x2d8   : > { %14782 = vtanh.f32 %v1720_v55  ;;  %v1738_v0 = vadd.f32 1.0, %v14779_v59  ;;  %v15932_v55 = vld [vmem:[#allocation4 + $0xd0] sm:$0xff]   ;;  %v15940_v57 = vld [vmem:[#allocation4 + $0xc8] sm:$0xff]   ;;  %v15948_v59 = vld [vmem:[#allocation4 + $0xc0] sm:$0xff]  }
 0x2d9   : > { %14784 = vrcp.f32 %v1731_v58  ;;  %v15946_v58 = vld [vmem:[#allocation4 + $0x80] sm:$0xff]  }
 0x2da   : > { %14786 = vrcp.f32 %v1738_v0  ;;  %v15956_v0 = vld [vmem:[#allocation4 + $0x178] sm:$0xff]  }
 0x2e4   : > { %v14781_v60 = vpop.eup %14780 }
 0x2e5   : > { %v14783_v62 = vpop.eup %14782 }
 0x2e6   : > { %v14785_v63 = vpop.eup %14784  ;;  %v1744_v1 = vmul.f32 %v14783_v62, %v14781_v60  ;;  %v15954_v62 = vld [vmem:[#allocation4 + $0x138] sm:$0xff]  }
 0x2e7   : > { %v1743_v2 = vmul.f32 %v14785_v63, %v1742_v61  ;;  %v14787_v5 = vpop.eup %14786 }
 0x2e9   : > { %v1745_v4 = vadd.f32 %v1744_v1, %v1743_v2  ;;  %v15966_v2 = vld [vmem:[#allocation4 + $0x130] sm:$0xff]  }
 0x2eb   : > { %1748 = vst [vmem:[#allocation3 + $0x8] sm:$0xff] %v1745_v4  ;;  %14788 = vtanh.f32 %v1745_v4  ;;  %v15968_v4 = vld [vmem:[#allocation4 + $0x170] sm:$0xff]  }
 0x2f8   : > { %v14789_v6 = vpop.eup %14788 }
 0x2f9   : > { %v1747_v7 = vmul.f32 %v14789_v6, %v14787_v5  ;;  %v15974_v5 = vld [vmem:[#allocation4 + $0x128] sm:$0xff]  }
 0x2fa   : > { %v15976_v6 = vld [vmem:[#allocation4 + $0x168] sm:$0xff]  }
 0x2fb   : > { %1749 = vst [vmem:[#allocation2 + $0x8] sm:$0xff] %v1747_v7  ;;  %v15842_v9 = vpack.c.bf16 %v1747_v7, %v1747_v7  ;;  %v15982_v7 = vld [vmem:[#allocation4 + $0x120] sm:$0xff]  }
 0x2fd   : > { %18279 = vst [vmem:[#allocation71_spill] sm:$0xff] %v15842_v9  ;;  %12246 = vmatmul.mubr.bf16.vlgmr.msra.gmra.mxu0 %v15842_v9  ;;  %v16079_v9 = vld [vmem:[#allocation4 + $0x188] sm:$0xff]  }
 0x2fe   : > { %12270 = vmatpush3.bf16.xpose.msra.mxu0 %v15840_v8  ;;  %12285 = vmatprep.mubr.msk.bf16.mxu0 %vm15529_vm0, %v18188_v10  ;;  %18292 = vst [vmem:[#allocation84_spill] sm:$0xff] %v16079_v9 }
 0x2ff   : > { %12271 = vmatprep.subr.bf16.mxu0 %v18188_v10 }
 0x306   : > { %12272 = vmatpush3.bf16.xpose.msra.mxu0 %v15849_v11 }
 0x307   : > { %12273 = vmatprep.subr.bf16.mxu0 %v18188_v10 }
 0x30e   : > { %12274 = vmatpush3.bf16.xpose.msra.mxu0 %v15853_v12 }
 0x30f   : > { %12275 = vmatprep.subr.bf16.mxu0 %v18188_v10 }
 0x316   : > { %12276 = vmatpush3.bf16.xpose.msra.mxu0 %v15857_v13 }
 0x317   : > { %12277 = vmatprep.subr.bf16.mxu0 %v18188_v10 }
 0x31e   : > { %12278 = vmatpush3.bf16.xpose.msra.mxu0 %v15861_v14 }
 0x31f   : > { %12279 = vmatprep.subr.bf16.mxu0 %v18188_v10 }
 0x326   : > { %12280 = vmatpush3.bf16.xpose.msra.mxu0 %v15865_v15 }
 0x327   : > { %12281 = vmatprep.subr.bf16.mxu0 %v18188_v10 }
 0x32e   : > { %12282 = vmatpush3.bf16.xpose.msra.mxu0 %v15869_v16 }
 0x32f   : > { %12283 = vmatprep.subr.bf16.mxu0 %v18188_v10 }
 0x336   : > { %12284 = vmatpush3.bf16.xpose.msra.mxu0 %v15873_v17 }
 0x337   : > { %12309 = vmatprep.subr.bf16.mxu0 %v18188_v10 }
 0x3bd   : > { %v15880_v34 = vpop.f32.mrf.mxu0 }
 0x3be   : > { %v1863_v35 = vrot.slane %v15880_v34, %v15878_v33 }
 0x3bf   : > { %v12247_v36 = vpop.f32.mrf.mxu0 }
 0x3c0   : > { %v1871_v37 = vcombine.high %v1863_v35, %v1863_v35  ;;  %v1879_v38 = vrot.slane %v1863_v35, %v15878_v33  ;;  %v15998_v35 = vld [vmem:[#allocation4 + $0x110] sm:$0xff]  }
 0x3c1   : > { %v1852_v39 = vpop.f32.mrf.mxu0  ;;  %v16000_v36 = vld [vmem:[#allocation4 + $0x150] sm:$0xff]  }
 0x3c2   : > { %v1893_v40 = vrot.slane %v1871_v37, %v15878_v33  ;;  %v1913_v43 = vpack.c.bf16 %v1879_v38, %v1879_v38  ;;  %v1901_v60 = vcombine.high %v1879_v38, %v1879_v38  ;;  %v16006_v37 = vld [vmem:[#allocation4 + $0x108] sm:$0xff]   ;;  %v1856_v39 = vcombine.high %v15880_v34, %v15880_v34 }
 0x3c3   : > { %v12248_v44 = vpop.f32.mrf.mxu0  ;;  %v16008_v38 = vld [vmem:[#allocation4 + $0x148] sm:$0xff]  }
 0x3c4   : > { %12266 = vmatmul.mubr.bf16.vlgmr.msra.gmra.mxu1 %v1913_v43  ;;  %v1914_v18 = vpack.c.bf16 %v1893_v40, %v1893_v40  ;;  %v1903_v61 = vcombine.high %v1893_v40, %v1893_v40  ;;  %v1915_v63 = vpack.c.bf16 %v1901_v60, %v1901_v60  ;;  %v1870_v40 = vrot.slane %v1856_v39, %v15878_v33  ;;  %v16017_v43 = vld [vmem:[#allocation4 + $0x100] sm:$0xff]  }
 0x3c5   : > { %12290 = vmatpush3.bf16.xpose.msra.mxu1 %v15886_v41  ;;  %12305 = vmatprep.mubr.msk.bf16.mxu1 %vm15529_vm0, %v18188_v10  ;;  %v16019_v44 = vld [vmem:[#allocation4 + $0x140] sm:$0xff]  }
 0x3c6   : > { %12286 = vmatmul.mubr.bf16.vlgmr.msra.gmra.mxu0 %v1914_v18  ;;  %12291 = vmatprep.subr.bf16.mxu1 %v18188_v10  ;;  %v1916_v1 = vpack.c.bf16 %v1903_v61, %v1903_v61  ;;  %v1872_v18 = vcombine.high %v1870_v40, %v1870_v40  ;;  %v1886_v60 = vrot.slane %v1870_v40, %v15878_v33  ;;  %v16027_v61 = vld [vmem:[#allocation4 + $0x1b8] sm:$0xff]   ;;  %v16039_v40 = vld [vmem:[#allocation4 + $0x1b0] sm:$0xff]  }
 0x3c7   : > { %12310 = vmatpush3.bf16.xpose.msra.mxu0 %v15888_v45  ;;  %12325 = vmatprep.mubr.msk.bf16.mxu0 %vm15529_vm0, %v18188_v10  ;;  %18282 = vst [vmem:[#allocation74_spill] sm:$0xff] %v16039_v40 }
 0x3c8   : > { %12311 = vmatprep.subr.bf16.mxu0 %v18188_v10  ;;  %v1900_v34 = vrot.slane %v1872_v18, %v15878_v33  ;;  %v16041_v18 = vld [vmem:[#allocation4 + $0x1f0] sm:$0xff]   ;;  %v16057_v33 = vld [vmem:[#allocation4 + $0x1e0] sm:$0xff]  }
 0x3c9   : > { %18283 = vst [vmem:[#allocation75_spill] sm:$0xff] %v16041_v18  ;;  %18287 = vst [vmem:[#allocation79_spill] sm:$0xff] %v16057_v33 }
 0x3ca   : > { %v1918_v39 = vpack.c.bf16 %v1900_v34, %v1900_v34 }
 0x3cd   : > { %12292 = vmatpush3.bf16.xpose.msra.mxu1 %v15898_v46 }
 0x3ce   : > { %12293 = vmatprep.subr.bf16.mxu1 %v18188_v10 }
 0x3cf   : > { %12312 = vmatpush3.bf16.xpose.msra.mxu0 %v15900_v47 }
 0x3d0   : > { %12313 = vmatprep.subr.bf16.mxu0 %v18188_v10 }
 0x3d5   : > { %12294 = vmatpush3.bf16.xpose.msra.mxu1 %v15906_v48 }
 0x3d6   : > { %12295 = vmatprep.subr.bf16.mxu1 %v18188_v10 }
 0x3d7   : > { %12314 = vmatpush3.bf16.xpose.msra.mxu0 %v15908_v49 }
 0x3d8   : > { %12315 = vmatprep.subr.bf16.mxu0 %v18188_v10 }
 0x3dd   : > { %12296 = vmatpush3.bf16.xpose.msra.mxu1 %v15914_v50 }
 0x3de   : > { %12297 = vmatprep.subr.bf16.mxu1 %v18188_v10 }
 0x3df   : > { %12316 = vmatpush3.bf16.xpose.msra.mxu0 %v15916_v51 }
 0x3e0   : > { %12317 = vmatprep.subr.bf16.mxu0 %v18188_v10 }
 0x3e5   : > { %12298 = vmatpush3.bf16.xpose.msra.mxu1 %v15922_v52 }
 0x3e6   : > { %12299 = vmatprep.subr.bf16.mxu1 %v18188_v10 }
 0x3e7   : > { %12318 = vmatpush3.bf16.xpose.msra.mxu0 %v15924_v53 }
 0x3e8   : > { %12319 = vmatprep.subr.bf16.mxu0 %v18188_v10 }
 0x3ed   : > { %12300 = vmatpush3.bf16.xpose.msra.mxu1 %v15930_v54 }
 0x3ee   : > { %12301 = vmatprep.subr.bf16.mxu1 %v18188_v10 }
 0x3ef   : > { %12320 = vmatpush3.bf16.xpose.msra.mxu0 %v15932_v55 }
 0x3f0   : > { %12321 = vmatprep.subr.bf16.mxu0 %v18188_v10 }
 0x3f5   : > { %12302 = vmatpush3.bf16.xpose.msra.mxu1 %v15938_v56 }
 0x3f6   : > { %12303 = vmatprep.subr.bf16.mxu1 %v18188_v10 }
 0x3f7   : > { %12322 = vmatpush3.bf16.xpose.msra.mxu0 %v15940_v57 }
 0x3f8   : > { %12323 = vmatprep.subr.bf16.mxu0 %v18188_v10 }
 0x3fd   : > { %12304 = vmatpush3.bf16.xpose.msra.mxu1 %v15946_v58 }
 0x3fe   : > { %12329 = vmatprep.subr.bf16.mxu1 %v18188_v10 }
 0x3ff   : > { %12324 = vmatpush3.bf16.xpose.msra.mxu0 %v15948_v59 }
 0x400   : > { %12349 = vmatprep.subr.bf16.mxu0 %v18188_v10 }
 0x404   : > { %12306 = vmatmul.mubr.bf16.vlgmr.msra.gmra.mxu1 %v1915_v63  ;;  %v1917_v63 = vpack.c.bf16 %v1886_v60, %v1886_v60 }
 0x405   : > { %12330 = vmatpush3.bf16.xpose.msra.mxu1 %v15954_v62  ;;  %12345 = vmatprep.mubr.msk.bf16.mxu1 %vm15529_vm0, %v18188_v10 }
 0x406   : > { %12326 = vmatmul.mubr.bf16.vlgmr.msra.gmra.mxu0 %v1916_v1  ;;  %12331 = vmatprep.subr.bf16.mxu1 %v18188_v10  ;;  %v16029_v1 = vld [vmem:[#allocation4 + $0x1f8] sm:$0xff]  }
 0x407   : > { %12350 = vmatpush3.bf16.xpose.msra.mxu0 %v15956_v0  ;;  %12365 = vmatprep.mubr.msk.bf16.mxu0 %vm15529_vm0, %v18188_v10  ;;  %18281 = vst [vmem:[#allocation73_spill] sm:$0xff] %v16029_v1 }
 0x408   : > { %12351 = vmatprep.subr.bf16.mxu0 %v18188_v10 }
 0x40d   : > { %12332 = vmatpush3.bf16.xpose.msra.mxu1 %v15966_v2 }
 0x40e   : > { %12333 = vmatprep.subr.bf16.mxu1 %v18188_v10 }
 0x40f   : > { %12352 = vmatpush3.bf16.xpose.msra.mxu0 %v15968_v4 }
 0x410   : > { %12353 = vmatprep.subr.bf16.mxu0 %v18188_v10 }
 0x415   : > { %12334 = vmatpush3.bf16.xpose.msra.mxu1 %v15974_v5 }
 0x416   : > { %12335 = vmatprep.subr.bf16.mxu1 %v18188_v10 }
 0x417   : > { %12354 = vmatpush3.bf16.xpose.msra.mxu0 %v15976_v6 }
 0x418   : > { %12355 = vmatprep.subr.bf16.mxu0 %v18188_v10 }
 0x41d   : > { %12336 = vmatpush3.bf16.xpose.msra.mxu1 %v15982_v7 }
 0x41e   : > { %12337 = vmatprep.subr.bf16.mxu1 %v18188_v10 }
 0x41f   : > { %12356 = vmatpush3.bf16.xpose.msra.mxu0 %v15984_v30 }
 0x420   : > { %12357 = vmatprep.subr.bf16.mxu0 %v18188_v10 }
 0x425   : > { %12338 = vmatpush3.bf16.xpose.msra.mxu1 %v15990_v31 }
 0x426   : > { %12339 = vmatprep.subr.bf16.mxu1 %v18188_v10 }
 0x427   : > { %12358 = vmatpush3.bf16.xpose.msra.mxu0 %v15992_v32 }
 0x428   : > { %12359 = vmatprep.subr.bf16.mxu0 %v18188_v10 }
 0x42d   : > { %12340 = vmatpush3.bf16.xpose.msra.mxu1 %v15998_v35 }
 0x42e   : > { %12341 = vmatprep.subr.bf16.mxu1 %v18188_v10 }
 0x42f   : > { %12360 = vmatpush3.bf16.xpose.msra.mxu0 %v16000_v36 }
 0x430   : > { %12361 = vmatprep.subr.bf16.mxu0 %v18188_v10 }
 0x435   : > { %12342 = vmatpush3.bf16.xpose.msra.mxu1 %v16006_v37 }
 0x436   : > { %12343 = vmatprep.subr.bf16.mxu1 %v18188_v10 }
 0x437   : > { %12362 = vmatpush3.bf16.xpose.msra.mxu0 %v16008_v38 }
 0x438   : > { %12363 = vmatprep.subr.bf16.mxu0 %v18188_v10 }
 0x43d   : > { %12344 = vmatpush3.bf16.xpose.msra.mxu1 %v16017_v43 }
 0x43e   : > { %12369 = vmatprep.subr.bf16.mxu1 %v18188_v10 }
 0x43f   : > { %12364 = vmatpush3.bf16.xpose.msra.mxu0 %v16019_v44 }
 0x440   : > { %12389 = vmatprep.subr.bf16.mxu0 %v18188_v10 }
 0x444   : > { %12346 = vmatmul.mubr.bf16.vlgmr.msra.gmra.mxu1 %v1917_v63  ;;  %v16047_v63 = vld [vmem:[#allocation4 + $0x1a8] sm:$0xff]  }
 0x445   : > { %12370 = vmatpush3.bf16.xpose.msra.mxu1 %v16027_v61  ;;  %12385 = vmatprep.mubr.msk.bf16.mxu1 %vm15529_vm0, %v18188_v10  ;;  %18284 = vst [vmem:[#allocation76_spill] sm:$0xff] %v16047_v63 }
 0x446   : > { %12366 = vmatmul.mubr.bf16.vlgmr.msra.gmra.mxu0 %v1918_v39  ;;  %12371 = vmatprep.subr.bf16.mxu1 %v18188_v10  ;;  %v16049_v39 = vld [vmem:[#allocation4 + $0x1e8] sm:$0xff]  }
 0x447   : > { %12390 = vmatpush3.bf16.xpose.msra.mxu0 %v16029_v1  ;;  %12405 = vmatprep.mubr.msk.bf16.mxu0 %vm15529_vm0, %v18188_v10  ;;  %18285 = vst [vmem:[#allocation77_spill] sm:$0xff] %v16049_v39 }
 0x448   : > { %12391 = vmatprep.subr.bf16.mxu0 %v18188_v10 }
 0x44d   : > { %12372 = vmatpush3.bf16.xpose.msra.mxu1 %v16039_v40 }
 0x44e   : > { %12373 = vmatprep.subr.bf16.mxu1 %v18188_v10 }
 0x44f   : > { %12392 = vmatpush3.bf16.xpose.msra.mxu0 %v16041_v18 }
 0x450   : > { %12393 = vmatprep.subr.bf16.mxu0 %v18188_v10 }
 0x455   : > { %12374 = vmatpush3.bf16.xpose.msra.mxu1 %v16047_v63 }
 0x456   : > { %12375 = vmatprep.subr.bf16.mxu1 %v18188_v10 }
 0x457   : > { %12394 = vmatpush3.bf16.xpose.msra.mxu0 %v16049_v39 }
 0x458   : > { %12395 = vmatprep.subr.bf16.mxu0 %v18188_v10 }
 0x45d   : > { %12376 = vmatpush3.bf16.xpose.msra.mxu1 %v16055_v3 }
 0x45e   : > { %12377 = vmatprep.subr.bf16.mxu1 %v18188_v10 }
 0x45f   : > { %12396 = vmatpush3.bf16.xpose.msra.mxu0 %v16057_v33  ;;  %v1904_v33 = vcombine.high %v1900_v34, %v1900_v34 }
 0x460   : > { %12397 = vmatprep.subr.bf16.mxu0 %v18188_v10 }
 0x465   : > { %12378 = vmatpush3.bf16.xpose.msra.mxu1 %v16063_v29  ;;  %v16081_v29 = vld [vmem:[#allocation4 + $0x1c8] sm:$0xff]  }
 0x466   : > { %12379 = vmatprep.subr.bf16.mxu1 %v18188_v10  ;;  %18293 = vst [vmem:[#allocation85_spill] sm:$0xff] %v16081_v29 }
 0x467   : > { %12398 = vmatpush3.bf16.xpose.msra.mxu0 %v16065_v42  ;;  %v16087_v42 = vld [vmem:[#allocation4 + $0x180] sm:$0xff]  }
 0x468   : > { %12399 = vmatprep.subr.bf16.mxu0 %v18188_v10  ;;  %18294 = vst [vmem:[#allocation86_spill] sm:$0xff] %v16087_v42 }
 0x46d   : > { %12380 = vmatpush3.bf16.xpose.msra.mxu1 %v16071_v19  ;;  %v16089_v19 = vld [vmem:[#allocation4 + $0x1c0] sm:$0xff]  }
 0x46e   : > { %12381 = vmatprep.subr.bf16.mxu1 %v18188_v10  ;;  %18295 = vst [vmem:[#allocation87_spill] sm:$0xff] %v16089_v19 }
 0x46f   : > { %12400 = vmatpush3.bf16.xpose.msra.mxu0 %v16073_v20  ;;  %v1902_v20 = vcombine.high %v1886_v60, %v1886_v60 }
 0x470   : > { %12401 = vmatprep.subr.bf16.mxu0 %v18188_v10 }
 0x475   : > { %12382 = vmatpush3.bf16.xpose.msra.mxu1 %v16079_v9  ;;  %v1919_v9 = vpack.c.bf16 %v1902_v20, %v1902_v20 }
 0x476   : > { %12383 = vmatprep.subr.bf16.mxu1 %v18188_v10 }
 0x477   : > { %12402 = vmatpush3.bf16.xpose.msra.mxu0 %v16081_v29  ;;  %v1920_v29 = vpack.c.bf16 %v1904_v33, %v1904_v33 }
 0x478   : > { %12403 = vmatprep.subr.bf16.mxu0 %v18188_v10 }
 0x47d   : > { %12384 = vmatpush3.bf16.xpose.msra.mxu1 %v16087_v42 }
 0x47e   : > { %12409 = vmatprep.subr.bf16.mxu1 %v18188_v10 }
 0x47f   : > { %12404 = vmatpush3.bf16.xpose.msra.mxu0 %v16089_v19 }
 0x480   : > { %12429 = vmatprep.subr.bf16.mxu0 %v18188_v10 }
 0x484   : > { %12386 = vmatmul.mubr.bf16.vlgmr.msra.gmra.mxu1 %v1919_v9  ;;  %v16095_v3 = vpop.f32.mrf.mxu1 }
 0x485   : > { %12410 = vmatpush3.bf16.msra.mxu1 %v15800_v21  ;;  %12425 = vmatprep.mubr.msk.bf16.mxu1 %vm15529_vm0, %v18188_v10 }
 0x486   : > { %12406 = vmatmul.mubr.bf16.vlgmr.msra.gmra.mxu0 %v1920_v29  ;;  %v12267_v42 = vpop.f32.mrf.mxu1  ;;  %v16100_v60 = vpop.f32.mrf.mxu0  ;;  %12411 = vmatprep.subr.bf16.mxu1 %v18188_v10 }
 0x487   : > { %12430 = vmatpush3.bf16.msra.mxu0 %v15840_v8  ;;  %12445 = vmatprep.mubr.msk.bf16.mxu0 %vm15529_vm0, %v18188_v10 }
 0x488   : > { %v2006_v20 = vpop.f32.mrf.mxu1  ;;  %v12287_v9 = vpop.f32.mrf.mxu0  ;;  %12431 = vmatprep.subr.bf16.mxu0 %v18188_v10 }
 0x489   : > { %12412 = vmatpush3.bf16.msra.mxu1 %v15804_v22 }
 0x48a   : > { %v12268_v21 = vpop.f32.mrf.mxu1  ;;  %v2094_v33 = vpop.f32.mrf.mxu0  ;;  %12413 = vmatprep.subr.bf16.mxu1 %v18188_v10 }
 0x48b   : > { %12432 = vmatpush3.bf16.msra.mxu0 %v15849_v11 }
 0x48c   : > { %v12288_v29 = vpop.f32.mrf.mxu0  ;;  %12433 = vmatprep.subr.bf16.mxu0 %v18188_v10 }
 0x48d   : > { %12414 = vmatpush3.bf16.msra.mxu1 %v15808_v23 }
 0x48e   : > { %12415 = vmatprep.subr.bf16.mxu1 %v18188_v10 }
 0x48f   : > { %12434 = vmatpush3.bf16.msra.mxu0 %v15853_v12 }
 0x490   : > { %12435 = vmatprep.subr.bf16.mxu0 %v18188_v10 }
 0x491   : > { %12416 = vmatpush3.bf16.msra.mxu1 %v15812_v24 }
 0x492   : > { %12417 = vmatprep.subr.bf16.mxu1 %v18188_v10 }
 0x493   : > { %12436 = vmatpush3.bf16.msra.mxu0 %v15857_v13 }
 0x494   : > { %12437 = vmatprep.subr.bf16.mxu0 %v18188_v10 }
 0x495   : > { %12418 = vmatpush3.bf16.msra.mxu1 %v15816_v25 }
 0x496   : > { %12419 = vmatprep.subr.bf16.mxu1 %v18188_v10 }
 0x497   : > { %12438 = vmatpush3.bf16.msra.mxu0 %v15861_v14 }
 0x498   : > { %12439 = vmatprep.subr.bf16.mxu0 %v18188_v10 }
 0x499   : > { %12420 = vmatpush3.bf16.msra.mxu1 %v15820_v26 }
 0x49a   : > { %12421 = vmatprep.subr.bf16.mxu1 %v18188_v10 }
 0x49b   : > { %12440 = vmatpush3.bf16.msra.mxu0 %v15865_v15 }
 0x49c   : > { %12441 = vmatprep.subr.bf16.mxu0 %v18188_v10 }
 0x49d   : > { %12422 = vmatpush3.bf16.msra.mxu1 %v15824_v27 }
 0x49e   : > { %12423 = vmatprep.subr.bf16.mxu1 %v18188_v10 }
 0x49f   : > { %12442 = vmatpush3.bf16.msra.mxu0 %v15869_v16 }
 0x4a0   : > { %12443 = vmatprep.subr.bf16.mxu0 %v18188_v10 }
 0x4a1   : > { %12424 = vmatpush3.bf16.msra.mxu1 %v15828_v28 }
 0x4a2   : > { %12449 = vmatprep.subr.bf16.mxu1 %v18188_v10 }
 0x4a3   : > { %12444 = vmatpush3.bf16.msra.mxu0 %v15873_v17  ;;  %v2633_v17 = vrot.slane %v16100_v60, 7 }
 0x4a4   : > { %12469 = vmatprep.subr.bf16.mxu0 %v18188_v10 }
 0x4a5   : > { %v2635_v9 = vsel %vm2634_vm1, %v2633_v17, %v16095_v3 }
 0x4c4   : > { %v2179_v42 = vpop.f32.mrf.mxu1 }
 0x4c5   : > { %v2636_v20 = vrot.slane %v2179_v42, 6 }
 0x4c6   : > { %v12307_v22 = vpop.f32.mrf.mxu1  ;;  %v2267_v23 = vpop.f32.mrf.mxu0 }
 0x4c7   : > { %v2639_v21 = vrot.slane %v2267_v23, 5  ;;  %v2638_v33 = vsel %vm2637_vm2, %v2636_v20, %v2635_v9 }
 0x4c8   : > { %v2182_v24 = vpop.f32.mrf.mxu1  ;;  %v12327_v25 = vpop.f32.mrf.mxu0 }
 0x4c9   : > { %v2641_v22 = vsel %vm2640_vm3, %v2639_v21, %v2638_v33 }
 0x4ca   : > { %v12308_v26 = vpop.f32.mrf.mxu1  ;;  %v2270_v27 = vpop.f32.mrf.mxu0 }
 0x4cc   : > { %v12328_v8 = vpop.f32.mrf.mxu0 }
 0x504   : > { %v2355_v11 = vpop.f32.mrf.mxu1 }
 0x505   : > { %v2642_v29 = vrot.slane %v2355_v11, 4 }
 0x506   : > { %v12347_v12 = vpop.f32.mrf.mxu1  ;;  %v2443_v13 = vpop.f32.mrf.mxu0 }
 0x507   : > { %v2645_v24 = vrot.slane %v2443_v13, 3  ;;  %v2644_v25 = vsel %vm2643_vm4, %v2642_v29, %v2641_v22 }
 0x508   : > { %v2358_v14 = vpop.f32.mrf.mxu1  ;;  %v12367_v15 = vpop.f32.mrf.mxu0 }
 0x509   : > { %v2647_v14 = vsel %vm2646_vm5, %v2645_v24, %v2644_v25 }
 0x50a   : > { %v12348_v28 = vpop.f32.mrf.mxu1  ;;  %v2446_v16 = vpop.f32.mrf.mxu0 }
 0x50c   : > { %v12368_v34 = vpop.f32.mrf.mxu0 }
 0x544   : > { %v2531_v26 = vpop.f32.mrf.mxu1 }
 0x545   : > { %v2648_v27 = vrot.slane %v2531_v26, 2 }
 0x546   : > { %v12387_v8 = vpop.f32.mrf.mxu1  ;;  %v2619_v12 = vpop.f32.mrf.mxu0 }
 0x547   : > { %v2651_v15 = vrot.slane %v2619_v12, 1  ;;  %v2650_v28 = vsel %vm2649_vm6, %v2648_v27, %v2647_v14 }
 0x548   : > { %v2534_v16 = vpop.f32.mrf.mxu1  ;;  %v12407_v34 = vpop.f32.mrf.mxu0 }
 0x549   : > { %v2653_v17 = vsel %vm2652_vm7, %v2651_v15, %v2650_v28 }
 0x54a   : > { %v2622_v20 = vpop.f32.mrf.mxu0  ;;  %2655 = vmax.xlane.f32.xlu0 %v2653_v17  ;;  %v12388_v9 = vpop.f32.mrf.mxu1 }
 0x54c   : > { %v12408_v21 = vpop.f32.mrf.mxu0 }
 0x5d3   : > { %v2656_v33 = vpop.xlane.xlu0 %2655 }
 0x5d4   : > { %v2658_v29 = vrot.slane %v2656_v33, 1  ;;  %v2659_v22 = vrot.slane %v2656_v33, 2  ;;  %v2660_v10 = vrot.slane %v2656_v33, 3  ;;  %v2661_v8 = vrot.slane %v2656_v33, 4 }
 0x5d5   : > { %v2662_v19 = vrot.slane %v2656_v33, 5  ;;  %v2663_v39 = vrot.slane %v2656_v33, 6  ;;  %v2664_v24 = vrot.slane %v2656_v33, 7  ;;  %v2673_v25 = vsub.f32 %v16095_v3, %v2656_v33 }
 0x5d6   : > { %v2674_v27 = vsub.f32 %v16100_v60, %v2658_v29  ;;  %v2675_v14 = vsub.f32 %v2179_v42, %v2659_v22  ;;  %v2676_v16 = vsub.f32 %v2267_v23, %v2660_v10  ;;  %v2677_v34 = vsub.f32 %v2355_v11, %v2661_v8 }
 0x5d7   : > { %v2678_v15 = vsub.f32 %v2443_v13, %v2662_v19  ;;  %v2679_v28 = vsub.f32 %v2531_v26, %v2663_v39  ;;  %v2681_v17 = vmul.f32 1.442695, %v2673_v25  ;;  %v2680_v63 = vsub.f32 %v2619_v12, %v2664_v24 }
 0x5d8   : > { %v2683_v20 = vmul.f32 1.442695, %v2674_v27  ;;  %v2685_v9 = vmul.f32 1.442695, %v2675_v14  ;;  %v2687_v21 = vmul.f32 1.442695, %v2676_v16 }
 0x5d9   : > { %14790 = vpow2.f32 %v2681_v17  ;;  %v2689_v18 = vmul.f32 1.442695, %v2677_v34  ;;  %v2691_v40 = vmul.f32 1.442695, %v2678_v15  ;;  %v2693_v1 = vmul.f32 1.442695, %v2679_v28 }
 0x5da   : > { %14792 = vpow2.f32 %v2683_v20  ;;  %v2695_v3 = vmul.f32 1.442695, %v2680_v63 }
 0x5db   : > { %14794 = vpow2.f32 %v2685_v9 }
 0x5dc   : > { %14796 = vpow2.f32 %v2687_v21 }
 0x5dd   : > { %14798 = vpow2.f32 %v2689_v18 }
 0x5de   : > { %14800 = vpow2.f32 %v2691_v40 }
 0x5df   : > { %14802 = vpow2.f32 %v2693_v1 }
 0x5e0   : > { %14804 = vpow2.f32 %v2695_v3 }
 0x5e6   : > { %v14791_v10 = vpop.eup %14790 }
 0x5e7   : > { %v14793_v19 = vpop.eup %14792 }
 0x5e8   : > { %v14795_v39 = vpop.eup %14794  ;;  %v2705_v60 = vrot.slane %v14793_v19, 7 }
 0x5e9   : > { %v14797_v42 = vpop.eup %14796  ;;  %v2707_v23 = vrot.slane %v14795_v39, 6 }
 0x5ea   : > { %v14799_v11 = vpop.eup %14798  ;;  %v2706_v13 = vsel %vm2634_vm1, %v2705_v60, %v14791_v10  ;;  %v2709_v26 = vrot.slane %v14797_v42, 5 }
 0x5eb   : > { %v14801_v12 = vpop.eup %14800  ;;  %v2708_v33 = vsel %vm2637_vm2, %v2707_v23, %v2706_v13  ;;  %v2711_v29 = vrot.slane %v14799_v11, 4 }
 0x5ec   : > { %v14803_v22 = vpop.eup %14802  ;;  %v2710_v18 = vsel %vm2640_vm3, %v2709_v26, %v2708_v33  ;;  %v2713_v40 = vrot.slane %v14801_v12, 3 }
 0x5ed   : > { %v14805_v1 = vpop.eup %14804  ;;  %v2712_v63 = vsel %vm2643_vm4, %v2711_v29, %v2710_v18  ;;  %v2715_v8 = vrot.slane %v14803_v22, 2 }
 0x5ee   : > { %v2714_v24 = vsel %vm2646_vm5, %v2713_v40, %v2712_v63  ;;  %v2717_v25 = vrot.slane %v14805_v1, 1 }
 0x5ef   : > { %v2716_v27 = vsel %vm2649_vm6, %v2715_v8, %v2714_v24 }
 0x5f0   : > { %v2718_v14 = vsel %vm2652_vm7, %v2717_v25, %v2716_v27 }
 0x5f1   : > { %2720 = vadd.xlane.f32.xlu0 %v2718_v14 }
 0x67a   : > { %v2721_v16 = vpop.xlane.xlu0 %2720 }
 0x67b   : > { %14806 = vrcp.f32 %v2721_v16 }
 0x688   : > { %v14807_v34 = vpop.eup %14806 }
 0x689   : > { %v2739_v15 = vmul.f32 %v14807_v34, %v14791_v10  ;;  %v2724_v28 = vrot.slane %v14807_v34, 1  ;;  %v2725_v17 = vrot.slane %v14807_v34, 2  ;;  %v2726_v20 = vrot.slane %v14807_v34, 3 }
 0x68a   : > { %v2727_v9 = vrot.slane %v14807_v34, 4  ;;  %v2728_v21 = vrot.slane %v14807_v34, 5  ;;  %v2729_v3 = vrot.slane %v14807_v34, 6  ;;  %v2730_v60 = vrot.slane %v14807_v34, 7  ;;  %v14107_v34 = vld [vmem:[#allocation6 + $0xc4] ss:$16 sps:$4 sm:$0xff]  }
 0x68b   : > { %v2747_v23 = vpack.c.bf16 %v2739_v15, %v2739_v15  ;;  %v2740_v13 = vmul.f32 %v14793_v19, %v2724_v28  ;;  %v2741_v26 = vmul.f32 %v14795_v39, %v2725_v17  ;;  %v2742_v33 = vmul.f32 %v14797_v42, %v2726_v20  ;;  %v14105_v28 = vld [vmem:[#allocation6 + $0xc0] ss:$16 sps:$4 sm:$0xff]   ;;  %v14110_v20 = vld [vmem:[#allocation6 + $0xa4] ss:$16 sps:$4 sm:$0xff]  }
 0x68c   : > { %v16153_v29 = vmul.f32 %v14799_v11, %v2727_v9  ;;  %v16155_v8 = vmul.f32 %v14801_v12, %v2728_v21  ;;  %v18296_v10 = vmov 0.0   ;;  %v16160_v24 = vmul.f32 %v14803_v22, %v2729_v3  ;;  %v14108_v9 = vld [vmem:[#allocation6 + $0xa0] ss:$16 sps:$4 sm:$0xff]   ;;  %v14113_v21 = vld [vmem:[#allocation6 + $0x84] ss:$16 sps:$4 sm:$0xff]  }
 0x68d   : > { %12426 = vmatmul.mubr.bf16.vlgmr.msra.gmra.mxu1 %v2747_v23  ;;  %v2748_v18 = vpack.c.bf16 %v2740_v13, %v2740_v13  ;;  %v3333_v40 = vrot.slane %v2740_v13, 7  ;;  %v3335_v63 = vrot.slane %v2741_v26, 6  ;;  %v3337_v39 = vrot.slane %v2742_v33, 5  ;;  %v14111_v3 = vld [vmem:[#allocation6 + $0x80] ss:$16 sps:$4 sm:$0xff]   ;;  %v14175_v13 = vld [vmem:[#allocation9 + $0x30] sm:$0xff]  }
 0x68e   : > { %12450 = vmatpush3.bf16.msra.mxu1 %v15886_v41  ;;  %12465 = vmatprep.mubr.msk.bf16.mxu1 %vm15529_vm0, %v18296_v10  ;;  %v16164_v42 = vmul.f32 %v14805_v1, %v2730_v60  ;;  %v3339_v41 = vrot.slane %v16153_v29, 4  ;;  %v3341_v22 = vrot.slane %v16155_v8, 3  ;;  %v18313_v17 = vmov 0   ;;  %v14174_v60 = vld [vmem:[#allocation9 + $0x38] sm:$0xff]  }
 0x68f   : > { %12446 = vmatmul.mubr.bf16.vlgmr.msra.gmra.mxu0 %v2748_v18  ;;  %v3334_v19 = vsel %vm2634_vm1, %v3333_v40, %v2739_v15  ;;  %12451 = vmatprep.subr.bf16.mxu1 %v18296_v10  ;;  %v18312_v15 = vld [vmem:[#allocation71_spill] sm:$0xff]  ;;  %v14116_v23 = vld [vmem:[#allocation6 + $0x64] ss:$16 sps:$4 sm:$0xff]   ;;  %v14117_v18 = vld [vmem:[#allocation6 + $0x40] ss:$16 sps:$4 sm:$0xff]  }
 0x690   : > { %12470 = vmatpush3.bf16.msra.mxu0 %v15888_v45  ;;  %v3336_v11 = vsel %vm2637_vm2, %v3335_v63, %v3334_v19  ;;  %12485 = vmatprep.mubr.msk.bf16.mxu0 %vm15529_vm0, %v18296_v10  ;;  %v3343_v45 = vrot.slane %v16160_v24, 2  ;;  %v3345_v27 = vrot.slane %v16164_v42, 1  ;;  %v14122_v40 = vld [vmem:[#allocation6 + $0x24] ss:$16 sps:$4 sm:$0xff]   ;;  %v14177_v63 = vld [vmem:[#allocation9 + $0x20] sm:$0xff]  }
 0x691   : > { %12471 = vmatprep.subr.bf16.mxu0 %v18296_v10  ;;  %v3338_v12 = vsel %vm2640_vm3, %v3337_v39, %v3336_v11  ;;  %v14178_v19 = vld [vmem:[#allocation9 + $0x18] sm:$0xff]  }
 0x692   : > { %12452 = vmatpush3.bf16.msra.mxu1 %v15898_v46  ;;  %v3340_v1 = vsel %vm2643_vm4, %v3339_v41, %v3338_v12  ;;  %v2749_v46 = vpack.c.bf16 %v2741_v26, %v2741_v26  ;;  %v14114_v26 = vld [vmem:[#allocation6 + $0x60] ss:$16 sps:$4 sm:$0xff]  }
 0x693   : > { %12453 = vmatprep.subr.bf16.mxu1 %v18296_v10  ;;  %v3342_v25 = vsel %vm2646_vm5, %v3341_v22, %v3340_v1  ;;  %v14123_v39 = vld [vmem:[#allocation6] ss:$16 sps:$4 sm:$0xff]   ;;  %v14131_v22 = vld [vmem:[#allocation5 + $0xc4] ss:$16 sps:$4 sm:$0xff]  }
 0x694   : > { %12472 = vmatpush3.bf16.msra.mxu0 %v15900_v47  ;;  %v3344_v14 = vsel %vm2649_vm6, %v3343_v45, %v3342_v25  ;;  %v2750_v47 = vpack.c.bf16 %v2742_v33, %v2742_v33  ;;  %v14119_v33 = vld [vmem:[#allocation6 + $0x44] ss:$16 sps:$4 sm:$0xff]   ;;  %v14126_v41 = vld [vmem:[#allocation5 + $0xe0] ss:$16 sps:$4 sm:$0xff]   ;;  %v14179_v25 = vld [vmem:[#allocation9 + $0x10] sm:$0xff]  }
 0x695   : > { %12473 = vmatprep.subr.bf16.mxu0 %v18296_v10  ;;  %v3346_v16 = vsel %vm2652_vm7, %v3345_v27, %v3344_v14  ;;  %v3383_v11 = vld [vmem:[#allocation2] sm:$0xff] }
 0x696   : > { %12454 = vmatpush3.bf16.msra.mxu1 %v15906_v48  ;;  %3348 = vst [vmem:[%s15721_s14] sm:$0xff] %v3346_v16  ;;  %v2751_v48 = vpack.c.bf16 %v16153_v29, %v16153_v29  ;;  %v14176_v29 = vld [vmem:[#allocation9 + $0x28] sm:$0xff]   ;;  %v16307_v12 = vpack.c.bf16 %v3383_v11, %v3383_v11 }
 0x697   : > { %12455 = vmatprep.subr.bf16.mxu1 %v18296_v10  ;;  %v14129_v1 = vld [vmem:[#allocation5 + $0xc0] ss:$16 sps:$4 sm:$0xff]   ;;  %v14134_v45 = vld [vmem:[#allocation5 + $0xa4] ss:$16 sps:$4 sm:$0xff]  }
 0x698   : > { %12474 = vmatpush3.bf16.msra.mxu0 %v15908_v49  ;;  %v2752_v49 = vpack.c.bf16 %v16155_v8, %v16155_v8  ;;  %v14120_v8 = vld [vmem:[#allocation6 + $0x20] ss:$16 sps:$4 sm:$0xff]   ;;  %v14137_v14 = vld [vmem:[#allocation5 + $0x84] ss:$16 sps:$4 sm:$0xff]  }
 0x699   : > { %12475 = vmatprep.subr.bf16.mxu0 %v18296_v10  ;;  %v14132_v27 = vld [vmem:[#allocation5 + $0xa0] ss:$16 sps:$4 sm:$0xff]  }
 0x69a   : > { %12456 = vmatpush3.bf16.msra.mxu1 %v15914_v50  ;;  %v18297_v50 = vld [vmem:[#allocation73_spill] sm:$0xff]  ;;  %v14180_v16 = vld [vmem:[#allocation9 + $0x8] sm:$0xff]  }
 0x69b   : > { %12457 = vmatprep.subr.bf16.mxu1 %v18296_v10 }
 0x69c   : > { %12476 = vmatpush3.bf16.msra.mxu0 %v15916_v51  ;;  %v18298_v51 = vld [vmem:[#allocation74_spill] sm:$0xff] }
 0x69d   : > { %12477 = vmatprep.subr.bf16.mxu0 %v18296_v10 }
 0x69e   : > { %12458 = vmatpush3.bf16.msra.mxu1 %v15922_v52  ;;  %v18299_v52 = vld [vmem:[#allocation75_spill] sm:$0xff] }
 0x69f   : > { %12459 = vmatprep.subr.bf16.mxu1 %v18296_v10 }
 0x6a0   : > { %12478 = vmatpush3.bf16.msra.mxu0 %v15924_v53  ;;  %v18300_v53 = vld [vmem:[#allocation76_spill] sm:$0xff] }
 0x6a1   : > { %12479 = vmatprep.subr.bf16.mxu0 %v18296_v10 }
 0x6a2   : > { %12460 = vmatpush3.bf16.msra.mxu1 %v15930_v54  ;;  %v18301_v54 = vld [vmem:[#allocation77_spill] sm:$0xff] }
 0x6a3   : > { %12461 = vmatprep.subr.bf16.mxu1 %v18296_v10 }
 0x6a4   : > { %12480 = vmatpush3.bf16.msra.mxu0 %v15932_v55  ;;  %v18302_v55 = vld [vmem:[#allocation78_spill] sm:$0xff] }
 0x6a5   : > { %12481 = vmatprep.subr.bf16.mxu0 %v18296_v10 }
 0x6a6   : > { %12462 = vmatpush3.bf16.msra.mxu1 %v15938_v56  ;;  %v18303_v56 = vld [vmem:[#allocation79_spill] sm:$0xff] }
 0x6a7   : > { %12463 = vmatprep.subr.bf16.mxu1 %v18296_v10 }
 0x6a8   : > { %12482 = vmatpush3.bf16.msra.mxu0 %v15940_v57  ;;  %v18304_v57 = vld [vmem:[#allocation80_spill] sm:$0xff] }
 0x6a9   : > { %12483 = vmatprep.subr.bf16.mxu0 %v18296_v10 }
 0x6aa   : > { %12464 = vmatpush3.bf16.msra.mxu1 %v15946_v58  ;;  %v18305_v58 = vld [vmem:[#allocation81_spill] sm:$0xff] }
 0x6ab   : > { %12489 = vmatprep.subr.bf16.mxu1 %v18296_v10 }
 0x6ac   : > { %12484 = vmatpush3.bf16.msra.mxu0 %v15948_v59  ;;  %v18306_v59 = vld [vmem:[#allocation82_spill] sm:$0xff] }
 0x6ad   : > { %12466 = vmatmul.mubr.bf16.vlgmr.msra.gmra.mxu1 %v2749_v46  ;;  %12509 = vmatprep.subr.bf16.mxu0 %v18296_v10  ;;  %v14135_v46 = vld [vmem:[#allocation5 + $0x80] ss:$16 sps:$4 sm:$0xff]  }
 0x6ae   : > { %12490 = vmatpush3.bf16.msra.mxu1 %v15954_v62  ;;  %12505 = vmatprep.mubr.msk.bf16.mxu1 %vm15529_vm0, %v18296_v10  ;;  %v18307_v62 = vld [vmem:[#allocation83_spill] sm:$0xff] }
 0x6af   : > { %12486 = vmatmul.mubr.bf16.vlgmr.msra.gmra.mxu0 %v2750_v47  ;;  %12491 = vmatprep.subr.bf16.mxu1 %v18296_v10  ;;  %v14140_v47 = vld [vmem:[#allocation5 + $0x64] ss:$16 sps:$4 sm:$0xff]  }
 0x6b0   : > { %12510 = vmatpush3.bf16.msra.mxu0 %v15956_v0  ;;  %12525 = vmatprep.mubr.msk.bf16.mxu0 %vm15529_vm0, %v18296_v10  ;;  %v18308_v0 = vld [vmem:[#allocation84_spill] sm:$0xff] }
 0x6b1   : > { %12511 = vmatprep.subr.bf16.mxu0 %v18296_v10 }
 0x6b2   : > { %12492 = vmatpush3.bf16.msra.mxu1 %v15966_v2  ;;  %v18309_v2 = vld [vmem:[#allocation85_spill] sm:$0xff] }
 0x6b3   : > { %12493 = vmatprep.subr.bf16.mxu1 %v18296_v10 }
 0x6b4   : > { %12512 = vmatpush3.bf16.msra.mxu0 %v15968_v4  ;;  %v18310_v4 = vld [vmem:[#allocation86_spill] sm:$0xff] }
 0x6b5   : > { %12513 = vmatprep.subr.bf16.mxu0 %v18296_v10 }
 0x6b6   : > { %12494 = vmatpush3.bf16.msra.mxu1 %v15974_v5  ;;  %v14094_v5 = vld [vmem:[#allocation10 + $0x38] sm:$0xff]  }
 0x6b7   : > { %12495 = vmatprep.subr.bf16.mxu1 %v18296_v10 }
 0x6b8   : > { %12514 = vmatpush3.bf16.msra.mxu0 %v15976_v6  ;;  %v2753_v6 = vpack.c.bf16 %v16160_v24, %v16160_v24  ;;  %v14125_v24 = vld [vmem:[#allocation6 + $0x4] ss:$16 sps:$4 sm:$0xff]  }
 0x6b9   : > { %12515 = vmatprep.subr.bf16.mxu0 %v18296_v10 }
 0x6ba   : > { %12496 = vmatpush3.bf16.msra.mxu1 %v15982_v7  ;;  %v18311_v7 = vld [vmem:[#allocation87_spill] sm:$0xff] }
 0x6bb   : > { %12497 = vmatprep.subr.bf16.mxu1 %v18296_v10 }
 0x6bc   : > { %12516 = vmatpush3.bf16.msra.mxu0 %v15984_v30  ;;  %v2754_v30 = vpack.c.bf16 %v16164_v42, %v16164_v42  ;;  %v14128_v42 = vld [vmem:[#allocation5 + $0xe4] ss:$16 sps:$4 sm:$0xff]  }
 0x6bd   : > { %12517 = vmatprep.subr.bf16.mxu0 %v18296_v10 }
 0x6be   : > { %12498 = vmatpush3.bf16.msra.mxu1 %v15990_v31  ;;  %v14095_v31 = vld [vmem:[#allocation10 + $0x30] sm:$0xff]  }
 0x6bf   : > { %12499 = vmatprep.subr.bf16.mxu1 %v18296_v10 }
 0x6c0   : > { %12518 = vmatpush3.bf16.msra.mxu0 %v15992_v32  ;;  %v14096_v32 = vld [vmem:[#allocation10 + $0x28] sm:$0xff]  }
 0x6c1   : > { %12519 = vmatprep.subr.bf16.mxu0 %v18296_v10 }
 0x6c2   : > { %12500 = vmatpush3.bf16.msra.mxu1 %v15998_v35  ;;  %v14097_v35 = vld [vmem:[#allocation10 + $0x20] sm:$0xff]  }
 0x6c3   : > { %12501 = vmatprep.subr.bf16.mxu1 %v18296_v10 }
 0x6c4   : > { %12520 = vmatpush3.bf16.msra.mxu0 %v16000_v36  ;;  %v14098_v36 = vld [vmem:[#allocation10 + $0x18] sm:$0xff]  }
 0x6c5   : > { %12521 = vmatprep.subr.bf16.mxu0 %v18296_v10 }
 0x6c6   : > { %12502 = vmatpush3.bf16.msra.mxu1 %v16006_v37  ;;  %v14099_v37 = vld [vmem:[#allocation10 + $0x10] sm:$0xff]  }
 0x6c7   : > { %12503 = vmatprep.subr.bf16.mxu1 %v18296_v10 }
 0x6c8   : > { %12522 = vmatpush3.bf16.msra.mxu0 %v16008_v38  ;;  %v14100_v38 = vld [vmem:[#allocation10 + $0x8] sm:$0xff]  }
 0x6c9   : > { %12523 = vmatprep.subr.bf16.mxu0 %v18296_v10 }
 0x6ca   : > { %12504 = vmatpush3.bf16.msra.mxu1 %v16017_v43  ;;  %v14101_v43 = vld [vmem:[#allocation10] sm:$0xff]  }
 0x6cb   : > { %12529 = vmatprep.subr.bf16.mxu1 %v18296_v10 }
 0x6cc   : > { %12524 = vmatpush3.bf16.msra.mxu0 %v16019_v44  ;;  %v14104_v44 = vld [vmem:[#allocation6 + $0xe4] ss:$16 sps:$4 sm:$0xff]  }
 0x6cd   : > { %12506 = vmatmul.mubr.bf16.vlgmr.msra.gmra.mxu1 %v2751_v48  ;;  %12549 = vmatprep.subr.bf16.mxu0 %v18296_v10  ;;  %v14181_v48 = vld [vmem:[#allocation9] sm:$0xff]  }
 0x6ce   : > { %12530 = vmatpush3.bf16.msra.mxu1 %v16027_v61  ;;  %12545 = vmatprep.mubr.msk.bf16.mxu1 %vm15529_vm0, %v18296_v10  ;;  %v14102_v61 = vld [vmem:[#allocation6 + $0xe0] ss:$16 sps:$4 sm:$0xff]  }
 0x6cf   : > { %12526 = vmatmul.mubr.bf16.vlgmr.msra.gmra.mxu0 %v2752_v49  ;;  %12531 = vmatprep.subr.bf16.mxu1 %v18296_v10  ;;  %v14184_v49 = vld [vmem:[#allocation6 + $0xec] ss:$16 sps:$4 sm:$0xff]  }
 0x6d0   : > { %12550 = vmatpush3.bf16.msra.mxu0 %v18297_v50  ;;  %12565 = vmatprep.mubr.msk.bf16.mxu0 %vm15529_vm0, %v18296_v10  ;;  %v14138_v50 = vld [vmem:[#allocation5 + $0x60] ss:$16 sps:$4 sm:$0xff]  }
 0x6d1   : > { %12551 = vmatprep.subr.bf16.mxu0 %v18296_v10 }
 0x6d2   : > { %12532 = vmatpush3.bf16.msra.mxu1 %v18298_v51  ;;  %v14143_v51 = vld [vmem:[#allocation5 + $0x44] ss:$16 sps:$4 sm:$0xff]  }
 0x6d3   : > { %12533 = vmatprep.subr.bf16.mxu1 %v18296_v10 }
 0x6d4   : > { %12552 = vmatpush3.bf16.msra.mxu0 %v18299_v52  ;;  %v14141_v52 = vld [vmem:[#allocation5 + $0x40] ss:$16 sps:$4 sm:$0xff]  }
 0x6d5   : > { %12553 = vmatprep.subr.bf16.mxu0 %v18296_v10 }
 0x6d6   : > { %12534 = vmatpush3.bf16.msra.mxu1 %v18300_v53  ;;  %v14146_v53 = vld [vmem:[#allocation5 + $0x24] ss:$16 sps:$4 sm:$0xff]  }
 0x6d7   : > { %12535 = vmatprep.subr.bf16.mxu1 %v18296_v10 }
 0x6d8   : > { %12554 = vmatpush3.bf16.msra.mxu0 %v18301_v54  ;;  %v14144_v54 = vld [vmem:[#allocation5 + $0x20] ss:$16 sps:$4 sm:$0xff]  }
 0x6d9   : > { %12555 = vmatprep.subr.bf16.mxu0 %v18296_v10 }
 0x6da   : > { %12536 = vmatpush3.bf16.msra.mxu1 %v18302_v55  ;;  %v14149_v55 = vld [vmem:[#allocation5 + $0x4] ss:$16 sps:$4 sm:$0xff]  }
 0x6db   : > { %12537 = vmatprep.subr.bf16.mxu1 %v18296_v10 }
 0x6dc   : > { %12556 = vmatpush3.bf16.msra.mxu0 %v18303_v56  ;;  %v14147_v56 = vld [vmem:[#allocation5] ss:$16 sps:$4 sm:$0xff]  }
 0x6dd   : > { %12557 = vmatprep.subr.bf16.mxu0 %v18296_v10 }
 0x6de   : > { %12538 = vmatpush3.bf16.msra.mxu1 %v18304_v57  ;;  %v14152_v57 = vld [vmem:[#allocation6 + $0x1e4] ss:$16 sps:$4 sm:$0xff]  }
 0x6df   : > { %12539 = vmatprep.subr.bf16.mxu1 %v18296_v10 }
 0x6e0   : > { %12558 = vmatpush3.bf16.msra.mxu0 %v18305_v58  ;;  %v16314_v58 = vld [vmem:[%s15712_s24 + $0x4] sm:$0xf] }
 0x6e1   : > { %12559 = vmatprep.subr.bf16.mxu0 %v18296_v10 }
 0x6e2   : > { %12540 = vmatpush3.bf16.msra.mxu1 %v18306_v59  ;;  %v14150_v59 = vld [vmem:[#allocation6 + $0x1e0] ss:$16 sps:$4 sm:$0xff]  }
 0x6e3   : > { %12541 = vmatprep.subr.bf16.mxu1 %v18296_v10 }
 0x6e4   : > { %12560 = vmatpush3.bf16.msra.mxu0 %v18307_v62  ;;  %v14155_v62 = vld [vmem:[#allocation6 + $0x1c4] ss:$16 sps:$4 sm:$0xff]  }
 0x6e5   : > { %12561 = vmatprep.subr.bf16.mxu0 %v18296_v10 }
 0x6e6   : > { %12542 = vmatpush3.bf16.msra.mxu1 %v18308_v0 }
 0x6e7   : > { %12543 = vmatprep.subr.bf16.mxu1 %v18296_v10 }
 0x6e8   : > { %12562 = vmatpush3.bf16.msra.mxu0 %v18309_v2  ;;  %v14153_v2 = vld [vmem:[#allocation6 + $0x1c0] ss:$16 sps:$4 sm:$0xff]  }
 0x6e9   : > { %12563 = vmatprep.subr.bf16.mxu0 %v18296_v10 }
 0x6ea   : > { %12544 = vmatpush3.bf16.msra.mxu1 %v18310_v4 }
 0x6eb   : > { %12569 = vmatprep.subr.bf16.mxu1 %v18296_v10 }
 0x6ec   : > { %12564 = vmatpush3.bf16.msra.mxu0 %v18311_v7 }
 0x6ed   : > { %12546 = vmatmul.mubr.bf16.vlgmr.msra.gmra.mxu1 %v2753_v6  ;;  %12589 = vmatprep.subr.bf16.mxu0 %v18296_v10  ;;  %v14158_v6 = vld [vmem:[#allocation6 + $0x1a4] ss:$16 sps:$4 sm:$0xff]  }
 0x6ee   : > { %12570 = vmatpush3.bf16.msra.mxu1 %v14094_v5  ;;  %12585 = vmatprep.mubr.msk.bf16.mxu1 %vm15529_vm0, %v18296_v10 }
 0x6ef   : > { %12566 = vmatmul.mubr.bf16.vlgmr.msra.gmra.mxu0 %v2754_v30  ;;  %12571 = vmatprep.subr.bf16.mxu1 %v18296_v10 }
 0x6f0   : > { %12605 = vmatprep.mubr.msk.bf16.mxu0 %vm15529_vm0, %v18296_v10  ;;  %12590 = vmatpush3.bf16.msra.mxu0 %v14174_v60  ;;  %v14170_v60 = vld [vmem:[#allocation6 + $0x124] ss:$16 sps:$4 sm:$0xff]  }
 0x6f1   : > { %12591 = vmatprep.subr.bf16.mxu0 %v18296_v10 }
 0x6f2   : > { %12572 = vmatpush3.bf16.msra.mxu1 %v14095_v31 }
 0x6f3   : > { %12573 = vmatprep.subr.bf16.mxu1 %v18296_v10 }
 0x6f4   : > { %12592 = vmatpush3.bf16.msra.mxu0 %v14175_v13  ;;  %v14173_v13 = vld [vmem:[#allocation6 + $0x104] ss:$16 sps:$4 sm:$0xff]  }
 0x6f5   : > { %12593 = vmatprep.subr.bf16.mxu0 %v18296_v10 }
 0x6f6   : > { %12574 = vmatpush3.bf16.msra.mxu1 %v14096_v32 }
 0x6f7   : > { %12575 = vmatprep.subr.bf16.mxu1 %v18296_v10 }
 0x6f8   : > { %12594 = vmatpush3.bf16.msra.mxu0 %v14176_v29 }
 0x6f9   : > { %12595 = vmatprep.subr.bf16.mxu0 %v18296_v10 }
 0x6fa   : > { %12576 = vmatpush3.bf16.msra.mxu1 %v14097_v35 }
 0x6fb   : > { %12577 = vmatprep.subr.bf16.mxu1 %v18296_v10 }
 0x6fc   : > { %12596 = vmatpush3.bf16.msra.mxu0 %v14177_v63 }
 0x6fd   : > { %12597 = vmatprep.subr.bf16.mxu0 %v18296_v10 }
 0x6fe   : > { %12578 = vmatpush3.bf16.msra.mxu1 %v14098_v36  ;;  %v14156_v36 = vld [vmem:[#allocation6 + $0x1a0] ss:$16 sps:$4 sm:$0xff]  }
 0x6ff   : > { %12579 = vmatprep.subr.bf16.mxu1 %v18296_v10 }
 0x700   : > { %12598 = vmatpush3.bf16.msra.mxu0 %v14178_v19 }
 0x701   : > { %12599 = vmatprep.subr.bf16.mxu0 %v18296_v10 }
 0x702   : > { %12580 = vmatpush3.bf16.msra.mxu1 %v14099_v37 }
 0x703   : > { %12581 = vmatprep.subr.bf16.mxu1 %v18296_v10 }
 0x704   : > { %12600 = vmatpush3.bf16.msra.mxu0 %v14179_v25 }
 0x705   : > { %12601 = vmatprep.subr.bf16.mxu0 %v18296_v10 }
 0x706   : > { %12582 = vmatpush3.bf16.msra.mxu1 %v14100_v38 }
 0x707   : > { %12583 = vmatprep.subr.bf16.mxu1 %v18296_v10 }
 0x708   : > { %12602 = vmatpush3.bf16.msra.mxu0 %v14180_v16 }
 0x709   : > { %12603 = vmatprep.subr.bf16.mxu0 %v18296_v10 }
 0x70a   : > { %12584 = vmatpush3.bf16.msra.mxu1 %v14101_v43  ;;  %v14161_v43 = vld [vmem:[#allocation6 + $0x184] ss:$16 sps:$4 sm:$0xff]  }
 0x70b   : > { %3577 = vmatprep.subr.bf16.mxu1 %v14104_v44 }
 0x70c   : > { %12604 = vmatpush3.bf16.msra.mxu0 %v14181_v48 }
 0x70d   : > { %12586 = vmatmul.mubr.bf16.vlgmr.msra.gmra.mxu1 %v18312_v15  ;;  %3618 = vmatprep.subr.bf16.mxu0 %v14184_v49 }
 0x70e   : > { %3578 = vmatpush1.bf16.msra.mxu1 %v14102_v61  ;;  %3609 = vmatprep.mubr.bf16.mxu1 %v18313_v17 }
 0x70f   : > { %3579 = vmatprep.subr.bf16.mxu1 %v14107_v34 }
 0x712   : > { %3580 = vmatpush1.bf16.msra.mxu1 %v14105_v28  ;;  %v14159_v28 = vld [vmem:[#allocation6 + $0x180] ss:$16 sps:$4 sm:$0xff]  }
 0x713   : > { %3581 = vmatprep.subr.bf16.mxu1 %v14110_v20  ;;  %v14164_v20 = vld [vmem:[#allocation6 + $0x164] ss:$16 sps:$4 sm:$0xff]  }
 0x716   : > { %3582 = vmatpush1.bf16.msra.mxu1 %v14108_v9  ;;  %v14162_v9 = vld [vmem:[#allocation6 + $0x160] ss:$16 sps:$4 sm:$0xff]  }
 0x717   : > { %3583 = vmatprep.subr.bf16.mxu1 %v14113_v21  ;;  %v14167_v21 = vld [vmem:[#allocation6 + $0x144] ss:$16 sps:$4 sm:$0xff]  }
 0x71a   : > { %3584 = vmatpush1.bf16.msra.mxu1 %v14111_v3  ;;  %v14165_v3 = vld [vmem:[#allocation6 + $0x140] ss:$16 sps:$4 sm:$0xff]  }
 0x71b   : > { %3585 = vmatprep.subr.bf16.mxu1 %v14116_v23  ;;  %v14168_v23 = vld [vmem:[#allocation6 + $0x120] ss:$16 sps:$4 sm:$0xff]  }
 0x71e   : > { %3586 = vmatpush1.bf16.msra.mxu1 %v14114_v26  ;;  %v14171_v26 = vld [vmem:[#allocation6 + $0x100] ss:$16 sps:$4 sm:$0xff]  }
 0x71f   : > { %3587 = vmatprep.subr.bf16.mxu1 %v14119_v33  ;;  %v3987_v33 = vld [vmem:[#allocation2 + $0x8] sm:$0xff] }
 0x720   : > { %v16319_v29 = vpack.c.bf16 %v3987_v33, %v3987_v33  ;;  %v14199_v33 = vld [vmem:[#allocation6 + $0x4c] ss:$16 sps:$4 sm:$0xff]  }
 0x722   : > { %3588 = vmatpush1.bf16.msra.mxu1 %v14117_v18 }
 0x723   : > { %3589 = vmatprep.subr.bf16.mxu1 %v14122_v40 }
 0x726   : > { %3590 = vmatpush1.bf16.msra.mxu1 %v14120_v8 }
 0x727   : > { %3591 = vmatprep.subr.bf16.mxu1 %v14125_v24 }
 0x72a   : > { %3592 = vmatpush1.bf16.msra.mxu1 %v14123_v39 }
 0x72b   : > { %3819 = vmatprep.subr.bf16.mxu1 %v14128_v42 }
 0x72d   : > { %3610 = vmatmul.mubr.bf16.vlgmr.msra.gmra.mxu1 %v16307_v12 }
 0x72e   : > { %3820 = vmatpush1.bf16.msra.mxu1 %v14126_v41  ;;  %3851 = vmatprep.mubr.bf16.mxu1 %v18313_v17 }
 0x72f   : > { %3821 = vmatprep.subr.bf16.mxu1 %v14131_v22 }
 0x732   : > { %3822 = vmatpush1.bf16.msra.mxu1 %v14129_v1 }
 0x733   : > { %3823 = vmatprep.subr.bf16.mxu1 %v14134_v45 }
 0x736   : > { %3824 = vmatpush1.bf16.msra.mxu1 %v14132_v27 }
 0x737   : > { %3825 = vmatprep.subr.bf16.mxu1 %v14137_v14 }
 0x73a   : > { %3826 = vmatpush1.bf16.msra.mxu1 %v14135_v46 }
 0x73b   : > { %3827 = vmatprep.subr.bf16.mxu1 %v14140_v47 }
 0x73e   : > { %3828 = vmatpush1.bf16.msra.mxu1 %v14138_v50 }
 0x73f   : > { %3829 = vmatprep.subr.bf16.mxu1 %v14143_v51 }
 0x742   : > { %3830 = vmatpush1.bf16.msra.mxu1 %v14141_v52 }
 0x743   : > { %3831 = vmatprep.subr.bf16.mxu1 %v14146_v53 }
 0x746   : > { %3832 = vmatpush1.bf16.msra.mxu1 %v14144_v54 }
 0x747   : > { %3833 = vmatprep.subr.bf16.mxu1 %v14149_v55 }
 0x74a   : > { %3834 = vmatpush1.bf16.msra.mxu1 %v14147_v56 }
 0x74b   : > { %4181 = vmatprep.subr.bf16.mxu1 %v14152_v57 }
 0x74d   : > { %3852 = vmatmul.mubr.bf16.vlgmr.msra.gmra.mxu1 %v16314_v58  ;;  %v2789_v0 = vpop.f32.mrf.mxu1 }
 0x74e   : > { %4182 = vmatpush1.bf16.msra.mxu1 %v14150_v59  ;;  %4213 = vmatprep.mubr.bf16.mxu1 %v18313_v17  ;;  %v3075_v7 = vpack.c.bf16 %v2789_v0, %v2789_v0 }
 0x74f   : > { %v12427_v4 = vpop.f32.mrf.mxu1  ;;  %v2829_v5 = vpop.f32.mrf.mxu0  ;;  %4183 = vmatprep.subr.bf16.mxu1 %v14155_v62 }
 0x750   : > { %v3076_v30 = vpack.c.bf16 %v2829_v5, %v2829_v5  ;;  %v3211_v44 = vunpack.c.l.b16 %v3075_v7 }
 0x751   : > { %v2792_v31 = vpop.f32.mrf.mxu1  ;;  %v12447_v32 = vpop.f32.mrf.mxu0 }
 0x752   : > { %v3212_v35 = vunpack.c.l.b16 %v3076_v30  ;;  %4184 = vmatpush1.bf16.msra.mxu1 %v14153_v2 }
 0x753   : > { %v12428_v37 = vpop.f32.mrf.mxu1  ;;  %v2832_v38 = vpop.f32.mrf.mxu0  ;;  %4185 = vmatprep.subr.bf16.mxu1 %v14158_v6 }
 0x754   : > { %v3219_v61 = vrot.slane %v3212_v35, 7 }
 0x755   : > { %v12448_v34 = vpop.f32.mrf.mxu0 }
 0x756   : > { %v3220_v15 = vsel %vm2634_vm1, %v3219_v61, %v3211_v44  ;;  %4186 = vmatpush1.bf16.msra.mxu1 %v14156_v36 }
 0x757   : > { %4187 = vmatprep.subr.bf16.mxu1 %v14161_v43 }
 0x75a   : > { %4188 = vmatpush1.bf16.msra.mxu1 %v14159_v28 }
 0x75b   : > { %4189 = vmatprep.subr.bf16.mxu1 %v14164_v20  ;;  %v14187_v20 = vld [vmem:[#allocation6 + $0xcc] ss:$16 sps:$4 sm:$0xff]  }
 0x75e   : > { %4190 = vmatpush1.bf16.msra.mxu1 %v14162_v9  ;;  %v14185_v9 = vld [vmem:[#allocation6 + $0xc8] ss:$16 sps:$4 sm:$0xff]  }
 0x75f   : > { %4191 = vmatprep.subr.bf16.mxu1 %v14167_v21  ;;  %v14190_v21 = vld [vmem:[#allocation6 + $0xac] ss:$16 sps:$4 sm:$0xff]  }
 0x762   : > { %4192 = vmatpush1.bf16.msra.mxu1 %v14165_v3  ;;  %v14188_v3 = vld [vmem:[#allocation6 + $0xa8] ss:$16 sps:$4 sm:$0xff]  }
 0x763   : > { %4193 = vmatprep.subr.bf16.mxu1 %v14170_v60  ;;  %v14193_v60 = vld [vmem:[#allocation6 + $0x8c] ss:$16 sps:$4 sm:$0xff]  }
 0x766   : > { %4194 = vmatpush1.bf16.msra.mxu1 %v14168_v23  ;;  %v14191_v23 = vld [vmem:[#allocation6 + $0x88] ss:$16 sps:$4 sm:$0xff]  }
 0x767   : > { %4195 = vmatprep.subr.bf16.mxu1 %v14173_v13  ;;  %v14196_v13 = vld [vmem:[#allocation6 + $0x6c] ss:$16 sps:$4 sm:$0xff]  }
 0x76a   : > { %4196 = vmatpush1.bf16.msra.mxu1 %v14171_v26  ;;  %v14194_v26 = vld [vmem:[#allocation6 + $0x68] ss:$16 sps:$4 sm:$0xff]  }
 0x76d   : > { %v2869_v18 = vpop.f32.mrf.mxu1  ;;  %4214 = vmatmul.mubr.bf16.vlgmr.msra.gmra.mxu1 %v16319_v29 }
 0x76e   : > { %4455 = vmatprep.mubr.bf16.mxu1 %v18313_v17  ;;  %v3077_v16 = vpack.c.bf16 %v2869_v18, %v2869_v18  ;;  %v14197_v18 = vld [vmem:[#allocation6 + $0x48] ss:$16 sps:$4 sm:$0xff]  }
 0x76f   : > { %v12467_v40 = vpop.f32.mrf.mxu1  ;;  %v2909_v63 = vpop.f32.mrf.mxu0 }
 0x770   : > { %v3078_v46 = vpack.c.bf16 %v2909_v63, %v2909_v63  ;;  %v3213_v47 = vunpack.c.l.b16 %v3077_v16  ;;  %v14202_v40 = vld [vmem:[#allocation6 + $0x2c] ss:$16 sps:$4 sm:$0xff]   ;;  %v14215_v16 = vld [vmem:[#allocation5 + $0x88] ss:$16 sps:$4 sm:$0xff]  }
 0x771   : > { %v2872_v8 = vpop.f32.mrf.mxu1  ;;  %v12487_v24 = vpop.f32.mrf.mxu0 }
 0x772   : > { %v3214_v49 = vunpack.c.l.b16 %v3078_v46  ;;  %v3221_v51 = vrot.slane %v3213_v47, 6  ;;  %v14200_v8 = vld [vmem:[#allocation6 + $0x28] ss:$16 sps:$4 sm:$0xff]   ;;  %v14220_v46 = vld [vmem:[#allocation5 + $0x6c] ss:$16 sps:$4 sm:$0xff]  }
 0x773   : > { %v12468_v19 = vpop.f32.mrf.mxu1  ;;  %v2912_v39 = vpop.f32.mrf.mxu0  ;;  %v14218_v47 = vld [vmem:[#allocation5 + $0x68] ss:$16 sps:$4 sm:$0xff]  }
 0x774   : > { %v3223_v53 = vrot.slane %v3214_v49, 5  ;;  %v3222_v55 = vsel %vm2637_vm2, %v3221_v51, %v3220_v15  ;;  %v14182_v15 = vld [vmem:[#allocation6 + $0xe8] ss:$16 sps:$4 sm:$0xff]   ;;  %v14205_v19 = vld [vmem:[#allocation6 + $0xc] ss:$16 sps:$4 sm:$0xff]  }
 0x775   : > { %v12488_v42 = vpop.f32.mrf.mxu0  ;;  %v14226_v49 = vld [vmem:[#allocation5 + $0x2c] ss:$16 sps:$4 sm:$0xff]   ;;  %v14224_v51 = vld [vmem:[#allocation5 + $0x28] ss:$16 sps:$4 sm:$0xff]  }
 0x776   : > { %v3224_v62 = vsel %vm2640_vm3, %v3223_v53, %v3222_v55  ;;  %v14203_v42 = vld [vmem:[#allocation6 + $0x8] ss:$16 sps:$4 sm:$0xff]   ;;  %v14229_v53 = vld [vmem:[#allocation5 + $0xc] ss:$16 sps:$4 sm:$0xff]  }
 0x777   : > { %v14227_v55 = vld [vmem:[#allocation5 + $0x8] ss:$16 sps:$4 sm:$0xff]  }
 0x78d   : > { %v2949_v11 = vpop.f32.mrf.mxu1 }
 0x78e   : > { %v3079_v48 = vpack.c.bf16 %v2949_v11, %v2949_v11 }
 0x78f   : > { %v12507_v41 = vpop.f32.mrf.mxu1  ;;  %v2989_v22 = vpop.f32.mrf.mxu0 }
 0x790   : > { %v3080_v50 = vpack.c.bf16 %v2989_v22, %v2989_v22  ;;  %v3215_v52 = vunpack.c.l.b16 %v3079_v48  ;;  %v14208_v41 = vld [vmem:[#allocation5 + $0xec] ss:$16 sps:$4 sm:$0xff]   ;;  %v14206_v22 = vld [vmem:[#allocation5 + $0xe8] ss:$16 sps:$4 sm:$0xff]  }
 0x791   : > { %v2952_v1 = vpop.f32.mrf.mxu1  ;;  %v12527_v45 = vpop.f32.mrf.mxu0  ;;  %v14223_v48 = vld [vmem:[#allocation5 + $0x4c] ss:$16 sps:$4 sm:$0xff]  }
 0x792   : > { %v3216_v54 = vunpack.c.l.b16 %v3080_v50  ;;  %v3225_v56 = vrot.slane %v3215_v52, 4  ;;  %v14211_v1 = vld [vmem:[#allocation5 + $0xcc] ss:$16 sps:$4 sm:$0xff]   ;;  %v14209_v45 = vld [vmem:[#allocation5 + $0xc8] ss:$16 sps:$4 sm:$0xff]  }
 0x793   : > { %v12508_v25 = vpop.f32.mrf.mxu1  ;;  %v2992_v27 = vpop.f32.mrf.mxu0 }
 0x794   : > { %v3227_v0 = vrot.slane %v3216_v54, 3  ;;  %v3226_v5 = vsel %vm2643_vm4, %v3225_v56, %v3224_v62  ;;  %v14214_v25 = vld [vmem:[#allocation5 + $0xac] ss:$16 sps:$4 sm:$0xff]   ;;  %v14212_v27 = vld [vmem:[#allocation5 + $0xa8] ss:$16 sps:$4 sm:$0xff]  }
 0x795   : > { %v12528_v14 = vpop.f32.mrf.mxu0  ;;  %v14235_v62 = vld [vmem:[#allocation6 + $0x1cc] ss:$16 sps:$4 sm:$0xff]  }
 0x796   : > { %v3228_v36 = vsel %vm2646_vm5, %v3227_v0, %v3226_v5  ;;  %v14217_v14 = vld [vmem:[#allocation5 + $0x8c] ss:$16 sps:$4 sm:$0xff]   ;;  %v14233_v0 = vld [vmem:[#allocation6 + $0x1c8] ss:$16 sps:$4 sm:$0xff]  }
 0x797   : > { %v14241_v5 = vld [vmem:[#allocation6 + $0x18c] ss:$16 sps:$4 sm:$0xff]  }
 0x7ad   : > { %v3029_v57 = vpop.f32.mrf.mxu1 }
 0x7ae   : > { %v3081_v59 = vpack.c.bf16 %v3029_v57, %v3029_v57  ;;  %v14232_v57 = vld [vmem:[#allocation6 + $0x1ec] ss:$16 sps:$4 sm:$0xff]  }
 0x7af   : > { %v12547_v2 = vpop.f32.mrf.mxu1  ;;  %v3069_v4 = vpop.f32.mrf.mxu0 }
 0x7b0   : > { %v3217_v6 = vunpack.c.l.b16 %v3081_v59  ;;  %v3082_v7 = vpack.c.bf16 %v3069_v4, %v3069_v4  ;;  %v14230_v59 = vld [vmem:[#allocation6 + $0x1e8] ss:$16 sps:$4 sm:$0xff]   ;;  %v14238_v2 = vld [vmem:[#allocation6 + $0x1ac] ss:$16 sps:$4 sm:$0xff]  }
 0x7b1   : > { %v3032_v30 = vpop.f32.mrf.mxu1  ;;  %v12567_v31 = vpop.f32.mrf.mxu0  ;;  %v14236_v4 = vld [vmem:[#allocation6 + $0x1a8] ss:$16 sps:$4 sm:$0xff]  }
 0x7b2   : > { %v3229_v32 = vrot.slane %v3217_v6, 2  ;;  %v3218_v35 = vunpack.c.l.b16 %v3082_v7  ;;  %v14239_v6 = vld [vmem:[#allocation6 + $0x188] ss:$16 sps:$4 sm:$0xff]   ;;  %v14244_v7 = vld [vmem:[#allocation6 + $0x16c] ss:$16 sps:$4 sm:$0xff]  }
 0x7b3   : > { %v12548_v37 = vpop.f32.mrf.mxu1  ;;  %v3072_v38 = vpop.f32.mrf.mxu0  ;;  %v14242_v30 = vld [vmem:[#allocation6 + $0x168] ss:$16 sps:$4 sm:$0xff]   ;;  %v14247_v31 = vld [vmem:[#allocation6 + $0x14c] ss:$16 sps:$4 sm:$0xff]  }
 0x7b4   : > { %v3230_v43 = vsel %vm2649_vm6, %v3229_v32, %v3228_v36  ;;  %v3231_v44 = vrot.slane %v3218_v35, 1  ;;  %v14250_v32 = vld [vmem:[#allocation6 + $0x12c] ss:$16 sps:$4 sm:$0xff]   ;;  %v14248_v37 = vld [vmem:[#allocation6 + $0x128] ss:$16 sps:$4 sm:$0xff]  }
 0x7b5   : > { %v12568_v61 = vpop.f32.mrf.mxu0 }
 0x7b6   : > { %v3232_v34 = vsel %vm2652_vm7, %v3231_v44, %v3230_v43  ;;  %v14253_v43 = vld [vmem:[#allocation6 + $0x10c] ss:$16 sps:$4 sm:$0xff]  }
 0x7b7   : > { %v3233_v28 = vpack.c.b16 %v3232_v34, %v3232_v34  ;;  %v14251_v34 = vld [vmem:[#allocation6 + $0x108] ss:$16 sps:$4 sm:$0xff]  }
 0x7b9   : > { %12606 = vmatmul.mubr.bf16.vlgmr.msra.gmra.mxu0 %v3233_v28 }
 0x7ba   : > { %3619 = vmatpush1.bf16.msra.mxu0 %v14182_v15  ;;  %3650 = vmatprep.mubr.bf16.mxu0 %v18313_v17 }
 0x7bb   : > { %3620 = vmatprep.subr.bf16.mxu0 %v14187_v20 }
 0x7be   : > { %3621 = vmatpush1.bf16.msra.mxu0 %v14185_v9 }
 0x7bf   : > { %3622 = vmatprep.subr.bf16.mxu0 %v14190_v21 }
 0x7c2   : > { %3623 = vmatpush1.bf16.msra.mxu0 %v14188_v3  ;;  %v14256_v3 = vld [vmem:[#allocation5 + $0x1e4] ss:$16 sps:$4 sm:$0xff]  }
 0x7c3   : > { %3624 = vmatprep.subr.bf16.mxu0 %v14193_v60  ;;  %v14259_v60 = vld [vmem:[#allocation5 + $0x1ec] ss:$16 sps:$4 sm:$0xff]   ;;  %4423 = vmatprep.subr.bf16.mxu1 %v14256_v3 }
 0x7c6   : > { %3625 = vmatpush1.bf16.msra.mxu0 %v14191_v23  ;;  %v14254_v23 = vld [vmem:[#allocation5 + $0x1e0] ss:$16 sps:$4 sm:$0xff]  }
 0x7c7   : > { %3626 = vmatprep.subr.bf16.mxu0 %v14196_v13  ;;  %v14257_v13 = vld [vmem:[#allocation5 + $0x1e8] ss:$16 sps:$4 sm:$0xff]   ;;  %4424 = vmatpush1.bf16.msra.mxu1 %v14254_v23 }
 0x7ca   : > { %3627 = vmatpush1.bf16.msra.mxu0 %v14194_v26  ;;  %v14262_v26 = vld [vmem:[#allocation5 + $0x1c4] ss:$16 sps:$4 sm:$0xff]  }
 0x7cb   : > { %3628 = vmatprep.subr.bf16.mxu0 %v14199_v33  ;;  %v14265_v33 = vld [vmem:[#allocation5 + $0x1cc] ss:$16 sps:$4 sm:$0xff]   ;;  %4425 = vmatprep.subr.bf16.mxu1 %v14262_v26 }
 0x7cd   : > { %v16330_v63 = vpop.f32.mrf.mxu1 }
 0x7ce   : > { %3629 = vmatpush1.bf16.msra.mxu0 %v14197_v18  ;;  %v14260_v18 = vld [vmem:[#allocation5 + $0x1c0] ss:$16 sps:$4 sm:$0xff]  }
 0x7cf   : > { %v12587_v24 = vpop.f32.mrf.mxu1  ;;  %3630 = vmatprep.subr.bf16.mxu0 %v14202_v40  ;;  %4426 = vmatpush1.bf16.msra.mxu1 %v14260_v18  ;;  %v14268_v40 = vld [vmem:[#allocation5 + $0x1a4] ss:$16 sps:$4 sm:$0xff]  }
 0x7d0   : > { %v14266_v24 = vld [vmem:[#allocation5 + $0x1a0] ss:$16 sps:$4 sm:$0xff]   ;;  %4427 = vmatprep.subr.bf16.mxu1 %v14268_v40 }
 0x7d1   : > { %v3200_v39 = vpop.f32.mrf.mxu1 }
 0x7d2   : > { %3631 = vmatpush1.bf16.msra.mxu0 %v14200_v8  ;;  %v14271_v8 = vld [vmem:[#allocation5 + $0x1ac] ss:$16 sps:$4 sm:$0xff]   ;;  %v14272_v39 = vld [vmem:[#allocation5 + $0x180] ss:$16 sps:$4 sm:$0xff]  }
 0x7d3   : > { %v12588_v11 = vpop.f32.mrf.mxu1  ;;  %3632 = vmatprep.subr.bf16.mxu0 %v14205_v19  ;;  %v14269_v19 = vld [vmem:[#allocation5 + $0x1a8] ss:$16 sps:$4 sm:$0xff]   ;;  %4428 = vmatpush1.bf16.msra.mxu1 %v14266_v24 }
 0x7d4   : > { %v14275_v11 = vld [vmem:[#allocation5 + $0x188] ss:$16 sps:$4 sm:$0xff]  }
 0x7d6   : > { %3633 = vmatpush1.bf16.msra.mxu0 %v14203_v42  ;;  %v14274_v42 = vld [vmem:[#allocation5 + $0x184] ss:$16 sps:$4 sm:$0xff]  }
 0x7d7   : > { %3860 = vmatprep.subr.bf16.mxu0 %v14208_v41  ;;  %v14277_v41 = vld [vmem:[#allocation5 + $0x18c] ss:$16 sps:$4 sm:$0xff]   ;;  %4429 = vmatprep.subr.bf16.mxu1 %v14274_v42 }
 0x7d8   : > { %4430 = vmatpush1.bf16.msra.mxu1 %v14272_v39 }
 0x7d9   : > { %3651 = vmatmul.mubr.bf16.vlgmr.msra.gmra.mxu0 %v16307_v12  ;;  %v14221_v12 = vld [vmem:[#allocation5 + $0x48] ss:$16 sps:$4 sm:$0xff]  }
 0x7da   : > { %3861 = vmatpush1.bf16.msra.mxu0 %v14206_v22  ;;  %3892 = vmatprep.mubr.bf16.mxu0 %v18313_v17  ;;  %v14280_v22 = vld [vmem:[#allocation5 + $0x164] ss:$16 sps:$4 sm:$0xff]  }
 0x7db   : > { %3862 = vmatprep.subr.bf16.mxu0 %v14211_v1  ;;  %v14283_v1 = vld [vmem:[#allocation5 + $0x16c] ss:$16 sps:$4 sm:$0xff]   ;;  %4431 = vmatprep.subr.bf16.mxu1 %v14280_v22 }
 0x7de   : > { %3863 = vmatpush1.bf16.msra.mxu0 %v14209_v45  ;;  %v14278_v45 = vld [vmem:[#allocation5 + $0x160] ss:$16 sps:$4 sm:$0xff]  }
 0x7df   : > { %3864 = vmatprep.subr.bf16.mxu0 %v14214_v25  ;;  %v14281_v25 = vld [vmem:[#allocation5 + $0x168] ss:$16 sps:$4 sm:$0xff]   ;;  %4432 = vmatpush1.bf16.msra.mxu1 %v14278_v45 }
 0x7e2   : > { %3865 = vmatpush1.bf16.msra.mxu0 %v14212_v27  ;;  %v14286_v27 = vld [vmem:[#allocation5 + $0x144] ss:$16 sps:$4 sm:$0xff]  }
 0x7e3   : > { %3866 = vmatprep.subr.bf16.mxu0 %v14217_v14  ;;  %v14289_v14 = vld [vmem:[#allocation5 + $0x14c] ss:$16 sps:$4 sm:$0xff]   ;;  %4433 = vmatprep.subr.bf16.mxu1 %v14286_v27 }
 0x7e6   : > { %3867 = vmatpush1.bf16.msra.mxu0 %v14215_v16  ;;  %v14284_v16 = vld [vmem:[#allocation5 + $0x140] ss:$16 sps:$4 sm:$0xff]  }
 0x7e7   : > { %3868 = vmatprep.subr.bf16.mxu0 %v14220_v46  ;;  %v14287_v46 = vld [vmem:[#allocation5 + $0x148] ss:$16 sps:$4 sm:$0xff]   ;;  %4434 = vmatpush1.bf16.msra.mxu1 %v14284_v16 }
 0x7ea   : > { %3869 = vmatpush1.bf16.msra.mxu0 %v14218_v47  ;;  %v14292_v47 = vld [vmem:[#allocation5 + $0x124] ss:$16 sps:$4 sm:$0xff]  }
 0x7eb   : > { %3870 = vmatprep.subr.bf16.mxu0 %v14223_v48  ;;  %v14295_v48 = vld [vmem:[#allocation5 + $0x12c] ss:$16 sps:$4 sm:$0xff]   ;;  %4435 = vmatprep.subr.bf16.mxu1 %v14292_v47 }
 0x7ed   : > { %v3611_v50 = vpop.f32.mrf.mxu1 }
 0x7ee   : > { %3871 = vmatpush1.bf16.msra.mxu0 %v14221_v12  ;;  %v14290_v12 = vld [vmem:[#allocation5 + $0x120] ss:$16 sps:$4 sm:$0xff]  }
 0x7ef   : > { %v3613_v52 = vpop.f32.mrf.mxu1  ;;  %3872 = vmatprep.subr.bf16.mxu0 %v14226_v49  ;;  %v14293_v49 = vld [vmem:[#allocation5 + $0x128] ss:$16 sps:$4 sm:$0xff]   ;;  %4436 = vmatpush1.bf16.msra.mxu1 %v14290_v12  ;;  %v16368_v12 = vld [vmem:[#allocation4 + $0x30] sm:$0xff]  }
 0x7f1   : > { %v3615_v54 = vpop.f32.mrf.mxu1 }
 0x7f2   : > { %3873 = vmatpush1.bf16.msra.mxu0 %v14224_v51  ;;  %v14301_v51 = vld [vmem:[#allocation5 + $0x10c] ss:$16 sps:$4 sm:$0xff]  }
 0x7f3   : > { %v3616_v56 = vpop.f32.mrf.mxu1  ;;  %3874 = vmatprep.subr.bf16.mxu0 %v14229_v53  ;;  %v14299_v53 = vld [vmem:[#allocation5 + $0x108] ss:$16 sps:$4 sm:$0xff]  }
 0x7f6   : > { %3875 = vmatpush1.bf16.msra.mxu0 %v14227_v55 }
 0x7f7   : > { %4222 = vmatprep.subr.bf16.mxu0 %v14232_v57 }
 0x7f9   : > { %3893 = vmatmul.mubr.bf16.vlgmr.msra.gmra.mxu0 %v16314_v58  ;;  %v14245_v58 = vld [vmem:[#allocation6 + $0x148] ss:$16 sps:$4 sm:$0xff]  }
 0x7fa   : > { %4223 = vmatpush1.bf16.msra.mxu0 %v14230_v59  ;;  %4254 = vmatprep.mubr.bf16.mxu0 %v18313_v17 }
 0x7fb   : > { %4224 = vmatprep.subr.bf16.mxu0 %v14235_v62 }
 0x7fe   : > { %4225 = vmatpush1.bf16.msra.mxu0 %v14233_v0 }
 0x7ff   : > { %4226 = vmatprep.subr.bf16.mxu0 %v14238_v2  ;;  %v3901_v2 = vld [vmem:[#allocation7] sm:$0xf] }
 0x802   : > { %4227 = vmatpush1.bf16.msra.mxu0 %v14236_v4 }
 0x803   : > { %4228 = vmatprep.subr.bf16.mxu0 %v14241_v5  ;;  %v18314_v5 = vld [vmem:[#allocation68_spill] sm:$0xff] }
 0x806   : > { %4229 = vmatpush1.bf16.msra.mxu0 %v14239_v6  ;;  %v3910_v6 = vrot.slane %v3901_v2, %v18314_v5 }
 0x807   : > { %4230 = vmatprep.subr.bf16.mxu0 %v14244_v7  ;;  %v18315_v7 = vld [vmem:[#allocation67_spill] sm:$0xff] }
 0x80a   : > { %4231 = vmatpush1.bf16.msra.mxu0 %v14242_v30  ;;  %v3906_v30 = vrot.slane %v3901_v2, %v18315_v7 }
 0x80b   : > { %4232 = vmatprep.subr.bf16.mxu0 %v14247_v31 }
 0x80d   : > { %v3853_v35 = vpop.f32.mrf.mxu1 }
 0x80e   : > { %v16336_v36 = vadd.f32 %v3853_v35, %v3611_v50  ;;  %4233 = vmatpush1.bf16.msra.mxu0 %v14245_v58  ;;  %v14298_v50 = vld [vmem:[#allocation5 + $0x104] ss:$16 sps:$4 sm:$0xff]  }
 0x80f   : > { %v3855_v38 = vpop.f32.mrf.mxu1  ;;  %4234 = vmatprep.subr.bf16.mxu0 %v14250_v32  ;;  %4437 = vmatprep.subr.bf16.mxu1 %v14298_v50  ;;  %v16376_v50 = vld [vmem:[#allocation4 + $0x20] sm:$0xff]  }
 0x810   : > { %v16338_v44 = vadd.f32 %v3855_v38, %v3613_v52  ;;  %v14296_v52 = vld [vmem:[#allocation5 + $0x100] ss:$16 sps:$4 sm:$0xff]   ;;  %v3923_v35 = vadd.f32 %v3906_v30, %v16336_v36 }
 0x811   : > { %v3857_v61 = vpop.f32.mrf.mxu1  ;;  %4438 = vmatpush1.bf16.msra.mxu1 %v14296_v52  ;;  %v16384_v52 = vld [vmem:[#allocation4 + $0x10] sm:$0xff]  }
 0x812   : > { %4235 = vmatpush1.bf16.msra.mxu0 %v14248_v37  ;;  %12609 = vmatprep.subr.bf16.mxu1 %v18296_v10  ;;  %v3924_v32 = vadd.f32 %v3910_v6, %v16338_v44  ;;  %v11111_v37 = vmul.f32 -1.442695, %v3923_v35  ;;  %v4505_v6 = vld [vmem:[#allocation7 + $0x4] sm:$0xf] }
 0x813   : > { %4236 = vmatprep.subr.bf16.mxu0 %v14253_v43  ;;  %v3858_v15 = vpop.f32.mrf.mxu1  ;;  %v4510_v30 = vrot.slane %v4505_v6, %v18315_v7  ;;  %v4514_v35 = vrot.slane %v4505_v6, %v18314_v5  ;;  %v16636_v7 = vld [vmem:[#allocation4 + $0x1d8] sm:$0xff]   ;;  %v16640_v5 = vld [vmem:[#allocation4 + $0x190] sm:$0xff]  }
 0x814   : > { %18329 = vst [vmem:[#allocation83_spill] sm:$0xff] %v16636_v7  ;;  %18330 = vst [vmem:[#allocation84_spill] sm:$0xff] %v16640_v5 }
 0x816   : > { %4237 = vmatpush1.bf16.msra.mxu0 %v14251_v34  ;;  %v18316_v34 = vld [vmem:[#allocation70_spill] sm:$0xff] }
 0x817   : > { %4464 = vmatprep.subr.bf16.mxu0 %v14259_v60  ;;  %v3914_v15 = vrot.slane %v3901_v2, %v18316_v34  ;;  %v18317_v60 = vld [vmem:[#allocation69_spill] sm:$0xff] }
 0x818   : > { %v3918_v23 = vrot.slane %v3901_v2, %v18317_v60  ;;  %v14308_v2 = vld [vmem:[#allocation8 + $0x8] sm:$0xff]  }
 0x819   : > { %4255 = vmatmul.mubr.bf16.vlgmr.msra.gmra.mxu0 %v16319_v29  ;;  %v14263_v29 = vld [vmem:[#allocation5 + $0x1c8] ss:$16 sps:$4 sm:$0xff]  }
 0x81a   : > { %4496 = vmatprep.mubr.bf16.mxu0 %v18313_v17  ;;  %4465 = vmatpush1.bf16.msra.mxu0 %v14257_v13  ;;  %v16644_v17 = vld [vmem:[#allocation4 + $0x1d0] sm:$0xff]  }
 0x81b   : > { %4466 = vmatprep.subr.bf16.mxu0 %v14265_v33  ;;  %18331 = vst [vmem:[#allocation85_spill] sm:$0xff] %v16644_v17 }
 0x81e   : > { %4467 = vmatpush1.bf16.msra.mxu0 %v14263_v29 }
 0x81f   : > { %4468 = vmatprep.subr.bf16.mxu0 %v14271_v8 }
 0x822   : > { %4469 = vmatpush1.bf16.msra.mxu0 %v14269_v19  ;;  %v3946_v19 = vld [vmem:[#allocation3] sm:$0xff] }
 0x823   : > { %4470 = vmatprep.subr.bf16.mxu0 %v14277_v41 }
 0x826   : > { %4471 = vmatpush1.bf16.msra.mxu0 %v14275_v11 }
 0x827   : > { %4472 = vmatprep.subr.bf16.mxu0 %v14283_v1 }
 0x82a   : > { %4473 = vmatpush1.bf16.msra.mxu0 %v14281_v25 }
 0x82b   : > { %4474 = vmatprep.subr.bf16.mxu0 %v14289_v14 }
 0x82d   : > { %v16342_v28 = vpop.f32.mrf.mxu1 }
 0x82e   : > { %4475 = vmatpush1.bf16.msra.mxu0 %v14287_v46 }
 0x82f   : > { %v16344_v20 = vpop.f32.mrf.mxu1  ;;  %4476 = vmatprep.subr.bf16.mxu0 %v14295_v48  ;;  %v16362_v48 = vld [vmem:[#allocation4 + $0x38] sm:$0xff]  }
 0x831   : > { %v4219_v9 = vpop.f32.mrf.mxu1 }
 0x832   : > { %4477 = vmatpush1.bf16.msra.mxu0 %v14293_v49  ;;  %v16372_v49 = vld [vmem:[#allocation4 + $0x28] sm:$0xff]  }
 0x833   : > { %v4220_v21 = vpop.f32.mrf.mxu1  ;;  %4478 = vmatprep.subr.bf16.mxu0 %v14301_v51  ;;  %v16380_v51 = vld [vmem:[#allocation4 + $0x18] sm:$0xff]  }
 0x836   : > { %4479 = vmatpush1.bf16.msra.mxu0 %v14299_v53  ;;  %v16388_v53 = vld [vmem:[#allocation4 + $0x8] sm:$0xff]  }
 0x837   : > { %12629 = vmatprep.subr.bf16.mxu0 %v18296_v10 }
 0x879   : > { %v3317_v54 = vpop.f32.mrf.mxu0 }
 0x87a   : > { %v3318_v55 = vadd.f32 %v3317_v54, %v16330_v63  ;;  %v11112_v63 = vmul.f32 -1.442695, %v3924_v32  ;;  %v16392_v54 = vld [vmem:[#allocation4] sm:$0xff]  }
 0x87b   : > { %v12607_v56 = vpop.f32.mrf.mxu0 }
 0x87c   : > { %14808 = vtanh.f32 %v3318_v55  ;;  %v14302_v55 = vld [vmem:[#allocation8 + $0x38] sm:$0xff]   ;;  %v14303_v56 = vld [vmem:[#allocation8 + $0x30] sm:$0xff]  }
 0x87d   : > { %v3320_v57 = vpop.f32.mrf.mxu0  ;;  %14810 = vpow2.f32 %v11112_v63 }
 0x87e   : > { %14812 = vpow2.f32 %v11111_v37  ;;  %v14304_v57 = vld [vmem:[#allocation8 + $0x28] sm:$0xff]  }
 0x87f   : > { %v12608_v59 = vpop.f32.mrf.mxu0 }
 0x880   : > { %v14305_v59 = vld [vmem:[#allocation8 + $0x20] sm:$0xff]  }
 0x889   : > { %v14809_v62 = vpop.eup %14808 }
 0x88a   : > { %3324 = vst [vmem:[%s15719_s27] sm:$0xff] %v14809_v62  ;;  %v14811_v38 = vpop.eup %14810  ;;  %v14306_v62 = vld [vmem:[#allocation8 + $0x18] sm:$0xff]  }
 0x88b   : > { %v14813_v43 = vpop.eup %14812  ;;  %v3936_v61 = vadd.f32 1.0, %v14811_v38 }
 0x88c   : > { %v3930_v9 = vadd.f32 1.0, %v14813_v43 }
 0x88d   : > { %14814 = vrcp.f32 %v3936_v61 }
 0x88e   : > { %14816 = vrcp.f32 %v3930_v9 }
 0x899   : > { %v3652_v0 = vpop.f32.mrf.mxu0 }
 0x89a   : > { %v14815_v40 = vpop.eup %14814 }
 0x89b   : > { %v3654_v4 = vpop.f32.mrf.mxu0  ;;  %v14817_v8 = vpop.eup %14816  ;;  %v3947_v39 = vmul.f32 %v14815_v40, %v3946_v19 }
 0x89d   : > { %v3656_v31 = vpop.f32.mrf.mxu0 }
 0x89f   : > { %v3657_v58 = vpop.f32.mrf.mxu0 }
 0x8b9   : > { %v3894_v21 = vpop.f32.mrf.mxu0 }
 0x8ba   : > { %v3895_v3 = vadd.f32 %v3894_v21, %v3652_v0  ;;  %v14307_v0 = vld [vmem:[#allocation8 + $0x10] sm:$0xff]  }
 0x8bb   : > { %v3896_v13 = vpop.f32.mrf.mxu0 }
 0x8bc   : > { %v3925_v26 = vadd.f32 %v3914_v15, %v3895_v3  ;;  %v3897_v44 = vadd.f32 %v3896_v13, %v3654_v4  ;;  %v14309_v4 = vld [vmem:[#allocation8] sm:$0xff]  }
 0x8bd   : > { %v3898_v36 = vpop.f32.mrf.mxu0 }
 0x8be   : > { %14818 = vtanh.f32 %v3925_v26  ;;  %v3926_v33 = vadd.f32 %v3918_v23, %v3897_v44 }
 0x8bf   : > { %v3899_v18 = vpop.f32.mrf.mxu0 }
 0x8c0   : > { %v11113_v29 = vmul.f32 -1.442695, %v3926_v33  ;;  %v4518_v33 = vrot.slane %v4505_v6, %v18316_v34  ;;  %v16632_v34 = vld [vmem:[#allocation4 + $0x198] sm:$0xff]  }
 0x8c1   : > { %18328 = vst [vmem:[#allocation82_spill] sm:$0xff] %v16632_v34 }
 0x8c2   : > { %14820 = vpow2.f32 %v11113_v29 }
 0x8cb   : > { %v14819_v24 = vpop.eup %14818 }
 0x8cc   : > { %v3948_v42 = vmul.f32 %v14819_v24, %v14817_v8 }
 0x8ce   : > { %v3949_v11 = vadd.f32 %v3948_v42, %v3947_v39 }
 0x8cf   : > { %v14821_v41 = vpop.eup %14820 }
 0x8d0   : > { %3952 = vst [vmem:[#allocation3] sm:$0xff] %v3949_v11  ;;  %v3943_v22 = vadd.f32 1.0, %v14821_v41  ;;  %14822 = vtanh.f32 %v3949_v11  ;;  %v4550_v41 = vld [vmem:[#allocation3 + $0x8] sm:$0xff] }
 0x8d2   : > { %14824 = vrcp.f32 %v3943_v22 }
 0x8d9   : > { %v16356_v1 = vpop.f32.mrf.mxu0 }
 0x8db   : > { %v16358_v45 = vpop.f32.mrf.mxu0 }
 0x8dd   : > { %v4260_v25 = vpop.f32.mrf.mxu0  ;;  %v14823_v27 = vpop.eup %14822 }
 0x8df   : > { %v14825_v14 = vpop.eup %14824  ;;  %v4261_v16 = vpop.f32.mrf.mxu0 }
 0x8e0   : > { %v3951_v46 = vmul.f32 %v14825_v14, %v14823_v27 }
 0x8e2   : > { %3953 = vst [vmem:[#allocation2] sm:$0xff] %v3951_v46  ;;  %v3954_v47 = vpack.c.bf16 %v3951_v46, %v3951_v46 }
 0x8e4   : > { %4456 = vmatmul.mubr.bf16.vlgmr.msra.gmra.mxu1 %v3954_v47  ;;  %4497 = vmatmul.mubr.bf16.vlgmr.msra.gmra.mxu0 %v3954_v47  ;;  %v16415_v47 = vld [vmem:[#allocation4 + $0x78] sm:$0xff]  }
 0x8e5   : > { %12625 = vmatprep.mubr.msk.bf16.mxu1 %vm15529_vm0, %v18296_v10  ;;  %12630 = vmatpush3.bf16.xpose.msra.mxu0 %v16362_v48 }
 0x8e6   : > { %12631 = vmatprep.subr.bf16.mxu0 %v18296_v10  ;;  %12645 = vmatprep.mubr.msk.bf16.mxu0 %vm15529_vm0, %v18296_v10 }
 0x8e7   : > { %12610 = vmatpush3.bf16.msra.mxu1 %v14302_v55  ;;  %v16421_v55 = vld [vmem:[#allocation4 + $0x70] sm:$0xff]  }
 0x8e8   : > { %12611 = vmatprep.subr.bf16.mxu1 %v18296_v10 }
 0x8eb   : > { %12612 = vmatpush3.bf16.msra.mxu1 %v14303_v56  ;;  %v16425_v56 = vld [vmem:[#allocation4 + $0x68] sm:$0xff]  }
 0x8ec   : > { %12613 = vmatprep.subr.bf16.mxu1 %v18296_v10 }
 0x8ed   : > { %12632 = vmatpush3.bf16.xpose.msra.mxu0 %v16368_v12 }
 0x8ee   : > { %12633 = vmatprep.subr.bf16.mxu0 %v18296_v10 }
 0x8ef   : > { %12614 = vmatpush3.bf16.msra.mxu1 %v14304_v57  ;;  %v16429_v57 = vld [vmem:[#allocation4 + $0x60] sm:$0xff]  }
 0x8f0   : > { %12615 = vmatprep.subr.bf16.mxu1 %v18296_v10 }
 0x8f3   : > { %12616 = vmatpush3.bf16.msra.mxu1 %v14305_v59  ;;  %v16433_v59 = vld [vmem:[#allocation4 + $0x58] sm:$0xff]  }
 0x8f4   : > { %12617 = vmatprep.subr.bf16.mxu1 %v18296_v10 }
 0x8f5   : > { %12634 = vmatpush3.bf16.xpose.msra.mxu0 %v16372_v49 }
 0x8f6   : > { %12635 = vmatprep.subr.bf16.mxu0 %v18296_v10 }
 0x8f7   : > { %12618 = vmatpush3.bf16.msra.mxu1 %v14306_v62  ;;  %v16437_v62 = vld [vmem:[#allocation4 + $0x50] sm:$0xff]  }
 0x8f8   : > { %12619 = vmatprep.subr.bf16.mxu1 %v18296_v10 }
 0x8fb   : > { %12620 = vmatpush3.bf16.msra.mxu1 %v14307_v0  ;;  %v16441_v0 = vld [vmem:[#allocation4 + $0x48] sm:$0xff]  }
 0x8fc   : > { %12621 = vmatprep.subr.bf16.mxu1 %v18296_v10 }
 0x8fd   : > { %12636 = vmatpush3.bf16.xpose.msra.mxu0 %v16376_v50 }
 0x8fe   : > { %12637 = vmatprep.subr.bf16.mxu0 %v18296_v10 }
 0x8ff   : > { %12622 = vmatpush3.bf16.msra.mxu1 %v14308_v2  ;;  %v16445_v2 = vld [vmem:[#allocation4 + $0x40] sm:$0xff]  }
 0x900   : > { %12623 = vmatprep.subr.bf16.mxu1 %v18296_v10 }
 0x903   : > { %12624 = vmatpush3.bf16.msra.mxu1 %v14309_v4 }
 0x904   : > { %12649 = vmatprep.subr.bf16.mxu1 %v18296_v10 }
 0x905   : > { %12638 = vmatpush3.bf16.xpose.msra.mxu0 %v16380_v51 }
 0x906   : > { %12639 = vmatprep.subr.bf16.mxu0 %v18296_v10 }
 0x90d   : > { %12640 = vmatpush3.bf16.xpose.msra.mxu0 %v16384_v52 }
 0x90e   : > { %12641 = vmatprep.subr.bf16.mxu0 %v18296_v10 }
 0x915   : > { %12642 = vmatpush3.bf16.xpose.msra.mxu0 %v16388_v53 }
 0x916   : > { %12643 = vmatprep.subr.bf16.mxu0 %v18296_v10 }
 0x91d   : > { %12644 = vmatpush3.bf16.xpose.msra.mxu0 %v16392_v54 }
 0x91e   : > { %12669 = vmatprep.subr.bf16.mxu0 %v18296_v10 }
 0x9a4   : > { %v4457_v31 = vpop.f32.mrf.mxu1  ;;  %v4498_v58 = vpop.f32.mrf.mxu0 }
 0x9a5   : > { %v4458_v32 = vadd.f32 %v4457_v31, %v16342_v28  ;;  %v4522_v28 = vrot.slane %v4505_v6, %v18317_v60  ;;  %v4499_v36 = vadd.f32 %v4498_v58, %v16356_v1  ;;  %v18319_v6 = vld [vmem:[#allocation72_spill] sm:$0xff]  ;;  %v16628_v60 = vld [vmem:[#allocation4 + $0x1e0] sm:$0xff]  }
 0x9a6   : > { %v4459_v63 = vpop.f32.mrf.mxu1  ;;  %v4500_v37 = vpop.f32.mrf.mxu0  ;;  %18327 = vst [vmem:[#allocation81_spill] sm:$0xff] %v16628_v60 }
 0x9a7   : > { %v4527_v38 = vadd.f32 %v4510_v30, %v4458_v32  ;;  %v4460_v43 = vadd.f32 %v4459_v63, %v16344_v20  ;;  %v4501_v26 = vadd.f32 %v4500_v37, %v16358_v45  ;;  %v4529_v29 = vadd.f32 %v4518_v33, %v4499_v36  ;;  %v16499_v36 = vld [vmem:[#allocation4 + $0x90] sm:$0xff]  }
 0x9a8   : > { %v4461_v61 = vpop.f32.mrf.mxu1  ;;  %v4502_v15 = vpop.f32.mrf.mxu0  ;;  %v16503_v33 = vld [vmem:[#allocation4 + $0xd0] sm:$0xff]  }
 0x9a9   : > { %v11178_v9 = vmul.f32 -1.442695, %v4527_v38  ;;  %v4528_v21 = vadd.f32 %v4514_v35, %v4460_v43  ;;  %v4530_v44 = vadd.f32 %v4522_v28, %v4501_v26  ;;  %v16455_v61 = vld [vmem:[#allocation4 + $0xb8] sm:$0xff]   ;;  %v16487_v26 = vld [vmem:[#allocation4 + $0xe0] sm:$0xff]  }
 0x9aa   : > { %v4462_v3 = vpop.f32.mrf.mxu1  ;;  %v4503_v23 = vpop.f32.mrf.mxu0  ;;  %v16461_v15 = vld [vmem:[#allocation4 + $0xf8] sm:$0xff]  }
 0x9ab   : > { %14826 = vpow2.f32 %v11178_v9  ;;  %v11179_v13 = vmul.f32 -1.442695, %v4528_v21  ;;  %v11180_v18 = vmul.f32 -1.442695, %v4530_v44  ;;  %v16467_v9 = vld [vmem:[#allocation4 + $0xb0] sm:$0xff]   ;;  %v16475_v3 = vld [vmem:[#allocation4 + $0xa8] sm:$0xff]  }
 0x9ac   : > { %v16471_v21 = vld [vmem:[#allocation4 + $0xf0] sm:$0xff]   ;;  %v16479_v23 = vld [vmem:[#allocation4 + $0xe8] sm:$0xff]   ;;  %v16491_v28 = vld [vmem:[#allocation4 + $0x98] sm:$0xff]  }
 0x9ad   : > { %14828 = vpow2.f32 %v11179_v13  ;;  %v16483_v13 = vld [vmem:[#allocation4 + $0xa0] sm:$0xff]   ;;  %v16495_v44 = vld [vmem:[#allocation4 + $0xd8] sm:$0xff]  }
 0x9ae   : > { %14830 = vpow2.f32 %v11180_v18  ;;  %v16507_v18 = vld [vmem:[#allocation4 + $0x88] sm:$0xff]  }
 0x9b8   : > { %v14827_v20 = vpop.eup %14826 }
 0x9b9   : > { %v4534_v40 = vadd.f32 1.0, %v14827_v20  ;;  %v16511_v20 = vld [vmem:[#allocation4 + $0xc8] sm:$0xff]  }
 0x9ba   : > { %v14829_v8 = vpop.eup %14828 }
 0x9bb   : > { %14832 = vrcp.f32 %v4534_v40  ;;  %v4540_v24 = vadd.f32 1.0, %v14829_v8  ;;  %v14831_v19 = vpop.eup %14830  ;;  %v16519_v8 = vld [vmem:[#allocation4 + $0xc0] sm:$0xff]  }
 0x9bc   : > { %14834 = vtanh.f32 %v4529_v29  ;;  %v4547_v22 = vadd.f32 1.0, %v14831_v19  ;;  %v16515_v29 = vld [vmem:[#allocation4 + $0x80] sm:$0xff]  }
 0x9bd   : > { %14836 = vrcp.f32 %v4540_v24 }
 0x9be   : > { %14838 = vrcp.f32 %v4547_v22  ;;  %v16539_v22 = vld [vmem:[#allocation4 + $0x170] sm:$0xff]  }
 0x9c8   : > { %v14833_v39 = vpop.eup %14832 }
 0x9c9   : > { %v14835_v42 = vpop.eup %14834 }
 0x9ca   : > { %v14837_v11 = vpop.eup %14836  ;;  %v4552_v45 = vmul.f32 %v14835_v42, %v14833_v39  ;;  %v16523_v42 = vld [vmem:[#allocation4 + $0x138] sm:$0xff]  }
 0x9cb   : > { %v4551_v1 = vmul.f32 %v14837_v11, %v4550_v41  ;;  %v14839_v27 = vpop.eup %14838  ;;  %v16529_v11 = vld [vmem:[#allocation4 + $0x178] sm:$0xff]   ;;  %v16535_v41 = vld [vmem:[#allocation4 + $0x130] sm:$0xff]  }
 0x9cd   : > { %v4553_v25 = vadd.f32 %v4552_v45, %v4551_v1  ;;  %v16543_v45 = vld [vmem:[#allocation4 + $0x128] sm:$0xff]  }
 0x9ce   : > { %v16547_v1 = vld [vmem:[#allocation4 + $0x168] sm:$0xff]  }
 0x9cf   : > { %4556 = vst [vmem:[#allocation3 + $0x8] sm:$0xff] %v4553_v25  ;;  %14840 = vtanh.f32 %v4553_v25  ;;  %v16551_v25 = vld [vmem:[#allocation4 + $0x120] sm:$0xff]  }
 0x9dc   : > { %v14841_v14 = vpop.eup %14840 }
 0x9dd   : > { %v4555_v16 = vmul.f32 %v14841_v14, %v14839_v27  ;;  %v16555_v27 = vld [vmem:[#allocation4 + $0x160] sm:$0xff]   ;;  %v16559_v14 = vld [vmem:[#allocation4 + $0x118] sm:$0xff]  }
 0x9df   : > { %4557 = vst [vmem:[#allocation2 + $0x8] sm:$0xff] %v4555_v16  ;;  %v16412_v46 = vpack.c.bf16 %v4555_v16, %v4555_v16  ;;  %v16563_v16 = vld [vmem:[#allocation4 + $0x158] sm:$0xff]  }
 0x9e1   : > { %18318 = vst [vmem:[#allocation73_spill] sm:$0xff] %v16412_v46  ;;  %12626 = vmatmul.mubr.bf16.vlgmr.msra.gmra.mxu1 %v16412_v46  ;;  %v16648_v46 = vld [vmem:[#allocation4 + $0x188] sm:$0xff]  }
 0x9e2   : > { %12650 = vmatpush3.bf16.xpose.msra.mxu1 %v16415_v47  ;;  %12665 = vmatprep.mubr.msk.bf16.mxu1 %vm15529_vm0, %v18296_v10  ;;  %18332 = vst [vmem:[#allocation86_spill] sm:$0xff] %v16648_v46 }
 0x9e3   : > { %12651 = vmatprep.subr.bf16.mxu1 %v18296_v10 }
 0x9ea   : > { %12652 = vmatpush3.bf16.xpose.msra.mxu1 %v16421_v55 }
 0x9eb   : > { %12653 = vmatprep.subr.bf16.mxu1 %v18296_v10 }
 0x9f2   : > { %12654 = vmatpush3.bf16.xpose.msra.mxu1 %v16425_v56 }
 0x9f3   : > { %12655 = vmatprep.subr.bf16.mxu1 %v18296_v10 }
 0x9fa   : > { %12656 = vmatpush3.bf16.xpose.msra.mxu1 %v16429_v57 }
 0x9fb   : > { %12657 = vmatprep.subr.bf16.mxu1 %v18296_v10 }
 0xa02   : > { %12658 = vmatpush3.bf16.xpose.msra.mxu1 %v16433_v59 }
 0xa03   : > { %12659 = vmatprep.subr.bf16.mxu1 %v18296_v10 }
 0xa0a   : > { %12660 = vmatpush3.bf16.xpose.msra.mxu1 %v16437_v62 }
 0xa0b   : > { %12661 = vmatprep.subr.bf16.mxu1 %v18296_v10 }
 0xa12   : > { %12662 = vmatpush3.bf16.xpose.msra.mxu1 %v16441_v0 }
 0xa13   : > { %12663 = vmatprep.subr.bf16.mxu1 %v18296_v10 }
 0xa1a   : > { %12664 = vmatpush3.bf16.xpose.msra.mxu1 %v16445_v2 }
 0xa1b   : > { %12689 = vmatprep.subr.bf16.mxu1 %v18296_v10 }
 0xaa1   : > { %v16449_v4 = vpop.f32.mrf.mxu1 }
 0xaa2   : > { %v4671_v30 = vrot.slane %v16449_v4, %v18319_v6 }
 0xaa3   : > { %v12627_v31 = vpop.f32.mrf.mxu1 }
 0xaa4   : > { %v4679_v58 = vcombine.high %v4671_v30, %v4671_v30  ;;  %v4687_v32 = vrot.slane %v4671_v30, %v18319_v6  ;;  %v16567_v30 = vld [vmem:[#allocation4 + $0x110] sm:$0xff]  }
 0xaa5   : > { %v4660_v35 = vpop.f32.mrf.mxu1  ;;  %v16571_v31 = vld [vmem:[#allocation4 + $0x150] sm:$0xff]  }
 0xaa6   : > { %v4701_v63 = vrot.slane %v4679_v58, %v18319_v6  ;;  %v4721_v37 = vpack.c.bf16 %v4687_v32, %v4687_v32  ;;  %v4709_v40 = vcombine.high %v4687_v32, %v4687_v32  ;;  %v4664_v58 = vcombine.high %v16449_v4, %v16449_v4  ;;  %v16577_v32 = vld [vmem:[#allocation4 + $0x108] sm:$0xff]  }
 0xaa7   : > { %v12628_v38 = vpop.f32.mrf.mxu1  ;;  %v16581_v35 = vld [vmem:[#allocation4 + $0x148] sm:$0xff]  }
 0xaa8   : > { %12646 = vmatmul.mubr.bf16.vlgmr.msra.gmra.mxu0 %v4721_v37  ;;  %v4722_v43 = vpack.c.bf16 %v4701_v63, %v4701_v63  ;;  %v4711_v24 = vcombine.high %v4701_v63, %v4701_v63  ;;  %v4723_v19 = vpack.c.bf16 %v4709_v40, %v4709_v40  ;;  %v4678_v63 = vrot.slane %v4664_v58, %v18319_v6  ;;  %v16586_v38 = vld [vmem:[#allocation4 + $0x100] sm:$0xff]   ;;  %v16602_v58 = vld [vmem:[#allocation4 + $0x1f8] sm:$0xff]  }
 0xaa9   : > { %12670 = vmatpush3.bf16.xpose.msra.mxu0 %v16455_v61  ;;  %12685 = vmatprep.mubr.msk.bf16.mxu0 %vm15529_vm0, %v18296_v10  ;;  %18321 = vst [vmem:[#allocation75_spill] sm:$0xff] %v16602_v58 }
 0xaaa   : > { %12666 = vmatmul.mubr.bf16.vlgmr.msra.gmra.mxu1 %v4722_v43  ;;  %12671 = vmatprep.subr.bf16.mxu0 %v18296_v10  ;;  %v4724_v39 = vpack.c.bf16 %v4711_v24, %v4711_v24  ;;  %v4680_v37 = vcombine.high %v4678_v63, %v4678_v63  ;;  %v4694_v4 = vrot.slane %v4678_v63, %v18319_v6  ;;  %v16591_v43 = vld [vmem:[#allocation4 + $0x140] sm:$0xff]   ;;  %v16608_v63 = vld [vmem:[#allocation4 + $0x1b0] sm:$0xff]  }
 0xaab   : > { %12690 = vmatpush3.bf16.xpose.msra.mxu1 %v16461_v15  ;;  %12705 = vmatprep.mubr.msk.bf16.mxu1 %vm15529_vm0, %v18296_v10  ;;  %18322 = vst [vmem:[#allocation76_spill] sm:$0xff] %v16608_v63 }
 0xaac   : > { %12691 = vmatprep.subr.bf16.mxu1 %v18296_v10  ;;  %v4708_v40 = vrot.slane %v4680_v37, %v18319_v6  ;;  %v4725_v24 = vpack.c.bf16 %v4694_v4, %v4694_v4  ;;  %v16612_v37 = vld [vmem:[#allocation4 + $0x1f0] sm:$0xff]   ;;  %v16624_v6 = vld [vmem:[#allocation4 + $0x1a0] sm:$0xff]  }
 0xaad   : > { %18323 = vst [vmem:[#allocation77_spill] sm:$0xff] %v16612_v37  ;;  %18326 = vst [vmem:[#allocation80_spill] sm:$0xff] %v16624_v6 }
 0xab1   : > { %12672 = vmatpush3.bf16.xpose.msra.mxu0 %v16467_v9 }
 0xab2   : > { %12673 = vmatprep.subr.bf16.mxu0 %v18296_v10 }
 0xab3   : > { %12692 = vmatpush3.bf16.xpose.msra.mxu1 %v16471_v21 }
 0xab4   : > { %12693 = vmatprep.subr.bf16.mxu1 %v18296_v10 }
 0xab9   : > { %12674 = vmatpush3.bf16.xpose.msra.mxu0 %v16475_v3 }
 0xaba   : > { %12675 = vmatprep.subr.bf16.mxu0 %v18296_v10 }
 0xabb   : > { %12694 = vmatpush3.bf16.xpose.msra.mxu1 %v16479_v23 }
 0xabc   : > { %12695 = vmatprep.subr.bf16.mxu1 %v18296_v10 }
 0xac1   : > { %12676 = vmatpush3.bf16.xpose.msra.mxu0 %v16483_v13 }
 0xac2   : > { %12677 = vmatprep.subr.bf16.mxu0 %v18296_v10 }
 0xac3   : > { %12696 = vmatpush3.bf16.xpose.msra.mxu1 %v16487_v26 }
 0xac4   : > { %12697 = vmatprep.subr.bf16.mxu1 %v18296_v10 }
 0xac9   : > { %12678 = vmatpush3.bf16.xpose.msra.mxu0 %v16491_v28 }
 0xaca   : > { %12679 = vmatprep.subr.bf16.mxu0 %v18296_v10 }
 0xacb   : > { %12698 = vmatpush3.bf16.xpose.msra.mxu1 %v16495_v44 }
 0xacc   : > { %12699 = vmatprep.subr.bf16.mxu1 %v18296_v10 }
 0xad1   : > { %12680 = vmatpush3.bf16.xpose.msra.mxu0 %v16499_v36 }
 0xad2   : > { %12681 = vmatprep.subr.bf16.mxu0 %v18296_v10 }
 0xad3   : > { %12700 = vmatpush3.bf16.xpose.msra.mxu1 %v16503_v33 }
 0xad4   : > { %12701 = vmatprep.subr.bf16.mxu1 %v18296_v10 }
 0xad9   : > { %12682 = vmatpush3.bf16.xpose.msra.mxu0 %v16507_v18 }
 0xada   : > { %12683 = vmatprep.subr.bf16.mxu0 %v18296_v10 }
 0xadb   : > { %12702 = vmatpush3.bf16.xpose.msra.mxu1 %v16511_v20 }
 0xadc   : > { %12703 = vmatprep.subr.bf16.mxu1 %v18296_v10 }
 0xae1   : > { %12684 = vmatpush3.bf16.xpose.msra.mxu0 %v16515_v29 }
 0xae2   : > { %12709 = vmatprep.subr.bf16.mxu0 %v18296_v10 }
 0xae3   : > { %12704 = vmatpush3.bf16.xpose.msra.mxu1 %v16519_v8 }
 0xae4   : > { %12729 = vmatprep.subr.bf16.mxu1 %v18296_v10 }
 0xae8   : > { %12686 = vmatmul.mubr.bf16.vlgmr.msra.gmra.mxu0 %v4723_v19  ;;  %v4726_v19 = vpack.c.bf16 %v4708_v40, %v4708_v40 }
 0xae9   : > { %12710 = vmatpush3.bf16.xpose.msra.mxu0 %v16523_v42  ;;  %12725 = vmatprep.mubr.msk.bf16.mxu0 %vm15529_vm0, %v18296_v10 }
 0xaea   : > { %12706 = vmatmul.mubr.bf16.vlgmr.msra.gmra.mxu1 %v4724_v39  ;;  %12711 = vmatprep.subr.bf16.mxu0 %v18296_v10  ;;  %v16596_v39 = vld [vmem:[#allocation4 + $0x1b8] sm:$0xff]  }
 0xaeb   : > { %12730 = vmatpush3.bf16.xpose.msra.mxu1 %v16529_v11  ;;  %12745 = vmatprep.mubr.msk.bf16.mxu1 %vm15529_vm0, %v18296_v10  ;;  %18320 = vst [vmem:[#allocation74_spill] sm:$0xff] %v16596_v39 }
 0xaec   : > { %12731 = vmatprep.subr.bf16.mxu1 %v18296_v10 }
 0xaf1   : > { %12712 = vmatpush3.bf16.xpose.msra.mxu0 %v16535_v41 }
 0xaf2   : > { %12713 = vmatprep.subr.bf16.mxu0 %v18296_v10 }
 0xaf3   : > { %12732 = vmatpush3.bf16.xpose.msra.mxu1 %v16539_v22 }
 0xaf4   : > { %12733 = vmatprep.subr.bf16.mxu1 %v18296_v10 }
 0xaf9   : > { %12714 = vmatpush3.bf16.xpose.msra.mxu0 %v16543_v45 }
 0xafa   : > { %12715 = vmatprep.subr.bf16.mxu0 %v18296_v10 }
 0xafb   : > { %12734 = vmatpush3.bf16.xpose.msra.mxu1 %v16547_v1 }
 0xafc   : > { %12735 = vmatprep.subr.bf16.mxu1 %v18296_v10 }
 0xb01   : > { %12716 = vmatpush3.bf16.xpose.msra.mxu0 %v16551_v25 }
 0xb02   : > { %12717 = vmatprep.subr.bf16.mxu0 %v18296_v10 }
 0xb03   : > { %12736 = vmatpush3.bf16.xpose.msra.mxu1 %v16555_v27 }
 0xb04   : > { %12737 = vmatprep.subr.bf16.mxu1 %v18296_v10 }
 0xb09   : > { %12718 = vmatpush3.bf16.xpose.msra.mxu0 %v16559_v14 }
 0xb0a   : > { %12719 = vmatprep.subr.bf16.mxu0 %v18296_v10 }
 0xb0b   : > { %12738 = vmatpush3.bf16.xpose.msra.mxu1 %v16563_v16 }
 0xb0c   : > { %12739 = vmatprep.subr.bf16.mxu1 %v18296_v10 }
 0xb11   : > { %12720 = vmatpush3.bf16.xpose.msra.mxu0 %v16567_v30 }
 0xb12   : > { %12721 = vmatprep.subr.bf16.mxu0 %v18296_v10 }
 0xb13   : > { %12740 = vmatpush3.bf16.xpose.msra.mxu1 %v16571_v31 }
 0xb14   : > { %12741 = vmatprep.subr.bf16.mxu1 %v18296_v10 }
 0xb19   : > { %12722 = vmatpush3.bf16.xpose.msra.mxu0 %v16577_v32 }
 0xb1a   : > { %12723 = vmatprep.subr.bf16.mxu0 %v18296_v10 }
 0xb1b   : > { %12742 = vmatpush3.bf16.xpose.msra.mxu1 %v16581_v35 }
 0xb1c   : > { %12743 = vmatprep.subr.bf16.mxu1 %v18296_v10 }
 0xb21   : > { %12724 = vmatpush3.bf16.xpose.msra.mxu0 %v16586_v38 }
 0xb22   : > { %12749 = vmatprep.subr.bf16.mxu0 %v18296_v10 }
 0xb23   : > { %12744 = vmatpush3.bf16.xpose.msra.mxu1 %v16591_v43 }
 0xb24   : > { %12769 = vmatprep.subr.bf16.mxu1 %v18296_v10 }
 0xb28   : > { %12726 = vmatmul.mubr.bf16.vlgmr.msra.gmra.mxu0 %v4725_v24  ;;  %v16616_v24 = vld [vmem:[#allocation4 + $0x1a8] sm:$0xff]  }
 0xb29   : > { %12750 = vmatpush3.bf16.xpose.msra.mxu0 %v16596_v39  ;;  %12765 = vmatprep.mubr.msk.bf16.mxu0 %vm15529_vm0, %v18296_v10  ;;  %18324 = vst [vmem:[#allocation78_spill] sm:$0xff] %v16616_v24 }
 0xb2a   : > { %12746 = vmatmul.mubr.bf16.vlgmr.msra.gmra.mxu1 %v4726_v19  ;;  %12751 = vmatprep.subr.bf16.mxu0 %v18296_v10  ;;  %v16620_v19 = vld [vmem:[#allocation4 + $0x1e8] sm:$0xff]  }
 0xb2b   : > { %12770 = vmatpush3.bf16.xpose.msra.mxu1 %v16602_v58  ;;  %12785 = vmatprep.mubr.msk.bf16.mxu1 %vm15529_vm0, %v18296_v10  ;;  %18325 = vst [vmem:[#allocation79_spill] sm:$0xff] %v16620_v19 }
 0xb2c   : > { %12771 = vmatprep.subr.bf16.mxu1 %v18296_v10 }
 0xb31   : > { %12752 = vmatpush3.bf16.xpose.msra.mxu0 %v16608_v63 }
 0xb32   : > { %12753 = vmatprep.subr.bf16.mxu0 %v18296_v10 }
 0xb33   : > { %12772 = vmatpush3.bf16.xpose.msra.mxu1 %v16612_v37 }
 0xb34   : > { %12773 = vmatprep.subr.bf16.mxu1 %v18296_v10 }
 0xb39   : > { %12754 = vmatpush3.bf16.xpose.msra.mxu0 %v16616_v24 }
 0xb3a   : > { %12755 = vmatprep.subr.bf16.mxu0 %v18296_v10 }
 0xb3b   : > { %12774 = vmatpush3.bf16.xpose.msra.mxu1 %v16620_v19 }
 0xb3c   : > { %12775 = vmatprep.subr.bf16.mxu1 %v18296_v10 }
 0xb41   : > { %12756 = vmatpush3.bf16.xpose.msra.mxu0 %v16624_v6 }
 0xb42   : > { %12757 = vmatprep.subr.bf16.mxu0 %v18296_v10 }
 0xb43   : > { %12776 = vmatpush3.bf16.xpose.msra.mxu1 %v16628_v60 }
 0xb44   : > { %12777 = vmatprep.subr.bf16.mxu1 %v18296_v10 }
 0xb49   : > { %12758 = vmatpush3.bf16.xpose.msra.mxu0 %v16632_v34  ;;  %v4710_v34 = vcombine.high %v4694_v4, %v4694_v4 }
 0xb4a   : > { %12759 = vmatprep.subr.bf16.mxu0 %v18296_v10 }
 0xb4b   : > { %12778 = vmatpush3.bf16.xpose.msra.mxu1 %v16636_v7  ;;  %v16652_v7 = vld [vmem:[#allocation4 + $0x1c8] sm:$0xff]   ;;  %v4727_v60 = vpack.c.bf16 %v4710_v34, %v4710_v34 }
 0xb4c   : > { %12779 = vmatprep.subr.bf16.mxu1 %v18296_v10  ;;  %18333 = vst [vmem:[#allocation87_spill] sm:$0xff] %v16652_v7 }
 0xb51   : > { %12760 = vmatpush3.bf16.xpose.msra.mxu0 %v16640_v5  ;;  %v16656_v5 = vld [vmem:[#allocation4 + $0x180] sm:$0xff]  }
 0xb52   : > { %12761 = vmatprep.subr.bf16.mxu0 %v18296_v10  ;;  %18334 = vst [vmem:[#allocation71_spill] sm:$0xff] %v16656_v5 }
 0xb53   : > { %12780 = vmatpush3.bf16.xpose.msra.mxu1 %v16644_v17  ;;  %v16660_v17 = vld [vmem:[#allocation4 + $0x1c0] sm:$0xff]  }
 0xb54   : > { %12781 = vmatprep.subr.bf16.mxu1 %v18296_v10  ;;  %18335 = vst [vmem:[#allocation88_spill] sm:$0xff] %v16660_v17 }
 0xb59   : > { %12762 = vmatpush3.bf16.xpose.msra.mxu0 %v16648_v46  ;;  %v4712_v46 = vcombine.high %v4708_v40, %v4708_v40 }
 0xb5a   : > { %12763 = vmatprep.subr.bf16.mxu0 %v18296_v10 }
 0xb5b   : > { %12782 = vmatpush3.bf16.xpose.msra.mxu1 %v16652_v7  ;;  %v4728_v7 = vpack.c.bf16 %v4712_v46, %v4712_v46 }
 0xb5c   : > { %12783 = vmatprep.subr.bf16.mxu1 %v18296_v10 }
 0xb61   : > { %12764 = vmatpush3.bf16.xpose.msra.mxu0 %v16656_v5 }
 0xb62   : > { %12789 = vmatprep.subr.bf16.mxu0 %v18296_v10 }
 0xb63   : > { %12784 = vmatpush3.bf16.xpose.msra.mxu1 %v16660_v17 }
 0xb64   : > { %12809 = vmatprep.subr.bf16.mxu1 %v18296_v10 }
 0xb68   : > { %12766 = vmatmul.mubr.bf16.vlgmr.msra.gmra.mxu0 %v4727_v60  ;;  %v16664_v6 = vpop.f32.mrf.mxu0 }
 0xb69   : > { %12790 = vmatpush3.bf16.msra.mxu0 %v16362_v48  ;;  %12805 = vmatprep.mubr.msk.bf16.mxu0 %vm15529_vm0, %v18296_v10 }
 0xb6a   : > { %12786 = vmatmul.mubr.bf16.vlgmr.msra.gmra.mxu1 %v4728_v7  ;;  %v12647_v4 = vpop.f32.mrf.mxu0  ;;  %v16669_v5 = vpop.f32.mrf.mxu1  ;;  %12791 = vmatprep.subr.bf16.mxu0 %v18296_v10 }
 0xb6b   : > { %12810 = vmatpush3.bf16.msra.mxu1 %v16415_v47  ;;  %12825 = vmatprep.mubr.msk.bf16.mxu1 %vm15529_vm0, %v18296_v10 }
 0xb6c   : > { %v4766_v34 = vpop.f32.mrf.mxu0  ;;  %v12667_v60 = vpop.f32.mrf.mxu1  ;;  %12811 = vmatprep.subr.bf16.mxu1 %v18296_v10 }
 0xb6d   : > { %12792 = vmatpush3.bf16.msra.mxu0 %v16368_v12 }
 0xb6e   : > { %v12648_v48 = vpop.f32.mrf.mxu0  ;;  %v4806_v46 = vpop.f32.mrf.mxu1  ;;  %12793 = vmatprep.subr.bf16.mxu0 %v18296_v10 }
 0xb6f   : > { %12812 = vmatpush3.bf16.msra.mxu1 %v16421_v55 }
 0xb70   : > { %v12668_v7 = vpop.f32.mrf.mxu1  ;;  %12813 = vmatprep.subr.bf16.mxu1 %v18296_v10 }
 0xb71   : > { %12794 = vmatpush3.bf16.msra.mxu0 %v16372_v49 }
 0xb72   : > { %12795 = vmatprep.subr.bf16.mxu0 %v18296_v10 }
 0xb73   : > { %12814 = vmatpush3.bf16.msra.mxu1 %v16425_v56 }
 0xb74   : > { %12815 = vmatprep.subr.bf16.mxu1 %v18296_v10 }
 0xb75   : > { %12796 = vmatpush3.bf16.msra.mxu0 %v16376_v50 }
 0xb76   : > { %12797 = vmatprep.subr.bf16.mxu0 %v18296_v10 }
 0xb77   : > { %12816 = vmatpush3.bf16.msra.mxu1 %v16429_v57 }
 0xb78   : > { %12817 = vmatprep.subr.bf16.mxu1 %v18296_v10 }
 0xb79   : > { %12798 = vmatpush3.bf16.msra.mxu0 %v16380_v51 }
 0xb7a   : > { %12799 = vmatprep.subr.bf16.mxu0 %v18296_v10 }
 0xb7b   : > { %12818 = vmatpush3.bf16.msra.mxu1 %v16433_v59 }
 0xb7c   : > { %12819 = vmatprep.subr.bf16.mxu1 %v18296_v10 }
 0xb7d   : > { %12800 = vmatpush3.bf16.msra.mxu0 %v16384_v52 }
 0xb7e   : > { %12801 = vmatprep.subr.bf16.mxu0 %v18296_v10 }
 0xb7f   : > { %12820 = vmatpush3.bf16.msra.mxu1 %v16437_v62 }
 0xb80   : > { %12821 = vmatprep.subr.bf16.mxu1 %v18296_v10 }
 0xb81   : > { %12802 = vmatpush3.bf16.msra.mxu0 %v16388_v53 }
 0xb82   : > { %12803 = vmatprep.subr.bf16.mxu0 %v18296_v10 }
 0xb83   : > { %12822 = vmatpush3.bf16.msra.mxu1 %v16441_v0 }
 0xb84   : > { %12823 = vmatprep.subr.bf16.mxu1 %v18296_v10 }
 0xb85   : > { %12804 = vmatpush3.bf16.msra.mxu0 %v16392_v54 }
 0xb86   : > { %12829 = vmatprep.subr.bf16.mxu0 %v18296_v10 }
 0xb87   : > { %12824 = vmatpush3.bf16.msra.mxu1 %v16445_v2  ;;  %v5057_v2 = vrot.slane %v16669_v5, 7 }
 0xb88   : > { %12849 = vmatprep.subr.bf16.mxu1 %v18296_v10 }
 0xb89   : > { %v5058_v60 = vsel %vm2634_vm1, %v5057_v2, %v16664_v6 }
 0xba8   : > { %v4843_v12 = vpop.f32.mrf.mxu0 }
 0xba9   : > { %v5059_v34 = vrot.slane %v4843_v12, 6 }
 0xbaa   : > { %v12687_v49 = vpop.f32.mrf.mxu0  ;;  %v4883_v50 = vpop.f32.mrf.mxu1 }
 0xbab   : > { %v5061_v48 = vrot.slane %v4883_v50, 5  ;;  %v5060_v46 = vsel %vm2637_vm2, %v5059_v34, %v5058_v60 }
 0xbac   : > { %v4846_v51 = vpop.f32.mrf.mxu0  ;;  %v12707_v52 = vpop.f32.mrf.mxu1 }
 0xbad   : > { %v5062_v49 = vsel %vm2640_vm3, %v5061_v48, %v5060_v46 }
 0xbae   : > { %v12688_v53 = vpop.f32.mrf.mxu0  ;;  %v4886_v47 = vpop.f32.mrf.mxu1 }
 0xbb0   : > { %v12708_v55 = vpop.f32.mrf.mxu1 }
 0xbe8   : > { %v4923_v56 = vpop.f32.mrf.mxu0 }
 0xbe9   : > { %v5063_v7 = vrot.slane %v4923_v56, 4 }
 0xbea   : > { %v12727_v57 = vpop.f32.mrf.mxu0  ;;  %v4963_v59 = vpop.f32.mrf.mxu1 }
 0xbeb   : > { %v5065_v51 = vrot.slane %v4963_v59, 3  ;;  %v5064_v52 = vsel %vm2643_vm4, %v5063_v7, %v5062_v49 }
 0xbec   : > { %v4926_v62 = vpop.f32.mrf.mxu0  ;;  %v12747_v0 = vpop.f32.mrf.mxu1 }
 0xbed   : > { %v5066_v62 = vsel %vm2646_vm5, %v5065_v51, %v5064_v52 }
 0xbee   : > { %v12728_v54 = vpop.f32.mrf.mxu0  ;;  %v4966_v40 = vpop.f32.mrf.mxu1 }
 0xbf0   : > { %v12748_v4 = vpop.f32.mrf.mxu1 }
 0xc28   : > { %v5003_v53 = vpop.f32.mrf.mxu0 }
 0xc29   : > { %v5067_v47 = vrot.slane %v5003_v53, 2 }
 0xc2a   : > { %v12767_v55 = vpop.f32.mrf.mxu0  ;;  %v5043_v57 = vpop.f32.mrf.mxu1 }
 0xc2b   : > { %v5069_v0 = vrot.slane %v5043_v57, 1  ;;  %v5068_v54 = vsel %vm2649_vm6, %v5067_v47, %v5066_v62 }
 0xc2c   : > { %v5006_v40 = vpop.f32.mrf.mxu0  ;;  %v12787_v4 = vpop.f32.mrf.mxu1 }
 0xc2d   : > { %v5070_v2 = vsel %vm2652_vm7, %v5069_v0, %v5068_v54 }
 0xc2e   : > { %v12768_v34 = vpop.f32.mrf.mxu0  ;;  %5072 = vmax.xlane.f32.xlu1 %v5070_v2  ;;  %v5046_v60 = vpop.f32.mrf.mxu1 }
 0xc30   : > { %v12788_v48 = vpop.f32.mrf.mxu1 }
 0xcb7   : > { %v5073_v46 = vpop.xlane.xlu1 %5072 }
 0xcb8   : > { %v5075_v17 = vrot.slane %v5073_v46, 1  ;;  %v5076_v7 = vrot.slane %v5073_v46, 2  ;;  %v5077_v49 = vrot.slane %v5073_v46, 3  ;;  %v5078_v19 = vrot.slane %v5073_v46, 4 }
 0xcb9   : > { %v5079_v55 = vrot.slane %v5073_v46, 5  ;;  %v5080_v24 = vrot.slane %v5073_v46, 6  ;;  %v5081_v37 = vrot.slane %v5073_v46, 7  ;;  %v5090_v51 = vsub.f32 %v16664_v6, %v5073_v46 }
 0xcba   : > { %v5091_v52 = vsub.f32 %v16669_v5, %v5075_v17  ;;  %v5092_v47 = vsub.f32 %v4843_v12, %v5076_v7  ;;  %v5093_v62 = vsub.f32 %v4883_v50, %v5077_v49  ;;  %v5094_v40 = vsub.f32 %v4923_v56, %v5078_v19 }
 0xcbb   : > { %v5095_v0 = vsub.f32 %v4963_v59, %v5079_v55  ;;  %v5096_v54 = vsub.f32 %v5003_v53, %v5080_v24  ;;  %v5098_v4 = vmul.f32 1.442695, %v5090_v51  ;;  %v5097_v48 = vsub.f32 %v5043_v57, %v5081_v37 }
 0xcbc   : > { %v5100_v2 = vmul.f32 1.442695, %v5091_v52  ;;  %v5102_v34 = vmul.f32 1.442695, %v5092_v47  ;;  %v5104_v60 = vmul.f32 1.442695, %v5093_v62 }
 0xcbd   : > { %14842 = vpow2.f32 %v5098_v4  ;;  %v5106_v63 = vmul.f32 1.442695, %v5094_v40  ;;  %v5108_v58 = vmul.f32 1.442695, %v5095_v0  ;;  %v5110_v39 = vmul.f32 1.442695, %v5096_v54 }
 0xcbe   : > { %14844 = vpow2.f32 %v5100_v2  ;;  %v5112_v6 = vmul.f32 1.442695, %v5097_v48 }
 0xcbf   : > { %14846 = vpow2.f32 %v5102_v34 }
 0xcc0   : > { %14848 = vpow2.f32 %v5104_v60 }
 0xcc1   : > { %14850 = vpow2.f32 %v5106_v63 }
 0xcc2   : > { %14852 = vpow2.f32 %v5108_v58 }
 0xcc3   : > { %14854 = vpow2.f32 %v5110_v39 }
 0xcc4   : > { %14856 = vpow2.f32 %v5112_v6 }
 0xcca   : > { %v14843_v17 = vpop.eup %14842 }
 0xccb   : > { %v14845_v5 = vpop.eup %14844 }
 0xccc   : > { %v14847_v24 = vpop.eup %14846  ;;  %v5122_v19 = vrot.slane %v14845_v5, 7 }
 0xccd   : > { %v14849_v12 = vpop.eup %14848  ;;  %v5124_v50 = vrot.slane %v14847_v24, 6 }
 0xcce   : > { %v14851_v56 = vpop.eup %14850  ;;  %v5123_v37 = vsel %vm2634_vm1, %v5122_v19, %v14843_v17  ;;  %v5126_v59 = vrot.slane %v14849_v12, 5 }
 0xccf   : > { %v14853_v53 = vpop.eup %14852  ;;  %v5125_v57 = vsel %vm2637_vm2, %v5124_v50, %v5123_v37  ;;  %v5128_v46 = vrot.slane %v14851_v56, 4 }
 0xcd0   : > { %v14855_v7 = vpop.eup %14854  ;;  %v5127_v63 = vsel %vm2640_vm3, %v5126_v59, %v5125_v57  ;;  %v5130_v58 = vrot.slane %v14853_v53, 3 }
 0xcd1   : > { %v14857_v39 = vpop.eup %14856  ;;  %v5129_v49 = vsel %vm2643_vm4, %v5128_v46, %v5127_v63  ;;  %v5132_v55 = vrot.slane %v14855_v7, 2 }
 0xcd2   : > { %v5131_v51 = vsel %vm2646_vm5, %v5130_v58, %v5129_v49  ;;  %v5134_v52 = vrot.slane %v14857_v39, 1 }
 0xcd3   : > { %v5133_v47 = vsel %vm2649_vm6, %v5132_v55, %v5131_v51 }
 0xcd4   : > { %v5135_v62 = vsel %vm2652_vm7, %v5134_v52, %v5133_v47 }
 0xcd5   : > { %5137 = vadd.xlane.f32.xlu1 %v5135_v62 }
 0xd5e   : > { %v5138_v40 = vpop.xlane.xlu1 %5137 }
 0xd5f   : > { %14858 = vrcp.f32 %v5138_v40  ;;  %v14320_v40 = vld [vmem:[#allocation6 + $0xe4] ss:$16 sps:$4 sm:$0xff]  }
 0xd6c   : > { %v14859_v0 = vpop.eup %14858 }
 0xd6d   : > { %v5156_v54 = vmul.f32 %v14859_v0, %v14843_v17  ;;  %v5141_v4 = vrot.slane %v14859_v0, 1  ;;  %v5142_v2 = vrot.slane %v14859_v0, 2  ;;  %v5143_v34 = vrot.slane %v14859_v0, 3 }
 0xd6e   : > { %v5144_v60 = vrot.slane %v14859_v0, 4  ;;  %v5145_v48 = vrot.slane %v14859_v0, 5  ;;  %v5146_v6 = vrot.slane %v14859_v0, 6  ;;  %v5147_v19 = vrot.slane %v14859_v0, 7  ;;  %v14318_v0 = vld [vmem:[#allocation6 + $0xe0] ss:$16 sps:$4 sm:$0xff]  }
 0xd6f   : > { %v5164_v50 = vpack.c.bf16 %v5156_v54, %v5156_v54  ;;  %v5157_v37 = vmul.f32 %v14845_v5, %v5141_v4  ;;  %v5158_v59 = vmul.f32 %v14847_v24, %v5142_v2  ;;  %v5159_v57 = vmul.f32 %v14849_v12, %v5143_v34  ;;  %v18352_v4 = vld [vmem:[#allocation73_spill] sm:$0xff]  ;;  %v14321_v2 = vld [vmem:[#allocation6 + $0xc0] ss:$16 sps:$4 sm:$0xff]  }
 0xd70   : > { %v16722_v46 = vmul.f32 %v14851_v56, %v5144_v60  ;;  %v16724_v55 = vmul.f32 %v14853_v53, %v5145_v48  ;;  %v16729_v17 = vmul.f32 %v14855_v7, %v5146_v6  ;;  %v16733_v12 = vmul.f32 %v14857_v39, %v5147_v19  ;;  %v14326_v60 = vld [vmem:[#allocation6 + $0xa4] ss:$16 sps:$4 sm:$0xff]   ;;  %v14324_v48 = vld [vmem:[#allocation6 + $0xa0] ss:$16 sps:$4 sm:$0xff]  }
 0xd71   : > { %12806 = vmatmul.mubr.bf16.vlgmr.msra.gmra.mxu0 %v5164_v50  ;;  %v5165_v63 = vpack.c.bf16 %v5157_v37, %v5157_v37  ;;  %v5751_v58 = vrot.slane %v5157_v37, 7  ;;  %v5753_v49 = vrot.slane %v5158_v59, 6  ;;  %v5755_v24 = vrot.slane %v5159_v57, 5  ;;  %v14329_v6 = vld [vmem:[#allocation6 + $0x84] ss:$16 sps:$4 sm:$0xff]  }
 0xd72   : > { %12830 = vmatpush3.bf16.msra.mxu0 %v16455_v61  ;;  %12845 = vmatprep.mubr.msk.bf16.mxu0 %vm15529_vm0, %v18296_v10  ;;  %v5757_v61 = vrot.slane %v16722_v46, 4  ;;  %v5759_v7 = vrot.slane %v16724_v55, 3  ;;  %v5763_v52 = vrot.slane %v16733_v12, 1  ;;  %v18353_v34 = vmov 0   ;;  %v14327_v19 = vld [vmem:[#allocation6 + $0x80] ss:$16 sps:$4 sm:$0xff]  }
 0xd73   : > { %12826 = vmatmul.mubr.bf16.vlgmr.msra.gmra.mxu1 %v5165_v63  ;;  %v5752_v5 = vsel %vm2634_vm1, %v5751_v58, %v5156_v54  ;;  %12831 = vmatprep.subr.bf16.mxu0 %v18296_v10  ;;  %v14323_v54 = vld [vmem:[#allocation6 + $0xc4] ss:$16 sps:$4 sm:$0xff]   ;;  %v14333_v58 = vld [vmem:[#allocation6 + $0x40] ss:$16 sps:$4 sm:$0xff]  }
 0xd74   : > { %12850 = vmatpush3.bf16.msra.mxu1 %v16461_v15  ;;  %v5754_v56 = vsel %vm2637_vm2, %v5753_v49, %v5752_v5  ;;  %12865 = vmatprep.mubr.msk.bf16.mxu1 %vm15529_vm0, %v18296_v10  ;;  %v5761_v15 = vrot.slane %v16729_v17, 2  ;;  %v14390_v50 = vld [vmem:[#allocation9 + $0x38] sm:$0xff]   ;;  %v14392_v63 = vld [vmem:[#allocation9 + $0x28] sm:$0xff]  }
 0xd75   : > { %12851 = vmatprep.subr.bf16.mxu1 %v18296_v10  ;;  %v5756_v53 = vsel %vm2640_vm3, %v5755_v24, %v5754_v56  ;;  %v14332_v37 = vld [vmem:[#allocation6 + $0x64] ss:$16 sps:$4 sm:$0xff]  }
 0xd76   : > { %12832 = vmatpush3.bf16.msra.mxu0 %v16467_v9  ;;  %v5758_v39 = vsel %vm2643_vm4, %v5757_v61, %v5756_v53  ;;  %v5166_v9 = vpack.c.bf16 %v5158_v59, %v5158_v59  ;;  %v14391_v59 = vld [vmem:[#allocation9 + $0x30] sm:$0xff]   ;;  %v14338_v49 = vld [vmem:[#allocation6 + $0x24] ss:$16 sps:$4 sm:$0xff]   ;;  %v14342_v53 = vld [vmem:[#allocation5 + $0xe0] ss:$16 sps:$4 sm:$0xff]  }
 0xd77   : > { %12833 = vmatprep.subr.bf16.mxu0 %v18296_v10  ;;  %v5760_v51 = vsel %vm2646_vm5, %v5759_v7, %v5758_v39  ;;  %v14341_v5 = vld [vmem:[#allocation6 + $0x4] ss:$16 sps:$4 sm:$0xff]  }
 0xd78   : > { %12852 = vmatpush3.bf16.msra.mxu1 %v16471_v21  ;;  %v5762_v47 = vsel %vm2649_vm6, %v5761_v15, %v5760_v51  ;;  %v5167_v21 = vpack.c.bf16 %v5159_v57, %v5159_v57  ;;  %v14330_v57 = vld [vmem:[#allocation6 + $0x60] ss:$16 sps:$4 sm:$0xff]   ;;  %v14344_v56 = vld [vmem:[#allocation5 + $0xe4] ss:$16 sps:$4 sm:$0xff]  }
 0xd79   : > { %12853 = vmatprep.subr.bf16.mxu1 %v18296_v10  ;;  %v5764_v62 = vsel %vm2652_vm7, %v5763_v52, %v5762_v47  ;;  %v14394_v24 = vld [vmem:[#allocation9 + $0x18] sm:$0xff]   ;;  %v14395_v52 = vld [vmem:[#allocation9 + $0x10] sm:$0xff]  }
 0xd7a   : > { %12834 = vmatpush3.bf16.msra.mxu0 %v16475_v3  ;;  %11206 = vst [vmem:[%s15721_s14 + $0x8] sm:$0xff] %v5764_v62  ;;  %v5168_v3 = vpack.c.bf16 %v16722_v46, %v16722_v46  ;;  %v14335_v46 = vld [vmem:[#allocation6 + $0x44] ss:$16 sps:$4 sm:$0xff]   ;;  %v14345_v15 = vld [vmem:[#allocation5 + $0xc0] ss:$16 sps:$4 sm:$0xff]  }
 0xd7b   : > { %12835 = vmatprep.subr.bf16.mxu0 %v18296_v10  ;;  %v5802_v61 = vld [vmem:[#allocation2] sm:$0xff] }
 0xd7c   : > { %12854 = vmatpush3.bf16.msra.mxu1 %v16479_v23  ;;  %v5169_v23 = vpack.c.bf16 %v16724_v55, %v16724_v55  ;;  %v14393_v55 = vld [vmem:[#allocation9 + $0x20] sm:$0xff]   ;;  %v16876_v7 = vpack.c.bf16 %v5802_v61, %v5802_v61  ;;  %v14347_v39 = vld [vmem:[#allocation5 + $0xc4] ss:$16 sps:$4 sm:$0xff]   ;;  %v14348_v47 = vld [vmem:[#allocation5 + $0xa0] ss:$16 sps:$4 sm:$0xff]  }
 0xd7d   : > { %12855 = vmatprep.subr.bf16.mxu1 %v18296_v10  ;;  %v14350_v51 = vld [vmem:[#allocation5 + $0xa4] ss:$16 sps:$4 sm:$0xff]  }
 0xd7e   : > { %12836 = vmatpush3.bf16.msra.mxu0 %v16483_v13  ;;  %v18336_v13 = vld [vmem:[#allocation74_spill] sm:$0xff] }
 0xd7f   : > { %12837 = vmatprep.subr.bf16.mxu0 %v18296_v10  ;;  %v14353_v62 = vld [vmem:[#allocation5 + $0x84] ss:$16 sps:$4 sm:$0xff]  }
 0xd80   : > { %12856 = vmatpush3.bf16.msra.mxu1 %v16487_v26  ;;  %v18337_v26 = vld [vmem:[#allocation75_spill] sm:$0xff] }
 0xd81   : > { %12857 = vmatprep.subr.bf16.mxu1 %v18296_v10 }
 0xd82   : > { %12838 = vmatpush3.bf16.msra.mxu0 %v16491_v28  ;;  %v18338_v28 = vld [vmem:[#allocation76_spill] sm:$0xff] }
 0xd83   : > { %12839 = vmatprep.subr.bf16.mxu0 %v18296_v10 }
 0xd84   : > { %12858 = vmatpush3.bf16.msra.mxu1 %v16495_v44  ;;  %v18339_v44 = vld [vmem:[#allocation77_spill] sm:$0xff] }
 0xd85   : > { %12859 = vmatprep.subr.bf16.mxu1 %v18296_v10 }
 0xd86   : > { %12840 = vmatpush3.bf16.msra.mxu0 %v16499_v36  ;;  %v18340_v36 = vld [vmem:[#allocation78_spill] sm:$0xff] }
 0xd87   : > { %12841 = vmatprep.subr.bf16.mxu0 %v18296_v10 }
 0xd88   : > { %12860 = vmatpush3.bf16.msra.mxu1 %v16503_v33  ;;  %v18341_v33 = vld [vmem:[#allocation79_spill] sm:$0xff] }
 0xd89   : > { %12861 = vmatprep.subr.bf16.mxu1 %v18296_v10 }
 0xd8a   : > { %12842 = vmatpush3.bf16.msra.mxu0 %v16507_v18  ;;  %v18342_v18 = vld [vmem:[#allocation80_spill] sm:$0xff] }
 0xd8b   : > { %12843 = vmatprep.subr.bf16.mxu0 %v18296_v10 }
 0xd8c   : > { %12862 = vmatpush3.bf16.msra.mxu1 %v16511_v20  ;;  %v18343_v20 = vld [vmem:[#allocation81_spill] sm:$0xff] }
 0xd8d   : > { %12863 = vmatprep.subr.bf16.mxu1 %v18296_v10 }
 0xd8e   : > { %12844 = vmatpush3.bf16.msra.mxu0 %v16515_v29  ;;  %v18344_v29 = vld [vmem:[#allocation82_spill] sm:$0xff] }
 0xd8f   : > { %12869 = vmatprep.subr.bf16.mxu0 %v18296_v10 }
 0xd90   : > { %12864 = vmatpush3.bf16.msra.mxu1 %v16519_v8  ;;  %v18345_v8 = vld [vmem:[#allocation83_spill] sm:$0xff] }
 0xd91   : > { %12846 = vmatmul.mubr.bf16.vlgmr.msra.gmra.mxu0 %v5166_v9  ;;  %12889 = vmatprep.subr.bf16.mxu1 %v18296_v10  ;;  %v14396_v9 = vld [vmem:[#allocation9 + $0x8] sm:$0xff]  }
 0xd92   : > { %12870 = vmatpush3.bf16.msra.mxu0 %v16523_v42  ;;  %12885 = vmatprep.mubr.msk.bf16.mxu0 %vm15529_vm0, %v18296_v10  ;;  %v18346_v42 = vld [vmem:[#allocation84_spill] sm:$0xff] }
 0xd93   : > { %12866 = vmatmul.mubr.bf16.vlgmr.msra.gmra.mxu1 %v5167_v21  ;;  %12871 = vmatprep.subr.bf16.mxu0 %v18296_v10  ;;  %v14351_v21 = vld [vmem:[#allocation5 + $0x80] ss:$16 sps:$4 sm:$0xff]  }
 0xd94   : > { %12890 = vmatpush3.bf16.msra.mxu1 %v16529_v11  ;;  %12905 = vmatprep.mubr.msk.bf16.mxu1 %vm15529_vm0, %v18296_v10  ;;  %v18347_v11 = vld [vmem:[#allocation85_spill] sm:$0xff] }
 0xd95   : > { %12891 = vmatprep.subr.bf16.mxu1 %v18296_v10 }
 0xd96   : > { %12872 = vmatpush3.bf16.msra.mxu0 %v16535_v41  ;;  %v18348_v41 = vld [vmem:[#allocation86_spill] sm:$0xff] }
 0xd97   : > { %12873 = vmatprep.subr.bf16.mxu0 %v18296_v10 }
 0xd98   : > { %12892 = vmatpush3.bf16.msra.mxu1 %v16539_v22  ;;  %v18349_v22 = vld [vmem:[#allocation87_spill] sm:$0xff] }
 0xd99   : > { %12893 = vmatprep.subr.bf16.mxu1 %v18296_v10 }
 0xd9a   : > { %12874 = vmatpush3.bf16.msra.mxu0 %v16543_v45  ;;  %v18350_v45 = vld [vmem:[#allocation71_spill] sm:$0xff] }
 0xd9b   : > { %12875 = vmatprep.subr.bf16.mxu0 %v18296_v10 }
 0xd9c   : > { %12894 = vmatpush3.bf16.msra.mxu1 %v16547_v1  ;;  %v14310_v1 = vld [vmem:[#allocation10 + $0x38] sm:$0xff]  }
 0xd9d   : > { %12895 = vmatprep.subr.bf16.mxu1 %v18296_v10 }
 0xd9e   : > { %12876 = vmatpush3.bf16.msra.mxu0 %v16551_v25  ;;  %v5170_v25 = vpack.c.bf16 %v16729_v17, %v16729_v17  ;;  %v14336_v17 = vld [vmem:[#allocation6 + $0x20] ss:$16 sps:$4 sm:$0xff]  }
 0xd9f   : > { %12877 = vmatprep.subr.bf16.mxu0 %v18296_v10 }
 0xda0   : > { %12896 = vmatpush3.bf16.msra.mxu1 %v16555_v27  ;;  %v18351_v27 = vld [vmem:[#allocation88_spill] sm:$0xff] }
 0xda1   : > { %12897 = vmatprep.subr.bf16.mxu1 %v18296_v10 }
 0xda2   : > { %12878 = vmatpush3.bf16.msra.mxu0 %v16559_v14  ;;  %v5171_v14 = vpack.c.bf16 %v16733_v12, %v16733_v12  ;;  %v14339_v12 = vld [vmem:[#allocation6] ss:$16 sps:$4 sm:$0xff]  }
 0xda3   : > { %12879 = vmatprep.subr.bf16.mxu0 %v18296_v10 }
 0xda4   : > { %12898 = vmatpush3.bf16.msra.mxu1 %v16563_v16  ;;  %v14311_v16 = vld [vmem:[#allocation10 + $0x30] sm:$0xff]  }
 0xda5   : > { %12899 = vmatprep.subr.bf16.mxu1 %v18296_v10 }
 0xda6   : > { %12880 = vmatpush3.bf16.msra.mxu0 %v16567_v30  ;;  %v14312_v30 = vld [vmem:[#allocation10 + $0x28] sm:$0xff]  }
 0xda7   : > { %12881 = vmatprep.subr.bf16.mxu0 %v18296_v10 }
 0xda8   : > { %12900 = vmatpush3.bf16.msra.mxu1 %v16571_v31  ;;  %v14313_v31 = vld [vmem:[#allocation10 + $0x20] sm:$0xff]  }
 0xda9   : > { %12901 = vmatprep.subr.bf16.mxu1 %v18296_v10 }
 0xdaa   : > { %12882 = vmatpush3.bf16.msra.mxu0 %v16577_v32  ;;  %v14314_v32 = vld [vmem:[#allocation10 + $0x18] sm:$0xff]  }
 0xdab   : > { %12883 = vmatprep.subr.bf16.mxu0 %v18296_v10 }
 0xdac   : > { %12902 = vmatpush3.bf16.msra.mxu1 %v16581_v35  ;;  %v14315_v35 = vld [vmem:[#allocation10 + $0x10] sm:$0xff]  }
 0xdad   : > { %12903 = vmatprep.subr.bf16.mxu1 %v18296_v10 }
 0xdae   : > { %12884 = vmatpush3.bf16.msra.mxu0 %v16586_v38  ;;  %v14316_v38 = vld [vmem:[#allocation10 + $0x8] sm:$0xff]  }
 0xdaf   : > { %12909 = vmatprep.subr.bf16.mxu0 %v18296_v10 }
 0xdb0   : > { %12904 = vmatpush3.bf16.msra.mxu1 %v16591_v43  ;;  %v14317_v43 = vld [vmem:[#allocation10] sm:$0xff]  }
 0xdb1   : > { %12886 = vmatmul.mubr.bf16.vlgmr.msra.gmra.mxu0 %v5168_v3  ;;  %12929 = vmatprep.subr.bf16.mxu1 %v18296_v10  ;;  %v14356_v3 = vld [vmem:[#allocation5 + $0x64] ss:$16 sps:$4 sm:$0xff]  }
 0xdb2   : > { %12910 = vmatpush3.bf16.msra.mxu0 %v18336_v13  ;;  %12925 = vmatprep.mubr.msk.bf16.mxu0 %vm15529_vm0, %v18296_v10  ;;  %v14400_v13 = vld [vmem:[#allocation6 + $0xec] ss:$16 sps:$4 sm:$0xff]  }
 0xdb3   : > { %12906 = vmatmul.mubr.bf16.vlgmr.msra.gmra.mxu1 %v5169_v23  ;;  %12911 = vmatprep.subr.bf16.mxu0 %v18296_v10  ;;  %v14397_v23 = vld [vmem:[#allocation9] sm:$0xff]  }
 0xdb4   : > { %12930 = vmatpush3.bf16.msra.mxu1 %v18337_v26  ;;  %12945 = vmatprep.mubr.msk.bf16.mxu1 %vm15529_vm0, %v18296_v10  ;;  %v14354_v26 = vld [vmem:[#allocation5 + $0x60] ss:$16 sps:$4 sm:$0xff]  }
 0xdb5   : > { %12931 = vmatprep.subr.bf16.mxu1 %v18296_v10 }
 0xdb6   : > { %12912 = vmatpush3.bf16.msra.mxu0 %v18338_v28  ;;  %v14359_v28 = vld [vmem:[#allocation5 + $0x44] ss:$16 sps:$4 sm:$0xff]  }
 0xdb7   : > { %12913 = vmatprep.subr.bf16.mxu0 %v18296_v10 }
 0xdb8   : > { %12932 = vmatpush3.bf16.msra.mxu1 %v18339_v44  ;;  %v14357_v44 = vld [vmem:[#allocation5 + $0x40] ss:$16 sps:$4 sm:$0xff]  }
 0xdb9   : > { %12933 = vmatprep.subr.bf16.mxu1 %v18296_v10 }
 0xdba   : > { %12914 = vmatpush3.bf16.msra.mxu0 %v18340_v36  ;;  %v14362_v36 = vld [vmem:[#allocation5 + $0x24] ss:$16 sps:$4 sm:$0xff]  }
 0xdbb   : > { %12915 = vmatprep.subr.bf16.mxu0 %v18296_v10 }
 0xdbc   : > { %12934 = vmatpush3.bf16.msra.mxu1 %v18341_v33  ;;  %v14360_v33 = vld [vmem:[#allocation5 + $0x20] ss:$16 sps:$4 sm:$0xff]  }
 0xdbd   : > { %12935 = vmatprep.subr.bf16.mxu1 %v18296_v10 }
 0xdbe   : > { %12916 = vmatpush3.bf16.msra.mxu0 %v18342_v18  ;;  %v14365_v18 = vld [vmem:[#allocation5 + $0x4] ss:$16 sps:$4 sm:$0xff]  }
 0xdbf   : > { %12917 = vmatprep.subr.bf16.mxu0 %v18296_v10 }
 0xdc0   : > { %12936 = vmatpush3.bf16.msra.mxu1 %v18343_v20  ;;  %v14363_v20 = vld [vmem:[#allocation5] ss:$16 sps:$4 sm:$0xff]  }
 0xdc1   : > { %12937 = vmatprep.subr.bf16.mxu1 %v18296_v10 }
 0xdc2   : > { %12918 = vmatpush3.bf16.msra.mxu0 %v18344_v29  ;;  %v14368_v29 = vld [vmem:[#allocation6 + $0x1e4] ss:$16 sps:$4 sm:$0xff]  }
 0xdc3   : > { %12919 = vmatprep.subr.bf16.mxu0 %v18296_v10 }
 0xdc4   : > { %12938 = vmatpush3.bf16.msra.mxu1 %v18345_v8  ;;  %v16883_v8 = vld [vmem:[%s15712_s24 + $0x8] sm:$0xf] }
 0xdc5   : > { %12939 = vmatprep.subr.bf16.mxu1 %v18296_v10 }
 0xdc6   : > { %12920 = vmatpush3.bf16.msra.mxu0 %v18346_v42  ;;  %v14366_v42 = vld [vmem:[#allocation6 + $0x1e0] ss:$16 sps:$4 sm:$0xff]  }
 0xdc7   : > { %12921 = vmatprep.subr.bf16.mxu0 %v18296_v10 }
 0xdc8   : > { %12940 = vmatpush3.bf16.msra.mxu1 %v18347_v11  ;;  %v14371_v11 = vld [vmem:[#allocation6 + $0x1c4] ss:$16 sps:$4 sm:$0xff]  }
 0xdc9   : > { %12941 = vmatprep.subr.bf16.mxu1 %v18296_v10 }
 0xdca   : > { %12922 = vmatpush3.bf16.msra.mxu0 %v18348_v41 }
 0xdcb   : > { %12923 = vmatprep.subr.bf16.mxu0 %v18296_v10 }
 0xdcc   : > { %12942 = vmatpush3.bf16.msra.mxu1 %v18349_v22  ;;  %v14369_v22 = vld [vmem:[#allocation6 + $0x1c0] ss:$16 sps:$4 sm:$0xff]  }
 0xdcd   : > { %12943 = vmatprep.subr.bf16.mxu1 %v18296_v10 }
 0xdce   : > { %12924 = vmatpush3.bf16.msra.mxu0 %v18350_v45 }
 0xdcf   : > { %12949 = vmatprep.subr.bf16.mxu0 %v18296_v10 }
 0xdd0   : > { %12944 = vmatpush3.bf16.msra.mxu1 %v18351_v27 }
 0xdd1   : > { %12926 = vmatmul.mubr.bf16.vlgmr.msra.gmra.mxu0 %v5170_v25  ;;  %12969 = vmatprep.subr.bf16.mxu1 %v18296_v10  ;;  %v14374_v25 = vld [vmem:[#allocation6 + $0x1a4] ss:$16 sps:$4 sm:$0xff]  }
 0xdd2   : > { %12950 = vmatpush3.bf16.msra.mxu0 %v14310_v1  ;;  %12965 = vmatprep.mubr.msk.bf16.mxu0 %vm15529_vm0, %v18296_v10 }
 0xdd3   : > { %12946 = vmatmul.mubr.bf16.vlgmr.msra.gmra.mxu1 %v5171_v14  ;;  %12951 = vmatprep.subr.bf16.mxu0 %v18296_v10 }
 0xdd4   : > { %12985 = vmatprep.mubr.msk.bf16.mxu1 %vm15529_vm0, %v18296_v10  ;;  %12970 = vmatpush3.bf16.msra.mxu1 %v14390_v50  ;;  %v14386_v50 = vld [vmem:[#allocation6 + $0x124] ss:$16 sps:$4 sm:$0xff]  }
 0xdd5   : > { %12971 = vmatprep.subr.bf16.mxu1 %v18296_v10 }
 0xdd6   : > { %12952 = vmatpush3.bf16.msra.mxu0 %v14311_v16 }
 0xdd7   : > { %12953 = vmatprep.subr.bf16.mxu0 %v18296_v10 }
 0xdd8   : > { %12972 = vmatpush3.bf16.msra.mxu1 %v14391_v59  ;;  %v14389_v59 = vld [vmem:[#allocation6 + $0x104] ss:$16 sps:$4 sm:$0xff]  }
 0xdd9   : > { %12973 = vmatprep.subr.bf16.mxu1 %v18296_v10 }
 0xdda   : > { %12954 = vmatpush3.bf16.msra.mxu0 %v14312_v30 }
 0xddb   : > { %12955 = vmatprep.subr.bf16.mxu0 %v18296_v10 }
 0xddc   : > { %12974 = vmatpush3.bf16.msra.mxu1 %v14392_v63 }
 0xddd   : > { %12975 = vmatprep.subr.bf16.mxu1 %v18296_v10 }
 0xdde   : > { %12956 = vmatpush3.bf16.msra.mxu0 %v14313_v31 }
 0xddf   : > { %12957 = vmatprep.subr.bf16.mxu0 %v18296_v10 }
 0xde0   : > { %12976 = vmatpush3.bf16.msra.mxu1 %v14393_v55 }
 0xde1   : > { %12977 = vmatprep.subr.bf16.mxu1 %v18296_v10 }
 0xde2   : > { %12958 = vmatpush3.bf16.msra.mxu0 %v14314_v32  ;;  %v14372_v32 = vld [vmem:[#allocation6 + $0x1a0] ss:$16 sps:$4 sm:$0xff]  }
 0xde3   : > { %12959 = vmatprep.subr.bf16.mxu0 %v18296_v10 }
 0xde4   : > { %12978 = vmatpush3.bf16.msra.mxu1 %v14394_v24 }
 0xde5   : > { %12979 = vmatprep.subr.bf16.mxu1 %v18296_v10 }
 0xde6   : > { %12960 = vmatpush3.bf16.msra.mxu0 %v14315_v35 }
 0xde7   : > { %12961 = vmatprep.subr.bf16.mxu0 %v18296_v10 }
 0xde8   : > { %12980 = vmatpush3.bf16.msra.mxu1 %v14395_v52 }
 0xde9   : > { %12981 = vmatprep.subr.bf16.mxu1 %v18296_v10 }
 0xdea   : > { %12962 = vmatpush3.bf16.msra.mxu0 %v14316_v38 }
 0xdeb   : > { %12963 = vmatprep.subr.bf16.mxu0 %v18296_v10 }
 0xdec   : > { %12982 = vmatpush3.bf16.msra.mxu1 %v14396_v9 }
 0xded   : > { %12983 = vmatprep.subr.bf16.mxu1 %v18296_v10 }
 0xdee   : > { %12964 = vmatpush3.bf16.msra.mxu0 %v14317_v43  ;;  %v14377_v43 = vld [vmem:[#allocation6 + $0x184] ss:$16 sps:$4 sm:$0xff]  }
 0xdef   : > { %5996 = vmatprep.subr.bf16.mxu0 %v14320_v40 }
 0xdf0   : > { %12984 = vmatpush3.bf16.msra.mxu1 %v14397_v23 }
 0xdf1   : > { %12966 = vmatmul.mubr.bf16.vlgmr.msra.gmra.mxu0 %v18352_v4  ;;  %6037 = vmatprep.subr.bf16.mxu1 %v14400_v13 }
 0xdf2   : > { %5997 = vmatpush1.bf16.msra.mxu0 %v14318_v0  ;;  %6028 = vmatprep.mubr.bf16.mxu0 %v18353_v34 }
 0xdf3   : > { %5998 = vmatprep.subr.bf16.mxu0 %v14323_v54 }
 0xdf6   : > { %5999 = vmatpush1.bf16.msra.mxu0 %v14321_v2  ;;  %v14375_v2 = vld [vmem:[#allocation6 + $0x180] ss:$16 sps:$4 sm:$0xff]  }
 0xdf7   : > { %6000 = vmatprep.subr.bf16.mxu0 %v14326_v60  ;;  %v14380_v60 = vld [vmem:[#allocation6 + $0x164] ss:$16 sps:$4 sm:$0xff]  }
 0xdfa   : > { %6001 = vmatpush1.bf16.msra.mxu0 %v14324_v48  ;;  %v14378_v48 = vld [vmem:[#allocation6 + $0x160] ss:$16 sps:$4 sm:$0xff]  }
 0xdfb   : > { %6002 = vmatprep.subr.bf16.mxu0 %v14329_v6  ;;  %v14383_v6 = vld [vmem:[#allocation6 + $0x144] ss:$16 sps:$4 sm:$0xff]  }
 0xdfe   : > { %6003 = vmatpush1.bf16.msra.mxu0 %v14327_v19  ;;  %v14381_v19 = vld [vmem:[#allocation6 + $0x140] ss:$16 sps:$4 sm:$0xff]  }
 0xdff   : > { %6004 = vmatprep.subr.bf16.mxu0 %v14332_v37  ;;  %v14384_v37 = vld [vmem:[#allocation6 + $0x120] ss:$16 sps:$4 sm:$0xff]  }
 0xe02   : > { %6005 = vmatpush1.bf16.msra.mxu0 %v14330_v57  ;;  %v14387_v57 = vld [vmem:[#allocation6 + $0x100] ss:$16 sps:$4 sm:$0xff]  }
 0xe03   : > { %6006 = vmatprep.subr.bf16.mxu0 %v14335_v46  ;;  %v6406_v46 = vld [vmem:[#allocation2 + $0x8] sm:$0xff] }
 0xe04   : > { %v16888_v63 = vpack.c.bf16 %v6406_v46, %v6406_v46  ;;  %v14415_v46 = vld [vmem:[#allocation6 + $0x4c] ss:$16 sps:$4 sm:$0xff]  }
 0xe06   : > { %6007 = vmatpush1.bf16.msra.mxu0 %v14333_v58 }
 0xe07   : > { %6008 = vmatprep.subr.bf16.mxu0 %v14338_v49 }
 0xe0a   : > { %6009 = vmatpush1.bf16.msra.mxu0 %v14336_v17 }
 0xe0b   : > { %6010 = vmatprep.subr.bf16.mxu0 %v14341_v5 }
 0xe0e   : > { %6011 = vmatpush1.bf16.msra.mxu0 %v14339_v12 }
 0xe0f   : > { %6238 = vmatprep.subr.bf16.mxu0 %v14344_v56 }
 0xe11   : > { %6029 = vmatmul.mubr.bf16.vlgmr.msra.gmra.mxu0 %v16876_v7 }
 0xe12   : > { %6239 = vmatpush1.bf16.msra.mxu0 %v14342_v53  ;;  %6270 = vmatprep.mubr.bf16.mxu0 %v18353_v34 }
 0xe13   : > { %6240 = vmatprep.subr.bf16.mxu0 %v14347_v39 }
 0xe16   : > { %6241 = vmatpush1.bf16.msra.mxu0 %v14345_v15 }
 0xe17   : > { %6242 = vmatprep.subr.bf16.mxu0 %v14350_v51 }
 0xe1a   : > { %6243 = vmatpush1.bf16.msra.mxu0 %v14348_v47 }
 0xe1b   : > { %6244 = vmatprep.subr.bf16.mxu0 %v14353_v62 }
 0xe1e   : > { %6245 = vmatpush1.bf16.msra.mxu0 %v14351_v21 }
 0xe1f   : > { %6246 = vmatprep.subr.bf16.mxu0 %v14356_v3 }
 0xe22   : > { %6247 = vmatpush1.bf16.msra.mxu0 %v14354_v26 }
 0xe23   : > { %6248 = vmatprep.subr.bf16.mxu0 %v14359_v28 }
 0xe26   : > { %6249 = vmatpush1.bf16.msra.mxu0 %v14357_v44 }
 0xe27   : > { %6250 = vmatprep.subr.bf16.mxu0 %v14362_v36 }
 0xe2a   : > { %6251 = vmatpush1.bf16.msra.mxu0 %v14360_v33 }
 0xe2b   : > { %6252 = vmatprep.subr.bf16.mxu0 %v14365_v18 }
 0xe2e   : > { %6253 = vmatpush1.bf16.msra.mxu0 %v14363_v20 }
 0xe2f   : > { %6600 = vmatprep.subr.bf16.mxu0 %v14368_v29 }
 0xe31   : > { %6271 = vmatmul.mubr.bf16.vlgmr.msra.gmra.mxu0 %v16883_v8  ;;  %v5206_v41 = vpop.f32.mrf.mxu0 }
 0xe32   : > { %6601 = vmatpush1.bf16.msra.mxu0 %v14366_v42  ;;  %6632 = vmatprep.mubr.bf16.mxu0 %v18353_v34  ;;  %v5492_v27 = vpack.c.bf16 %v5206_v41, %v5206_v41 }
 0xe33   : > { %v12807_v45 = vpop.f32.mrf.mxu0  ;;  %v5246_v1 = vpop.f32.mrf.mxu1  ;;  %6602 = vmatprep.subr.bf16.mxu0 %v14371_v11 }
 0xe34   : > { %v5493_v14 = vpack.c.bf16 %v5246_v1, %v5246_v1  ;;  %v5628_v40 = vunpack.c.l.b16 %v5492_v27 }
 0xe35   : > { %v5209_v16 = vpop.f32.mrf.mxu0  ;;  %v12827_v30 = vpop.f32.mrf.mxu1 }
 0xe36   : > { %v5629_v31 = vunpack.c.l.b16 %v5493_v14  ;;  %6603 = vmatpush1.bf16.msra.mxu0 %v14369_v22 }
 0xe37   : > { %v12808_v35 = vpop.f32.mrf.mxu0  ;;  %v5249_v38 = vpop.f32.mrf.mxu1  ;;  %6604 = vmatprep.subr.bf16.mxu0 %v14374_v25 }
 0xe38   : > { %v5636_v0 = vrot.slane %v5629_v31, 7 }
 0xe39   : > { %v12828_v54 = vpop.f32.mrf.mxu1 }
 0xe3a   : > { %v5637_v4 = vsel %vm2634_vm1, %v5636_v0, %v5628_v40  ;;  %6605 = vmatpush1.bf16.msra.mxu0 %v14372_v32 }
 0xe3b   : > { %6606 = vmatprep.subr.bf16.mxu0 %v14377_v43 }
 0xe3e   : > { %6607 = vmatpush1.bf16.msra.mxu0 %v14375_v2 }
 0xe3f   : > { %6608 = vmatprep.subr.bf16.mxu0 %v14380_v60  ;;  %v14403_v60 = vld [vmem:[#allocation6 + $0xcc] ss:$16 sps:$4 sm:$0xff]  }
 0xe42   : > { %6609 = vmatpush1.bf16.msra.mxu0 %v14378_v48  ;;  %v14401_v48 = vld [vmem:[#allocation6 + $0xc8] ss:$16 sps:$4 sm:$0xff]  }
 0xe43   : > { %6610 = vmatprep.subr.bf16.mxu0 %v14383_v6  ;;  %v14406_v6 = vld [vmem:[#allocation6 + $0xac] ss:$16 sps:$4 sm:$0xff]  }
 0xe46   : > { %6611 = vmatpush1.bf16.msra.mxu0 %v14381_v19  ;;  %v14404_v19 = vld [vmem:[#allocation6 + $0xa8] ss:$16 sps:$4 sm:$0xff]  }
 0xe47   : > { %6612 = vmatprep.subr.bf16.mxu0 %v14386_v50  ;;  %v14409_v50 = vld [vmem:[#allocation6 + $0x8c] ss:$16 sps:$4 sm:$0xff]  }
 0xe4a   : > { %6613 = vmatpush1.bf16.msra.mxu0 %v14384_v37  ;;  %v14407_v37 = vld [vmem:[#allocation6 + $0x88] ss:$16 sps:$4 sm:$0xff]  }
 0xe4b   : > { %6614 = vmatprep.subr.bf16.mxu0 %v14389_v59  ;;  %v14412_v59 = vld [vmem:[#allocation6 + $0x6c] ss:$16 sps:$4 sm:$0xff]  }
 0xe4e   : > { %6615 = vmatpush1.bf16.msra.mxu0 %v14387_v57  ;;  %v14410_v57 = vld [vmem:[#allocation6 + $0x68] ss:$16 sps:$4 sm:$0xff]  }
 0xe51   : > { %v5286_v58 = vpop.f32.mrf.mxu0  ;;  %6633 = vmatmul.mubr.bf16.vlgmr.msra.gmra.mxu0 %v16888_v63 }
 0xe52   : > { %6874 = vmatprep.mubr.bf16.mxu0 %v18353_v34  ;;  %v5494_v9 = vpack.c.bf16 %v5286_v58, %v5286_v58  ;;  %v14413_v58 = vld [vmem:[#allocation6 + $0x48] ss:$16 sps:$4 sm:$0xff]  }
 0xe53   : > { %v12847_v49 = vpop.f32.mrf.mxu0  ;;  %v5326_v55 = vpop.f32.mrf.mxu1 }
 0xe54   : > { %v5495_v21 = vpack.c.bf16 %v5326_v55, %v5326_v55  ;;  %v5630_v3 = vunpack.c.l.b16 %v5494_v9  ;;  %v14418_v49 = vld [vmem:[#allocation6 + $0x2c] ss:$16 sps:$4 sm:$0xff]   ;;  %v14431_v9 = vld [vmem:[#allocation5 + $0x88] ss:$16 sps:$4 sm:$0xff]  }
 0xe55   : > { %v5289_v17 = vpop.f32.mrf.mxu0  ;;  %v12867_v5 = vpop.f32.mrf.mxu1 }
 0xe56   : > { %v5631_v13 = vunpack.c.l.b16 %v5495_v21  ;;  %v5638_v28 = vrot.slane %v5630_v3, 6  ;;  %v14416_v17 = vld [vmem:[#allocation6 + $0x28] ss:$16 sps:$4 sm:$0xff]   ;;  %v14436_v21 = vld [vmem:[#allocation5 + $0x6c] ss:$16 sps:$4 sm:$0xff]  }
 0xe57   : > { %v12848_v24 = vpop.f32.mrf.mxu0  ;;  %v5329_v12 = vpop.f32.mrf.mxu1  ;;  %v14434_v3 = vld [vmem:[#allocation5 + $0x68] ss:$16 sps:$4 sm:$0xff]  }
 0xe58   : > { %v5640_v36 = vrot.slane %v5631_v13, 5  ;;  %v5639_v18 = vsel %vm2637_vm2, %v5638_v28, %v5637_v4  ;;  %v14398_v4 = vld [vmem:[#allocation6 + $0xe8] ss:$16 sps:$4 sm:$0xff]   ;;  %v14421_v24 = vld [vmem:[#allocation6 + $0xc] ss:$16 sps:$4 sm:$0xff]  }
 0xe59   : > { %v12868_v56 = vpop.f32.mrf.mxu1  ;;  %v14442_v13 = vld [vmem:[#allocation5 + $0x2c] ss:$16 sps:$4 sm:$0xff]   ;;  %v14440_v28 = vld [vmem:[#allocation5 + $0x28] ss:$16 sps:$4 sm:$0xff]  }
 0xe5a   : > { %v5641_v11 = vsel %vm2640_vm3, %v5640_v36, %v5639_v18  ;;  %v14419_v56 = vld [vmem:[#allocation6 + $0x8] ss:$16 sps:$4 sm:$0xff]   ;;  %v14445_v36 = vld [vmem:[#allocation5 + $0xc] ss:$16 sps:$4 sm:$0xff]  }
 0xe5b   : > { %v14443_v18 = vld [vmem:[#allocation5 + $0x8] ss:$16 sps:$4 sm:$0xff]  }
 0xe71   : > { %v5366_v61 = vpop.f32.mrf.mxu0 }
 0xe72   : > { %v5496_v23 = vpack.c.bf16 %v5366_v61, %v5366_v61 }
 0xe73   : > { %v12887_v53 = vpop.f32.mrf.mxu0  ;;  %v5406_v39 = vpop.f32.mrf.mxu1 }
 0xe74   : > { %v5497_v26 = vpack.c.bf16 %v5406_v39, %v5406_v39  ;;  %v5632_v44 = vunpack.c.l.b16 %v5496_v23  ;;  %v14424_v53 = vld [vmem:[#allocation5 + $0xec] ss:$16 sps:$4 sm:$0xff]   ;;  %v14422_v39 = vld [vmem:[#allocation5 + $0xe8] ss:$16 sps:$4 sm:$0xff]  }
 0xe75   : > { %v5369_v15 = vpop.f32.mrf.mxu0  ;;  %v12907_v51 = vpop.f32.mrf.mxu1  ;;  %v14439_v23 = vld [vmem:[#allocation5 + $0x4c] ss:$16 sps:$4 sm:$0xff]  }
 0xe76   : > { %v5633_v33 = vunpack.c.l.b16 %v5497_v26  ;;  %v5642_v20 = vrot.slane %v5632_v44, 4  ;;  %v14427_v15 = vld [vmem:[#allocation5 + $0xcc] ss:$16 sps:$4 sm:$0xff]   ;;  %v14425_v51 = vld [vmem:[#allocation5 + $0xc8] ss:$16 sps:$4 sm:$0xff]  }
 0xe77   : > { %v12888_v52 = vpop.f32.mrf.mxu0  ;;  %v5409_v47 = vpop.f32.mrf.mxu1 }
 0xe78   : > { %v5644_v41 = vrot.slane %v5633_v33, 3  ;;  %v5643_v1 = vsel %vm2643_vm4, %v5642_v20, %v5641_v11  ;;  %v14430_v52 = vld [vmem:[#allocation5 + $0xac] ss:$16 sps:$4 sm:$0xff]   ;;  %v14428_v47 = vld [vmem:[#allocation5 + $0xa8] ss:$16 sps:$4 sm:$0xff]  }
 0xe79   : > { %v12908_v62 = vpop.f32.mrf.mxu1  ;;  %v14451_v11 = vld [vmem:[#allocation6 + $0x1cc] ss:$16 sps:$4 sm:$0xff]  }
 0xe7a   : > { %v5645_v32 = vsel %vm2646_vm5, %v5644_v41, %v5643_v1  ;;  %v14433_v62 = vld [vmem:[#allocation5 + $0x8c] ss:$16 sps:$4 sm:$0xff]   ;;  %v14449_v41 = vld [vmem:[#allocation6 + $0x1c8] ss:$16 sps:$4 sm:$0xff]  }
 0xe7b   : > { %v14457_v1 = vld [vmem:[#allocation6 + $0x18c] ss:$16 sps:$4 sm:$0xff]  }
 0xe91   : > { %v5446_v29 = vpop.f32.mrf.mxu0 }
 0xe92   : > { %v5498_v42 = vpack.c.bf16 %v5446_v29, %v5446_v29  ;;  %v14448_v29 = vld [vmem:[#allocation6 + $0x1ec] ss:$16 sps:$4 sm:$0xff]  }
 0xe93   : > { %v12927_v22 = vpop.f32.mrf.mxu0  ;;  %v5486_v45 = vpop.f32.mrf.mxu1 }
 0xe94   : > { %v5634_v25 = vunpack.c.l.b16 %v5498_v42  ;;  %v5499_v27 = vpack.c.bf16 %v5486_v45, %v5486_v45  ;;  %v14446_v42 = vld [vmem:[#allocation6 + $0x1e8] ss:$16 sps:$4 sm:$0xff]   ;;  %v14454_v22 = vld [vmem:[#allocation6 + $0x1ac] ss:$16 sps:$4 sm:$0xff]  }
 0xe95   : > { %v5449_v14 = vpop.f32.mrf.mxu0  ;;  %v12947_v16 = vpop.f32.mrf.mxu1  ;;  %v14452_v45 = vld [vmem:[#allocation6 + $0x1a8] ss:$16 sps:$4 sm:$0xff]  }
 0xe96   : > { %v5646_v30 = vrot.slane %v5634_v25, 2  ;;  %v5635_v31 = vunpack.c.l.b16 %v5499_v27  ;;  %v14455_v25 = vld [vmem:[#allocation6 + $0x188] ss:$16 sps:$4 sm:$0xff]   ;;  %v14460_v27 = vld [vmem:[#allocation6 + $0x16c] ss:$16 sps:$4 sm:$0xff]  }
 0xe97   : > { %v12928_v35 = vpop.f32.mrf.mxu0  ;;  %v5489_v38 = vpop.f32.mrf.mxu1  ;;  %v14458_v14 = vld [vmem:[#allocation6 + $0x168] ss:$16 sps:$4 sm:$0xff]   ;;  %v14463_v16 = vld [vmem:[#allocation6 + $0x14c] ss:$16 sps:$4 sm:$0xff]  }
 0xe98   : > { %v5647_v43 = vsel %vm2649_vm6, %v5646_v30, %v5645_v32  ;;  %v5648_v40 = vrot.slane %v5635_v31, 1  ;;  %v14466_v30 = vld [vmem:[#allocation6 + $0x12c] ss:$16 sps:$4 sm:$0xff]   ;;  %v14464_v35 = vld [vmem:[#allocation6 + $0x128] ss:$16 sps:$4 sm:$0xff]  }
 0xe99   : > { %v12948_v0 = vpop.f32.mrf.mxu1 }
 0xe9a   : > { %v5649_v54 = vsel %vm2652_vm7, %v5648_v40, %v5647_v43  ;;  %v14469_v43 = vld [vmem:[#allocation6 + $0x10c] ss:$16 sps:$4 sm:$0xff]  }
 0xe9b   : > { %v5650_v2 = vpack.c.b16 %v5649_v54, %v5649_v54  ;;  %v14467_v54 = vld [vmem:[#allocation6 + $0x108] ss:$16 sps:$4 sm:$0xff]  }
 0xe9d   : > { %12986 = vmatmul.mubr.bf16.vlgmr.msra.gmra.mxu1 %v5650_v2 }
 0xe9e   : > { %6038 = vmatpush1.bf16.msra.mxu1 %v14398_v4  ;;  %6069 = vmatprep.mubr.bf16.mxu1 %v18353_v34 }
 0xe9f   : > { %6039 = vmatprep.subr.bf16.mxu1 %v14403_v60 }
 0xea2   : > { %6040 = vmatpush1.bf16.msra.mxu1 %v14401_v48 }
 0xea3   : > { %6041 = vmatprep.subr.bf16.mxu1 %v14406_v6 }
 0xea6   : > { %6042 = vmatpush1.bf16.msra.mxu1 %v14404_v19  ;;  %v14472_v19 = vld [vmem:[#allocation5 + $0x1e4] ss:$16 sps:$4 sm:$0xff]  }
 0xea7   : > { %6043 = vmatprep.subr.bf16.mxu1 %v14409_v50  ;;  %v14475_v50 = vld [vmem:[#allocation5 + $0x1ec] ss:$16 sps:$4 sm:$0xff]   ;;  %6842 = vmatprep.subr.bf16.mxu0 %v14472_v19 }
 0xeaa   : > { %6044 = vmatpush1.bf16.msra.mxu1 %v14407_v37  ;;  %v14470_v37 = vld [vmem:[#allocation5 + $0x1e0] ss:$16 sps:$4 sm:$0xff]  }
 0xeab   : > { %6045 = vmatprep.subr.bf16.mxu1 %v14412_v59  ;;  %v14473_v59 = vld [vmem:[#allocation5 + $0x1e8] ss:$16 sps:$4 sm:$0xff]   ;;  %6843 = vmatpush1.bf16.msra.mxu0 %v14470_v37 }
 0xeae   : > { %6046 = vmatpush1.bf16.msra.mxu1 %v14410_v57  ;;  %v14478_v57 = vld [vmem:[#allocation5 + $0x1c4] ss:$16 sps:$4 sm:$0xff]  }
 0xeaf   : > { %6047 = vmatprep.subr.bf16.mxu1 %v14415_v46  ;;  %v14481_v46 = vld [vmem:[#allocation5 + $0x1cc] ss:$16 sps:$4 sm:$0xff]   ;;  %6844 = vmatprep.subr.bf16.mxu0 %v14478_v57 }
 0xeb1   : > { %v16899_v55 = vpop.f32.mrf.mxu0 }
 0xeb2   : > { %6048 = vmatpush1.bf16.msra.mxu1 %v14413_v58  ;;  %v14476_v58 = vld [vmem:[#allocation5 + $0x1c0] ss:$16 sps:$4 sm:$0xff]  }
 0xeb3   : > { %v12967_v5 = vpop.f32.mrf.mxu0  ;;  %6049 = vmatprep.subr.bf16.mxu1 %v14418_v49  ;;  %6845 = vmatpush1.bf16.msra.mxu0 %v14476_v58  ;;  %v14484_v49 = vld [vmem:[#allocation5 + $0x1a4] ss:$16 sps:$4 sm:$0xff]  }
 0xeb4   : > { %v14482_v5 = vld [vmem:[#allocation5 + $0x1a0] ss:$16 sps:$4 sm:$0xff]   ;;  %6846 = vmatprep.subr.bf16.mxu0 %v14484_v49 }
 0xeb5   : > { %v5617_v12 = vpop.f32.mrf.mxu0 }
 0xeb6   : > { %6050 = vmatpush1.bf16.msra.mxu1 %v14416_v17  ;;  %v14487_v17 = vld [vmem:[#allocation5 + $0x1ac] ss:$16 sps:$4 sm:$0xff]   ;;  %v14488_v12 = vld [vmem:[#allocation5 + $0x180] ss:$16 sps:$4 sm:$0xff]  }
 0xeb7   : > { %v12968_v61 = vpop.f32.mrf.mxu0  ;;  %6051 = vmatprep.subr.bf16.mxu1 %v14421_v24  ;;  %v14485_v24 = vld [vmem:[#allocation5 + $0x1a8] ss:$16 sps:$4 sm:$0xff]   ;;  %6847 = vmatpush1.bf16.msra.mxu0 %v14482_v5 }
 0xeb8   : > { %v14491_v61 = vld [vmem:[#allocation5 + $0x188] ss:$16 sps:$4 sm:$0xff]  }
 0xeba   : > { %6052 = vmatpush1.bf16.msra.mxu1 %v14419_v56  ;;  %v14490_v56 = vld [vmem:[#allocation5 + $0x184] ss:$16 sps:$4 sm:$0xff]  }
 0xebb   : > { %6279 = vmatprep.subr.bf16.mxu1 %v14424_v53  ;;  %v14493_v53 = vld [vmem:[#allocation5 + $0x18c] ss:$16 sps:$4 sm:$0xff]   ;;  %6848 = vmatprep.subr.bf16.mxu0 %v14490_v56 }
 0xebc   : > { %6849 = vmatpush1.bf16.msra.mxu0 %v14488_v12 }
 0xebd   : > { %6070 = vmatmul.mubr.bf16.vlgmr.msra.gmra.mxu1 %v16876_v7  ;;  %v14437_v7 = vld [vmem:[#allocation5 + $0x48] ss:$16 sps:$4 sm:$0xff]  }
 0xebe   : > { %6280 = vmatpush1.bf16.msra.mxu1 %v14422_v39  ;;  %6311 = vmatprep.mubr.bf16.mxu1 %v18353_v34  ;;  %v14496_v39 = vld [vmem:[#allocation5 + $0x164] ss:$16 sps:$4 sm:$0xff]  }
 0xebf   : > { %6281 = vmatprep.subr.bf16.mxu1 %v14427_v15  ;;  %v14499_v15 = vld [vmem:[#allocation5 + $0x16c] ss:$16 sps:$4 sm:$0xff]   ;;  %6850 = vmatprep.subr.bf16.mxu0 %v14496_v39 }
 0xec2   : > { %6282 = vmatpush1.bf16.msra.mxu1 %v14425_v51  ;;  %v14494_v51 = vld [vmem:[#allocation5 + $0x160] ss:$16 sps:$4 sm:$0xff]  }
 0xec3   : > { %6283 = vmatprep.subr.bf16.mxu1 %v14430_v52  ;;  %v14497_v52 = vld [vmem:[#allocation5 + $0x168] ss:$16 sps:$4 sm:$0xff]   ;;  %6851 = vmatpush1.bf16.msra.mxu0 %v14494_v51 }
 0xec6   : > { %6284 = vmatpush1.bf16.msra.mxu1 %v14428_v47  ;;  %v14502_v47 = vld [vmem:[#allocation5 + $0x144] ss:$16 sps:$4 sm:$0xff]  }
 0xec7   : > { %6285 = vmatprep.subr.bf16.mxu1 %v14433_v62  ;;  %v14505_v62 = vld [vmem:[#allocation5 + $0x14c] ss:$16 sps:$4 sm:$0xff]   ;;  %6852 = vmatprep.subr.bf16.mxu0 %v14502_v47 }
 0xeca   : > { %6286 = vmatpush1.bf16.msra.mxu1 %v14431_v9  ;;  %v14500_v9 = vld [vmem:[#allocation5 + $0x140] ss:$16 sps:$4 sm:$0xff]  }
 0xecb   : > { %6287 = vmatprep.subr.bf16.mxu1 %v14436_v21  ;;  %v14503_v21 = vld [vmem:[#allocation5 + $0x148] ss:$16 sps:$4 sm:$0xff]   ;;  %6853 = vmatpush1.bf16.msra.mxu0 %v14500_v9 }
 0xece   : > { %6288 = vmatpush1.bf16.msra.mxu1 %v14434_v3  ;;  %v14508_v3 = vld [vmem:[#allocation5 + $0x124] ss:$16 sps:$4 sm:$0xff]  }
 0xecf   : > { %6289 = vmatprep.subr.bf16.mxu1 %v14439_v23  ;;  %v14511_v23 = vld [vmem:[#allocation5 + $0x12c] ss:$16 sps:$4 sm:$0xff]   ;;  %6854 = vmatprep.subr.bf16.mxu0 %v14508_v3 }
 0xed1   : > { %v6030_v26 = vpop.f32.mrf.mxu0 }
 0xed2   : > { %6290 = vmatpush1.bf16.msra.mxu1 %v14437_v7  ;;  %v14506_v7 = vld [vmem:[#allocation5 + $0x120] ss:$16 sps:$4 sm:$0xff]  }
 0xed3   : > { %v6032_v44 = vpop.f32.mrf.mxu0  ;;  %6291 = vmatprep.subr.bf16.mxu1 %v14442_v13  ;;  %v14509_v13 = vld [vmem:[#allocation5 + $0x128] ss:$16 sps:$4 sm:$0xff]   ;;  %6855 = vmatpush1.bf16.msra.mxu0 %v14506_v7  ;;  %v16937_v7 = vld [vmem:[#allocation4 + $0x30] sm:$0xff]  }
 0xed5   : > { %v6034_v33 = vpop.f32.mrf.mxu0 }
 0xed6   : > { %6292 = vmatpush1.bf16.msra.mxu1 %v14440_v28  ;;  %v14517_v28 = vld [vmem:[#allocation5 + $0x10c] ss:$16 sps:$4 sm:$0xff]  }
 0xed7   : > { %v6035_v20 = vpop.f32.mrf.mxu0  ;;  %6293 = vmatprep.subr.bf16.mxu1 %v14445_v36  ;;  %v14515_v36 = vld [vmem:[#allocation5 + $0x108] ss:$16 sps:$4 sm:$0xff]  }
 0xeda   : > { %6294 = vmatpush1.bf16.msra.mxu1 %v14443_v18 }
 0xedb   : > { %6641 = vmatprep.subr.bf16.mxu1 %v14448_v29 }
 0xedd   : > { %6312 = vmatmul.mubr.bf16.vlgmr.msra.gmra.mxu1 %v16883_v8  ;;  %v14461_v8 = vld [vmem:[#allocation6 + $0x148] ss:$16 sps:$4 sm:$0xff]  }
 0xede   : > { %6642 = vmatpush1.bf16.msra.mxu1 %v14446_v42  ;;  %6673 = vmatprep.mubr.bf16.mxu1 %v18353_v34 }
 0xedf   : > { %6643 = vmatprep.subr.bf16.mxu1 %v14451_v11 }
 0xee2   : > { %6644 = vmatpush1.bf16.msra.mxu1 %v14449_v41 }
 0xee3   : > { %6645 = vmatprep.subr.bf16.mxu1 %v14454_v22  ;;  %v6320_v22 = vld [vmem:[#allocation7] sm:$0xf] }
 0xee6   : > { %6646 = vmatpush1.bf16.msra.mxu1 %v14452_v45 }
 0xee7   : > { %6647 = vmatprep.subr.bf16.mxu1 %v14457_v1  ;;  %v18354_v1 = vld [vmem:[#allocation68_spill] sm:$0xff] }
 0xeea   : > { %6648 = vmatpush1.bf16.msra.mxu1 %v14455_v25  ;;  %v6329_v25 = vrot.slane %v6320_v22, %v18354_v1 }
 0xeeb   : > { %6649 = vmatprep.subr.bf16.mxu1 %v14460_v27  ;;  %v18355_v27 = vld [vmem:[#allocation67_spill] sm:$0xff] }
 0xeee   : > { %6650 = vmatpush1.bf16.msra.mxu1 %v14458_v14  ;;  %v6325_v14 = vrot.slane %v6320_v22, %v18355_v27 }
 0xeef   : > { %6651 = vmatprep.subr.bf16.mxu1 %v14463_v16 }
 0xef1   : > { %v6272_v31 = vpop.f32.mrf.mxu0 }
 0xef2   : > { %v16905_v32 = vadd.f32 %v6272_v31, %v6030_v26  ;;  %6652 = vmatpush1.bf16.msra.mxu1 %v14461_v8  ;;  %v14514_v26 = vld [vmem:[#allocation5 + $0x104] ss:$16 sps:$4 sm:$0xff]  }
 0xef3   : > { %v6274_v38 = vpop.f32.mrf.mxu0  ;;  %6653 = vmatprep.subr.bf16.mxu1 %v14466_v30  ;;  %6856 = vmatprep.subr.bf16.mxu0 %v14514_v26  ;;  %v16945_v26 = vld [vmem:[#allocation4 + $0x20] sm:$0xff]  }
 0xef4   : > { %v16907_v40 = vadd.f32 %v6274_v38, %v6032_v44  ;;  %v14512_v44 = vld [vmem:[#allocation5 + $0x100] ss:$16 sps:$4 sm:$0xff]   ;;  %v6342_v31 = vadd.f32 %v6325_v14, %v16905_v32 }
 0xef5   : > { %v6276_v0 = vpop.f32.mrf.mxu0  ;;  %6857 = vmatpush1.bf16.msra.mxu0 %v14512_v44  ;;  %v16953_v44 = vld [vmem:[#allocation4 + $0x10] sm:$0xff]  }
 0xef6   : > { %6654 = vmatpush1.bf16.msra.mxu1 %v14464_v35  ;;  %12989 = vmatprep.subr.bf16.mxu0 %v18296_v10  ;;  %v6343_v30 = vadd.f32 %v6329_v25, %v16907_v40  ;;  %v11272_v35 = vmul.f32 -1.442695, %v6342_v31  ;;  %v6924_v25 = vld [vmem:[#allocation7 + $0x4] sm:$0xf] }
 0xef7   : > { %6655 = vmatprep.subr.bf16.mxu1 %v14469_v43  ;;  %v6277_v4 = vpop.f32.mrf.mxu0  ;;  %v6929_v14 = vrot.slane %v6924_v25, %v18355_v27  ;;  %v6933_v31 = vrot.slane %v6924_v25, %v18354_v1  ;;  %v17205_v27 = vld [vmem:[#allocation4 + $0x1d8] sm:$0xff]   ;;  %v17209_v1 = vld [vmem:[#allocation4 + $0x190] sm:$0xff]  }
 0xef8   : > { %18369 = vst [vmem:[#allocation84_spill] sm:$0xff] %v17205_v27  ;;  %18370 = vst [vmem:[#allocation85_spill] sm:$0xff] %v17209_v1 }
 0xefa   : > { %6656 = vmatpush1.bf16.msra.mxu1 %v14467_v54  ;;  %v18356_v54 = vld [vmem:[#allocation70_spill] sm:$0xff] }
 0xefb   : > { %6883 = vmatprep.subr.bf16.mxu1 %v14475_v50  ;;  %v6333_v4 = vrot.slane %v6320_v22, %v18356_v54  ;;  %v18357_v50 = vld [vmem:[#allocation69_spill] sm:$0xff] }
 0xefc   : > { %v6337_v37 = vrot.slane %v6320_v22, %v18357_v50  ;;  %v14524_v22 = vld [vmem:[#allocation8 + $0x8] sm:$0xff]  }
 0xefd   : > { %6674 = vmatmul.mubr.bf16.vlgmr.msra.gmra.mxu1 %v16888_v63  ;;  %v14479_v63 = vld [vmem:[#allocation5 + $0x1c8] ss:$16 sps:$4 sm:$0xff]  }
 0xefe   : > { %6915 = vmatprep.mubr.bf16.mxu1 %v18353_v34  ;;  %6884 = vmatpush1.bf16.msra.mxu1 %v14473_v59  ;;  %v17213_v34 = vld [vmem:[#allocation4 + $0x1d0] sm:$0xff]  }
 0xeff   : > { %6885 = vmatprep.subr.bf16.mxu1 %v14481_v46  ;;  %18371 = vst [vmem:[#allocation86_spill] sm:$0xff] %v17213_v34 }
 0xf02   : > { %6886 = vmatpush1.bf16.msra.mxu1 %v14479_v63 }
 0xf03   : > { %6887 = vmatprep.subr.bf16.mxu1 %v14487_v17 }
 0xf06   : > { %6888 = vmatpush1.bf16.msra.mxu1 %v14485_v24  ;;  %v6365_v24 = vld [vmem:[#allocation3] sm:$0xff] }
 0xf07   : > { %6889 = vmatprep.subr.bf16.mxu1 %v14493_v53 }
 0xf0a   : > { %6890 = vmatpush1.bf16.msra.mxu1 %v14491_v61 }
 0xf0b   : > { %6891 = vmatprep.subr.bf16.mxu1 %v14499_v15 }
 0xf0e   : > { %6892 = vmatpush1.bf16.msra.mxu1 %v14497_v52 }
 0xf0f   : > { %6893 = vmatprep.subr.bf16.mxu1 %v14505_v62 }
 0xf11   : > { %v16911_v2 = vpop.f32.mrf.mxu0 }
 0xf12   : > { %6894 = vmatpush1.bf16.msra.mxu1 %v14503_v21 }
 0xf13   : > { %v16913_v60 = vpop.f32.mrf.mxu0  ;;  %6895 = vmatprep.subr.bf16.mxu1 %v14511_v23  ;;  %v16931_v23 = vld [vmem:[#allocation4 + $0x38] sm:$0xff]  }
 0xf15   : > { %v6638_v48 = vpop.f32.mrf.mxu0 }
 0xf16   : > { %6896 = vmatpush1.bf16.msra.mxu1 %v14509_v13  ;;  %v16941_v13 = vld [vmem:[#allocation4 + $0x28] sm:$0xff]  }
 0xf17   : > { %v6639_v6 = vpop.f32.mrf.mxu0  ;;  %6897 = vmatprep.subr.bf16.mxu1 %v14517_v28  ;;  %v16949_v28 = vld [vmem:[#allocation4 + $0x18] sm:$0xff]  }
 0xf1a   : > { %6898 = vmatpush1.bf16.msra.mxu1 %v14515_v36  ;;  %v16957_v36 = vld [vmem:[#allocation4 + $0x8] sm:$0xff]  }
 0xf1b   : > { %13009 = vmatprep.subr.bf16.mxu1 %v18296_v10 }
 0xf5d   : > { %v5734_v33 = vpop.f32.mrf.mxu1 }
 0xf5e   : > { %v5735_v18 = vadd.f32 %v5734_v33, %v16899_v55  ;;  %v11273_v55 = vmul.f32 -1.442695, %v6343_v30  ;;  %v16961_v33 = vld [vmem:[#allocation4] sm:$0xff]  }
 0xf5f   : > { %v12987_v20 = vpop.f32.mrf.mxu1 }
 0xf60   : > { %14860 = vtanh.f32 %v5735_v18  ;;  %v14518_v18 = vld [vmem:[#allocation8 + $0x38] sm:$0xff]   ;;  %v14519_v20 = vld [vmem:[#allocation8 + $0x30] sm:$0xff]  }
 0xf61   : > { %v5737_v29 = vpop.f32.mrf.mxu1  ;;  %14862 = vpow2.f32 %v11273_v55 }
 0xf62   : > { %14864 = vpow2.f32 %v11272_v35  ;;  %v14520_v29 = vld [vmem:[#allocation8 + $0x28] sm:$0xff]  }
 0xf63   : > { %v12988_v42 = vpop.f32.mrf.mxu1 }
 0xf64   : > { %v14521_v42 = vld [vmem:[#allocation8 + $0x20] sm:$0xff]  }
 0xf6d   : > { %v14861_v11 = vpop.eup %14860 }
 0xf6e   : > { %11205 = vst [vmem:[%s15719_s27 + $0x8] sm:$0xff] %v14861_v11  ;;  %v14863_v38 = vpop.eup %14862  ;;  %v14522_v11 = vld [vmem:[#allocation8 + $0x18] sm:$0xff]  }
 0xf6f   : > { %v14865_v43 = vpop.eup %14864  ;;  %v6355_v0 = vadd.f32 1.0, %v14863_v38 }
 0xf70   : > { %v6349_v48 = vadd.f32 1.0, %v14865_v43 }
 0xf71   : > { %14866 = vrcp.f32 %v6355_v0 }
 0xf72   : > { %14868 = vrcp.f32 %v6349_v48 }
 0xf7d   : > { %v6071_v41 = vpop.f32.mrf.mxu1 }
 0xf7e   : > { %v14867_v49 = vpop.eup %14866 }
 0xf7f   : > { %v6073_v45 = vpop.f32.mrf.mxu1  ;;  %v14869_v17 = vpop.eup %14868  ;;  %v6366_v12 = vmul.f32 %v14867_v49, %v6365_v24 }
 0xf81   : > { %v6075_v16 = vpop.f32.mrf.mxu1 }
 0xf83   : > { %v6076_v8 = vpop.f32.mrf.mxu1 }
 0xf9d   : > { %v6313_v6 = vpop.f32.mrf.mxu1 }
 0xf9e   : > { %v6314_v19 = vadd.f32 %v6313_v6, %v6071_v41  ;;  %v14523_v41 = vld [vmem:[#allocation8 + $0x10] sm:$0xff]  }
 0xf9f   : > { %v6315_v59 = vpop.f32.mrf.mxu1 }
 0xfa0   : > { %v6344_v57 = vadd.f32 %v6333_v4, %v6314_v19  ;;  %v6316_v40 = vadd.f32 %v6315_v59, %v6073_v45  ;;  %v14525_v45 = vld [vmem:[#allocation8] sm:$0xff]  }
 0xfa1   : > { %v6317_v32 = vpop.f32.mrf.mxu1 }
 0xfa2   : > { %14870 = vtanh.f32 %v6344_v57  ;;  %v6345_v46 = vadd.f32 %v6337_v37, %v6316_v40 }
 0xfa3   : > { %v6318_v58 = vpop.f32.mrf.mxu1 }
 0xfa4   : > { %v11274_v63 = vmul.f32 -1.442695, %v6345_v46  ;;  %v6937_v46 = vrot.slane %v6924_v25, %v18356_v54  ;;  %v17201_v54 = vld [vmem:[#allocation4 + $0x198] sm:$0xff]  }
 0xfa5   : > { %18368 = vst [vmem:[#allocation83_spill] sm:$0xff] %v17201_v54 }
 0xfa6   : > { %14872 = vpow2.f32 %v11274_v63 }
 0xfaf   : > { %v14871_v5 = vpop.eup %14870 }
 0xfb0   : > { %v6367_v56 = vmul.f32 %v14871_v5, %v14869_v17 }
 0xfb2   : > { %v6368_v61 = vadd.f32 %v6367_v56, %v6366_v12 }
 0xfb3   : > { %v14873_v53 = vpop.eup %14872 }
 0xfb4   : > { %6371 = vst [vmem:[#allocation3] sm:$0xff] %v6368_v61  ;;  %v6362_v39 = vadd.f32 1.0, %v14873_v53  ;;  %14874 = vtanh.f32 %v6368_v61  ;;  %v6969_v53 = vld [vmem:[#allocation3 + $0x8] sm:$0xff] }
 0xfb6   : > { %14876 = vrcp.f32 %v6362_v39 }
 0xfbd   : > { %v16925_v15 = vpop.f32.mrf.mxu1 }
 0xfbf   : > { %v16927_v51 = vpop.f32.mrf.mxu1 }
 0xfc1   : > { %v6679_v52 = vpop.f32.mrf.mxu1  ;;  %v14875_v47 = vpop.eup %14874 }
 0xfc3   : > { %v14877_v62 = vpop.eup %14876  ;;  %v6680_v9 = vpop.f32.mrf.mxu1 }
 0xfc4   : > { %v6370_v21 = vmul.f32 %v14877_v62, %v14875_v47 }
 0xfc6   : > { %6372 = vst [vmem:[#allocation2] sm:$0xff] %v6370_v21  ;;  %v6373_v3 = vpack.c.bf16 %v6370_v21, %v6370_v21 }
 0xfc8   : > { %6875 = vmatmul.mubr.bf16.vlgmr.msra.gmra.mxu0 %v6373_v3  ;;  %6916 = vmatmul.mubr.bf16.vlgmr.msra.gmra.mxu1 %v6373_v3  ;;  %v16984_v3 = vld [vmem:[#allocation4 + $0x78] sm:$0xff]  }
 0xfc9   : > { %13005 = vmatprep.mubr.msk.bf16.mxu0 %vm15529_vm0, %v18296_v10  ;;  %13010 = vmatpush3.bf16.xpose.msra.mxu1 %v16931_v23 }
 0xfca   : > { %13011 = vmatprep.subr.bf16.mxu1 %v18296_v10  ;;  %13025 = vmatprep.mubr.msk.bf16.mxu1 %vm15529_vm0, %v18296_v10 }
 0xfcb   : > { %12990 = vmatpush3.bf16.msra.mxu0 %v14518_v18  ;;  %v16990_v18 = vld [vmem:[#allocation4 + $0x70] sm:$0xff]  }
 0xfcc   : > { %12991 = vmatprep.subr.bf16.mxu0 %v18296_v10 }
 0xfcf   : > { %12992 = vmatpush3.bf16.msra.mxu0 %v14519_v20  ;;  %v16994_v20 = vld [vmem:[#allocation4 + $0x68] sm:$0xff]  }
 0xfd0   : > { %12993 = vmatprep.subr.bf16.mxu0 %v18296_v10 }
 0xfd1   : > { %13012 = vmatpush3.bf16.xpose.msra.mxu1 %v16937_v7 }
 0xfd2   : > { %13013 = vmatprep.subr.bf16.mxu1 %v18296_v10 }
 0xfd3   : > { %12994 = vmatpush3.bf16.msra.mxu0 %v14520_v29  ;;  %v16998_v29 = vld [vmem:[#allocation4 + $0x60] sm:$0xff]  }
 0xfd4   : > { %12995 = vmatprep.subr.bf16.mxu0 %v18296_v10 }
 0xfd7   : > { %12996 = vmatpush3.bf16.msra.mxu0 %v14521_v42  ;;  %v17002_v42 = vld [vmem:[#allocation4 + $0x58] sm:$0xff]  }
 0xfd8   : > { %12997 = vmatprep.subr.bf16.mxu0 %v18296_v10 }
 0xfd9   : > { %13014 = vmatpush3.bf16.xpose.msra.mxu1 %v16941_v13 }
 0xfda   : > { %13015 = vmatprep.subr.bf16.mxu1 %v18296_v10 }
 0xfdb   : > { %12998 = vmatpush3.bf16.msra.mxu0 %v14522_v11  ;;  %v17006_v11 = vld [vmem:[#allocation4 + $0x50] sm:$0xff]  }
 0xfdc   : > { %12999 = vmatprep.subr.bf16.mxu0 %v18296_v10 }
 0xfdf   : > { %13000 = vmatpush3.bf16.msra.mxu0 %v14523_v41  ;;  %v17010_v41 = vld [vmem:[#allocation4 + $0x48] sm:$0xff]  }
 0xfe0   : > { %13001 = vmatprep.subr.bf16.mxu0 %v18296_v10 }
 0xfe1   : > { %13016 = vmatpush3.bf16.xpose.msra.mxu1 %v16945_v26 }
 0xfe2   : > { %13017 = vmatprep.subr.bf16.mxu1 %v18296_v10 }
 0xfe3   : > { %13002 = vmatpush3.bf16.msra.mxu0 %v14524_v22  ;;  %v17014_v22 = vld [vmem:[#allocation4 + $0x40] sm:$0xff]  }
 0xfe4   : > { %13003 = vmatprep.subr.bf16.mxu0 %v18296_v10 }
 0xfe7   : > { %13004 = vmatpush3.bf16.msra.mxu0 %v14525_v45 }
 0xfe8   : > { %13029 = vmatprep.subr.bf16.mxu0 %v18296_v10 }
 0xfe9   : > { %13018 = vmatpush3.bf16.xpose.msra.mxu1 %v16949_v28 }
 0xfea   : > { %13019 = vmatprep.subr.bf16.mxu1 %v18296_v10 }
 0xff1   : > { %13020 = vmatpush3.bf16.xpose.msra.mxu1 %v16953_v44 }
 0xff2   : > { %13021 = vmatprep.subr.bf16.mxu1 %v18296_v10 }
 0xff9   : > { %13022 = vmatpush3.bf16.xpose.msra.mxu1 %v16957_v36 }
 0xffa   : > { %13023 = vmatprep.subr.bf16.mxu1 %v18296_v10 }
0x1001   : > { %13024 = vmatpush3.bf16.xpose.msra.mxu1 %v16961_v33 }
0x1002   : > { %13049 = vmatprep.subr.bf16.mxu1 %v18296_v10 }
0x1088   : > { %v6876_v16 = vpop.f32.mrf.mxu0  ;;  %v6917_v8 = vpop.f32.mrf.mxu1 }
0x1089   : > { %v6877_v30 = vadd.f32 %v6876_v16, %v16911_v2  ;;  %v6941_v2 = vrot.slane %v6924_v25, %v18357_v50  ;;  %v6918_v32 = vadd.f32 %v6917_v8, %v16925_v15  ;;  %v18359_v25 = vld [vmem:[#allocation72_spill] sm:$0xff]  ;;  %v17197_v50 = vld [vmem:[#allocation4 + $0x1e0] sm:$0xff]  }
0x108a   : > { %v6878_v55 = vpop.f32.mrf.mxu0  ;;  %v6919_v35 = vpop.f32.mrf.mxu1  ;;  %18367 = vst [vmem:[#allocation82_spill] sm:$0xff] %v17197_v50 }
0x108b   : > { %v6946_v38 = vadd.f32 %v6929_v14, %v6877_v30  ;;  %v6879_v43 = vadd.f32 %v6878_v55, %v16913_v60  ;;  %v6920_v57 = vadd.f32 %v6919_v35, %v16927_v51  ;;  %v6948_v63 = vadd.f32 %v6937_v46, %v6918_v32  ;;  %v17068_v32 = vld [vmem:[#allocation4 + $0x90] sm:$0xff]  }
0x108c   : > { %v6880_v0 = vpop.f32.mrf.mxu0  ;;  %v6921_v4 = vpop.f32.mrf.mxu1  ;;  %v17072_v46 = vld [vmem:[#allocation4 + $0xd0] sm:$0xff]  }
0x108d   : > { %v11339_v48 = vmul.f32 -1.442695, %v6946_v38  ;;  %v6947_v6 = vadd.f32 %v6933_v31, %v6879_v43  ;;  %v6949_v40 = vadd.f32 %v6941_v2, %v6920_v57  ;;  %v17024_v0 = vld [vmem:[#allocation4 + $0xb8] sm:$0xff]   ;;  %v17056_v57 = vld [vmem:[#allocation4 + $0xe0] sm:$0xff]  }
0x108e   : > { %v6881_v19 = vpop.f32.mrf.mxu0  ;;  %v6922_v37 = vpop.f32.mrf.mxu1  ;;  %v17028_v4 = vld [vmem:[#allocation4 + $0xf8] sm:$0xff]  }
0x108f   : > { %14878 = vpow2.f32 %v11339_v48  ;;  %v11340_v59 = vmul.f32 -1.442695, %v6947_v6  ;;  %v11341_v58 = vmul.f32 -1.442695, %v6949_v40  ;;  %v17036_v48 = vld [vmem:[#allocation4 + $0xb0] sm:$0xff]   ;;  %v17044_v19 = vld [vmem:[#allocation4 + $0xa8] sm:$0xff]  }
0x1090   : > { %v17040_v6 = vld [vmem:[#allocation4 + $0xf0] sm:$0xff]   ;;  %v17048_v37 = vld [vmem:[#allocation4 + $0xe8] sm:$0xff]   ;;  %v17060_v2 = vld [vmem:[#allocation4 + $0x98] sm:$0xff]  }
0x1091   : > { %14880 = vpow2.f32 %v11340_v59  ;;  %v17052_v59 = vld [vmem:[#allocation4 + $0xa0] sm:$0xff]   ;;  %v17064_v40 = vld [vmem:[#allocation4 + $0xd8] sm:$0xff]  }
0x1092   : > { %14882 = vpow2.f32 %v11341_v58  ;;  %v17076_v58 = vld [vmem:[#allocation4 + $0x88] sm:$0xff]  }
0x109c   : > { %v14879_v60 = vpop.eup %14878 }
0x109d   : > { %v6953_v49 = vadd.f32 1.0, %v14879_v60  ;;  %v17080_v60 = vld [vmem:[#allocation4 + $0xc8] sm:$0xff]  }
0x109e   : > { %v14881_v17 = vpop.eup %14880 }
0x109f   : > { %14884 = vrcp.f32 %v6953_v49  ;;  %v6959_v5 = vadd.f32 1.0, %v14881_v17  ;;  %v14883_v24 = vpop.eup %14882  ;;  %v17088_v17 = vld [vmem:[#allocation4 + $0xc0] sm:$0xff]  }
0x10a0   : > { %14886 = vtanh.f32 %v6948_v63  ;;  %v6966_v39 = vadd.f32 1.0, %v14883_v24  ;;  %v17084_v63 = vld [vmem:[#allocation4 + $0x80] sm:$0xff]  }
0x10a1   : > { %14888 = vrcp.f32 %v6959_v5 }
0x10a2   : > { %14890 = vrcp.f32 %v6966_v39  ;;  %v17108_v39 = vld [vmem:[#allocation4 + $0x170] sm:$0xff]  }
0x10ac   : > { %v14885_v12 = vpop.eup %14884 }
0x10ad   : > { %v14887_v56 = vpop.eup %14886 }
0x10ae   : > { %v14889_v61 = vpop.eup %14888  ;;  %v6971_v51 = vmul.f32 %v14887_v56, %v14885_v12  ;;  %v17092_v56 = vld [vmem:[#allocation4 + $0x138] sm:$0xff]  }
0x10af   : > { %v6970_v15 = vmul.f32 %v14889_v61, %v6969_v53  ;;  %v14891_v47 = vpop.eup %14890  ;;  %v17098_v61 = vld [vmem:[#allocation4 + $0x178] sm:$0xff]   ;;  %v17104_v53 = vld [vmem:[#allocation4 + $0x130] sm:$0xff]  }
0x10b1   : > { %v6972_v52 = vadd.f32 %v6971_v51, %v6970_v15  ;;  %v17112_v51 = vld [vmem:[#allocation4 + $0x128] sm:$0xff]  }
0x10b2   : > { %v17116_v15 = vld [vmem:[#allocation4 + $0x168] sm:$0xff]  }
0x10b3   : > { %14892 = vtanh.f32 %v6972_v52  ;;  %6975 = vst [vmem:[#allocation3 + $0x8] sm:$0xff] %v6972_v52  ;;  %v17120_v52 = vld [vmem:[#allocation4 + $0x120] sm:$0xff]  }
0x10c0   : > { %v14893_v62 = vpop.eup %14892 }
0x10c1   : > { %v6974_v9 = vmul.f32 %v14893_v62, %v14891_v47  ;;  %v17124_v47 = vld [vmem:[#allocation4 + $0x160] sm:$0xff]   ;;  %v17128_v62 = vld [vmem:[#allocation4 + $0x118] sm:$0xff]  }
0x10c3   : > { %6976 = vst [vmem:[#allocation2 + $0x8] sm:$0xff] %v6974_v9  ;;  %v16981_v21 = vpack.c.bf16 %v6974_v9, %v6974_v9  ;;  %v17132_v9 = vld [vmem:[#allocation4 + $0x158] sm:$0xff]  }
0x10c5   : > { %18358 = vst [vmem:[#allocation74_spill] sm:$0xff] %v16981_v21  ;;  %13006 = vmatmul.mubr.bf16.vlgmr.msra.gmra.mxu0 %v16981_v21  ;;  %v17217_v21 = vld [vmem:[#allocation4 + $0x188] sm:$0xff]  }
0x10c6   : > { %13030 = vmatpush3.bf16.xpose.msra.mxu0 %v16984_v3  ;;  %13045 = vmatprep.mubr.msk.bf16.mxu0 %vm15529_vm0, %v18296_v10  ;;  %18372 = vst [vmem:[#allocation87_spill] sm:$0xff] %v17217_v21 }
0x10c7   : > { %13031 = vmatprep.subr.bf16.mxu0 %v18296_v10 }
0x10ce   : > { %13032 = vmatpush3.bf16.xpose.msra.mxu0 %v16990_v18 }
0x10cf   : > { %13033 = vmatprep.subr.bf16.mxu0 %v18296_v10 }
0x10d6   : > { %13034 = vmatpush3.bf16.xpose.msra.mxu0 %v16994_v20 }
0x10d7   : > { %13035 = vmatprep.subr.bf16.mxu0 %v18296_v10 }
0x10de   : > { %13036 = vmatpush3.bf16.xpose.msra.mxu0 %v16998_v29 }
0x10df   : > { %13037 = vmatprep.subr.bf16.mxu0 %v18296_v10 }
0x10e6   : > { %13038 = vmatpush3.bf16.xpose.msra.mxu0 %v17002_v42 }
0x10e7   : > { %13039 = vmatprep.subr.bf16.mxu0 %v18296_v10 }
0x10ee   : > { %13040 = vmatpush3.bf16.xpose.msra.mxu0 %v17006_v11 }
0x10ef   : > { %13041 = vmatprep.subr.bf16.mxu0 %v18296_v10 }
0x10f6   : > { %13042 = vmatpush3.bf16.xpose.msra.mxu0 %v17010_v41 }
0x10f7   : > { %13043 = vmatprep.subr.bf16.mxu0 %v18296_v10 }
0x10fe   : > { %13044 = vmatpush3.bf16.xpose.msra.mxu0 %v17014_v22 }
0x10ff   : > { %13069 = vmatprep.subr.bf16.mxu0 %v18296_v10 }
0x1185   : > { %v17018_v45 = vpop.f32.mrf.mxu0 }
0x1186   : > { %v7090_v14 = vrot.slane %v17018_v45, %v18359_v25 }
0x1187   : > { %v13007_v16 = vpop.f32.mrf.mxu0 }
0x1188   : > { %v7098_v8 = vcombine.high %v7090_v14, %v7090_v14  ;;  %v7106_v30 = vrot.slane %v7090_v14, %v18359_v25  ;;  %v17136_v14 = vld [vmem:[#allocation4 + $0x110] sm:$0xff]  }
0x1189   : > { %v7079_v31 = vpop.f32.mrf.mxu0  ;;  %v17140_v16 = vld [vmem:[#allocation4 + $0x150] sm:$0xff]  }
0x118a   : > { %v7120_v55 = vrot.slane %v7098_v8, %v18359_v25  ;;  %v7140_v35 = vpack.c.bf16 %v7106_v30, %v7106_v30  ;;  %v7128_v49 = vcombine.high %v7106_v30, %v7106_v30  ;;  %v7083_v8 = vcombine.high %v17018_v45, %v17018_v45  ;;  %v17146_v30 = vld [vmem:[#allocation4 + $0x108] sm:$0xff]  }
0x118b   : > { %v13008_v38 = vpop.f32.mrf.mxu0  ;;  %v17150_v31 = vld [vmem:[#allocation4 + $0x148] sm:$0xff]  }
0x118c   : > { %v7141_v43 = vpack.c.bf16 %v7120_v55, %v7120_v55  ;;  %13026 = vmatmul.mubr.bf16.vlgmr.msra.gmra.mxu1 %v7140_v35  ;;  %v7130_v5 = vcombine.high %v7120_v55, %v7120_v55  ;;  %v7142_v24 = vpack.c.bf16 %v7128_v49, %v7128_v49  ;;  %v7097_v55 = vrot.slane %v7083_v8, %v18359_v25  ;;  %v17155_v38 = vld [vmem:[#allocation4 + $0x100] sm:$0xff]   ;;  %v17171_v8 = vld [vmem:[#allocation4 + $0x1f8] sm:$0xff]  }
0x118d   : > { %13050 = vmatpush3.bf16.xpose.msra.mxu1 %v17024_v0  ;;  %13065 = vmatprep.mubr.msk.bf16.mxu1 %vm15529_vm0, %v18296_v10  ;;  %18361 = vst [vmem:[#allocation76_spill] sm:$0xff] %v17171_v8 }
0x118e   : > { %13046 = vmatmul.mubr.bf16.vlgmr.msra.gmra.mxu0 %v7141_v43  ;;  %13051 = vmatprep.subr.bf16.mxu1 %v18296_v10  ;;  %v7143_v12 = vpack.c.bf16 %v7130_v5, %v7130_v5  ;;  %v7099_v35 = vcombine.high %v7097_v55, %v7097_v55  ;;  %v7113_v45 = vrot.slane %v7097_v55, %v18359_v25  ;;  %v17160_v43 = vld [vmem:[#allocation4 + $0x140] sm:$0xff]   ;;  %v17177_v55 = vld [vmem:[#allocation4 + $0x1b0] sm:$0xff]  }
0x118f   : > { %13070 = vmatpush3.bf16.xpose.msra.mxu0 %v17028_v4  ;;  %13085 = vmatprep.mubr.msk.bf16.mxu0 %vm15529_vm0, %v18296_v10  ;;  %18362 = vst [vmem:[#allocation77_spill] sm:$0xff] %v17177_v55 }
0x1190   : > { %13071 = vmatprep.subr.bf16.mxu0 %v18296_v10  ;;  %v7127_v49 = vrot.slane %v7099_v35, %v18359_v25  ;;  %v7144_v5 = vpack.c.bf16 %v7113_v45, %v7113_v45  ;;  %v17181_v35 = vld [vmem:[#allocation4 + $0x1f0] sm:$0xff]   ;;  %v17193_v25 = vld [vmem:[#allocation4 + $0x1a0] sm:$0xff]  }
0x1191   : > { %18363 = vst [vmem:[#allocation78_spill] sm:$0xff] %v17181_v35  ;;  %18366 = vst [vmem:[#allocation81_spill] sm:$0xff] %v17193_v25 }
0x1195   : > { %13052 = vmatpush3.bf16.xpose.msra.mxu1 %v17036_v48 }
0x1196   : > { %13053 = vmatprep.subr.bf16.mxu1 %v18296_v10 }
0x1197   : > { %13072 = vmatpush3.bf16.xpose.msra.mxu0 %v17040_v6 }
0x1198   : > { %13073 = vmatprep.subr.bf16.mxu0 %v18296_v10 }
0x119d   : > { %13054 = vmatpush3.bf16.xpose.msra.mxu1 %v17044_v19 }
0x119e   : > { %13055 = vmatprep.subr.bf16.mxu1 %v18296_v10 }
0x119f   : > { %13074 = vmatpush3.bf16.xpose.msra.mxu0 %v17048_v37 }
0x11a0   : > { %13075 = vmatprep.subr.bf16.mxu0 %v18296_v10 }
0x11a5   : > { %13056 = vmatpush3.bf16.xpose.msra.mxu1 %v17052_v59 }
0x11a6   : > { %13057 = vmatprep.subr.bf16.mxu1 %v18296_v10 }
0x11a7   : > { %13076 = vmatpush3.bf16.xpose.msra.mxu0 %v17056_v57 }
0x11a8   : > { %13077 = vmatprep.subr.bf16.mxu0 %v18296_v10 }
0x11ad   : > { %13058 = vmatpush3.bf16.xpose.msra.mxu1 %v17060_v2 }
0x11ae   : > { %13059 = vmatprep.subr.bf16.mxu1 %v18296_v10 }
0x11af   : > { %13078 = vmatpush3.bf16.xpose.msra.mxu0 %v17064_v40 }
0x11b0   : > { %13079 = vmatprep.subr.bf16.mxu0 %v18296_v10 }
0x11b5   : > { %13060 = vmatpush3.bf16.xpose.msra.mxu1 %v17068_v32 }
0x11b6   : > { %13061 = vmatprep.subr.bf16.mxu1 %v18296_v10 }
0x11b7   : > { %13080 = vmatpush3.bf16.xpose.msra.mxu0 %v17072_v46 }
0x11b8   : > { %13081 = vmatprep.subr.bf16.mxu0 %v18296_v10 }
0x11bd   : > { %13062 = vmatpush3.bf16.xpose.msra.mxu1 %v17076_v58 }
0x11be   : > { %13063 = vmatprep.subr.bf16.mxu1 %v18296_v10 }
0x11bf   : > { %13082 = vmatpush3.bf16.xpose.msra.mxu0 %v17080_v60 }
0x11c0   : > { %13083 = vmatprep.subr.bf16.mxu0 %v18296_v10 }
0x11c5   : > { %13064 = vmatpush3.bf16.xpose.msra.mxu1 %v17084_v63 }
0x11c6   : > { %13089 = vmatprep.subr.bf16.mxu1 %v18296_v10 }
0x11c7   : > { %13084 = vmatpush3.bf16.xpose.msra.mxu0 %v17088_v17 }
0x11c8   : > { %13109 = vmatprep.subr.bf16.mxu0 %v18296_v10 }
0x11cc   : > { %13066 = vmatmul.mubr.bf16.vlgmr.msra.gmra.mxu1 %v7142_v24  ;;  %v7145_v24 = vpack.c.bf16 %v7127_v49, %v7127_v49 }
0x11cd   : > { %13090 = vmatpush3.bf16.xpose.msra.mxu1 %v17092_v56  ;;  %13105 = vmatprep.mubr.msk.bf16.mxu1 %vm15529_vm0, %v18296_v10 }
0x11ce   : > { %13086 = vmatmul.mubr.bf16.vlgmr.msra.gmra.mxu0 %v7143_v12  ;;  %13091 = vmatprep.subr.bf16.mxu1 %v18296_v10  ;;  %v17165_v12 = vld [vmem:[#allocation4 + $0x1b8] sm:$0xff]  }
0x11cf   : > { %13110 = vmatpush3.bf16.xpose.msra.mxu0 %v17098_v61  ;;  %13125 = vmatprep.mubr.msk.bf16.mxu0 %vm15529_vm0, %v18296_v10  ;;  %18360 = vst [vmem:[#allocation75_spill] sm:$0xff] %v17165_v12 }
0x11d0   : > { %13111 = vmatprep.subr.bf16.mxu0 %v18296_v10 }
0x11d5   : > { %13092 = vmatpush3.bf16.xpose.msra.mxu1 %v17104_v53 }
0x11d6   : > { %13093 = vmatprep.subr.bf16.mxu1 %v18296_v10 }
0x11d7   : > { %13112 = vmatpush3.bf16.xpose.msra.mxu0 %v17108_v39 }
0x11d8   : > { %13113 = vmatprep.subr.bf16.mxu0 %v18296_v10 }
0x11dd   : > { %13094 = vmatpush3.bf16.xpose.msra.mxu1 %v17112_v51 }
0x11de   : > { %13095 = vmatprep.subr.bf16.mxu1 %v18296_v10 }
0x11df   : > { %13114 = vmatpush3.bf16.xpose.msra.mxu0 %v17116_v15 }
0x11e0   : > { %13115 = vmatprep.subr.bf16.mxu0 %v18296_v10 }
0x11e5   : > { %13096 = vmatpush3.bf16.xpose.msra.mxu1 %v17120_v52 }
0x11e6   : > { %13097 = vmatprep.subr.bf16.mxu1 %v18296_v10 }
0x11e7   : > { %13116 = vmatpush3.bf16.xpose.msra.mxu0 %v17124_v47 }
0x11e8   : > { %13117 = vmatprep.subr.bf16.mxu0 %v18296_v10 }
0x11ed   : > { %13098 = vmatpush3.bf16.xpose.msra.mxu1 %v17128_v62 }
0x11ee   : > { %13099 = vmatprep.subr.bf16.mxu1 %v18296_v10 }
0x11ef   : > { %13118 = vmatpush3.bf16.xpose.msra.mxu0 %v17132_v9 }
0x11f0   : > { %13119 = vmatprep.subr.bf16.mxu0 %v18296_v10 }
0x11f5   : > { %13100 = vmatpush3.bf16.xpose.msra.mxu1 %v17136_v14 }
0x11f6   : > { %13101 = vmatprep.subr.bf16.mxu1 %v18296_v10 }
0x11f7   : > { %13120 = vmatpush3.bf16.xpose.msra.mxu0 %v17140_v16 }
0x11f8   : > { %13121 = vmatprep.subr.bf16.mxu0 %v18296_v10 }
0x11fd   : > { %13102 = vmatpush3.bf16.xpose.msra.mxu1 %v17146_v30 }
0x11fe   : > { %13103 = vmatprep.subr.bf16.mxu1 %v18296_v10 }
0x11ff   : > { %13122 = vmatpush3.bf16.xpose.msra.mxu0 %v17150_v31 }
0x1200   : > { %13123 = vmatprep.subr.bf16.mxu0 %v18296_v10 }
0x1205   : > { %13104 = vmatpush3.bf16.xpose.msra.mxu1 %v17155_v38 }
0x1206   : > { %13129 = vmatprep.subr.bf16.mxu1 %v18296_v10 }
0x1207   : > { %13124 = vmatpush3.bf16.xpose.msra.mxu0 %v17160_v43 }
0x1208   : > { %13149 = vmatprep.subr.bf16.mxu0 %v18296_v10 }
0x120c   : > { %13106 = vmatmul.mubr.bf16.vlgmr.msra.gmra.mxu1 %v7144_v5  ;;  %v17185_v5 = vld [vmem:[#allocation4 + $0x1a8] sm:$0xff]  }
0x120d   : > { %13130 = vmatpush3.bf16.xpose.msra.mxu1 %v17165_v12  ;;  %13145 = vmatprep.mubr.msk.bf16.mxu1 %vm15529_vm0, %v18296_v10  ;;  %18364 = vst [vmem:[#allocation79_spill] sm:$0xff] %v17185_v5 }
0x120e   : > { %13126 = vmatmul.mubr.bf16.vlgmr.msra.gmra.mxu0 %v7145_v24  ;;  %13131 = vmatprep.subr.bf16.mxu1 %v18296_v10  ;;  %v17189_v24 = vld [vmem:[#allocation4 + $0x1e8] sm:$0xff]  }
0x120f   : > { %13150 = vmatpush3.bf16.xpose.msra.mxu0 %v17171_v8  ;;  %13165 = vmatprep.mubr.msk.bf16.mxu0 %vm15529_vm0, %v18296_v10  ;;  %18365 = vst [vmem:[#allocation80_spill] sm:$0xff] %v17189_v24 }
0x1210   : > { %13151 = vmatprep.subr.bf16.mxu0 %v18296_v10 }
0x1215   : > { %13132 = vmatpush3.bf16.xpose.msra.mxu1 %v17177_v55 }
0x1216   : > { %13133 = vmatprep.subr.bf16.mxu1 %v18296_v10 }
0x1217   : > { %13152 = vmatpush3.bf16.xpose.msra.mxu0 %v17181_v35 }
0x1218   : > { %13153 = vmatprep.subr.bf16.mxu0 %v18296_v10 }
0x121d   : > { %13134 = vmatpush3.bf16.xpose.msra.mxu1 %v17185_v5 }
0x121e   : > { %13135 = vmatprep.subr.bf16.mxu1 %v18296_v10 }
0x121f   : > { %13154 = vmatpush3.bf16.xpose.msra.mxu0 %v17189_v24 }
0x1220   : > { %13155 = vmatprep.subr.bf16.mxu0 %v18296_v10 }
0x1225   : > { %13136 = vmatpush3.bf16.xpose.msra.mxu1 %v17193_v25 }
0x1226   : > { %13137 = vmatprep.subr.bf16.mxu1 %v18296_v10 }
0x1227   : > { %13156 = vmatpush3.bf16.xpose.msra.mxu0 %v17197_v50 }
0x1228   : > { %13157 = vmatprep.subr.bf16.mxu0 %v18296_v10 }
0x122d   : > { %13138 = vmatpush3.bf16.xpose.msra.mxu1 %v17201_v54  ;;  %v7129_v54 = vcombine.high %v7113_v45, %v7113_v45 }
0x122e   : > { %13139 = vmatprep.subr.bf16.mxu1 %v18296_v10 }
0x122f   : > { %13158 = vmatpush3.bf16.xpose.msra.mxu0 %v17205_v27  ;;  %v17221_v27 = vld [vmem:[#allocation4 + $0x1c8] sm:$0xff]   ;;  %v7146_v50 = vpack.c.bf16 %v7129_v54, %v7129_v54 }
0x1230   : > { %13159 = vmatprep.subr.bf16.mxu0 %v18296_v10  ;;  %18373 = vst [vmem:[#allocation71_spill] sm:$0xff] %v17221_v27 }
0x1235   : > { %13140 = vmatpush3.bf16.xpose.msra.mxu1 %v17209_v1  ;;  %v17225_v1 = vld [vmem:[#allocation4 + $0x180] sm:$0xff]  }
0x1236   : > { %13141 = vmatprep.subr.bf16.mxu1 %v18296_v10  ;;  %18374 = vst [vmem:[#allocation88_spill] sm:$0xff] %v17225_v1 }
0x1237   : > { %13160 = vmatpush3.bf16.xpose.msra.mxu0 %v17213_v34  ;;  %v17229_v34 = vld [vmem:[#allocation4 + $0x1c0] sm:$0xff]  }
0x1238   : > { %13161 = vmatprep.subr.bf16.mxu0 %v18296_v10  ;;  %18375 = vst [vmem:[#allocation73_spill] sm:$0xff] %v17229_v34 }
0x123d   : > { %13142 = vmatpush3.bf16.xpose.msra.mxu1 %v17217_v21  ;;  %v7131_v21 = vcombine.high %v7127_v49, %v7127_v49 }
0x123e   : > { %13143 = vmatprep.subr.bf16.mxu1 %v18296_v10 }
0x123f   : > { %13162 = vmatpush3.bf16.xpose.msra.mxu0 %v17221_v27  ;;  %v7147_v25 = vpack.c.bf16 %v7131_v21, %v7131_v21 }
0x1240   : > { %13163 = vmatprep.subr.bf16.mxu0 %v18296_v10 }
0x1245   : > { %13144 = vmatpush3.bf16.xpose.msra.mxu1 %v17225_v1 }
0x1246   : > { %13169 = vmatprep.subr.bf16.mxu1 %v18296_v10 }
0x1247   : > { %13164 = vmatpush3.bf16.xpose.msra.mxu0 %v17229_v34 }
0x1248   : > { %13189 = vmatprep.subr.bf16.mxu0 %v18296_v10 }
0x124c   : > { %13146 = vmatmul.mubr.bf16.vlgmr.msra.gmra.mxu1 %v7146_v50  ;;  %v17233_v27 = vpop.f32.mrf.mxu1 }
0x124d   : > { %13170 = vmatpush3.bf16.msra.mxu1 %v16931_v23  ;;  %13185 = vmatprep.mubr.msk.bf16.mxu1 %vm15529_vm0, %v18296_v10 }
0x124e   : > { %13166 = vmatmul.mubr.bf16.vlgmr.msra.gmra.mxu0 %v7147_v25  ;;  %v13027_v45 = vpop.f32.mrf.mxu1  ;;  %v17238_v1 = vpop.f32.mrf.mxu0  ;;  %13171 = vmatprep.subr.bf16.mxu1 %v18296_v10 }
0x124f   : > { %13190 = vmatpush3.bf16.msra.mxu0 %v16984_v3  ;;  %13205 = vmatprep.mubr.msk.bf16.mxu0 %vm15529_vm0, %v18296_v10 }
0x1250   : > { %v7185_v54 = vpop.f32.mrf.mxu1  ;;  %v13047_v50 = vpop.f32.mrf.mxu0  ;;  %13191 = vmatprep.subr.bf16.mxu0 %v18296_v10 }
0x1251   : > { %13172 = vmatpush3.bf16.msra.mxu1 %v16937_v7 }
0x1252   : > { %v13028_v23 = vpop.f32.mrf.mxu1  ;;  %v7225_v21 = vpop.f32.mrf.mxu0  ;;  %13173 = vmatprep.subr.bf16.mxu1 %v18296_v10 }
0x1253   : > { %13192 = vmatpush3.bf16.msra.mxu0 %v16990_v18 }
0x1254   : > { %v13048_v25 = vpop.f32.mrf.mxu0  ;;  %13193 = vmatprep.subr.bf16.mxu0 %v18296_v10 }
0x1255   : > { %13174 = vmatpush3.bf16.msra.mxu1 %v16941_v13 }
0x1256   : > { %13175 = vmatprep.subr.bf16.mxu1 %v18296_v10 }
0x1257   : > { %13194 = vmatpush3.bf16.msra.mxu0 %v16994_v20 }
0x1258   : > { %13195 = vmatprep.subr.bf16.mxu0 %v18296_v10 }
0x1259   : > { %13176 = vmatpush3.bf16.msra.mxu1 %v16945_v26 }
0x125a   : > { %13177 = vmatprep.subr.bf16.mxu1 %v18296_v10 }
0x125b   : > { %13196 = vmatpush3.bf16.msra.mxu0 %v16998_v29 }
0x125c   : > { %13197 = vmatprep.subr.bf16.mxu0 %v18296_v10 }
0x125d   : > { %13178 = vmatpush3.bf16.msra.mxu1 %v16949_v28 }
0x125e   : > { %13179 = vmatprep.subr.bf16.mxu1 %v18296_v10 }
0x125f   : > { %13198 = vmatpush3.bf16.msra.mxu0 %v17002_v42 }
0x1260   : > { %13199 = vmatprep.subr.bf16.mxu0 %v18296_v10 }
0x1261   : > { %13180 = vmatpush3.bf16.msra.mxu1 %v16953_v44 }
0x1262   : > { %13181 = vmatprep.subr.bf16.mxu1 %v18296_v10 }
0x1263   : > { %13200 = vmatpush3.bf16.msra.mxu0 %v17006_v11 }
0x1264   : > { %13201 = vmatprep.subr.bf16.mxu0 %v18296_v10 }
0x1265   : > { %13182 = vmatpush3.bf16.msra.mxu1 %v16957_v36 }
0x1266   : > { %13183 = vmatprep.subr.bf16.mxu1 %v18296_v10 }
0x1267   : > { %13202 = vmatpush3.bf16.msra.mxu0 %v17010_v41 }
0x1268   : > { %13203 = vmatprep.subr.bf16.mxu0 %v18296_v10 }
0x1269   : > { %13184 = vmatpush3.bf16.msra.mxu1 %v16961_v33 }
0x126a   : > { %13209 = vmatprep.subr.bf16.mxu1 %v18296_v10 }
0x126b   : > { %13204 = vmatpush3.bf16.msra.mxu0 %v17014_v22  ;;  %v7476_v22 = vrot.slane %v17238_v1, 7 }
0x126c   : > { %13229 = vmatprep.subr.bf16.mxu0 %v18296_v10 }
0x126d   : > { %v7477_v50 = vsel %vm2634_vm1, %v7476_v22, %v17233_v27 }
0x128c   : > { %v7262_v7 = vpop.f32.mrf.mxu1 }
0x128d   : > { %v7478_v54 = vrot.slane %v7262_v7, 6 }
0x128e   : > { %v13067_v13 = vpop.f32.mrf.mxu1  ;;  %v7302_v26 = vpop.f32.mrf.mxu0 }
0x128f   : > { %v7480_v23 = vrot.slane %v7302_v26, 5  ;;  %v7479_v21 = vsel %vm2637_vm2, %v7478_v54, %v7477_v50 }
0x1290   : > { %v7265_v28 = vpop.f32.mrf.mxu1  ;;  %v13087_v44 = vpop.f32.mrf.mxu0 }
0x1291   : > { %v7481_v13 = vsel %vm2640_vm3, %v7480_v23, %v7479_v21 }
0x1292   : > { %v13068_v36 = vpop.f32.mrf.mxu1  ;;  %v7305_v3 = vpop.f32.mrf.mxu0 }
0x1294   : > { %v13088_v18 = vpop.f32.mrf.mxu0 }
0x12cc   : > { %v7342_v20 = vpop.f32.mrf.mxu1 }
0x12cd   : > { %v7482_v25 = vrot.slane %v7342_v20, 4 }
0x12ce   : > { %v13107_v29 = vpop.f32.mrf.mxu1  ;;  %v7382_v42 = vpop.f32.mrf.mxu0 }
0x12cf   : > { %v7484_v28 = vrot.slane %v7382_v42, 3  ;;  %v7483_v44 = vsel %vm2643_vm4, %v7482_v25, %v7481_v13 }
0x12d0   : > { %v7345_v11 = vpop.f32.mrf.mxu1  ;;  %v13127_v41 = vpop.f32.mrf.mxu0 }
0x12d1   : > { %v7485_v11 = vsel %vm2646_vm5, %v7484_v28, %v7483_v44 }
0x12d2   : > { %v13108_v33 = vpop.f32.mrf.mxu1  ;;  %v7385_v49 = vpop.f32.mrf.mxu0 }
0x12d4   : > { %v13128_v45 = vpop.f32.mrf.mxu0 }
0x130c   : > { %v7422_v36 = vpop.f32.mrf.mxu1 }
0x130d   : > { %v7486_v3 = vrot.slane %v7422_v36, 2 }
0x130e   : > { %v13147_v18 = vpop.f32.mrf.mxu1  ;;  %v7462_v29 = vpop.f32.mrf.mxu0 }
0x130f   : > { %v7488_v41 = vrot.slane %v7462_v29, 1  ;;  %v7487_v33 = vsel %vm2649_vm6, %v7486_v3, %v7485_v11 }
0x1310   : > { %v7425_v49 = vpop.f32.mrf.mxu1  ;;  %v13167_v45 = vpop.f32.mrf.mxu0 }
0x1311   : > { %v7489_v22 = vsel %vm2652_vm7, %v7488_v41, %v7487_v33 }
0x1312   : > { %v13148_v54 = vpop.f32.mrf.mxu1  ;;  %7491 = vmax.xlane.f32.xlu0 %v7489_v22  ;;  %v7465_v50 = vpop.f32.mrf.mxu0 }
0x1314   : > { %v13168_v23 = vpop.f32.mrf.mxu0 }
0x139b   : > { %v7492_v21 = vpop.xlane.xlu0 %7491 }
0x139c   : > { %v7494_v34 = vrot.slane %v7492_v21, 1  ;;  %v7495_v25 = vrot.slane %v7492_v21, 2  ;;  %v7496_v13 = vrot.slane %v7492_v21, 3  ;;  %v7497_v24 = vrot.slane %v7492_v21, 4 }
0x139d   : > { %v7498_v18 = vrot.slane %v7492_v21, 5  ;;  %v7499_v5 = vrot.slane %v7492_v21, 6  ;;  %v7500_v35 = vrot.slane %v7492_v21, 7  ;;  %v7509_v28 = vsub.f32 %v17233_v27, %v7492_v21 }
0x139e   : > { %v7510_v44 = vsub.f32 %v17238_v1, %v7494_v34  ;;  %v7511_v3 = vsub.f32 %v7262_v7, %v7495_v25  ;;  %v7512_v11 = vsub.f32 %v7302_v26, %v7496_v13  ;;  %v7513_v49 = vsub.f32 %v7342_v20, %v7497_v24 }
0x139f   : > { %v7514_v41 = vsub.f32 %v7382_v42, %v7498_v18  ;;  %v7515_v33 = vsub.f32 %v7422_v36, %v7499_v5  ;;  %v7517_v45 = vmul.f32 1.442695, %v7509_v28  ;;  %v7516_v23 = vsub.f32 %v7462_v29, %v7500_v35 }
0x13a0   : > { %v7519_v22 = vmul.f32 1.442695, %v7510_v44  ;;  %v7521_v54 = vmul.f32 1.442695, %v7511_v3  ;;  %v7523_v50 = vmul.f32 1.442695, %v7512_v11 }
0x13a1   : > { %14894 = vpow2.f32 %v7517_v45  ;;  %v7525_v55 = vmul.f32 1.442695, %v7513_v49  ;;  %v7527_v8 = vmul.f32 1.442695, %v7514_v41  ;;  %v7529_v12 = vmul.f32 1.442695, %v7515_v33 }
0x13a2   : > { %14896 = vpow2.f32 %v7519_v22  ;;  %v7531_v27 = vmul.f32 1.442695, %v7516_v23 }
0x13a3   : > { %14898 = vpow2.f32 %v7521_v54 }
0x13a4   : > { %14900 = vpow2.f32 %v7523_v50 }
0x13a5   : > { %14902 = vpow2.f32 %v7525_v55 }
0x13a6   : > { %14904 = vpow2.f32 %v7527_v8 }
0x13a7   : > { %14906 = vpow2.f32 %v7529_v12 }
0x13a8   : > { %14908 = vpow2.f32 %v7531_v27 }
0x13ae   : > { %v14895_v34 = vpop.eup %14894 }
0x13af   : > { %v14897_v1 = vpop.eup %14896 }
0x13b0   : > { %v14899_v5 = vpop.eup %14898  ;;  %v7541_v24 = vrot.slane %v14897_v1, 7 }
0x13b1   : > { %v14901_v7 = vpop.eup %14900  ;;  %v7543_v26 = vrot.slane %v14899_v5, 6 }
0x13b2   : > { %v14903_v20 = vpop.eup %14902  ;;  %v7542_v35 = vsel %vm2634_vm1, %v7541_v24, %v14895_v34  ;;  %v7545_v42 = vrot.slane %v14901_v7, 5 }
0x13b3   : > { %v14905_v36 = vpop.eup %14904  ;;  %v7544_v29 = vsel %vm2637_vm2, %v7543_v26, %v7542_v35  ;;  %v7547_v21 = vrot.slane %v14903_v20, 4 }
0x13b4   : > { %v14907_v25 = vpop.eup %14906  ;;  %v7546_v55 = vsel %vm2640_vm3, %v7545_v42, %v7544_v29  ;;  %v7549_v8 = vrot.slane %v14905_v36, 3 }
0x13b5   : > { %v14909_v12 = vpop.eup %14908  ;;  %v7548_v13 = vsel %vm2643_vm4, %v7547_v21, %v7546_v55  ;;  %v7551_v18 = vrot.slane %v14907_v25, 2 }
0x13b6   : > { %v7550_v28 = vsel %vm2646_vm5, %v7549_v8, %v7548_v13  ;;  %v7553_v44 = vrot.slane %v14909_v12, 1 }
0x13b7   : > { %v7552_v3 = vsel %vm2649_vm6, %v7551_v18, %v7550_v28 }
0x13b8   : > { %v7554_v11 = vsel %vm2652_vm7, %v7553_v44, %v7552_v3 }
0x13b9   : > { %7556 = vadd.xlane.f32.xlu1 %v7554_v11 }
0x1442   : > { %v7557_v49 = vpop.xlane.xlu1 %7556 }
0x1443   : > { %14910 = vrcp.f32 %v7557_v49  ;;  %v14536_v49 = vld [vmem:[#allocation6 + $0xe4] ss:$16 sps:$4 sm:$0xff]  }
0x1450   : > { %v14911_v41 = vpop.eup %14910 }
0x1451   : > { %v7575_v33 = vmul.f32 %v14911_v41, %v14895_v34  ;;  %v7560_v45 = vrot.slane %v14911_v41, 1  ;;  %v7561_v22 = vrot.slane %v14911_v41, 2  ;;  %v7562_v54 = vrot.slane %v14911_v41, 3 }
0x1452   : > { %v7563_v50 = vrot.slane %v14911_v41, 4  ;;  %v7564_v23 = vrot.slane %v14911_v41, 5  ;;  %v7565_v27 = vrot.slane %v14911_v41, 6  ;;  %v7566_v24 = vrot.slane %v14911_v41, 7  ;;  %v14534_v41 = vld [vmem:[#allocation6 + $0xe0] ss:$16 sps:$4 sm:$0xff]  }
0x1453   : > { %v7583_v26 = vpack.c.bf16 %v7575_v33, %v7575_v33  ;;  %v7576_v35 = vmul.f32 %v14897_v1, %v7560_v45  ;;  %v7577_v42 = vmul.f32 %v14899_v5, %v7561_v22  ;;  %v7578_v29 = vmul.f32 %v14901_v7, %v7562_v54  ;;  %v18392_v45 = vld [vmem:[#allocation74_spill] sm:$0xff] }
0x1454   : > { %v17291_v21 = vmul.f32 %v14903_v20, %v7563_v50  ;;  %v17293_v18 = vmul.f32 %v14905_v36, %v7564_v23  ;;  %v17298_v34 = vmul.f32 %v14907_v25, %v7565_v27  ;;  %v17302_v7 = vmul.f32 %v14909_v12, %v7566_v24  ;;  %v14537_v22 = vld [vmem:[#allocation6 + $0xc0] ss:$16 sps:$4 sm:$0xff]   ;;  %v14542_v50 = vld [vmem:[#allocation6 + $0xa4] ss:$16 sps:$4 sm:$0xff]  }
0x1455   : > { %13186 = vmatmul.mubr.bf16.vlgmr.msra.gmra.mxu1 %v7583_v26  ;;  %v7584_v55 = vpack.c.bf16 %v7576_v35, %v7576_v35  ;;  %v8170_v8 = vrot.slane %v7576_v35, 7  ;;  %v8172_v13 = vrot.slane %v7577_v42, 6  ;;  %v8174_v5 = vrot.slane %v7578_v29, 5  ;;  %v14540_v23 = vld [vmem:[#allocation6 + $0xa0] ss:$16 sps:$4 sm:$0xff]  }
0x1456   : > { %13210 = vmatpush3.bf16.msra.mxu1 %v17024_v0  ;;  %13225 = vmatprep.mubr.msk.bf16.mxu1 %vm15529_vm0, %v18296_v10  ;;  %v8176_v0 = vrot.slane %v17291_v21, 4  ;;  %v8178_v25 = vrot.slane %v17293_v18, 3  ;;  %v8182_v44 = vrot.slane %v17302_v7, 1  ;;  %v18393_v54 = vmov 0   ;;  %v14545_v27 = vld [vmem:[#allocation6 + $0x84] ss:$16 sps:$4 sm:$0xff]  }
0x1457   : > { %13206 = vmatmul.mubr.bf16.vlgmr.msra.gmra.mxu0 %v7584_v55  ;;  %v8171_v1 = vsel %vm2634_vm1, %v8170_v8, %v7575_v33  ;;  %13211 = vmatprep.subr.bf16.mxu1 %v18296_v10  ;;  %v14539_v33 = vld [vmem:[#allocation6 + $0xc4] ss:$16 sps:$4 sm:$0xff]   ;;  %v14543_v24 = vld [vmem:[#allocation6 + $0x80] ss:$16 sps:$4 sm:$0xff]  }
0x1458   : > { %13230 = vmatpush3.bf16.msra.mxu0 %v17028_v4  ;;  %v8173_v20 = vsel %vm2637_vm2, %v8172_v13, %v8171_v1  ;;  %13245 = vmatprep.mubr.msk.bf16.mxu0 %vm15529_vm0, %v18296_v10  ;;  %v8180_v4 = vrot.slane %v17298_v34, 2  ;;  %v14606_v26 = vld [vmem:[#allocation9 + $0x38] sm:$0xff]   ;;  %v14608_v55 = vld [vmem:[#allocation9 + $0x28] sm:$0xff]  }
0x1459   : > { %13231 = vmatprep.subr.bf16.mxu0 %v18296_v10  ;;  %v8175_v36 = vsel %vm2640_vm3, %v8174_v5, %v8173_v20  ;;  %v14548_v35 = vld [vmem:[#allocation6 + $0x64] ss:$16 sps:$4 sm:$0xff]   ;;  %v14549_v8 = vld [vmem:[#allocation6 + $0x40] ss:$16 sps:$4 sm:$0xff]  }
0x145a   : > { %13212 = vmatpush3.bf16.msra.mxu1 %v17036_v48  ;;  %v8177_v12 = vsel %vm2643_vm4, %v8176_v0, %v8175_v36  ;;  %v7585_v48 = vpack.c.bf16 %v7577_v42, %v7577_v42  ;;  %v14607_v42 = vld [vmem:[#allocation9 + $0x30] sm:$0xff]   ;;  %v14554_v13 = vld [vmem:[#allocation6 + $0x24] ss:$16 sps:$4 sm:$0xff]   ;;  %v14558_v36 = vld [vmem:[#allocation5 + $0xe0] ss:$16 sps:$4 sm:$0xff]  }
0x145b   : > { %13213 = vmatprep.subr.bf16.mxu1 %v18296_v10  ;;  %v8179_v28 = vsel %vm2646_vm5, %v8178_v25, %v8177_v12  ;;  %v14557_v1 = vld [vmem:[#allocation6 + $0x4] ss:$16 sps:$4 sm:$0xff]  }
0x145c   : > { %13232 = vmatpush3.bf16.msra.mxu0 %v17040_v6  ;;  %v8181_v3 = vsel %vm2649_vm6, %v8180_v4, %v8179_v28  ;;  %v7586_v6 = vpack.c.bf16 %v7578_v29, %v7578_v29  ;;  %v14546_v29 = vld [vmem:[#allocation6 + $0x60] ss:$16 sps:$4 sm:$0xff]   ;;  %v14560_v20 = vld [vmem:[#allocation5 + $0xe4] ss:$16 sps:$4 sm:$0xff]  }
0x145d   : > { %13233 = vmatprep.subr.bf16.mxu0 %v18296_v10  ;;  %v8183_v11 = vsel %vm2652_vm7, %v8182_v44, %v8181_v3  ;;  %v14610_v5 = vld [vmem:[#allocation9 + $0x18] sm:$0xff]   ;;  %v14611_v44 = vld [vmem:[#allocation9 + $0x10] sm:$0xff]  }
0x145e   : > { %13214 = vmatpush3.bf16.msra.mxu1 %v17044_v19  ;;  %11367 = vst [vmem:[%s15721_s14 + $0x10] sm:$0xff] %v8183_v11  ;;  %v7587_v19 = vpack.c.bf16 %v17291_v21, %v17291_v21  ;;  %v14551_v21 = vld [vmem:[#allocation6 + $0x44] ss:$16 sps:$4 sm:$0xff]   ;;  %v14561_v4 = vld [vmem:[#allocation5 + $0xc0] ss:$16 sps:$4 sm:$0xff]  }
0x145f   : > { %13215 = vmatprep.subr.bf16.mxu1 %v18296_v10  ;;  %v8221_v0 = vld [vmem:[#allocation2] sm:$0xff] }
0x1460   : > { %13234 = vmatpush3.bf16.msra.mxu0 %v17048_v37  ;;  %v7588_v37 = vpack.c.bf16 %v17293_v18, %v17293_v18  ;;  %v14609_v18 = vld [vmem:[#allocation9 + $0x20] sm:$0xff]   ;;  %v17445_v25 = vpack.c.bf16 %v8221_v0, %v8221_v0  ;;  %v14563_v12 = vld [vmem:[#allocation5 + $0xc4] ss:$16 sps:$4 sm:$0xff]   ;;  %v14564_v3 = vld [vmem:[#allocation5 + $0xa0] ss:$16 sps:$4 sm:$0xff]  }
0x1461   : > { %13235 = vmatprep.subr.bf16.mxu0 %v18296_v10  ;;  %v14566_v28 = vld [vmem:[#allocation5 + $0xa4] ss:$16 sps:$4 sm:$0xff]  }
0x1462   : > { %13216 = vmatpush3.bf16.msra.mxu1 %v17052_v59  ;;  %v18376_v59 = vld [vmem:[#allocation75_spill] sm:$0xff]  ;;  %v14569_v11 = vld [vmem:[#allocation5 + $0x84] ss:$16 sps:$4 sm:$0xff]  }
0x1463   : > { %13217 = vmatprep.subr.bf16.mxu1 %v18296_v10 }
0x1464   : > { %13236 = vmatpush3.bf16.msra.mxu0 %v17056_v57  ;;  %v18377_v57 = vld [vmem:[#allocation76_spill] sm:$0xff] }
0x1465   : > { %13237 = vmatprep.subr.bf16.mxu0 %v18296_v10 }
0x1466   : > { %13218 = vmatpush3.bf16.msra.mxu1 %v17060_v2  ;;  %v18378_v2 = vld [vmem:[#allocation77_spill] sm:$0xff] }
0x1467   : > { %13219 = vmatprep.subr.bf16.mxu1 %v18296_v10 }
0x1468   : > { %13238 = vmatpush3.bf16.msra.mxu0 %v17064_v40  ;;  %v18379_v40 = vld [vmem:[#allocation78_spill] sm:$0xff] }
0x1469   : > { %13239 = vmatprep.subr.bf16.mxu0 %v18296_v10 }
0x146a   : > { %13220 = vmatpush3.bf16.msra.mxu1 %v17068_v32  ;;  %v18380_v32 = vld [vmem:[#allocation79_spill] sm:$0xff] }
0x146b   : > { %13221 = vmatprep.subr.bf16.mxu1 %v18296_v10 }
0x146c   : > { %13240 = vmatpush3.bf16.msra.mxu0 %v17072_v46  ;;  %v18381_v46 = vld [vmem:[#allocation80_spill] sm:$0xff] }
0x146d   : > { %13241 = vmatprep.subr.bf16.mxu0 %v18296_v10 }
0x146e   : > { %13222 = vmatpush3.bf16.msra.mxu1 %v17076_v58  ;;  %v18382_v58 = vld [vmem:[#allocation81_spill] sm:$0xff] }
0x146f   : > { %13223 = vmatprep.subr.bf16.mxu1 %v18296_v10 }
0x1470   : > { %13242 = vmatpush3.bf16.msra.mxu0 %v17080_v60  ;;  %v18383_v60 = vld [vmem:[#allocation82_spill] sm:$0xff] }
0x1471   : > { %13243 = vmatprep.subr.bf16.mxu0 %v18296_v10 }
0x1472   : > { %13224 = vmatpush3.bf16.msra.mxu1 %v17084_v63  ;;  %v18384_v63 = vld [vmem:[#allocation83_spill] sm:$0xff] }
0x1473   : > { %13249 = vmatprep.subr.bf16.mxu1 %v18296_v10 }
0x1474   : > { %13244 = vmatpush3.bf16.msra.mxu0 %v17088_v17  ;;  %v18385_v17 = vld [vmem:[#allocation84_spill] sm:$0xff] }
0x1475   : > { %13226 = vmatmul.mubr.bf16.vlgmr.msra.gmra.mxu1 %v7585_v48  ;;  %13269 = vmatprep.subr.bf16.mxu0 %v18296_v10  ;;  %v14612_v48 = vld [vmem:[#allocation9 + $0x8] sm:$0xff]  }
0x1476   : > { %13250 = vmatpush3.bf16.msra.mxu1 %v17092_v56  ;;  %13265 = vmatprep.mubr.msk.bf16.mxu1 %vm15529_vm0, %v18296_v10  ;;  %v18386_v56 = vld [vmem:[#allocation85_spill] sm:$0xff] }
0x1477   : > { %13246 = vmatmul.mubr.bf16.vlgmr.msra.gmra.mxu0 %v7586_v6  ;;  %13251 = vmatprep.subr.bf16.mxu1 %v18296_v10  ;;  %v14567_v6 = vld [vmem:[#allocation5 + $0x80] ss:$16 sps:$4 sm:$0xff]  }
0x1478   : > { %13270 = vmatpush3.bf16.msra.mxu0 %v17098_v61  ;;  %13285 = vmatprep.mubr.msk.bf16.mxu0 %vm15529_vm0, %v18296_v10  ;;  %v18387_v61 = vld [vmem:[#allocation86_spill] sm:$0xff] }
0x1479   : > { %13271 = vmatprep.subr.bf16.mxu0 %v18296_v10 }
0x147a   : > { %13252 = vmatpush3.bf16.msra.mxu1 %v17104_v53  ;;  %v18388_v53 = vld [vmem:[#allocation87_spill] sm:$0xff] }
0x147b   : > { %13253 = vmatprep.subr.bf16.mxu1 %v18296_v10 }
0x147c   : > { %13272 = vmatpush3.bf16.msra.mxu0 %v17108_v39  ;;  %v18389_v39 = vld [vmem:[#allocation71_spill] sm:$0xff] }
0x147d   : > { %13273 = vmatprep.subr.bf16.mxu0 %v18296_v10 }
0x147e   : > { %13254 = vmatpush3.bf16.msra.mxu1 %v17112_v51  ;;  %v18390_v51 = vld [vmem:[#allocation88_spill] sm:$0xff] }
0x147f   : > { %13255 = vmatprep.subr.bf16.mxu1 %v18296_v10 }
0x1480   : > { %13274 = vmatpush3.bf16.msra.mxu0 %v17116_v15  ;;  %v14526_v15 = vld [vmem:[#allocation10 + $0x38] sm:$0xff]  }
0x1481   : > { %13275 = vmatprep.subr.bf16.mxu0 %v18296_v10 }
0x1482   : > { %13256 = vmatpush3.bf16.msra.mxu1 %v17120_v52  ;;  %v7589_v52 = vpack.c.bf16 %v17298_v34, %v17298_v34  ;;  %v14552_v34 = vld [vmem:[#allocation6 + $0x20] ss:$16 sps:$4 sm:$0xff]  }
0x1483   : > { %13257 = vmatprep.subr.bf16.mxu1 %v18296_v10 }
0x1484   : > { %13276 = vmatpush3.bf16.msra.mxu0 %v17124_v47  ;;  %v18391_v47 = vld [vmem:[#allocation73_spill] sm:$0xff] }
0x1485   : > { %13277 = vmatprep.subr.bf16.mxu0 %v18296_v10 }
0x1486   : > { %13258 = vmatpush3.bf16.msra.mxu1 %v17128_v62  ;;  %v7590_v62 = vpack.c.bf16 %v17302_v7, %v17302_v7  ;;  %v14555_v7 = vld [vmem:[#allocation6] ss:$16 sps:$4 sm:$0xff]  }
0x1487   : > { %13259 = vmatprep.subr.bf16.mxu1 %v18296_v10 }
0x1488   : > { %13278 = vmatpush3.bf16.msra.mxu0 %v17132_v9  ;;  %v14527_v9 = vld [vmem:[#allocation10 + $0x30] sm:$0xff]  }
0x1489   : > { %13279 = vmatprep.subr.bf16.mxu0 %v18296_v10 }
0x148a   : > { %13260 = vmatpush3.bf16.msra.mxu1 %v17136_v14  ;;  %v14528_v14 = vld [vmem:[#allocation10 + $0x28] sm:$0xff]  }
0x148b   : > { %13261 = vmatprep.subr.bf16.mxu1 %v18296_v10 }
0x148c   : > { %13280 = vmatpush3.bf16.msra.mxu0 %v17140_v16  ;;  %v14529_v16 = vld [vmem:[#allocation10 + $0x20] sm:$0xff]  }
0x148d   : > { %13281 = vmatprep.subr.bf16.mxu0 %v18296_v10 }
0x148e   : > { %13262 = vmatpush3.bf16.msra.mxu1 %v17146_v30  ;;  %v14530_v30 = vld [vmem:[#allocation10 + $0x18] sm:$0xff]  }
0x148f   : > { %13263 = vmatprep.subr.bf16.mxu1 %v18296_v10 }
0x1490   : > { %13282 = vmatpush3.bf16.msra.mxu0 %v17150_v31  ;;  %v14531_v31 = vld [vmem:[#allocation10 + $0x10] sm:$0xff]  }
0x1491   : > { %13283 = vmatprep.subr.bf16.mxu0 %v18296_v10 }
0x1492   : > { %13264 = vmatpush3.bf16.msra.mxu1 %v17155_v38  ;;  %v14532_v38 = vld [vmem:[#allocation10 + $0x8] sm:$0xff]  }
0x1493   : > { %13289 = vmatprep.subr.bf16.mxu1 %v18296_v10 }
0x1494   : > { %13284 = vmatpush3.bf16.msra.mxu0 %v17160_v43  ;;  %v14533_v43 = vld [vmem:[#allocation10] sm:$0xff]  }
0x1495   : > { %13266 = vmatmul.mubr.bf16.vlgmr.msra.gmra.mxu1 %v7587_v19  ;;  %13309 = vmatprep.subr.bf16.mxu0 %v18296_v10  ;;  %v14572_v19 = vld [vmem:[#allocation5 + $0x64] ss:$16 sps:$4 sm:$0xff]  }
0x1496   : > { %13290 = vmatpush3.bf16.msra.mxu1 %v18376_v59  ;;  %13305 = vmatprep.mubr.msk.bf16.mxu1 %vm15529_vm0, %v18296_v10  ;;  %v14616_v59 = vld [vmem:[#allocation6 + $0xec] ss:$16 sps:$4 sm:$0xff]  }
0x1497   : > { %13286 = vmatmul.mubr.bf16.vlgmr.msra.gmra.mxu0 %v7588_v37  ;;  %13291 = vmatprep.subr.bf16.mxu1 %v18296_v10  ;;  %v14613_v37 = vld [vmem:[#allocation9] sm:$0xff]  }
0x1498   : > { %13310 = vmatpush3.bf16.msra.mxu0 %v18377_v57  ;;  %13325 = vmatprep.mubr.msk.bf16.mxu0 %vm15529_vm0, %v18296_v10  ;;  %v14570_v57 = vld [vmem:[#allocation5 + $0x60] ss:$16 sps:$4 sm:$0xff]  }
0x1499   : > { %13311 = vmatprep.subr.bf16.mxu0 %v18296_v10 }
0x149a   : > { %13292 = vmatpush3.bf16.msra.mxu1 %v18378_v2  ;;  %v14575_v2 = vld [vmem:[#allocation5 + $0x44] ss:$16 sps:$4 sm:$0xff]  }
0x149b   : > { %13293 = vmatprep.subr.bf16.mxu1 %v18296_v10 }
0x149c   : > { %13312 = vmatpush3.bf16.msra.mxu0 %v18379_v40  ;;  %v14573_v40 = vld [vmem:[#allocation5 + $0x40] ss:$16 sps:$4 sm:$0xff]  }
0x149d   : > { %13313 = vmatprep.subr.bf16.mxu0 %v18296_v10 }
0x149e   : > { %13294 = vmatpush3.bf16.msra.mxu1 %v18380_v32  ;;  %v14578_v32 = vld [vmem:[#allocation5 + $0x24] ss:$16 sps:$4 sm:$0xff]  }
0x149f   : > { %13295 = vmatprep.subr.bf16.mxu1 %v18296_v10 }
0x14a0   : > { %13314 = vmatpush3.bf16.msra.mxu0 %v18381_v46  ;;  %v14576_v46 = vld [vmem:[#allocation5 + $0x20] ss:$16 sps:$4 sm:$0xff]  }
0x14a1   : > { %13315 = vmatprep.subr.bf16.mxu0 %v18296_v10 }
0x14a2   : > { %13296 = vmatpush3.bf16.msra.mxu1 %v18382_v58  ;;  %v14581_v58 = vld [vmem:[#allocation5 + $0x4] ss:$16 sps:$4 sm:$0xff]  }
0x14a3   : > { %13297 = vmatprep.subr.bf16.mxu1 %v18296_v10 }
0x14a4   : > { %13316 = vmatpush3.bf16.msra.mxu0 %v18383_v60  ;;  %v14579_v60 = vld [vmem:[#allocation5] ss:$16 sps:$4 sm:$0xff]  }
0x14a5   : > { %13317 = vmatprep.subr.bf16.mxu0 %v18296_v10 }
0x14a6   : > { %13298 = vmatpush3.bf16.msra.mxu1 %v18384_v63  ;;  %v14584_v63 = vld [vmem:[#allocation6 + $0x1e4] ss:$16 sps:$4 sm:$0xff]  }
0x14a7   : > { %13299 = vmatprep.subr.bf16.mxu1 %v18296_v10 }
0x14a8   : > { %13318 = vmatpush3.bf16.msra.mxu0 %v18385_v17  ;;  %v17452_v17 = vld [vmem:[%s15712_s24 + $0xc] sm:$0xf] }
0x14a9   : > { %13319 = vmatprep.subr.bf16.mxu0 %v18296_v10 }
0x14aa   : > { %13300 = vmatpush3.bf16.msra.mxu1 %v18386_v56  ;;  %v14582_v56 = vld [vmem:[#allocation6 + $0x1e0] ss:$16 sps:$4 sm:$0xff]  }
0x14ab   : > { %13301 = vmatprep.subr.bf16.mxu1 %v18296_v10 }
0x14ac   : > { %13320 = vmatpush3.bf16.msra.mxu0 %v18387_v61  ;;  %v14587_v61 = vld [vmem:[#allocation6 + $0x1c4] ss:$16 sps:$4 sm:$0xff]  }
0x14ad   : > { %13321 = vmatprep.subr.bf16.mxu0 %v18296_v10 }
0x14ae   : > { %13302 = vmatpush3.bf16.msra.mxu1 %v18388_v53 }
0x14af   : > { %13303 = vmatprep.subr.bf16.mxu1 %v18296_v10 }
0x14b0   : > { %13322 = vmatpush3.bf16.msra.mxu0 %v18389_v39  ;;  %v14585_v39 = vld [vmem:[#allocation6 + $0x1c0] ss:$16 sps:$4 sm:$0xff]  }
0x14b1   : > { %13323 = vmatprep.subr.bf16.mxu0 %v18296_v10 }
0x14b2   : > { %13304 = vmatpush3.bf16.msra.mxu1 %v18390_v51 }
0x14b3   : > { %13329 = vmatprep.subr.bf16.mxu1 %v18296_v10 }
0x14b4   : > { %13324 = vmatpush3.bf16.msra.mxu0 %v18391_v47 }
0x14b5   : > { %13306 = vmatmul.mubr.bf16.vlgmr.msra.gmra.mxu1 %v7589_v52  ;;  %13349 = vmatprep.subr.bf16.mxu0 %v18296_v10  ;;  %v14590_v52 = vld [vmem:[#allocation6 + $0x1a4] ss:$16 sps:$4 sm:$0xff]  }
0x14b6   : > { %13330 = vmatpush3.bf16.msra.mxu1 %v14526_v15  ;;  %13345 = vmatprep.mubr.msk.bf16.mxu1 %vm15529_vm0, %v18296_v10 }
0x14b7   : > { %13326 = vmatmul.mubr.bf16.vlgmr.msra.gmra.mxu0 %v7590_v62  ;;  %13331 = vmatprep.subr.bf16.mxu1 %v18296_v10 }
0x14b8   : > { %13365 = vmatprep.mubr.msk.bf16.mxu0 %vm15529_vm0, %v18296_v10  ;;  %13350 = vmatpush3.bf16.msra.mxu0 %v14606_v26  ;;  %v14602_v26 = vld [vmem:[#allocation6 + $0x124] ss:$16 sps:$4 sm:$0xff]  }
0x14b9   : > { %13351 = vmatprep.subr.bf16.mxu0 %v18296_v10 }
0x14ba   : > { %13332 = vmatpush3.bf16.msra.mxu1 %v14527_v9 }
0x14bb   : > { %13333 = vmatprep.subr.bf16.mxu1 %v18296_v10 }
0x14bc   : > { %13352 = vmatpush3.bf16.msra.mxu0 %v14607_v42  ;;  %v14605_v42 = vld [vmem:[#allocation6 + $0x104] ss:$16 sps:$4 sm:$0xff]  }
0x14bd   : > { %13353 = vmatprep.subr.bf16.mxu0 %v18296_v10 }
0x14be   : > { %13334 = vmatpush3.bf16.msra.mxu1 %v14528_v14 }
0x14bf   : > { %13335 = vmatprep.subr.bf16.mxu1 %v18296_v10 }
0x14c0   : > { %13354 = vmatpush3.bf16.msra.mxu0 %v14608_v55 }
0x14c1   : > { %13355 = vmatprep.subr.bf16.mxu0 %v18296_v10 }
0x14c2   : > { %13336 = vmatpush3.bf16.msra.mxu1 %v14529_v16 }
0x14c3   : > { %13337 = vmatprep.subr.bf16.mxu1 %v18296_v10 }
0x14c4   : > { %13356 = vmatpush3.bf16.msra.mxu0 %v14609_v18 }
0x14c5   : > { %13357 = vmatprep.subr.bf16.mxu0 %v18296_v10 }
0x14c6   : > { %13338 = vmatpush3.bf16.msra.mxu1 %v14530_v30  ;;  %v14588_v30 = vld [vmem:[#allocation6 + $0x1a0] ss:$16 sps:$4 sm:$0xff]  }
0x14c7   : > { %13339 = vmatprep.subr.bf16.mxu1 %v18296_v10 }
0x14c8   : > { %13358 = vmatpush3.bf16.msra.mxu0 %v14610_v5 }
0x14c9   : > { %13359 = vmatprep.subr.bf16.mxu0 %v18296_v10 }
0x14ca   : > { %13340 = vmatpush3.bf16.msra.mxu1 %v14531_v31 }
0x14cb   : > { %13341 = vmatprep.subr.bf16.mxu1 %v18296_v10 }
0x14cc   : > { %13360 = vmatpush3.bf16.msra.mxu0 %v14611_v44 }
0x14cd   : > { %13361 = vmatprep.subr.bf16.mxu0 %v18296_v10 }
0x14ce   : > { %13342 = vmatpush3.bf16.msra.mxu1 %v14532_v38 }
0x14cf   : > { %13343 = vmatprep.subr.bf16.mxu1 %v18296_v10 }
0x14d0   : > { %13362 = vmatpush3.bf16.msra.mxu0 %v14612_v48 }
0x14d1   : > { %13363 = vmatprep.subr.bf16.mxu0 %v18296_v10 }
0x14d2   : > { %13344 = vmatpush3.bf16.msra.mxu1 %v14533_v43  ;;  %v14593_v43 = vld [vmem:[#allocation6 + $0x184] ss:$16 sps:$4 sm:$0xff]  }
0x14d3   : > { %8415 = vmatprep.subr.bf16.mxu1 %v14536_v49 }
0x14d4   : > { %13364 = vmatpush3.bf16.msra.mxu0 %v14613_v37 }
0x14d5   : > { %13346 = vmatmul.mubr.bf16.vlgmr.msra.gmra.mxu1 %v18392_v45  ;;  %8456 = vmatprep.subr.bf16.mxu0 %v14616_v59 }
0x14d6   : > { %8416 = vmatpush1.bf16.msra.mxu1 %v14534_v41  ;;  %8447 = vmatprep.mubr.bf16.mxu1 %v18393_v54 }
0x14d7   : > { %8417 = vmatprep.subr.bf16.mxu1 %v14539_v33 }
0x14da   : > { %8418 = vmatpush1.bf16.msra.mxu1 %v14537_v22  ;;  %v14591_v22 = vld [vmem:[#allocation6 + $0x180] ss:$16 sps:$4 sm:$0xff]  }
0x14db   : > { %8419 = vmatprep.subr.bf16.mxu1 %v14542_v50  ;;  %v14596_v50 = vld [vmem:[#allocation6 + $0x164] ss:$16 sps:$4 sm:$0xff]  }
0x14de   : > { %8420 = vmatpush1.bf16.msra.mxu1 %v14540_v23  ;;  %v14594_v23 = vld [vmem:[#allocation6 + $0x160] ss:$16 sps:$4 sm:$0xff]  }
0x14df   : > { %8421 = vmatprep.subr.bf16.mxu1 %v14545_v27  ;;  %v14599_v27 = vld [vmem:[#allocation6 + $0x144] ss:$16 sps:$4 sm:$0xff]  }
0x14e2   : > { %8422 = vmatpush1.bf16.msra.mxu1 %v14543_v24  ;;  %v14597_v24 = vld [vmem:[#allocation6 + $0x140] ss:$16 sps:$4 sm:$0xff]  }
0x14e3   : > { %8423 = vmatprep.subr.bf16.mxu1 %v14548_v35  ;;  %v14600_v35 = vld [vmem:[#allocation6 + $0x120] ss:$16 sps:$4 sm:$0xff]  }
0x14e6   : > { %8424 = vmatpush1.bf16.msra.mxu1 %v14546_v29  ;;  %v14603_v29 = vld [vmem:[#allocation6 + $0x100] ss:$16 sps:$4 sm:$0xff]  }
0x14e7   : > { %8425 = vmatprep.subr.bf16.mxu1 %v14551_v21  ;;  %v8825_v21 = vld [vmem:[#allocation2 + $0x8] sm:$0xff] }
0x14e8   : > { %v17457_v55 = vpack.c.bf16 %v8825_v21, %v8825_v21  ;;  %v14631_v21 = vld [vmem:[#allocation6 + $0x4c] ss:$16 sps:$4 sm:$0xff]  }
0x14ea   : > { %8426 = vmatpush1.bf16.msra.mxu1 %v14549_v8 }
0x14eb   : > { %8427 = vmatprep.subr.bf16.mxu1 %v14554_v13 }
0x14ee   : > { %8428 = vmatpush1.bf16.msra.mxu1 %v14552_v34 }
0x14ef   : > { %8429 = vmatprep.subr.bf16.mxu1 %v14557_v1 }
0x14f2   : > { %8430 = vmatpush1.bf16.msra.mxu1 %v14555_v7 }
0x14f3   : > { %8657 = vmatprep.subr.bf16.mxu1 %v14560_v20 }
0x14f5   : > { %8448 = vmatmul.mubr.bf16.vlgmr.msra.gmra.mxu1 %v17445_v25 }
0x14f6   : > { %8658 = vmatpush1.bf16.msra.mxu1 %v14558_v36  ;;  %8689 = vmatprep.mubr.bf16.mxu1 %v18393_v54 }
0x14f7   : > { %8659 = vmatprep.subr.bf16.mxu1 %v14563_v12 }
0x14fa   : > { %8660 = vmatpush1.bf16.msra.mxu1 %v14561_v4 }
0x14fb   : > { %8661 = vmatprep.subr.bf16.mxu1 %v14566_v28 }
0x14fe   : > { %8662 = vmatpush1.bf16.msra.mxu1 %v14564_v3 }
0x14ff   : > { %8663 = vmatprep.subr.bf16.mxu1 %v14569_v11 }
0x1502   : > { %8664 = vmatpush1.bf16.msra.mxu1 %v14567_v6 }
0x1503   : > { %8665 = vmatprep.subr.bf16.mxu1 %v14572_v19 }
0x1506   : > { %8666 = vmatpush1.bf16.msra.mxu1 %v14570_v57 }
0x1507   : > { %8667 = vmatprep.subr.bf16.mxu1 %v14575_v2 }
0x150a   : > { %8668 = vmatpush1.bf16.msra.mxu1 %v14573_v40 }
0x150b   : > { %8669 = vmatprep.subr.bf16.mxu1 %v14578_v32 }
0x150e   : > { %8670 = vmatpush1.bf16.msra.mxu1 %v14576_v46 }
0x150f   : > { %8671 = vmatprep.subr.bf16.mxu1 %v14581_v58 }
0x1512   : > { %8672 = vmatpush1.bf16.msra.mxu1 %v14579_v60 }
0x1513   : > { %9019 = vmatprep.subr.bf16.mxu1 %v14584_v63 }
0x1515   : > { %8690 = vmatmul.mubr.bf16.vlgmr.msra.gmra.mxu1 %v17452_v17  ;;  %v7625_v53 = vpop.f32.mrf.mxu1 }
0x1516   : > { %9020 = vmatpush1.bf16.msra.mxu1 %v14582_v56  ;;  %9051 = vmatprep.mubr.bf16.mxu1 %v18393_v54  ;;  %v7911_v47 = vpack.c.bf16 %v7625_v53, %v7625_v53 }
0x1517   : > { %v13187_v51 = vpop.f32.mrf.mxu1  ;;  %v7665_v15 = vpop.f32.mrf.mxu0  ;;  %9021 = vmatprep.subr.bf16.mxu1 %v14587_v61 }
0x1518   : > { %v7912_v62 = vpack.c.bf16 %v7665_v15, %v7665_v15  ;;  %v8047_v49 = vunpack.c.l.b16 %v7911_v47 }
0x1519   : > { %v7628_v9 = vpop.f32.mrf.mxu1  ;;  %v13207_v14 = vpop.f32.mrf.mxu0 }
0x151a   : > { %v8048_v16 = vunpack.c.l.b16 %v7912_v62  ;;  %9022 = vmatpush1.bf16.msra.mxu1 %v14585_v39 }
0x151b   : > { %v13188_v31 = vpop.f32.mrf.mxu1  ;;  %v7668_v38 = vpop.f32.mrf.mxu0  ;;  %9023 = vmatprep.subr.bf16.mxu1 %v14590_v52 }
0x151c   : > { %v8055_v41 = vrot.slane %v8048_v16, 7 }
0x151d   : > { %v13208_v33 = vpop.f32.mrf.mxu0 }
0x151e   : > { %v8056_v45 = vsel %vm2634_vm1, %v8055_v41, %v8047_v49  ;;  %9024 = vmatpush1.bf16.msra.mxu1 %v14588_v30 }
0x151f   : > { %9025 = vmatprep.subr.bf16.mxu1 %v14593_v43 }
0x1522   : > { %9026 = vmatpush1.bf16.msra.mxu1 %v14591_v22 }
0x1523   : > { %9027 = vmatprep.subr.bf16.mxu1 %v14596_v50  ;;  %v14619_v50 = vld [vmem:[#allocation6 + $0xcc] ss:$16 sps:$4 sm:$0xff]  }
0x1526   : > { %9028 = vmatpush1.bf16.msra.mxu1 %v14594_v23  ;;  %v14617_v23 = vld [vmem:[#allocation6 + $0xc8] ss:$16 sps:$4 sm:$0xff]  }
0x1527   : > { %9029 = vmatprep.subr.bf16.mxu1 %v14599_v27  ;;  %v14622_v27 = vld [vmem:[#allocation6 + $0xac] ss:$16 sps:$4 sm:$0xff]  }
0x152a   : > { %9030 = vmatpush1.bf16.msra.mxu1 %v14597_v24  ;;  %v14620_v24 = vld [vmem:[#allocation6 + $0xa8] ss:$16 sps:$4 sm:$0xff]  }
0x152b   : > { %9031 = vmatprep.subr.bf16.mxu1 %v14602_v26  ;;  %v14625_v26 = vld [vmem:[#allocation6 + $0x8c] ss:$16 sps:$4 sm:$0xff]  }
0x152e   : > { %9032 = vmatpush1.bf16.msra.mxu1 %v14600_v35  ;;  %v14623_v35 = vld [vmem:[#allocation6 + $0x88] ss:$16 sps:$4 sm:$0xff]  }
0x152f   : > { %9033 = vmatprep.subr.bf16.mxu1 %v14605_v42  ;;  %v14628_v42 = vld [vmem:[#allocation6 + $0x6c] ss:$16 sps:$4 sm:$0xff]  }
0x1532   : > { %9034 = vmatpush1.bf16.msra.mxu1 %v14603_v29  ;;  %v14626_v29 = vld [vmem:[#allocation6 + $0x68] ss:$16 sps:$4 sm:$0xff]  }
0x1535   : > { %v7705_v8 = vpop.f32.mrf.mxu1  ;;  %9052 = vmatmul.mubr.bf16.vlgmr.msra.gmra.mxu1 %v17457_v55 }
0x1536   : > { %9293 = vmatprep.mubr.bf16.mxu1 %v18393_v54  ;;  %v7913_v48 = vpack.c.bf16 %v7705_v8, %v7705_v8  ;;  %v14629_v8 = vld [vmem:[#allocation6 + $0x48] ss:$16 sps:$4 sm:$0xff]  }
0x1537   : > { %v13227_v13 = vpop.f32.mrf.mxu1  ;;  %v7745_v18 = vpop.f32.mrf.mxu0 }
0x1538   : > { %v7914_v6 = vpack.c.bf16 %v7745_v18, %v7745_v18  ;;  %v8049_v19 = vunpack.c.l.b16 %v7913_v48  ;;  %v14634_v13 = vld [vmem:[#allocation6 + $0x2c] ss:$16 sps:$4 sm:$0xff]   ;;  %v14647_v48 = vld [vmem:[#allocation5 + $0x88] ss:$16 sps:$4 sm:$0xff]  }
0x1539   : > { %v7708_v34 = vpop.f32.mrf.mxu1  ;;  %v13247_v1 = vpop.f32.mrf.mxu0 }
0x153a   : > { %v8050_v59 = vunpack.c.l.b16 %v7914_v6  ;;  %v8057_v2 = vrot.slane %v8049_v19, 6  ;;  %v14632_v34 = vld [vmem:[#allocation6 + $0x28] ss:$16 sps:$4 sm:$0xff]   ;;  %v14652_v6 = vld [vmem:[#allocation5 + $0x6c] ss:$16 sps:$4 sm:$0xff]  }
0x153b   : > { %v13228_v5 = vpop.f32.mrf.mxu1  ;;  %v7748_v7 = vpop.f32.mrf.mxu0  ;;  %v14650_v19 = vld [vmem:[#allocation5 + $0x68] ss:$16 sps:$4 sm:$0xff]  }
0x153c   : > { %v8059_v32 = vrot.slane %v8050_v59, 5  ;;  %v8058_v58 = vsel %vm2637_vm2, %v8057_v2, %v8056_v45  ;;  %v14614_v45 = vld [vmem:[#allocation6 + $0xe8] ss:$16 sps:$4 sm:$0xff]   ;;  %v14637_v5 = vld [vmem:[#allocation6 + $0xc] ss:$16 sps:$4 sm:$0xff]  }
0x153d   : > { %v13248_v20 = vpop.f32.mrf.mxu0  ;;  %v14658_v59 = vld [vmem:[#allocation5 + $0x2c] ss:$16 sps:$4 sm:$0xff]   ;;  %v14656_v2 = vld [vmem:[#allocation5 + $0x28] ss:$16 sps:$4 sm:$0xff]  }
0x153e   : > { %v8060_v61 = vsel %vm2640_vm3, %v8059_v32, %v8058_v58  ;;  %v14635_v20 = vld [vmem:[#allocation6 + $0x8] ss:$16 sps:$4 sm:$0xff]   ;;  %v14661_v32 = vld [vmem:[#allocation5 + $0xc] ss:$16 sps:$4 sm:$0xff]  }
0x153f   : > { %v14659_v58 = vld [vmem:[#allocation5 + $0x8] ss:$16 sps:$4 sm:$0xff]  }
0x1555   : > { %v7785_v0 = vpop.f32.mrf.mxu1 }
0x1556   : > { %v7915_v37 = vpack.c.bf16 %v7785_v0, %v7785_v0 }
0x1557   : > { %v13267_v36 = vpop.f32.mrf.mxu1  ;;  %v7825_v12 = vpop.f32.mrf.mxu0 }
0x1558   : > { %v7916_v57 = vpack.c.bf16 %v7825_v12, %v7825_v12  ;;  %v8051_v40 = vunpack.c.l.b16 %v7915_v37  ;;  %v14640_v36 = vld [vmem:[#allocation5 + $0xec] ss:$16 sps:$4 sm:$0xff]   ;;  %v14638_v12 = vld [vmem:[#allocation5 + $0xe8] ss:$16 sps:$4 sm:$0xff]  }
0x1559   : > { %v7788_v4 = vpop.f32.mrf.mxu1  ;;  %v13287_v28 = vpop.f32.mrf.mxu0  ;;  %v14655_v37 = vld [vmem:[#allocation5 + $0x4c] ss:$16 sps:$4 sm:$0xff]  }
0x155a   : > { %v8052_v46 = vunpack.c.l.b16 %v7916_v57  ;;  %v8061_v60 = vrot.slane %v8051_v40, 4  ;;  %v14643_v4 = vld [vmem:[#allocation5 + $0xcc] ss:$16 sps:$4 sm:$0xff]   ;;  %v14641_v28 = vld [vmem:[#allocation5 + $0xc8] ss:$16 sps:$4 sm:$0xff]  }
0x155b   : > { %v13268_v44 = vpop.f32.mrf.mxu1  ;;  %v7828_v3 = vpop.f32.mrf.mxu0 }
0x155c   : > { %v8063_v53 = vrot.slane %v8052_v46, 3  ;;  %v8062_v15 = vsel %vm2643_vm4, %v8061_v60, %v8060_v61  ;;  %v14646_v44 = vld [vmem:[#allocation5 + $0xac] ss:$16 sps:$4 sm:$0xff]   ;;  %v14644_v3 = vld [vmem:[#allocation5 + $0xa8] ss:$16 sps:$4 sm:$0xff]  }
0x155d   : > { %v13288_v11 = vpop.f32.mrf.mxu0  ;;  %v14667_v61 = vld [vmem:[#allocation6 + $0x1cc] ss:$16 sps:$4 sm:$0xff]  }
0x155e   : > { %v8064_v30 = vsel %vm2646_vm5, %v8063_v53, %v8062_v15  ;;  %v14649_v11 = vld [vmem:[#allocation5 + $0x8c] ss:$16 sps:$4 sm:$0xff]   ;;  %v14665_v53 = vld [vmem:[#allocation6 + $0x1c8] ss:$16 sps:$4 sm:$0xff]  }
0x155f   : > { %v14673_v15 = vld [vmem:[#allocation6 + $0x18c] ss:$16 sps:$4 sm:$0xff]  }
0x1575   : > { %v7865_v63 = vpop.f32.mrf.mxu1 }
0x1576   : > { %v7917_v56 = vpack.c.bf16 %v7865_v63, %v7865_v63  ;;  %v14664_v63 = vld [vmem:[#allocation6 + $0x1ec] ss:$16 sps:$4 sm:$0xff]  }
0x1577   : > { %v13307_v39 = vpop.f32.mrf.mxu1  ;;  %v7905_v51 = vpop.f32.mrf.mxu0 }
0x1578   : > { %v8053_v52 = vunpack.c.l.b16 %v7917_v56  ;;  %v7918_v47 = vpack.c.bf16 %v7905_v51, %v7905_v51  ;;  %v14662_v56 = vld [vmem:[#allocation6 + $0x1e8] ss:$16 sps:$4 sm:$0xff]   ;;  %v14670_v39 = vld [vmem:[#allocation6 + $0x1ac] ss:$16 sps:$4 sm:$0xff]  }
0x1579   : > { %v7868_v62 = vpop.f32.mrf.mxu1  ;;  %v13327_v9 = vpop.f32.mrf.mxu0  ;;  %v14668_v51 = vld [vmem:[#allocation6 + $0x1a8] ss:$16 sps:$4 sm:$0xff]  }
0x157a   : > { %v8065_v14 = vrot.slane %v8053_v52, 2  ;;  %v8054_v16 = vunpack.c.l.b16 %v7918_v47  ;;  %v14671_v52 = vld [vmem:[#allocation6 + $0x188] ss:$16 sps:$4 sm:$0xff]   ;;  %v14676_v47 = vld [vmem:[#allocation6 + $0x16c] ss:$16 sps:$4 sm:$0xff]  }
0x157b   : > { %v13308_v31 = vpop.f32.mrf.mxu1  ;;  %v7908_v38 = vpop.f32.mrf.mxu0  ;;  %v14674_v62 = vld [vmem:[#allocation6 + $0x168] ss:$16 sps:$4 sm:$0xff]   ;;  %v14679_v9 = vld [vmem:[#allocation6 + $0x14c] ss:$16 sps:$4 sm:$0xff]  }
0x157c   : > { %v8066_v43 = vsel %vm2649_vm6, %v8065_v14, %v8064_v30  ;;  %v8067_v49 = vrot.slane %v8054_v16, 1  ;;  %v14682_v14 = vld [vmem:[#allocation6 + $0x12c] ss:$16 sps:$4 sm:$0xff]   ;;  %v14680_v31 = vld [vmem:[#allocation6 + $0x128] ss:$16 sps:$4 sm:$0xff]  }
0x157d   : > { %v13328_v41 = vpop.f32.mrf.mxu0 }
0x157e   : > { %v8068_v33 = vsel %vm2652_vm7, %v8067_v49, %v8066_v43  ;;  %v14685_v43 = vld [vmem:[#allocation6 + $0x10c] ss:$16 sps:$4 sm:$0xff]  }
0x157f   : > { %v8069_v22 = vpack.c.b16 %v8068_v33, %v8068_v33  ;;  %v14683_v33 = vld [vmem:[#allocation6 + $0x108] ss:$16 sps:$4 sm:$0xff]  }
0x1581   : > { %13366 = vmatmul.mubr.bf16.vlgmr.msra.gmra.mxu0 %v8069_v22 }
0x1582   : > { %8457 = vmatpush1.bf16.msra.mxu0 %v14614_v45  ;;  %8488 = vmatprep.mubr.bf16.mxu0 %v18393_v54 }
0x1583   : > { %8458 = vmatprep.subr.bf16.mxu0 %v14619_v50 }
0x1586   : > { %8459 = vmatpush1.bf16.msra.mxu0 %v14617_v23 }
0x1587   : > { %8460 = vmatprep.subr.bf16.mxu0 %v14622_v27 }
0x158a   : > { %8461 = vmatpush1.bf16.msra.mxu0 %v14620_v24  ;;  %v14688_v24 = vld [vmem:[#allocation5 + $0x1e4] ss:$16 sps:$4 sm:$0xff]  }
0x158b   : > { %8462 = vmatprep.subr.bf16.mxu0 %v14625_v26  ;;  %v14691_v26 = vld [vmem:[#allocation5 + $0x1ec] ss:$16 sps:$4 sm:$0xff]   ;;  %9261 = vmatprep.subr.bf16.mxu1 %v14688_v24 }
0x158c   : > { %v18397_v24 = vld [vmem:[#allocation69_spill] sm:$0xff] }
0x158e   : > { %8463 = vmatpush1.bf16.msra.mxu0 %v14623_v35  ;;  %v14686_v35 = vld [vmem:[#allocation5 + $0x1e0] ss:$16 sps:$4 sm:$0xff]  }
0x158f   : > { %8464 = vmatprep.subr.bf16.mxu0 %v14628_v42  ;;  %v14689_v42 = vld [vmem:[#allocation5 + $0x1e8] ss:$16 sps:$4 sm:$0xff]   ;;  %9262 = vmatpush1.bf16.msra.mxu1 %v14686_v35 }
0x1592   : > { %8465 = vmatpush1.bf16.msra.mxu0 %v14626_v29  ;;  %v14694_v29 = vld [vmem:[#allocation5 + $0x1c4] ss:$16 sps:$4 sm:$0xff]  }
0x1593   : > { %8466 = vmatprep.subr.bf16.mxu0 %v14631_v21  ;;  %v14697_v21 = vld [vmem:[#allocation5 + $0x1cc] ss:$16 sps:$4 sm:$0xff]   ;;  %9263 = vmatprep.subr.bf16.mxu1 %v14694_v29 }
0x1595   : > { %v17468_v18 = vpop.f32.mrf.mxu1 }
0x1596   : > { %8467 = vmatpush1.bf16.msra.mxu0 %v14629_v8  ;;  %v14692_v8 = vld [vmem:[#allocation5 + $0x1c0] ss:$16 sps:$4 sm:$0xff]  }
0x1597   : > { %v13347_v1 = vpop.f32.mrf.mxu1  ;;  %8468 = vmatprep.subr.bf16.mxu0 %v14634_v13  ;;  %9264 = vmatpush1.bf16.msra.mxu1 %v14692_v8  ;;  %v14703_v13 = vld [vmem:[#allocation5 + $0x1ac] ss:$16 sps:$4 sm:$0xff]  }
0x1598   : > { %v14701_v1 = vld [vmem:[#allocation5 + $0x1a8] ss:$16 sps:$4 sm:$0xff]  }
0x1599   : > { %v8036_v7 = vpop.f32.mrf.mxu1 }
0x159a   : > { %8469 = vmatpush1.bf16.msra.mxu0 %v14632_v34  ;;  %v14698_v34 = vld [vmem:[#allocation5 + $0x1a0] ss:$16 sps:$4 sm:$0xff]   ;;  %v14706_v7 = vld [vmem:[#allocation5 + $0x184] ss:$16 sps:$4 sm:$0xff]  }
0x159b   : > { %v13348_v0 = vpop.f32.mrf.mxu1  ;;  %8470 = vmatprep.subr.bf16.mxu0 %v14637_v5  ;;  %v14704_v5 = vld [vmem:[#allocation5 + $0x180] ss:$16 sps:$4 sm:$0xff]  }
0x159c   : > { %v14709_v0 = vld [vmem:[#allocation5 + $0x18c] ss:$16 sps:$4 sm:$0xff]  }
0x159e   : > { %8471 = vmatpush1.bf16.msra.mxu0 %v14635_v20  ;;  %v14707_v20 = vld [vmem:[#allocation5 + $0x188] ss:$16 sps:$4 sm:$0xff]  }
0x159f   : > { %8698 = vmatprep.subr.bf16.mxu0 %v14640_v36  ;;  %v14712_v36 = vld [vmem:[#allocation5 + $0x164] ss:$16 sps:$4 sm:$0xff]  }
0x15a1   : > { %8489 = vmatmul.mubr.bf16.vlgmr.msra.gmra.mxu0 %v17445_v25  ;;  %v14653_v25 = vld [vmem:[#allocation5 + $0x48] ss:$16 sps:$4 sm:$0xff]  }
0x15a2   : > { %8699 = vmatpush1.bf16.msra.mxu0 %v14638_v12  ;;  %8730 = vmatprep.mubr.bf16.mxu0 %v18393_v54  ;;  %v14715_v12 = vld [vmem:[#allocation5 + $0x16c] ss:$16 sps:$4 sm:$0xff]  }
0x15a3   : > { %8700 = vmatprep.subr.bf16.mxu0 %v14643_v4  ;;  %v14710_v4 = vld [vmem:[#allocation5 + $0x160] ss:$16 sps:$4 sm:$0xff]  }
0x15a6   : > { %8701 = vmatpush1.bf16.msra.mxu0 %v14641_v28  ;;  %v14713_v28 = vld [vmem:[#allocation5 + $0x168] ss:$16 sps:$4 sm:$0xff]  }
0x15a7   : > { %8702 = vmatprep.subr.bf16.mxu0 %v14646_v44  ;;  %v14718_v44 = vld [vmem:[#allocation5 + $0x144] ss:$16 sps:$4 sm:$0xff]  }
0x15aa   : > { %8703 = vmatpush1.bf16.msra.mxu0 %v14644_v3  ;;  %v14721_v3 = vld [vmem:[#allocation5 + $0x14c] ss:$16 sps:$4 sm:$0xff]  }
0x15ab   : > { %8704 = vmatprep.subr.bf16.mxu0 %v14649_v11  ;;  %v14716_v11 = vld [vmem:[#allocation5 + $0x140] ss:$16 sps:$4 sm:$0xff]  }
0x15ae   : > { %8705 = vmatpush1.bf16.msra.mxu0 %v14647_v48  ;;  %v14719_v48 = vld [vmem:[#allocation5 + $0x148] ss:$16 sps:$4 sm:$0xff]  }
0x15af   : > { %8706 = vmatprep.subr.bf16.mxu0 %v14652_v6  ;;  %v14724_v6 = vld [vmem:[#allocation5 + $0x124] ss:$16 sps:$4 sm:$0xff]  }
0x15b2   : > { %8707 = vmatpush1.bf16.msra.mxu0 %v14650_v19  ;;  %v14727_v19 = vld [vmem:[#allocation5 + $0x12c] ss:$16 sps:$4 sm:$0xff]  }
0x15b3   : > { %8708 = vmatprep.subr.bf16.mxu0 %v14655_v37  ;;  %v14722_v37 = vld [vmem:[#allocation5 + $0x120] ss:$16 sps:$4 sm:$0xff]  }
0x15b5   : > { %v8449_v57 = vpop.f32.mrf.mxu1 }
0x15b6   : > { %8709 = vmatpush1.bf16.msra.mxu0 %v14653_v25  ;;  %v14725_v25 = vld [vmem:[#allocation5 + $0x128] ss:$16 sps:$4 sm:$0xff]  }
0x15b7   : > { %v8451_v40 = vpop.f32.mrf.mxu1  ;;  %8710 = vmatprep.subr.bf16.mxu0 %v14658_v59  ;;  %v14730_v59 = vld [vmem:[#allocation5 + $0x104] ss:$16 sps:$4 sm:$0xff]  }
0x15b9   : > { %v8453_v46 = vpop.f32.mrf.mxu1 }
0x15ba   : > { %8711 = vmatpush1.bf16.msra.mxu0 %v14656_v2  ;;  %v14728_v2 = vld [vmem:[#allocation5 + $0x100] ss:$16 sps:$4 sm:$0xff]  }
0x15bb   : > { %v8454_v60 = vpop.f32.mrf.mxu1  ;;  %8712 = vmatprep.subr.bf16.mxu0 %v14661_v32 }
0x15be   : > { %8713 = vmatpush1.bf16.msra.mxu0 %v14659_v58 }
0x15bf   : > { %9060 = vmatprep.subr.bf16.mxu0 %v14664_v63 }
0x15c1   : > { %8731 = vmatmul.mubr.bf16.vlgmr.msra.gmra.mxu0 %v17452_v17  ;;  %v14677_v17 = vld [vmem:[#allocation6 + $0x148] ss:$16 sps:$4 sm:$0xff]  }
0x15c2   : > { %9061 = vmatpush1.bf16.msra.mxu0 %v14662_v56  ;;  %9092 = vmatprep.mubr.bf16.mxu0 %v18393_v54 }
0x15c3   : > { %9062 = vmatprep.subr.bf16.mxu0 %v14667_v61 }
0x15c6   : > { %9063 = vmatpush1.bf16.msra.mxu0 %v14665_v53  ;;  %v8739_v53 = vld [vmem:[#allocation7] sm:$0xf] }
0x15c7   : > { %9064 = vmatprep.subr.bf16.mxu0 %v14670_v39 }
0x15ca   : > { %9065 = vmatpush1.bf16.msra.mxu0 %v14668_v51  ;;  %v18394_v51 = vld [vmem:[#allocation68_spill] sm:$0xff] }
0x15cb   : > { %9066 = vmatprep.subr.bf16.mxu0 %v14673_v15  ;;  %v8748_v15 = vrot.slane %v8739_v53, %v18394_v51 }
0x15ce   : > { %9067 = vmatpush1.bf16.msra.mxu0 %v14671_v52  ;;  %v18395_v52 = vld [vmem:[#allocation67_spill] sm:$0xff] }
0x15cf   : > { %9068 = vmatprep.subr.bf16.mxu0 %v14676_v47  ;;  %v8744_v47 = vrot.slane %v8739_v53, %v18395_v52 }
0x15d2   : > { %9069 = vmatpush1.bf16.msra.mxu0 %v14674_v62 }
0x15d3   : > { %9070 = vmatprep.subr.bf16.mxu0 %v14679_v9 }
0x15d5   : > { %v8691_v16 = vpop.f32.mrf.mxu1 }
0x15d6   : > { %v17474_v30 = vadd.f32 %v8691_v16, %v8449_v57  ;;  %9071 = vmatpush1.bf16.msra.mxu0 %v14677_v17  ;;  %v14733_v57 = vld [vmem:[#allocation5 + $0x10c] ss:$16 sps:$4 sm:$0xff]  }
0x15d7   : > { %v8693_v38 = vpop.f32.mrf.mxu1  ;;  %9072 = vmatprep.subr.bf16.mxu0 %v14682_v14 }
0x15d8   : > { %v17476_v49 = vadd.f32 %v8693_v38, %v8451_v40  ;;  %v14731_v40 = vld [vmem:[#allocation5 + $0x108] ss:$16 sps:$4 sm:$0xff]   ;;  %v8761_v14 = vadd.f32 %v8744_v47, %v17474_v30 }
0x15d9   : > { %v8695_v41 = vpop.f32.mrf.mxu1 }
0x15da   : > { %9073 = vmatpush1.bf16.msra.mxu0 %v14680_v31  ;;  %v8762_v17 = vadd.f32 %v8748_v15, %v17476_v49  ;;  %v11433_v16 = vmul.f32 -1.442695, %v8761_v14  ;;  %v18396_v41 = vld [vmem:[#allocation70_spill] sm:$0xff] }
0x15db   : > { %9074 = vmatprep.subr.bf16.mxu0 %v14685_v43  ;;  %v8696_v45 = vpop.f32.mrf.mxu1 }
0x15de   : > { %9075 = vmatpush1.bf16.msra.mxu0 %v14683_v33  ;;  %v8752_v33 = vrot.slane %v8739_v53, %v18396_v41 }
0x15df   : > { %9302 = vmatprep.subr.bf16.mxu0 %v14691_v26  ;;  %v8756_v26 = vrot.slane %v8739_v53, %v18397_v24  ;;  %v14741_v53 = vld [vmem:[#allocation8] sm:$0xff]  }
0x15e1   : > { %9093 = vmatmul.mubr.bf16.vlgmr.msra.gmra.mxu0 %v17457_v55  ;;  %v14695_v55 = vld [vmem:[#allocation5 + $0x1c8] ss:$16 sps:$4 sm:$0xff]  }
0x15e2   : > { %9334 = vmatprep.mubr.bf16.mxu0 %v18393_v54  ;;  %9303 = vmatpush1.bf16.msra.mxu0 %v14689_v42  ;;  %v14700_v54 = vld [vmem:[#allocation5 + $0x1a4] ss:$16 sps:$4 sm:$0xff]  }
0x15e3   : > { %9304 = vmatprep.subr.bf16.mxu0 %v14697_v21  ;;  %9265 = vmatprep.subr.bf16.mxu1 %v14700_v54 }
0x15e4   : > { %9266 = vmatpush1.bf16.msra.mxu1 %v14698_v34  ;;  %v8784_v34 = vld [vmem:[#allocation3] sm:$0xff] }
0x15e5   : > { %9267 = vmatprep.subr.bf16.mxu1 %v14706_v7 }
0x15e6   : > { %9305 = vmatpush1.bf16.msra.mxu0 %v14695_v55 }
0x15e7   : > { %9306 = vmatprep.subr.bf16.mxu0 %v14703_v13 }
0x15e8   : > { %9268 = vmatpush1.bf16.msra.mxu1 %v14704_v5 }
0x15e9   : > { %9269 = vmatprep.subr.bf16.mxu1 %v14712_v36 }
0x15ea   : > { %9307 = vmatpush1.bf16.msra.mxu0 %v14701_v1 }
0x15eb   : > { %9308 = vmatprep.subr.bf16.mxu0 %v14709_v0 }
0x15ec   : > { %9270 = vmatpush1.bf16.msra.mxu1 %v14710_v4 }
0x15ed   : > { %9271 = vmatprep.subr.bf16.mxu1 %v14718_v44 }
0x15ee   : > { %9309 = vmatpush1.bf16.msra.mxu0 %v14707_v20 }
0x15ef   : > { %9310 = vmatprep.subr.bf16.mxu0 %v14715_v12 }
0x15f0   : > { %9272 = vmatpush1.bf16.msra.mxu1 %v14716_v11 }
0x15f1   : > { %9273 = vmatprep.subr.bf16.mxu1 %v14724_v6  ;;  %v17500_v6 = vld [vmem:[#allocation4 + $0x38] sm:$0xff]  }
0x15f2   : > { %9311 = vmatpush1.bf16.msra.mxu0 %v14713_v28 }
0x15f3   : > { %9312 = vmatprep.subr.bf16.mxu0 %v14721_v3 }
0x15f4   : > { %9274 = vmatpush1.bf16.msra.mxu1 %v14722_v37  ;;  %v17510_v37 = vld [vmem:[#allocation4 + $0x28] sm:$0xff]  }
0x15f5   : > { %v17480_v22 = vpop.f32.mrf.mxu1  ;;  %9275 = vmatprep.subr.bf16.mxu1 %v14730_v59  ;;  %v17518_v59 = vld [vmem:[#allocation4 + $0x18] sm:$0xff]  }
0x15f6   : > { %9313 = vmatpush1.bf16.msra.mxu0 %v14719_v48 }
0x15f7   : > { %v17482_v50 = vpop.f32.mrf.mxu1  ;;  %9314 = vmatprep.subr.bf16.mxu0 %v14727_v19  ;;  %v17506_v19 = vld [vmem:[#allocation4 + $0x30] sm:$0xff]  }
0x15f8   : > { %9276 = vmatpush1.bf16.msra.mxu1 %v14728_v2  ;;  %v17526_v2 = vld [vmem:[#allocation4 + $0x8] sm:$0xff]  }
0x15f9   : > { %v9057_v23 = vpop.f32.mrf.mxu1  ;;  %13369 = vmatprep.subr.bf16.mxu1 %v18296_v10 }
0x15fa   : > { %9315 = vmatpush1.bf16.msra.mxu0 %v14725_v25  ;;  %v17514_v25 = vld [vmem:[#allocation4 + $0x20] sm:$0xff]  }
0x15fb   : > { %v9058_v27 = vpop.f32.mrf.mxu1  ;;  %9316 = vmatprep.subr.bf16.mxu0 %v14733_v57  ;;  %v17522_v57 = vld [vmem:[#allocation4 + $0x10] sm:$0xff]  }
0x15fe   : > { %9317 = vmatpush1.bf16.msra.mxu0 %v14731_v40  ;;  %v17530_v40 = vld [vmem:[#allocation4] sm:$0xff]  }
0x15ff   : > { %13389 = vmatprep.subr.bf16.mxu0 %v18296_v10 }
0x1641   : > { %v8153_v32 = vpop.f32.mrf.mxu0 }
0x1642   : > { %v8154_v46 = vadd.f32 %v8153_v32, %v17468_v18  ;;  %v11434_v18 = vmul.f32 -1.442695, %v8762_v17  ;;  %v14734_v32 = vld [vmem:[#allocation8 + $0x38] sm:$0xff]  }
0x1643   : > { %v13367_v58 = vpop.f32.mrf.mxu0 }
0x1644   : > { %14912 = vtanh.f32 %v8154_v46  ;;  %v14735_v46 = vld [vmem:[#allocation8 + $0x30] sm:$0xff]   ;;  %v14736_v58 = vld [vmem:[#allocation8 + $0x28] sm:$0xff]  }
0x1645   : > { %v8156_v60 = vpop.f32.mrf.mxu0  ;;  %14914 = vpow2.f32 %v11434_v18 }
0x1646   : > { %14916 = vpow2.f32 %v11433_v16  ;;  %v14737_v60 = vld [vmem:[#allocation8 + $0x20] sm:$0xff]  }
0x1647   : > { %v13368_v63 = vpop.f32.mrf.mxu0 }
0x1648   : > { %v14738_v63 = vld [vmem:[#allocation8 + $0x18] sm:$0xff]  }
0x1651   : > { %v14913_v56 = vpop.eup %14912 }
0x1652   : > { %11366 = vst [vmem:[%s15719_s27 + $0x10] sm:$0xff] %v14913_v56  ;;  %v14915_v31 = vpop.eup %14914  ;;  %v14739_v56 = vld [vmem:[#allocation8 + $0x10] sm:$0xff]  }
0x1653   : > { %v14917_v38 = vpop.eup %14916  ;;  %v8774_v43 = vadd.f32 1.0, %v14915_v31 }
0x1654   : > { %v8768_v45 = vadd.f32 1.0, %v14917_v38 }
0x1655   : > { %14918 = vrcp.f32 %v8774_v43 }
0x1656   : > { %14920 = vrcp.f32 %v8768_v45 }
0x1661   : > { %v8490_v61 = vpop.f32.mrf.mxu0 }
0x1662   : > { %v14919_v55 = vpop.eup %14918 }
0x1663   : > { %v8492_v39 = vpop.f32.mrf.mxu0  ;;  %v14921_v54 = vpop.eup %14920  ;;  %v8785_v1 = vmul.f32 %v14919_v55, %v8784_v34 }
0x1665   : > { %v8494_v62 = vpop.f32.mrf.mxu0 }
0x1667   : > { %v8495_v9 = vpop.f32.mrf.mxu0 }
0x1681   : > { %v8732_v23 = vpop.f32.mrf.mxu0 }
0x1682   : > { %v8733_v27 = vadd.f32 %v8732_v23, %v8490_v61  ;;  %v14740_v61 = vld [vmem:[#allocation8 + $0x8] sm:$0xff]  }
0x1683   : > { %v8734_v35 = vpop.f32.mrf.mxu0 }
0x1684   : > { %v8763_v42 = vadd.f32 %v8752_v33, %v8733_v27  ;;  %v8735_v49 = vadd.f32 %v8734_v35, %v8492_v39  ;;  %v9343_v39 = vld [vmem:[#allocation7 + $0x4] sm:$0xf] }
0x1685   : > { %v8736_v30 = vpop.f32.mrf.mxu0  ;;  %v9348_v15 = vrot.slane %v9343_v39, %v18395_v52  ;;  %v9352_v17 = vrot.slane %v9343_v39, %v18394_v51 }
0x1686   : > { %14922 = vtanh.f32 %v8763_v42  ;;  %v8764_v29 = vadd.f32 %v8756_v26, %v8735_v49  ;;  %v9356_v42 = vrot.slane %v9343_v39, %v18396_v41 }
0x1687   : > { %v8737_v21 = vpop.f32.mrf.mxu0 }
0x1688   : > { %v11435_v8 = vmul.f32 -1.442695, %v8764_v29 }
0x168a   : > { %14924 = vpow2.f32 %v11435_v8 }
0x1693   : > { %v14923_v13 = vpop.eup %14922 }
0x1694   : > { %v8786_v5 = vmul.f32 %v14923_v13, %v14921_v54 }
0x1696   : > { %v8787_v7 = vadd.f32 %v8786_v5, %v8785_v1 }
0x1697   : > { %v14925_v20 = vpop.eup %14924 }
0x1698   : > { %8790 = vst [vmem:[#allocation3] sm:$0xff] %v8787_v7  ;;  %v8781_v0 = vadd.f32 1.0, %v14925_v20  ;;  %14926 = vtanh.f32 %v8787_v7 }
0x169a   : > { %14928 = vrcp.f32 %v8781_v0 }
0x16a1   : > { %v17494_v36 = vpop.f32.mrf.mxu0 }
0x16a3   : > { %v17496_v12 = vpop.f32.mrf.mxu0 }
0x16a5   : > { %v9098_v4 = vpop.f32.mrf.mxu0  ;;  %v14927_v28 = vpop.eup %14926 }
0x16a6   : > { %v17553_v4 = vld [vmem:[#allocation4 + $0x78] sm:$0xff]  }
0x16a7   : > { %v14929_v44 = vpop.eup %14928  ;;  %v9099_v3 = vpop.f32.mrf.mxu0 }
0x16a8   : > { %v8789_v11 = vmul.f32 %v14929_v44, %v14927_v28  ;;  %v17559_v28 = vld [vmem:[#allocation4 + $0x70] sm:$0xff]   ;;  %v17563_v44 = vld [vmem:[#allocation4 + $0x68] sm:$0xff]   ;;  %v17567_v3 = vld [vmem:[#allocation4 + $0x60] sm:$0xff]  }
0x16aa   : > { %8791 = vst [vmem:[#allocation2] sm:$0xff] %v8789_v11  ;;  %v8792_v48 = vpack.c.bf16 %v8789_v11, %v8789_v11  ;;  %v17571_v11 = vld [vmem:[#allocation4 + $0x58] sm:$0xff]  }
0x16ac   : > { %9294 = vmatmul.mubr.bf16.vlgmr.msra.gmra.mxu1 %v8792_v48  ;;  %9335 = vmatmul.mubr.bf16.vlgmr.msra.gmra.mxu0 %v8792_v48  ;;  %v17575_v48 = vld [vmem:[#allocation4 + $0x50] sm:$0xff]  }
0x16ad   : > { %13385 = vmatprep.mubr.msk.bf16.mxu1 %vm15529_vm0, %v18296_v10  ;;  %13390 = vmatpush3.bf16.xpose.msra.mxu0 %v17500_v6 }
0x16ae   : > { %13391 = vmatprep.subr.bf16.mxu0 %v18296_v10  ;;  %13405 = vmatprep.mubr.msk.bf16.mxu0 %vm15529_vm0, %v18296_v10 }
0x16af   : > { %13370 = vmatpush3.bf16.msra.mxu1 %v14734_v32  ;;  %v17579_v32 = vld [vmem:[#allocation4 + $0x48] sm:$0xff]  }
0x16b0   : > { %13371 = vmatprep.subr.bf16.mxu1 %v18296_v10 }
0x16b3   : > { %13372 = vmatpush3.bf16.msra.mxu1 %v14735_v46  ;;  %v17583_v46 = vld [vmem:[#allocation4 + $0x40] sm:$0xff]  }
0x16b4   : > { %13373 = vmatprep.subr.bf16.mxu1 %v18296_v10 }
0x16b5   : > { %13392 = vmatpush3.bf16.xpose.msra.mxu0 %v17506_v19 }
0x16b6   : > { %13393 = vmatprep.subr.bf16.mxu0 %v18296_v10 }
0x16b7   : > { %13374 = vmatpush3.bf16.msra.mxu1 %v14736_v58 }
0x16b8   : > { %13375 = vmatprep.subr.bf16.mxu1 %v18296_v10 }
0x16bb   : > { %13376 = vmatpush3.bf16.msra.mxu1 %v14737_v60  ;;  %v18399_v60 = vld [vmem:[#allocation72_spill] sm:$0xff] }
0x16bc   : > { %13377 = vmatprep.subr.bf16.mxu1 %v18296_v10 }
0x16bd   : > { %13394 = vmatpush3.bf16.xpose.msra.mxu0 %v17510_v37 }
0x16be   : > { %13395 = vmatprep.subr.bf16.mxu0 %v18296_v10 }
0x16bf   : > { %13378 = vmatpush3.bf16.msra.mxu1 %v14738_v63 }
0x16c0   : > { %13379 = vmatprep.subr.bf16.mxu1 %v18296_v10 }
0x16c3   : > { %13380 = vmatpush3.bf16.msra.mxu1 %v14739_v56 }
0x16c4   : > { %13381 = vmatprep.subr.bf16.mxu1 %v18296_v10 }
0x16c5   : > { %13396 = vmatpush3.bf16.xpose.msra.mxu0 %v17514_v25 }
0x16c6   : > { %13397 = vmatprep.subr.bf16.mxu0 %v18296_v10 }
0x16c7   : > { %13382 = vmatpush3.bf16.msra.mxu1 %v14740_v61 }
0x16c8   : > { %13383 = vmatprep.subr.bf16.mxu1 %v18296_v10 }
0x16cb   : > { %13384 = vmatpush3.bf16.msra.mxu1 %v14741_v53 }
0x16cc   : > { %13409 = vmatprep.subr.bf16.mxu1 %v18296_v10 }
0x16cd   : > { %13398 = vmatpush3.bf16.xpose.msra.mxu0 %v17518_v59 }
0x16ce   : > { %13399 = vmatprep.subr.bf16.mxu0 %v18296_v10 }
0x16d5   : > { %13400 = vmatpush3.bf16.xpose.msra.mxu0 %v17522_v57 }
0x16d6   : > { %13401 = vmatprep.subr.bf16.mxu0 %v18296_v10 }
0x16dd   : > { %13402 = vmatpush3.bf16.xpose.msra.mxu0 %v17526_v2 }
0x16de   : > { %13403 = vmatprep.subr.bf16.mxu0 %v18296_v10 }
0x16e5   : > { %13404 = vmatpush3.bf16.xpose.msra.mxu0 %v17530_v40 }
0x16e6   : > { %13429 = vmatprep.subr.bf16.mxu0 %v18296_v10 }
0x176c   : > { %v9295_v47 = vpop.f32.mrf.mxu1  ;;  %v9336_v62 = vpop.f32.mrf.mxu0 }
0x176d   : > { %v9296_v9 = vadd.f32 %v9295_v47, %v17480_v22  ;;  %v9360_v22 = vrot.slane %v9343_v39, %v18397_v24  ;;  %v9337_v51 = vadd.f32 %v9336_v62, %v17494_v36  ;;  %v9388_v24 = vld [vmem:[#allocation3 + $0x8] sm:$0xff] }
0x176e   : > { %v9297_v14 = vpop.f32.mrf.mxu1  ;;  %v9338_v18 = vpop.f32.mrf.mxu0 }
0x176f   : > { %v9365_v16 = vadd.f32 %v9348_v15, %v9296_v9  ;;  %v9298_v31 = vadd.f32 %v9297_v14, %v17482_v50  ;;  %v9339_v52 = vadd.f32 %v9338_v18, %v17496_v12  ;;  %v9367_v30 = vadd.f32 %v9356_v42, %v9337_v51  ;;  %v17597_v14 = vld [vmem:[#allocation4 + $0xf8] sm:$0xff]   ;;  %v17605_v18 = vld [vmem:[#allocation4 + $0xb0] sm:$0xff]   ;;  %v17657_v42 = vld [vmem:[#allocation4 + $0xc0] sm:$0xff]  }
0x1770   : > { %v9299_v38 = vpop.f32.mrf.mxu1  ;;  %v9340_v43 = vpop.f32.mrf.mxu0 }
0x1771   : > { %v11500_v33 = vmul.f32 -1.442695, %v9365_v16  ;;  %v9366_v45 = vadd.f32 %v9352_v17, %v9298_v31  ;;  %v9368_v35 = vadd.f32 %v9360_v22, %v9339_v52  ;;  %v17593_v17 = vld [vmem:[#allocation4 + $0xb8] sm:$0xff]   ;;  %v17609_v16 = vld [vmem:[#allocation4 + $0xf0] sm:$0xff]   ;;  %v17613_v31 = vld [vmem:[#allocation4 + $0xa8] sm:$0xff]  }
0x1772   : > { %v9300_v23 = vpop.f32.mrf.mxu1  ;;  %v9341_v27 = vpop.f32.mrf.mxu0  ;;  %v17617_v38 = vld [vmem:[#allocation4 + $0xe8] sm:$0xff]   ;;  %v17621_v43 = vld [vmem:[#allocation4 + $0xa0] sm:$0xff]  }
0x1773   : > { %14930 = vpow2.f32 %v11500_v33  ;;  %v11501_v26 = vmul.f32 -1.442695, %v9366_v45  ;;  %v11502_v49 = vmul.f32 -1.442695, %v9368_v35  ;;  %v17625_v33 = vld [vmem:[#allocation4 + $0xe0] sm:$0xff]   ;;  %v17629_v45 = vld [vmem:[#allocation4 + $0x98] sm:$0xff]  }
0x1774   : > { %v17633_v23 = vld [vmem:[#allocation4 + $0xd8] sm:$0xff]   ;;  %v17637_v27 = vld [vmem:[#allocation4 + $0x90] sm:$0xff]   ;;  %v17645_v52 = vld [vmem:[#allocation4 + $0x88] sm:$0xff]  }
0x1775   : > { %14932 = vpow2.f32 %v11501_v26  ;;  %v17641_v26 = vld [vmem:[#allocation4 + $0xd0] sm:$0xff]   ;;  %v17649_v22 = vld [vmem:[#allocation4 + $0xc8] sm:$0xff]   ;;  %v17653_v35 = vld [vmem:[#allocation4 + $0x80] sm:$0xff]  }
0x1776   : > { %14934 = vpow2.f32 %v11502_v49 }
0x1780   : > { %v14931_v50 = vpop.eup %14930 }
0x1781   : > { %v9372_v29 = vadd.f32 1.0, %v14931_v50 }
0x1782   : > { %v14933_v21 = vpop.eup %14932 }
0x1783   : > { %14936 = vrcp.f32 %v9372_v29  ;;  %v9378_v8 = vadd.f32 1.0, %v14933_v21  ;;  %v14935_v55 = vpop.eup %14934  ;;  %v17661_v29 = vld [vmem:[#allocation4 + $0x138] sm:$0xff]  }
0x1784   : > { %14938 = vtanh.f32 %v9367_v30  ;;  %v9385_v1 = vadd.f32 1.0, %v14935_v55  ;;  %v17667_v21 = vld [vmem:[#allocation4 + $0x178] sm:$0xff]   ;;  %v17677_v55 = vld [vmem:[#allocation4 + $0x170] sm:$0xff]  }
0x1785   : > { %14940 = vrcp.f32 %v9378_v8  ;;  %v17673_v8 = vld [vmem:[#allocation4 + $0x130] sm:$0xff]  }
0x1786   : > { %14942 = vrcp.f32 %v9385_v1  ;;  %v17697_v1 = vld [vmem:[#allocation4 + $0x118] sm:$0xff]  }
0x1790   : > { %v14937_v54 = vpop.eup %14936 }
0x1791   : > { %v14939_v13 = vpop.eup %14938 }
0x1792   : > { %v14941_v34 = vpop.eup %14940  ;;  %v9390_v5 = vmul.f32 %v14939_v13, %v14937_v54  ;;  %v17681_v54 = vld [vmem:[#allocation4 + $0x128] sm:$0xff]  }
0x1793   : > { %v9389_v7 = vmul.f32 %v14941_v34, %v9388_v24  ;;  %v14943_v41 = vpop.eup %14942  ;;  %v17685_v13 = vld [vmem:[#allocation4 + $0x168] sm:$0xff]   ;;  %v17689_v34 = vld [vmem:[#allocation4 + $0x120] sm:$0xff]  }
0x1794   : > { %v17693_v24 = vld [vmem:[#allocation4 + $0x160] sm:$0xff]  }
0x1795   : > { %v9391_v20 = vadd.f32 %v9390_v5, %v9389_v7  ;;  %v17701_v5 = vld [vmem:[#allocation4 + $0x158] sm:$0xff]   ;;  %v17705_v7 = vld [vmem:[#allocation4 + $0x110] sm:$0xff]  }
0x1797   : > { %14944 = vtanh.f32 %v9391_v20  ;;  %9394 = vst [vmem:[#allocation3 + $0x8] sm:$0xff] %v9391_v20  ;;  %v17709_v20 = vld [vmem:[#allocation4 + $0x150] sm:$0xff]  }
0x17a4   : > { %v14945_v0 = vpop.eup %14944 }
0x17a5   : > { %v9393_v36 = vmul.f32 %v14945_v0, %v14943_v41  ;;  %v17715_v0 = vld [vmem:[#allocation4 + $0x108] sm:$0xff]  }
0x17a7   : > { %9395 = vst [vmem:[#allocation2 + $0x8] sm:$0xff] %v9393_v36  ;;  %v17550_v12 = vpack.c.bf16 %v9393_v36, %v9393_v36  ;;  %v17719_v36 = vld [vmem:[#allocation4 + $0x148] sm:$0xff]  }
0x17a9   : > { %18398 = vst [vmem:[#allocation75_spill] sm:$0xff] %v17550_v12  ;;  %13386 = vmatmul.mubr.bf16.vlgmr.msra.gmra.mxu1 %v17550_v12  ;;  %v17786_v12 = vld [vmem:[#allocation4 + $0x188] sm:$0xff]  }
0x17aa   : > { %13410 = vmatpush3.bf16.xpose.msra.mxu1 %v17553_v4  ;;  %13425 = vmatprep.mubr.msk.bf16.mxu1 %vm15529_vm0, %v18296_v10  ;;  %18412 = vst [vmem:[#allocation71_spill] sm:$0xff] %v17786_v12 }
0x17ab   : > { %13411 = vmatprep.subr.bf16.mxu1 %v18296_v10 }
0x17b2   : > { %13412 = vmatpush3.bf16.xpose.msra.mxu1 %v17559_v28 }
0x17b3   : > { %13413 = vmatprep.subr.bf16.mxu1 %v18296_v10 }
0x17ba   : > { %13414 = vmatpush3.bf16.xpose.msra.mxu1 %v17563_v44 }
0x17bb   : > { %13415 = vmatprep.subr.bf16.mxu1 %v18296_v10 }
0x17c2   : > { %13416 = vmatpush3.bf16.xpose.msra.mxu1 %v17567_v3 }
0x17c3   : > { %13417 = vmatprep.subr.bf16.mxu1 %v18296_v10 }
0x17ca   : > { %13418 = vmatpush3.bf16.xpose.msra.mxu1 %v17571_v11 }
0x17cb   : > { %13419 = vmatprep.subr.bf16.mxu1 %v18296_v10 }
0x17d2   : > { %13420 = vmatpush3.bf16.xpose.msra.mxu1 %v17575_v48 }
0x17d3   : > { %13421 = vmatprep.subr.bf16.mxu1 %v18296_v10 }
0x17da   : > { %13422 = vmatpush3.bf16.xpose.msra.mxu1 %v17579_v32 }
0x17db   : > { %13423 = vmatprep.subr.bf16.mxu1 %v18296_v10 }
0x17e2   : > { %13424 = vmatpush3.bf16.xpose.msra.mxu1 %v17583_v46 }
0x17e3   : > { %13449 = vmatprep.subr.bf16.mxu1 %v18296_v10 }
0x1869   : > { %v17587_v58 = vpop.f32.mrf.mxu1 }
0x186a   : > { %v9509_v63 = vrot.slane %v17587_v58, %v18399_v60  ;;  %v9502_v41 = vcombine.high %v17587_v58, %v17587_v58 }
0x186b   : > { %v13387_v56 = vpop.f32.mrf.mxu1 }
0x186c   : > { %v9517_v61 = vcombine.high %v9509_v63, %v9509_v63  ;;  %v9525_v53 = vrot.slane %v9509_v63, %v18399_v60  ;;  %v9516_v63 = vrot.slane %v9502_v41, %v18399_v60  ;;  %v17766_v41 = vld [vmem:[#allocation4 + $0x1e0] sm:$0xff]  }
0x186d   : > { %v9498_v39 = vpop.f32.mrf.mxu1  ;;  %18407 = vst [vmem:[#allocation83_spill] sm:$0xff] %v17766_v41 }
0x186e   : > { %v9539_v15 = vrot.slane %v9517_v61, %v18399_v60  ;;  %v9559_v47 = vpack.c.bf16 %v9525_v53, %v9525_v53  ;;  %v9547_v51 = vcombine.high %v9525_v53, %v9525_v53  ;;  %v9518_v56 = vcombine.high %v9516_v63, %v9516_v63  ;;  %v17724_v61 = vld [vmem:[#allocation4 + $0x100] sm:$0xff]  }
0x186f   : > { %v13388_v62 = vpop.f32.mrf.mxu1  ;;  %v9532_v58 = vrot.slane %v9516_v63, %v18399_v60  ;;  %v17729_v53 = vld [vmem:[#allocation4 + $0x140] sm:$0xff]   ;;  %v17770_v63 = vld [vmem:[#allocation4 + $0x198] sm:$0xff]  }
0x1870   : > { %v9560_v9 = vpack.c.bf16 %v9539_v15, %v9539_v15  ;;  %13406 = vmatmul.mubr.bf16.vlgmr.msra.gmra.mxu0 %v9559_v47  ;;  %v9549_v49 = vcombine.high %v9539_v15, %v9539_v15  ;;  %v9561_v50 = vpack.c.bf16 %v9547_v51, %v9547_v51  ;;  %v9546_v39 = vrot.slane %v9518_v56, %v18399_v60  ;;  %v17734_v62 = vld [vmem:[#allocation4 + $0x1b8] sm:$0xff]   ;;  %v17746_v60 = vld [vmem:[#allocation4 + $0x1b0] sm:$0xff]  }
0x1871   : > { %13430 = vmatpush3.bf16.xpose.msra.mxu0 %v17593_v17  ;;  %13445 = vmatprep.mubr.msk.bf16.mxu0 %vm15529_vm0, %v18296_v10  ;;  %v9563_v15 = vpack.c.bf16 %v9532_v58, %v9532_v58  ;;  %18400 = vst [vmem:[#allocation76_spill] sm:$0xff] %v17734_v62  ;;  %18402 = vst [vmem:[#allocation78_spill] sm:$0xff] %v17746_v60  ;;  %v17750_v51 = vld [vmem:[#allocation4 + $0x1f0] sm:$0xff]   ;;  %v17774_v56 = vld [vmem:[#allocation4 + $0x1d8] sm:$0xff]  }
0x1872   : > { %13426 = vmatmul.mubr.bf16.vlgmr.msra.gmra.mxu1 %v9560_v9  ;;  %13431 = vmatprep.subr.bf16.mxu0 %v18296_v10  ;;  %v9562_v30 = vpack.c.bf16 %v9549_v49, %v9549_v49  ;;  %v9564_v47 = vpack.c.bf16 %v9546_v39, %v9546_v39  ;;  %v17740_v9 = vld [vmem:[#allocation4 + $0x1f8] sm:$0xff]   ;;  %18403 = vst [vmem:[#allocation79_spill] sm:$0xff] %v17750_v51  ;;  %v17754_v49 = vld [vmem:[#allocation4 + $0x1a8] sm:$0xff]   ;;  %18408 = vst [vmem:[#allocation84_spill] sm:$0xff] %v17770_v63 }
0x1873   : > { %13450 = vmatpush3.bf16.xpose.msra.mxu1 %v17597_v14  ;;  %13465 = vmatprep.mubr.msk.bf16.mxu1 %vm15529_vm0, %v18296_v10  ;;  %18401 = vst [vmem:[#allocation77_spill] sm:$0xff] %v17740_v9  ;;  %18404 = vst [vmem:[#allocation80_spill] sm:$0xff] %v17754_v49 }
0x1874   : > { %13451 = vmatprep.subr.bf16.mxu1 %v18296_v10  ;;  %18409 = vst [vmem:[#allocation85_spill] sm:$0xff] %v17774_v56 }
0x1879   : > { %13432 = vmatpush3.bf16.xpose.msra.mxu0 %v17605_v18 }
0x187a   : > { %13433 = vmatprep.subr.bf16.mxu0 %v18296_v10 }
0x187b   : > { %13452 = vmatpush3.bf16.xpose.msra.mxu1 %v17609_v16 }
0x187c   : > { %13453 = vmatprep.subr.bf16.mxu1 %v18296_v10 }
0x1881   : > { %13434 = vmatpush3.bf16.xpose.msra.mxu0 %v17613_v31 }
0x1882   : > { %13435 = vmatprep.subr.bf16.mxu0 %v18296_v10 }
0x1883   : > { %13454 = vmatpush3.bf16.xpose.msra.mxu1 %v17617_v38 }
0x1884   : > { %13455 = vmatprep.subr.bf16.mxu1 %v18296_v10 }
0x1889   : > { %13436 = vmatpush3.bf16.xpose.msra.mxu0 %v17621_v43 }
0x188a   : > { %13437 = vmatprep.subr.bf16.mxu0 %v18296_v10 }
0x188b   : > { %13456 = vmatpush3.bf16.xpose.msra.mxu1 %v17625_v33 }
0x188c   : > { %13457 = vmatprep.subr.bf16.mxu1 %v18296_v10 }
0x1891   : > { %13438 = vmatpush3.bf16.xpose.msra.mxu0 %v17629_v45 }
0x1892   : > { %13439 = vmatprep.subr.bf16.mxu0 %v18296_v10 }
0x1893   : > { %13458 = vmatpush3.bf16.xpose.msra.mxu1 %v17633_v23 }
0x1894   : > { %13459 = vmatprep.subr.bf16.mxu1 %v18296_v10 }
0x1899   : > { %13440 = vmatpush3.bf16.xpose.msra.mxu0 %v17637_v27 }
0x189a   : > { %13441 = vmatprep.subr.bf16.mxu0 %v18296_v10 }
0x189b   : > { %13460 = vmatpush3.bf16.xpose.msra.mxu1 %v17641_v26 }
0x189c   : > { %13461 = vmatprep.subr.bf16.mxu1 %v18296_v10 }
0x18a1   : > { %13442 = vmatpush3.bf16.xpose.msra.mxu0 %v17645_v52 }
0x18a2   : > { %13443 = vmatprep.subr.bf16.mxu0 %v18296_v10 }
0x18a3   : > { %13462 = vmatpush3.bf16.xpose.msra.mxu1 %v17649_v22 }
0x18a4   : > { %13463 = vmatprep.subr.bf16.mxu1 %v18296_v10 }
0x18a9   : > { %13444 = vmatpush3.bf16.xpose.msra.mxu0 %v17653_v35 }
0x18aa   : > { %13469 = vmatprep.subr.bf16.mxu0 %v18296_v10 }
0x18ab   : > { %13464 = vmatpush3.bf16.xpose.msra.mxu1 %v17657_v42 }
0x18ac   : > { %13489 = vmatprep.subr.bf16.mxu1 %v18296_v10 }
0x18b0   : > { %13446 = vmatmul.mubr.bf16.vlgmr.msra.gmra.mxu0 %v9561_v50  ;;  %v17758_v50 = vld [vmem:[#allocation4 + $0x1e8] sm:$0xff]  }
0x18b1   : > { %13470 = vmatpush3.bf16.xpose.msra.mxu0 %v17661_v29  ;;  %13485 = vmatprep.mubr.msk.bf16.mxu0 %vm15529_vm0, %v18296_v10  ;;  %18405 = vst [vmem:[#allocation81_spill] sm:$0xff] %v17758_v50 }
0x18b2   : > { %13466 = vmatmul.mubr.bf16.vlgmr.msra.gmra.mxu1 %v9562_v30  ;;  %13471 = vmatprep.subr.bf16.mxu0 %v18296_v10  ;;  %v17762_v30 = vld [vmem:[#allocation4 + $0x1a0] sm:$0xff]  }
0x18b3   : > { %13490 = vmatpush3.bf16.xpose.msra.mxu1 %v17667_v21  ;;  %13505 = vmatprep.mubr.msk.bf16.mxu1 %vm15529_vm0, %v18296_v10  ;;  %18406 = vst [vmem:[#allocation82_spill] sm:$0xff] %v17762_v30 }
0x18b4   : > { %13491 = vmatprep.subr.bf16.mxu1 %v18296_v10 }
0x18b9   : > { %13472 = vmatpush3.bf16.xpose.msra.mxu0 %v17673_v8 }
0x18ba   : > { %13473 = vmatprep.subr.bf16.mxu0 %v18296_v10 }
0x18bb   : > { %13492 = vmatpush3.bf16.xpose.msra.mxu1 %v17677_v55 }
0x18bc   : > { %13493 = vmatprep.subr.bf16.mxu1 %v18296_v10 }
0x18c1   : > { %13474 = vmatpush3.bf16.xpose.msra.mxu0 %v17681_v54 }
0x18c2   : > { %13475 = vmatprep.subr.bf16.mxu0 %v18296_v10 }
0x18c3   : > { %13494 = vmatpush3.bf16.xpose.msra.mxu1 %v17685_v13 }
0x18c4   : > { %13495 = vmatprep.subr.bf16.mxu1 %v18296_v10 }
0x18c9   : > { %13476 = vmatpush3.bf16.xpose.msra.mxu0 %v17689_v34 }
0x18ca   : > { %13477 = vmatprep.subr.bf16.mxu0 %v18296_v10 }
0x18cb   : > { %13496 = vmatpush3.bf16.xpose.msra.mxu1 %v17693_v24 }
0x18cc   : > { %13497 = vmatprep.subr.bf16.mxu1 %v18296_v10 }
0x18d1   : > { %13478 = vmatpush3.bf16.xpose.msra.mxu0 %v17697_v1 }
0x18d2   : > { %13479 = vmatprep.subr.bf16.mxu0 %v18296_v10 }
0x18d3   : > { %13498 = vmatpush3.bf16.xpose.msra.mxu1 %v17701_v5 }
0x18d4   : > { %13499 = vmatprep.subr.bf16.mxu1 %v18296_v10 }
0x18d9   : > { %13480 = vmatpush3.bf16.xpose.msra.mxu0 %v17705_v7 }
0x18da   : > { %13481 = vmatprep.subr.bf16.mxu0 %v18296_v10 }
0x18db   : > { %13500 = vmatpush3.bf16.xpose.msra.mxu1 %v17709_v20 }
0x18dc   : > { %13501 = vmatprep.subr.bf16.mxu1 %v18296_v10 }
0x18e1   : > { %13482 = vmatpush3.bf16.xpose.msra.mxu0 %v17715_v0 }
0x18e2   : > { %13483 = vmatprep.subr.bf16.mxu0 %v18296_v10 }
0x18e3   : > { %13502 = vmatpush3.bf16.xpose.msra.mxu1 %v17719_v36 }
0x18e4   : > { %13503 = vmatprep.subr.bf16.mxu1 %v18296_v10 }
0x18e9   : > { %13484 = vmatpush3.bf16.xpose.msra.mxu0 %v17724_v61 }
0x18ea   : > { %13509 = vmatprep.subr.bf16.mxu0 %v18296_v10 }
0x18eb   : > { %13504 = vmatpush3.bf16.xpose.msra.mxu1 %v17729_v53 }
0x18ec   : > { %13529 = vmatprep.subr.bf16.mxu1 %v18296_v10 }
0x18f0   : > { %13486 = vmatmul.mubr.bf16.vlgmr.msra.gmra.mxu0 %v9563_v15  ;;  %v17778_v15 = vld [vmem:[#allocation4 + $0x190] sm:$0xff]  }
0x18f1   : > { %13510 = vmatpush3.bf16.xpose.msra.mxu0 %v17734_v62  ;;  %13525 = vmatprep.mubr.msk.bf16.mxu0 %vm15529_vm0, %v18296_v10  ;;  %18410 = vst [vmem:[#allocation86_spill] sm:$0xff] %v17778_v15 }
0x18f2   : > { %13506 = vmatmul.mubr.bf16.vlgmr.msra.gmra.mxu1 %v9564_v47  ;;  %13511 = vmatprep.subr.bf16.mxu0 %v18296_v10  ;;  %v17782_v47 = vld [vmem:[#allocation4 + $0x1d0] sm:$0xff]  }
0x18f3   : > { %13530 = vmatpush3.bf16.xpose.msra.mxu1 %v17740_v9  ;;  %13545 = vmatprep.mubr.msk.bf16.mxu1 %vm15529_vm0, %v18296_v10  ;;  %18411 = vst [vmem:[#allocation87_spill] sm:$0xff] %v17782_v47 }
0x18f4   : > { %13531 = vmatprep.subr.bf16.mxu1 %v18296_v10 }
0x18f9   : > { %13512 = vmatpush3.bf16.xpose.msra.mxu0 %v17746_v60 }
0x18fa   : > { %13513 = vmatprep.subr.bf16.mxu0 %v18296_v10 }
0x18fb   : > { %13532 = vmatpush3.bf16.xpose.msra.mxu1 %v17750_v51 }
0x18fc   : > { %13533 = vmatprep.subr.bf16.mxu1 %v18296_v10 }
0x1901   : > { %13514 = vmatpush3.bf16.xpose.msra.mxu0 %v17754_v49 }
0x1902   : > { %13515 = vmatprep.subr.bf16.mxu0 %v18296_v10 }
0x1903   : > { %13534 = vmatpush3.bf16.xpose.msra.mxu1 %v17758_v50 }
0x1904   : > { %13535 = vmatprep.subr.bf16.mxu1 %v18296_v10 }
0x1909   : > { %13516 = vmatpush3.bf16.xpose.msra.mxu0 %v17762_v30 }
0x190a   : > { %13517 = vmatprep.subr.bf16.mxu0 %v18296_v10 }
0x190b   : > { %13536 = vmatpush3.bf16.xpose.msra.mxu1 %v17766_v41 }
0x190c   : > { %13537 = vmatprep.subr.bf16.mxu1 %v18296_v10 }
0x1911   : > { %13518 = vmatpush3.bf16.xpose.msra.mxu0 %v17770_v63  ;;  %v9548_v63 = vcombine.high %v9532_v58, %v9532_v58 }
0x1912   : > { %13519 = vmatprep.subr.bf16.mxu0 %v18296_v10 }
0x1913   : > { %13538 = vmatpush3.bf16.xpose.msra.mxu1 %v17774_v56  ;;  %v17790_v56 = vld [vmem:[#allocation4 + $0x1c8] sm:$0xff]   ;;  %v9565_v41 = vpack.c.bf16 %v9548_v63, %v9548_v63 }
0x1914   : > { %13539 = vmatprep.subr.bf16.mxu1 %v18296_v10  ;;  %18413 = vst [vmem:[#allocation88_spill] sm:$0xff] %v17790_v56 }
0x1919   : > { %13520 = vmatpush3.bf16.xpose.msra.mxu0 %v17778_v15  ;;  %v17794_v15 = vld [vmem:[#allocation4 + $0x180] sm:$0xff]  }
0x191a   : > { %13521 = vmatprep.subr.bf16.mxu0 %v18296_v10  ;;  %18414 = vst [vmem:[#allocation73_spill] sm:$0xff] %v17794_v15 }
0x191b   : > { %13540 = vmatpush3.bf16.xpose.msra.mxu1 %v17782_v47  ;;  %v17798_v47 = vld [vmem:[#allocation4 + $0x1c0] sm:$0xff]  }
0x191c   : > { %13541 = vmatprep.subr.bf16.mxu1 %v18296_v10  ;;  %18415 = vst [vmem:[#allocation74_spill] sm:$0xff] %v17798_v47 }
0x1921   : > { %13522 = vmatpush3.bf16.xpose.msra.mxu0 %v17786_v12  ;;  %v9550_v12 = vcombine.high %v9546_v39, %v9546_v39 }
0x1922   : > { %13523 = vmatprep.subr.bf16.mxu0 %v18296_v10 }
0x1923   : > { %13542 = vmatpush3.bf16.xpose.msra.mxu1 %v17790_v56  ;;  %v9566_v30 = vpack.c.bf16 %v9550_v12, %v9550_v12 }
0x1924   : > { %13543 = vmatprep.subr.bf16.mxu1 %v18296_v10 }
0x1929   : > { %13524 = vmatpush3.bf16.xpose.msra.mxu0 %v17794_v15 }
0x192a   : > { %13549 = vmatprep.subr.bf16.mxu0 %v18296_v10 }
0x192b   : > { %13544 = vmatpush3.bf16.xpose.msra.mxu1 %v17798_v47 }
0x192c   : > { %13569 = vmatprep.subr.bf16.mxu1 %v18296_v10 }
0x1930   : > { %13526 = vmatmul.mubr.bf16.vlgmr.msra.gmra.mxu0 %v9565_v41  ;;  %v17802_v56 = vpop.f32.mrf.mxu0 }
0x1931   : > { %13550 = vmatpush3.bf16.msra.mxu0 %v17500_v6  ;;  %13565 = vmatprep.mubr.msk.bf16.mxu0 %vm15529_vm0, %v18296_v10 }
0x1932   : > { %13546 = vmatmul.mubr.bf16.vlgmr.msra.gmra.mxu1 %v9566_v30  ;;  %v13407_v58 = vpop.f32.mrf.mxu0  ;;  %v17807_v15 = vpop.f32.mrf.mxu1  ;;  %13551 = vmatprep.subr.bf16.mxu0 %v18296_v10 }
0x1933   : > { %13570 = vmatpush3.bf16.msra.mxu1 %v17553_v4  ;;  %13585 = vmatprep.mubr.msk.bf16.mxu1 %vm15529_vm0, %v18296_v10 }
0x1934   : > { %v9604_v12 = vpop.f32.mrf.mxu0  ;;  %v13427_v39 = vpop.f32.mrf.mxu1  ;;  %13571 = vmatprep.subr.bf16.mxu1 %v18296_v10 }
0x1935   : > { %13552 = vmatpush3.bf16.msra.mxu0 %v17506_v19 }
0x1936   : > { %v13408_v6 = vpop.f32.mrf.mxu0  ;;  %v9644_v41 = vpop.f32.mrf.mxu1  ;;  %13553 = vmatprep.subr.bf16.mxu0 %v18296_v10 }
0x1937   : > { %13572 = vmatpush3.bf16.msra.mxu1 %v17559_v28 }
0x1938   : > { %v13428_v30 = vpop.f32.mrf.mxu1  ;;  %13573 = vmatprep.subr.bf16.mxu1 %v18296_v10 }
0x1939   : > { %13554 = vmatpush3.bf16.msra.mxu0 %v17510_v37 }
0x193a   : > { %13555 = vmatprep.subr.bf16.mxu0 %v18296_v10 }
0x193b   : > { %13574 = vmatpush3.bf16.msra.mxu1 %v17563_v44 }
0x193c   : > { %13575 = vmatprep.subr.bf16.mxu1 %v18296_v10 }
0x193d   : > { %13556 = vmatpush3.bf16.msra.mxu0 %v17514_v25 }
0x193e   : > { %13557 = vmatprep.subr.bf16.mxu0 %v18296_v10 }
0x193f   : > { %13576 = vmatpush3.bf16.msra.mxu1 %v17567_v3 }
0x1940   : > { %13577 = vmatprep.subr.bf16.mxu1 %v18296_v10 }
0x1941   : > { %13558 = vmatpush3.bf16.msra.mxu0 %v17518_v59 }
0x1942   : > { %13559 = vmatprep.subr.bf16.mxu0 %v18296_v10 }
0x1943   : > { %13578 = vmatpush3.bf16.msra.mxu1 %v17571_v11 }
0x1944   : > { %13579 = vmatprep.subr.bf16.mxu1 %v18296_v10 }
0x1945   : > { %13560 = vmatpush3.bf16.msra.mxu0 %v17522_v57 }
0x1946   : > { %13561 = vmatprep.subr.bf16.mxu0 %v18296_v10 }
0x1947   : > { %13580 = vmatpush3.bf16.msra.mxu1 %v17575_v48 }
0x1948   : > { %13581 = vmatprep.subr.bf16.mxu1 %v18296_v10 }
0x1949   : > { %13562 = vmatpush3.bf16.msra.mxu0 %v17526_v2 }
0x194a   : > { %13563 = vmatprep.subr.bf16.mxu0 %v18296_v10 }
0x194b   : > { %13582 = vmatpush3.bf16.msra.mxu1 %v17579_v32 }
0x194c   : > { %13583 = vmatprep.subr.bf16.mxu1 %v18296_v10 }
0x194d   : > { %13564 = vmatpush3.bf16.msra.mxu0 %v17530_v40 }
0x194e   : > { %13589 = vmatprep.subr.bf16.mxu0 %v18296_v10 }
0x194f   : > { %13584 = vmatpush3.bf16.msra.mxu1 %v17583_v46  ;;  %v9895_v46 = vrot.slane %v17807_v15, 7 }
0x1950   : > { %13609 = vmatprep.subr.bf16.mxu1 %v18296_v10 }
0x1951   : > { %v9896_v39 = vsel %vm2634_vm1, %v9895_v46, %v17802_v56 }
0x1970   : > { %v9681_v19 = vpop.f32.mrf.mxu0 }
0x1971   : > { %v9897_v12 = vrot.slane %v9681_v19, 6 }
0x1972   : > { %v13447_v37 = vpop.f32.mrf.mxu0  ;;  %v9721_v25 = vpop.f32.mrf.mxu1 }
0x1973   : > { %v9899_v6 = vrot.slane %v9721_v25, 5  ;;  %v9898_v41 = vsel %vm2637_vm2, %v9897_v12, %v9896_v39 }
0x1974   : > { %v9684_v59 = vpop.f32.mrf.mxu0  ;;  %v13467_v57 = vpop.f32.mrf.mxu1 }
0x1975   : > { %v9900_v37 = vsel %vm2640_vm3, %v9899_v6, %v9898_v41 }
0x1976   : > { %v13448_v2 = vpop.f32.mrf.mxu0  ;;  %v9724_v4 = vpop.f32.mrf.mxu1 }
0x1978   : > { %v13468_v28 = vpop.f32.mrf.mxu1 }
0x19b0   : > { %v9761_v44 = vpop.f32.mrf.mxu0 }
0x19b1   : > { %v9901_v30 = vrot.slane %v9761_v44, 4 }
0x19b2   : > { %v13487_v3 = vpop.f32.mrf.mxu0  ;;  %v9801_v11 = vpop.f32.mrf.mxu1 }
0x19b3   : > { %v9903_v59 = vrot.slane %v9801_v11, 3  ;;  %v9902_v57 = vsel %vm2643_vm4, %v9901_v30, %v9900_v37 }
0x19b4   : > { %v9764_v48 = vpop.f32.mrf.mxu0  ;;  %v13507_v32 = vpop.f32.mrf.mxu1 }
0x19b5   : > { %v9904_v48 = vsel %vm2646_vm5, %v9903_v59, %v9902_v57 }
0x19b6   : > { %v13488_v40 = vpop.f32.mrf.mxu0  ;;  %v9804_v63 = vpop.f32.mrf.mxu1 }
0x19b8   : > { %v13508_v58 = vpop.f32.mrf.mxu1 }
0x19f0   : > { %v9841_v2 = vpop.f32.mrf.mxu0 }
0x19f1   : > { %v9905_v4 = vrot.slane %v9841_v2, 2 }
0x19f2   : > { %v13527_v28 = vpop.f32.mrf.mxu0  ;;  %v9881_v3 = vpop.f32.mrf.mxu1 }
0x19f3   : > { %v9907_v32 = vrot.slane %v9881_v3, 1  ;;  %v9906_v40 = vsel %vm2649_vm6, %v9905_v4, %v9904_v48 }
0x19f4   : > { %v9844_v63 = vpop.f32.mrf.mxu0  ;;  %v13547_v58 = vpop.f32.mrf.mxu1 }
0x19f5   : > { %v9908_v46 = vsel %vm2652_vm7, %v9907_v32, %v9906_v40 }
0x19f6   : > { %v13528_v12 = vpop.f32.mrf.mxu0  ;;  %9910 = vmax.xlane.f32.xlu0 %v9908_v46  ;;  %v9884_v39 = vpop.f32.mrf.mxu1 }
0x19f8   : > { %v13548_v6 = vpop.f32.mrf.mxu1 }
0x1a7f   : > { %v9911_v41 = vpop.xlane.xlu0 %9910 }
0x1a80   : > { %v9913_v47 = vrot.slane %v9911_v41, 1  ;;  %v9914_v30 = vrot.slane %v9911_v41, 2  ;;  %v9915_v37 = vrot.slane %v9911_v41, 3  ;;  %v9916_v50 = vrot.slane %v9911_v41, 4 }
0x1a81   : > { %v9917_v28 = vrot.slane %v9911_v41, 5  ;;  %v9918_v49 = vrot.slane %v9911_v41, 6  ;;  %v9919_v51 = vrot.slane %v9911_v41, 7  ;;  %v9928_v59 = vsub.f32 %v17802_v56, %v9911_v41 }
0x1a82   : > { %v9929_v57 = vsub.f32 %v17807_v15, %v9913_v47  ;;  %v9930_v4 = vsub.f32 %v9681_v19, %v9914_v30  ;;  %v9931_v48 = vsub.f32 %v9721_v25, %v9915_v37  ;;  %v9932_v63 = vsub.f32 %v9761_v44, %v9916_v50 }
0x1a83   : > { %v9933_v32 = vsub.f32 %v9801_v11, %v9917_v28  ;;  %v9934_v40 = vsub.f32 %v9841_v2, %v9918_v49  ;;  %v9936_v58 = vmul.f32 1.442695, %v9928_v59  ;;  %v9935_v46 = vsub.f32 %v9881_v3, %v9919_v51 }
0x1a84   : > { %v9938_v12 = vmul.f32 1.442695, %v9929_v57  ;;  %v9940_v39 = vmul.f32 1.442695, %v9930_v4  ;;  %v9942_v6 = vmul.f32 1.442695, %v9931_v48 }
0x1a85   : > { %14946 = vpow2.f32 %v9936_v58  ;;  %v9944_v60 = vmul.f32 1.442695, %v9932_v63  ;;  %v9946_v9 = vmul.f32 1.442695, %v9933_v32  ;;  %v9948_v62 = vmul.f32 1.442695, %v9934_v40 }
0x1a86   : > { %14948 = vpow2.f32 %v9938_v12  ;;  %v9950_v56 = vmul.f32 1.442695, %v9935_v46 }
0x1a87   : > { %14950 = vpow2.f32 %v9940_v39 }
0x1a88   : > { %14952 = vpow2.f32 %v9942_v6 }
0x1a89   : > { %14954 = vpow2.f32 %v9944_v60 }
0x1a8a   : > { %14956 = vpow2.f32 %v9946_v9 }
0x1a8b   : > { %14958 = vpow2.f32 %v9948_v62 }
0x1a8c   : > { %14960 = vpow2.f32 %v9950_v56 }
0x1a92   : > { %v14947_v50 = vpop.eup %14946 }
0x1a93   : > { %v14949_v15 = vpop.eup %14948 }
0x1a94   : > { %v14951_v49 = vpop.eup %14950  ;;  %v9960_v47 = vrot.slane %v14949_v15, 7 }
0x1a95   : > { %v14953_v51 = vpop.eup %14952  ;;  %v9962_v19 = vrot.slane %v14951_v49, 6 }
0x1a96   : > { %v14955_v25 = vpop.eup %14954  ;;  %v9961_v44 = vsel %vm2634_vm1, %v9960_v47, %v14947_v50  ;;  %v9964_v11 = vrot.slane %v14953_v51, 5 }
0x1a97   : > { %v14957_v2 = vpop.eup %14956  ;;  %v9963_v3 = vsel %vm2637_vm2, %v9962_v19, %v9961_v44  ;;  %v9966_v41 = vrot.slane %v14955_v25, 4 }
0x1a98   : > { %v14959_v30 = vpop.eup %14958  ;;  %v9965_v60 = vsel %vm2640_vm3, %v9964_v11, %v9963_v3  ;;  %v9968_v9 = vrot.slane %v14957_v2, 3 }
0x1a99   : > { %v14961_v62 = vpop.eup %14960  ;;  %v9967_v37 = vsel %vm2643_vm4, %v9966_v41, %v9965_v60  ;;  %v9970_v28 = vrot.slane %v14959_v30, 2 }
0x1a9a   : > { %v9969_v59 = vsel %vm2646_vm5, %v9968_v9, %v9967_v37  ;;  %v9972_v57 = vrot.slane %v14961_v62, 1 }
0x1a9b   : > { %v9971_v4 = vsel %vm2649_vm6, %v9970_v28, %v9969_v59 }
0x1a9c   : > { %v9973_v48 = vsel %vm2652_vm7, %v9972_v57, %v9971_v4 }
0x1a9d   : > { %9975 = vadd.xlane.f32.xlu1 %v9973_v48 }
0x1b26   : > { %v9976_v63 = vpop.xlane.xlu1 %9975 }
0x1b27   : > { %14962 = vrcp.f32 %v9976_v63  ;;  %v18432_v63 = vld [vmem:[#allocation75_spill] sm:$0xff] }
0x1b34   : > { %v14963_v32 = vpop.eup %14962 }
0x1b35   : > { %v9994_v40 = vmul.f32 %v14963_v32, %v14947_v50  ;;  %v9979_v58 = vrot.slane %v14963_v32, 1  ;;  %v9980_v46 = vrot.slane %v14963_v32, 2  ;;  %v9981_v12 = vrot.slane %v14963_v32, 3 }
0x1b36   : > { %v9982_v39 = vrot.slane %v14963_v32, 4  ;;  %v9983_v6 = vrot.slane %v14963_v32, 5  ;;  %v9984_v56 = vrot.slane %v14963_v32, 6  ;;  %v9985_v47 = vrot.slane %v14963_v32, 7  ;;  %v14750_v32 = vld [vmem:[#allocation9 + $0x38] sm:$0xff]  }
0x1b37   : > { %v10002_v19 = vpack.c.bf16 %v9994_v40, %v9994_v40  ;;  %v9995_v44 = vmul.f32 %v14949_v15, %v9979_v58  ;;  %v9996_v11 = vmul.f32 %v14951_v49, %v9980_v46  ;;  %v9997_v3 = vmul.f32 %v14953_v51, %v9981_v12  ;;  %v14752_v58 = vld [vmem:[#allocation9 + $0x28] sm:$0xff]   ;;  %v14753_v46 = vld [vmem:[#allocation9 + $0x20] sm:$0xff]   ;;  %v14754_v12 = vld [vmem:[#allocation9 + $0x18] sm:$0xff]  }
0x1b38   : > { %v17860_v41 = vmul.f32 %v14955_v25, %v9982_v39  ;;  %v17862_v28 = vmul.f32 %v14957_v2, %v9983_v6  ;;  %v17867_v50 = vmul.f32 %v14959_v30, %v9984_v56  ;;  %v17871_v51 = vmul.f32 %v14961_v62, %v9985_v47  ;;  %v14755_v39 = vld [vmem:[#allocation9 + $0x10] sm:$0xff]   ;;  %v14756_v6 = vld [vmem:[#allocation9 + $0x8] sm:$0xff]   ;;  %v14757_v56 = vld [vmem:[#allocation9] sm:$0xff]  }
0x1b39   : > { %13566 = vmatmul.mubr.bf16.vlgmr.msra.gmra.mxu0 %v10002_v19  ;;  %v10003_v60 = vpack.c.bf16 %v9995_v44, %v9995_v44  ;;  %v10589_v9 = vrot.slane %v9995_v44, 7  ;;  %v10591_v37 = vrot.slane %v9996_v11, 6  ;;  %v10593_v49 = vrot.slane %v9997_v3, 5 }
0x1b3a   : > { %13590 = vmatpush3.bf16.msra.mxu0 %v17593_v17  ;;  %13605 = vmatprep.mubr.msk.bf16.mxu0 %vm15529_vm0, %v18296_v10  ;;  %v10595_v17 = vrot.slane %v17860_v41, 4  ;;  %v10597_v30 = vrot.slane %v17862_v28, 3  ;;  %v10601_v57 = vrot.slane %v17871_v51, 1 }
0x1b3b   : > { %13586 = vmatmul.mubr.bf16.vlgmr.msra.gmra.mxu1 %v10003_v60  ;;  %v10590_v15 = vsel %vm2634_vm1, %v10589_v9, %v9994_v40  ;;  %13591 = vmatprep.subr.bf16.mxu0 %v18296_v10  ;;  %v14751_v40 = vld [vmem:[#allocation9 + $0x30] sm:$0xff]  }
0x1b3c   : > { %13610 = vmatpush3.bf16.msra.mxu1 %v17597_v14  ;;  %v10592_v25 = vsel %vm2637_vm2, %v10591_v37, %v10590_v15  ;;  %13625 = vmatprep.mubr.msk.bf16.mxu1 %vm15529_vm0, %v18296_v10  ;;  %v10599_v14 = vrot.slane %v17867_v50, 2 }
0x1b3d   : > { %13611 = vmatprep.subr.bf16.mxu1 %v18296_v10  ;;  %v10594_v2 = vsel %vm2640_vm3, %v10593_v49, %v10592_v25 }
0x1b3e   : > { %13592 = vmatpush3.bf16.msra.mxu0 %v17605_v18  ;;  %v10596_v62 = vsel %vm2643_vm4, %v10595_v17, %v10594_v2  ;;  %v10004_v18 = vpack.c.bf16 %v9996_v11, %v9996_v11 }
0x1b3f   : > { %13593 = vmatprep.subr.bf16.mxu0 %v18296_v10  ;;  %v10598_v59 = vsel %vm2646_vm5, %v10597_v30, %v10596_v62 }
0x1b40   : > { %13612 = vmatpush3.bf16.msra.mxu1 %v17609_v16  ;;  %v10600_v4 = vsel %vm2649_vm6, %v10599_v14, %v10598_v59  ;;  %v10005_v16 = vpack.c.bf16 %v9997_v3, %v9997_v3 }
0x1b41   : > { %13613 = vmatprep.subr.bf16.mxu1 %v18296_v10  ;;  %v10602_v48 = vsel %vm2652_vm7, %v10601_v57, %v10600_v4 }
0x1b42   : > { %13594 = vmatpush3.bf16.msra.mxu0 %v17613_v31  ;;  %11528 = vst [vmem:[%s15721_s14 + $0x18] sm:$0xff] %v10602_v48  ;;  %v10006_v31 = vpack.c.bf16 %v17860_v41, %v17860_v41 }
0x1b43   : > { %13595 = vmatprep.subr.bf16.mxu0 %v18296_v10 }
0x1b44   : > { %13614 = vmatpush3.bf16.msra.mxu1 %v17617_v38  ;;  %v10007_v38 = vpack.c.bf16 %v17862_v28, %v17862_v28 }
0x1b45   : > { %13615 = vmatprep.subr.bf16.mxu1 %v18296_v10 }
0x1b46   : > { %13596 = vmatpush3.bf16.msra.mxu0 %v17621_v43  ;;  %v18416_v43 = vld [vmem:[#allocation76_spill] sm:$0xff] }
0x1b47   : > { %13597 = vmatprep.subr.bf16.mxu0 %v18296_v10 }
0x1b48   : > { %13616 = vmatpush3.bf16.msra.mxu1 %v17625_v33  ;;  %v18417_v33 = vld [vmem:[#allocation77_spill] sm:$0xff] }
0x1b49   : > { %13617 = vmatprep.subr.bf16.mxu1 %v18296_v10 }
0x1b4a   : > { %13598 = vmatpush3.bf16.msra.mxu0 %v17629_v45  ;;  %v18418_v45 = vld [vmem:[#allocation78_spill] sm:$0xff] }
0x1b4b   : > { %13599 = vmatprep.subr.bf16.mxu0 %v18296_v10 }
0x1b4c   : > { %13618 = vmatpush3.bf16.msra.mxu1 %v17633_v23  ;;  %v18419_v23 = vld [vmem:[#allocation79_spill] sm:$0xff] }
0x1b4d   : > { %13619 = vmatprep.subr.bf16.mxu1 %v18296_v10 }
0x1b4e   : > { %13600 = vmatpush3.bf16.msra.mxu0 %v17637_v27  ;;  %v18420_v27 = vld [vmem:[#allocation80_spill] sm:$0xff] }
0x1b4f   : > { %13601 = vmatprep.subr.bf16.mxu0 %v18296_v10 }
0x1b50   : > { %13620 = vmatpush3.bf16.msra.mxu1 %v17641_v26  ;;  %v18421_v26 = vld [vmem:[#allocation81_spill] sm:$0xff] }
0x1b51   : > { %13621 = vmatprep.subr.bf16.mxu1 %v18296_v10 }
0x1b52   : > { %13602 = vmatpush3.bf16.msra.mxu0 %v17645_v52  ;;  %v18422_v52 = vld [vmem:[#allocation82_spill] sm:$0xff] }
0x1b53   : > { %13603 = vmatprep.subr.bf16.mxu0 %v18296_v10 }
0x1b54   : > { %13622 = vmatpush3.bf16.msra.mxu1 %v17649_v22  ;;  %v18423_v22 = vld [vmem:[#allocation83_spill] sm:$0xff] }
0x1b55   : > { %13623 = vmatprep.subr.bf16.mxu1 %v18296_v10 }
0x1b56   : > { %13604 = vmatpush3.bf16.msra.mxu0 %v17653_v35  ;;  %v18424_v35 = vld [vmem:[#allocation84_spill] sm:$0xff] }
0x1b57   : > { %13629 = vmatprep.subr.bf16.mxu0 %v18296_v10 }
0x1b58   : > { %13624 = vmatpush3.bf16.msra.mxu1 %v17657_v42  ;;  %v18425_v42 = vld [vmem:[#allocation85_spill] sm:$0xff] }
0x1b59   : > { %13606 = vmatmul.mubr.bf16.vlgmr.msra.gmra.mxu0 %v10004_v18  ;;  %13649 = vmatprep.subr.bf16.mxu1 %v18296_v10 }
0x1b5a   : > { %13630 = vmatpush3.bf16.msra.mxu0 %v17661_v29  ;;  %13645 = vmatprep.mubr.msk.bf16.mxu0 %vm15529_vm0, %v18296_v10  ;;  %v18426_v29 = vld [vmem:[#allocation86_spill] sm:$0xff] }
0x1b5b   : > { %13626 = vmatmul.mubr.bf16.vlgmr.msra.gmra.mxu1 %v10005_v16  ;;  %13631 = vmatprep.subr.bf16.mxu0 %v18296_v10 }
0x1b5c   : > { %13650 = vmatpush3.bf16.msra.mxu1 %v17667_v21  ;;  %13665 = vmatprep.mubr.msk.bf16.mxu1 %vm15529_vm0, %v18296_v10  ;;  %v18427_v21 = vld [vmem:[#allocation87_spill] sm:$0xff] }
0x1b5d   : > { %13651 = vmatprep.subr.bf16.mxu1 %v18296_v10 }
0x1b5e   : > { %13632 = vmatpush3.bf16.msra.mxu0 %v17673_v8  ;;  %v18428_v8 = vld [vmem:[#allocation71_spill] sm:$0xff] }
0x1b5f   : > { %13633 = vmatprep.subr.bf16.mxu0 %v18296_v10 }
0x1b60   : > { %13652 = vmatpush3.bf16.msra.mxu1 %v17677_v55  ;;  %v18429_v55 = vld [vmem:[#allocation88_spill] sm:$0xff] }
0x1b61   : > { %13653 = vmatprep.subr.bf16.mxu1 %v18296_v10 }
0x1b62   : > { %13634 = vmatpush3.bf16.msra.mxu0 %v17681_v54  ;;  %v18430_v54 = vld [vmem:[#allocation73_spill] sm:$0xff] }
0x1b63   : > { %13635 = vmatprep.subr.bf16.mxu0 %v18296_v10 }
0x1b64   : > { %13654 = vmatpush3.bf16.msra.mxu1 %v17685_v13  ;;  %v14742_v13 = vld [vmem:[#allocation10 + $0x38] sm:$0xff]  }
0x1b65   : > { %13655 = vmatprep.subr.bf16.mxu1 %v18296_v10 }
0x1b66   : > { %13636 = vmatpush3.bf16.msra.mxu0 %v17689_v34  ;;  %v10008_v34 = vpack.c.bf16 %v17867_v50, %v17867_v50 }
0x1b67   : > { %13637 = vmatprep.subr.bf16.mxu0 %v18296_v10 }
0x1b68   : > { %13656 = vmatpush3.bf16.msra.mxu1 %v17693_v24  ;;  %v18431_v24 = vld [vmem:[#allocation74_spill] sm:$0xff] }
0x1b69   : > { %13657 = vmatprep.subr.bf16.mxu1 %v18296_v10 }
0x1b6a   : > { %13638 = vmatpush3.bf16.msra.mxu0 %v17697_v1  ;;  %v10009_v1 = vpack.c.bf16 %v17871_v51, %v17871_v51 }
0x1b6b   : > { %13639 = vmatprep.subr.bf16.mxu0 %v18296_v10 }
0x1b6c   : > { %13658 = vmatpush3.bf16.msra.mxu1 %v17701_v5  ;;  %v14743_v5 = vld [vmem:[#allocation10 + $0x30] sm:$0xff]  }
0x1b6d   : > { %13659 = vmatprep.subr.bf16.mxu1 %v18296_v10 }
0x1b6e   : > { %13640 = vmatpush3.bf16.msra.mxu0 %v17705_v7  ;;  %v14744_v7 = vld [vmem:[#allocation10 + $0x28] sm:$0xff]  }
0x1b6f   : > { %13641 = vmatprep.subr.bf16.mxu0 %v18296_v10 }
0x1b70   : > { %13660 = vmatpush3.bf16.msra.mxu1 %v17709_v20  ;;  %v14745_v20 = vld [vmem:[#allocation10 + $0x20] sm:$0xff]  }
0x1b71   : > { %13661 = vmatprep.subr.bf16.mxu1 %v18296_v10 }
0x1b72   : > { %13642 = vmatpush3.bf16.msra.mxu0 %v17715_v0  ;;  %v14746_v0 = vld [vmem:[#allocation10 + $0x18] sm:$0xff]  }
0x1b73   : > { %13643 = vmatprep.subr.bf16.mxu0 %v18296_v10 }
0x1b74   : > { %13662 = vmatpush3.bf16.msra.mxu1 %v17719_v36  ;;  %v14747_v36 = vld [vmem:[#allocation10 + $0x10] sm:$0xff]  }
0x1b75   : > { %13663 = vmatprep.subr.bf16.mxu1 %v18296_v10 }
0x1b76   : > { %13644 = vmatpush3.bf16.msra.mxu0 %v17724_v61  ;;  %v14748_v61 = vld [vmem:[#allocation10 + $0x8] sm:$0xff]  }
0x1b77   : > { %13669 = vmatprep.subr.bf16.mxu0 %v18296_v10 }
0x1b78   : > { %13664 = vmatpush3.bf16.msra.mxu1 %v17729_v53  ;;  %v14749_v53 = vld [vmem:[#allocation10] sm:$0xff]  }
0x1b79   : > { %13646 = vmatmul.mubr.bf16.vlgmr.msra.gmra.mxu0 %v10006_v31  ;;  %13689 = vmatprep.subr.bf16.mxu1 %v18296_v10 }
0x1b7a   : > { %13670 = vmatpush3.bf16.msra.mxu0 %v18416_v43  ;;  %13685 = vmatprep.mubr.msk.bf16.mxu0 %vm15529_vm0, %v18296_v10 }
0x1b7b   : > { %13666 = vmatmul.mubr.bf16.vlgmr.msra.gmra.mxu1 %v10007_v38  ;;  %13671 = vmatprep.subr.bf16.mxu0 %v18296_v10 }
0x1b7c   : > { %13690 = vmatpush3.bf16.msra.mxu1 %v18417_v33  ;;  %13705 = vmatprep.mubr.msk.bf16.mxu1 %vm15529_vm0, %v18296_v10 }
0x1b7d   : > { %13691 = vmatprep.subr.bf16.mxu1 %v18296_v10 }
0x1b7e   : > { %13672 = vmatpush3.bf16.msra.mxu0 %v18418_v45 }
0x1b7f   : > { %13673 = vmatprep.subr.bf16.mxu0 %v18296_v10 }
0x1b80   : > { %13692 = vmatpush3.bf16.msra.mxu1 %v18419_v23 }
0x1b81   : > { %13693 = vmatprep.subr.bf16.mxu1 %v18296_v10 }
0x1b82   : > { %13674 = vmatpush3.bf16.msra.mxu0 %v18420_v27 }
0x1b83   : > { %13675 = vmatprep.subr.bf16.mxu0 %v18296_v10 }
0x1b84   : > { %13694 = vmatpush3.bf16.msra.mxu1 %v18421_v26 }
0x1b85   : > { %13695 = vmatprep.subr.bf16.mxu1 %v18296_v10 }
0x1b86   : > { %13676 = vmatpush3.bf16.msra.mxu0 %v18422_v52 }
0x1b87   : > { %13677 = vmatprep.subr.bf16.mxu0 %v18296_v10 }
0x1b88   : > { %13696 = vmatpush3.bf16.msra.mxu1 %v18423_v22 }
0x1b89   : > { %13697 = vmatprep.subr.bf16.mxu1 %v18296_v10 }
0x1b8a   : > { %13678 = vmatpush3.bf16.msra.mxu0 %v18424_v35 }
0x1b8b   : > { %13679 = vmatprep.subr.bf16.mxu0 %v18296_v10 }
0x1b8c   : > { %13698 = vmatpush3.bf16.msra.mxu1 %v18425_v42 }
0x1b8d   : > { %13699 = vmatprep.subr.bf16.mxu1 %v18296_v10 }
0x1b8e   : > { %13680 = vmatpush3.bf16.msra.mxu0 %v18426_v29 }
0x1b8f   : > { %13681 = vmatprep.subr.bf16.mxu0 %v18296_v10 }
0x1b90   : > { %13700 = vmatpush3.bf16.msra.mxu1 %v18427_v21 }
0x1b91   : > { %13701 = vmatprep.subr.bf16.mxu1 %v18296_v10 }
0x1b92   : > { %13682 = vmatpush3.bf16.msra.mxu0 %v18428_v8 }
0x1b93   : > { %13683 = vmatprep.subr.bf16.mxu0 %v18296_v10 }
0x1b94   : > { %13702 = vmatpush3.bf16.msra.mxu1 %v18429_v55 }
0x1b95   : > { %13703 = vmatprep.subr.bf16.mxu1 %v18296_v10 }
0x1b96   : > { %13684 = vmatpush3.bf16.msra.mxu0 %v18430_v54 }
0x1b97   : > { %13709 = vmatprep.subr.bf16.mxu0 %v18296_v10 }
0x1b98   : > { %13704 = vmatpush3.bf16.msra.mxu1 %v18431_v24 }
0x1b99   : > { %13686 = vmatmul.mubr.bf16.vlgmr.msra.gmra.mxu0 %v10008_v34  ;;  %13729 = vmatprep.subr.bf16.mxu1 %v18296_v10 }
0x1b9a   : > { %13710 = vmatpush3.bf16.msra.mxu0 %v14742_v13  ;;  %13725 = vmatprep.mubr.msk.bf16.mxu0 %vm15529_vm0, %v18296_v10 }
0x1b9b   : > { %13706 = vmatmul.mubr.bf16.vlgmr.msra.gmra.mxu1 %v10009_v1  ;;  %13711 = vmatprep.subr.bf16.mxu0 %v18296_v10 }
0x1b9c   : > { %13745 = vmatprep.mubr.msk.bf16.mxu1 %vm15529_vm0, %v18296_v10  ;;  %13730 = vmatpush3.bf16.msra.mxu1 %v14750_v32 }
0x1b9d   : > { %13731 = vmatprep.subr.bf16.mxu1 %v18296_v10 }
0x1b9e   : > { %13712 = vmatpush3.bf16.msra.mxu0 %v14743_v5 }
0x1b9f   : > { %13713 = vmatprep.subr.bf16.mxu0 %v18296_v10 }
0x1ba0   : > { %13732 = vmatpush3.bf16.msra.mxu1 %v14751_v40 }
0x1ba1   : > { %13733 = vmatprep.subr.bf16.mxu1 %v18296_v10 }
0x1ba2   : > { %13714 = vmatpush3.bf16.msra.mxu0 %v14744_v7 }
0x1ba3   : > { %13715 = vmatprep.subr.bf16.mxu0 %v18296_v10 }
0x1ba4   : > { %13734 = vmatpush3.bf16.msra.mxu1 %v14752_v58 }
0x1ba5   : > { %13735 = vmatprep.subr.bf16.mxu1 %v18296_v10 }
0x1ba6   : > { %13716 = vmatpush3.bf16.msra.mxu0 %v14745_v20 }
0x1ba7   : > { %13717 = vmatprep.subr.bf16.mxu0 %v18296_v10 }
0x1ba8   : > { %13736 = vmatpush3.bf16.msra.mxu1 %v14753_v46 }
0x1ba9   : > { %13737 = vmatprep.subr.bf16.mxu1 %v18296_v10 }
0x1baa   : > { %13718 = vmatpush3.bf16.msra.mxu0 %v14746_v0 }
0x1bab   : > { %13719 = vmatprep.subr.bf16.mxu0 %v18296_v10 }
0x1bac   : > { %13738 = vmatpush3.bf16.msra.mxu1 %v14754_v12 }
0x1bad   : > { %13739 = vmatprep.subr.bf16.mxu1 %v18296_v10 }
0x1bae   : > { %13720 = vmatpush3.bf16.msra.mxu0 %v14747_v36 }
0x1baf   : > { %13721 = vmatprep.subr.bf16.mxu0 %v18296_v10 }
0x1bb0   : > { %13740 = vmatpush3.bf16.msra.mxu1 %v14755_v39 }
0x1bb1   : > { %13741 = vmatprep.subr.bf16.mxu1 %v18296_v10 }
0x1bb2   : > { %13722 = vmatpush3.bf16.msra.mxu0 %v14748_v61 }
0x1bb3   : > { %13723 = vmatprep.subr.bf16.mxu0 %v18296_v10 }
0x1bb4   : > { %13742 = vmatpush3.bf16.msra.mxu1 %v14756_v6 }
0x1bb5   : > { %13743 = vmatprep.subr.bf16.mxu1 %v18296_v10 }
0x1bb6   : > { %13724 = vmatpush3.bf16.msra.mxu0 %v14749_v53 }
0x1bb8   : > { %13744 = vmatpush3.bf16.msra.mxu1 %v14757_v56 }
0x1bb9   : > { %13726 = vmatmul.mubr.bf16.vlgmr.msra.gmra.mxu0 %v18432_v63 }
0x1bf9   : > { %v10044_v47 = vpop.f32.mrf.mxu0 }
0x1bfa   : > { %v10330_v11 = vpack.c.bf16 %v10044_v47, %v10044_v47 }
0x1bfb   : > { %v13567_v19 = vpop.f32.mrf.mxu0  ;;  %v10084_v44 = vpop.f32.mrf.mxu1 }
0x1bfc   : > { %v10331_v3 = vpack.c.bf16 %v10084_v44, %v10084_v44  ;;  %v10466_v50 = vunpack.c.l.b16 %v10330_v11 }
0x1bfd   : > { %v10047_v41 = vpop.f32.mrf.mxu0  ;;  %v13587_v60 = vpop.f32.mrf.mxu1 }
0x1bfe   : > { %v10467_v9 = vunpack.c.l.b16 %v10331_v3 }
0x1bff   : > { %v13568_v37 = vpop.f32.mrf.mxu0  ;;  %v10087_v28 = vpop.f32.mrf.mxu1 }
0x1c00   : > { %v10474_v15 = vrot.slane %v10467_v9, 7 }
0x1c01   : > { %v13588_v49 = vpop.f32.mrf.mxu1 }
0x1c02   : > { %v10475_v51 = vsel %vm2634_vm1, %v10474_v15, %v10466_v50 }
0x1c19   : > { %v10124_v25 = vpop.f32.mrf.mxu0 }
0x1c1a   : > { %v10332_v33 = vpack.c.bf16 %v10124_v25, %v10124_v25 }
0x1c1b   : > { %v13607_v17 = vpop.f32.mrf.mxu0  ;;  %v10164_v2 = vpop.f32.mrf.mxu1 }
0x1c1c   : > { %v10333_v45 = vpack.c.bf16 %v10164_v2, %v10164_v2  ;;  %v10468_v23 = vunpack.c.l.b16 %v10332_v33 }
0x1c1d   : > { %v10127_v10 = vpop.f32.mrf.mxu0  ;;  %v13627_v30 = vpop.f32.mrf.mxu1 }
0x1c1e   : > { %v10469_v26 = vunpack.c.l.b16 %v10333_v45  ;;  %v10476_v22 = vrot.slane %v10468_v23, 6 }
0x1c1f   : > { %v13608_v62 = vpop.f32.mrf.mxu0  ;;  %v10167_v14 = vpop.f32.mrf.mxu1 }
0x1c20   : > { %v10478_v42 = vrot.slane %v10469_v26, 5  ;;  %v10477_v21 = vsel %vm2637_vm2, %v10476_v22, %v10475_v51 }
0x1c21   : > { %v13628_v59 = vpop.f32.mrf.mxu1 }
0x1c22   : > { %v10479_v13 = vsel %vm2640_vm3, %v10478_v42, %v10477_v21 }
0x1c39   : > { %v10204_v57 = vpop.f32.mrf.mxu0 }
0x1c3a   : > { %v10334_v27 = vpack.c.bf16 %v10204_v57, %v10204_v57 }
0x1c3b   : > { %v13647_v4 = vpop.f32.mrf.mxu0  ;;  %v10244_v48 = vpop.f32.mrf.mxu1 }
0x1c3c   : > { %v10335_v52 = vpack.c.bf16 %v10244_v48, %v10244_v48  ;;  %v10470_v35 = vunpack.c.l.b16 %v10334_v27 }
0x1c3d   : > { %v10207_v18 = vpop.f32.mrf.mxu0  ;;  %v13667_v16 = vpop.f32.mrf.mxu1 }
0x1c3e   : > { %v10471_v29 = vunpack.c.l.b16 %v10335_v52  ;;  %v10480_v8 = vrot.slane %v10470_v35, 4 }
0x1c3f   : > { %v13648_v31 = vpop.f32.mrf.mxu0  ;;  %v10247_v38 = vpop.f32.mrf.mxu1 }
0x1c40   : > { %v10482_v34 = vrot.slane %v10471_v29, 3  ;;  %v10481_v5 = vsel %vm2643_vm4, %v10480_v8, %v10479_v13 }
0x1c41   : > { %v13668_v43 = vpop.f32.mrf.mxu1 }
0x1c42   : > { %v10483_v63 = vsel %vm2646_vm5, %v10482_v34, %v10481_v5 }
0x1c59   : > { %v10284_v55 = vpop.f32.mrf.mxu0 }
0x1c5a   : > { %v10336_v54 = vpack.c.bf16 %v10284_v55, %v10284_v55 }
0x1c5b   : > { %v13687_v24 = vpop.f32.mrf.mxu0  ;;  %v10324_v1 = vpop.f32.mrf.mxu1 }
0x1c5c   : > { %v10472_v7 = vunpack.c.l.b16 %v10336_v54  ;;  %v10337_v20 = vpack.c.bf16 %v10324_v1, %v10324_v1 }
0x1c5d   : > { %v10287_v0 = vpop.f32.mrf.mxu0  ;;  %v13707_v36 = vpop.f32.mrf.mxu1 }
0x1c5e   : > { %v10484_v61 = vrot.slane %v10472_v7, 2  ;;  %v10473_v53 = vunpack.c.l.b16 %v10337_v20 }
0x1c5f   : > { %v13688_v32 = vpop.f32.mrf.mxu0  ;;  %v10327_v40 = vpop.f32.mrf.mxu1 }
0x1c60   : > { %v10485_v58 = vsel %vm2649_vm6, %v10484_v61, %v10483_v63  ;;  %v10486_v46 = vrot.slane %v10473_v53, 1 }
0x1c61   : > { %v13708_v12 = vpop.f32.mrf.mxu1 }
0x1c62   : > { %v10487_v39 = vsel %vm2652_vm7, %v10486_v46, %v10485_v58 }
0x1c63   : > { %v10488_v6 = vpack.c.b16 %v10487_v39, %v10487_v39 }
0x1c65   : > { %13746 = vmatmul.mubr.bf16.vlgmr.msra.gmra.mxu1 %v10488_v6 }
0x1c79   : > { %v10452_v56 = vpop.f32.mrf.mxu0 }
0x1c7b   : > { %v13727_v47 = vpop.f32.mrf.mxu0 }
0x1c7d   : > { %v10455_v19 = vpop.f32.mrf.mxu0 }
0x1c7f   : > { %v13728_v44 = vpop.f32.mrf.mxu0 }
0x1d25   : > { %v10572_v11 = vpop.f32.mrf.mxu1 }
0x1d26   : > { %v10573_v3 = vadd.f32 %v10572_v11, %v10452_v56 }
0x1d27   : > { %v13747_v41 = vpop.f32.mrf.mxu1 }
0x1d28   : > { %14964 = vtanh.f32 %v10573_v3 }
0x1d29   : > { %v10575_v60 = vpop.f32.mrf.mxu1 }
0x1d2b   : > { %v13748_v9 = vpop.f32.mrf.mxu1 }
0x1d32   : > { %10609 = sbr.rel (%p11529_p6) target bundleno = 7482 (0x1d3a), region = 111 }
0x1d35   : > { %v14965_v37 = vpop.eup %14964 }
0x1d36   : > { %11527 = vst [vmem:[%s15719_s27 + $0x18] sm:$0xff] %v14965_v37 }
0x1d37   : > { %v10610_v28 = vld [vmem:[#allocation2] sm:$0xff]  ;;  %v10611_v50 = vld [vmem:[#allocation2 + $0x8] sm:$0xff]  ;;  %v10614_v15 = vld [vmem:[#allocation3] sm:$0xff] }
0x1d38   : > { %10612 = vst [vmem:[#allocation17] sm:$0xff] %v10610_v28  ;;  %10613 = vst [vmem:[#allocation17 + $0x8] sm:$0xff] %v10611_v50  ;;  %v10615_v49 = vld [vmem:[#allocation3 + $0x8] sm:$0xff] }
0x1d39   : > { %10616 = vst [vmem:[#allocation18] sm:$0xff] %v10614_v15  ;;  %10617 = vst [vmem:[#allocation18 + $0x8] sm:$0xff] %v10615_v49 }
0x1d3a PF: > { %s10623_s24 = sand.u32 1, %s15628_s29   ;;  %s11543_s16 = sshll.u32 %s15628_s29, 9 }
0x1d3b   : > { %s18029_s21 = scalar_lea.hbm %s18154_s11, %s11543_s16  ;;  %s10653_s15 = sshll.u32 %s15721_s14, 4  ;;  %s18032_s15 = int_to_ptr.vmem [resolvable:$true] %s10653_s15 }
0x1d3c   : > { %s18037_s25 = scalar_lea.hbm %s18153_s10, %s11543_s16  ;;  %s18039_s17 = scalar_lea.sflag [#allocation16], %s10623_s24 }
0x1d3d   : > { %s15346_s22 = scalar_lea.vmem %s18032_s15, 512  ;;  %p18433_p12 = scmp.ne.s32.totalorder %s18268_s20, 0 }
0x1d3e   : > { %p15347_p11 = scmp.ne.s32.totalorder %s18032_s15, %s15346_s22  ;;  %s15531_s19 = smov [#allocation15]  }
0x1d3f   : > { %s15350_s23 = sshll.u32 %s15531_s19, 4  ;;  %s15351_s23 = int_to_ptr.vmem [resolvable:$false] %s15350_s23 }
0x1d40   : > { %p15348_p13 = pnand %p15347_p11, %p18433_p12  ;;  %s15352_s14 = scalar_lea.vmem %s15351_s23, 1024 }
0x1d41   : > { %p15353_p4 = scmp.lt.s32.totalorder %s18032_s15, %s15351_s23  ;;  %p15354_p5 = scmp.lt.s32.totalorder %s15352_s14, %s15346_s22 }
0x1d42   : > { %p15349_p3 = pneg %p15348_p13 }
0x1d43   : > { %p15355_p8 = por %p15354_p5, %p15353_p4 }
0x1d45   : > { %p15356_p10 = pnand %p15355_p8, %p15349_p3 }
0x1d47   : > { %15359 = shalt.err (!%p15356_p10)
}
0x1d48   : > { %s15360_s24 = scalar_lea.hbm %s18029_s21, 512  ;;  %s15364_s18 = scalar_lea.hbm %s18154_s11, 1024 }
0x1d49   : > { %p15361_p0 = scmp.ne.s32.totalorder %s18029_s21, %s15360_s24  ;;  %p15365_p9 = scmp.lt.s32.totalorder %s18029_s21, %s18154_s11 }
0x1d4a   : > { %p15366_p1 = scmp.lt.s32.totalorder %s15364_s18, %s15360_s24 }
0x1d4b   : > { %p15362_p2 = pnand %p15361_p0, %p18433_p12 }
0x1d4c   : > { %p15367_p6 = por %p15366_p1, %p15365_p9 }
0x1d4d   : > { %p15363_p7 = pneg %p15362_p2 }
0x1d4f   : > { %p15368_p11 = pnand %p15367_p6, %p15363_p7 }
0x1d51   : > { %15371 = shalt.err (!%p15368_p11)
}
0x1d52   : > { %s15532_s22 = smov 128   ;;  %s15533_s23 = smov 8  }
0x1d53   : > { %13752 = dma.vmem_to_hbm [thread:$0]  (%p18433_p12), %s18032_s15, 512, %s18029_s21, %s18039_s17, %s15532_s22, %s15532_s22, %s15533_s23  }
0x1d54   : > { %s10637_s0 = sshll.u32 %s15719_s27, 4  ;;  %s15534_s14 = smov [#allocation17]   ;;  %s18066_s0 = int_to_ptr.vmem [resolvable:$true] %s10637_s0 }
0x1d55   : > { %s18068_s24 = sshll.u32 %s15534_s14, 4  ;;  %s10619_s16 = scalar_lea.sflag [#allocation13], %s15708_s13  ;;  %s10667_s24 = int_to_ptr.vmem [resolvable:$true] %s18068_s24 }
0x1d56   : > { %s15372_s30 = scalar_lea.vmem %s18066_s0, 512  ;;  %s15535_s18 = smov [#allocation14]  }
0x1d57   : > { %p15373_p13 = scmp.ne.s32.totalorder %s18066_s0, %s15372_s30  ;;  %s15376_s19 = sshll.u32 %s15535_s18, 4  ;;  %s15377_s19 = int_to_ptr.vmem [resolvable:$false] %s15376_s19 }
0x1d58   : > { %s15378_s1 = scalar_lea.vmem %s15377_s19, 1024  ;;  %p15379_p5 = scmp.lt.s32.totalorder %s18066_s0, %s15377_s19 }
0x1d59   : > { %p15374_p3 = pnand %p15373_p13, %p18433_p12  ;;  %p15380_p8 = scmp.lt.s32.totalorder %s15378_s1, %s15372_s30 }
0x1d5b   : > { %p15375_p4 = pneg %p15374_p3  ;;  %p15381_p10 = por %p15380_p8, %p15379_p5 }
0x1d5d   : > { %p15382_p0 = pnand %p15381_p10, %p15375_p4 }
0x1d5f   : > { %15385 = shalt.err (!%p15382_p0)
}
0x1d60   : > { %s15386_s27 = scalar_lea.hbm %s18037_s25, 512  ;;  %s15390_s15 = scalar_lea.hbm %s18153_s10, 1024 }
0x1d61   : > { %p15387_p2 = scmp.ne.s32.totalorder %s18037_s25, %s15386_s27  ;;  %p15391_p1 = scmp.lt.s32.totalorder %s18037_s25, %s18153_s10 }
0x1d62   : > { %p15392_p6 = scmp.lt.s32.totalorder %s15390_s15, %s15386_s27 }
0x1d63   : > { %p15388_p7 = pnand %p15387_p2, %p18433_p12 }
0x1d64   : > { %p15393_p11 = por %p15392_p6, %p15391_p1 }
0x1d65   : > { %p15389_p9 = pneg %p15388_p7 }
0x1d67   : > { %p15394_p13 = pnand %p15393_p11, %p15389_p9 }
0x1d69   : > { %15397 = shalt.err (!%p15394_p13)
}
0x1d6a   : > { %13751 = dma.vmem_to_hbm [thread:$0]  (%p18433_p12), %s18066_s0, 512, %s18037_s25, %s10619_s16, %s15532_s22, %s15532_s22, %s15533_s23  }
0x1d6b   : > { %s15398_s1 = scalar_lea.vmem %s10667_s24, 256  ;;  %p18434_p4 = scmp.eq.s32.totalorder %s15628_s29, 1 }
0x1d6c   : > { %p15399_p3 = scmp.ne.s32.totalorder %s10667_s24, %s15398_s1  ;;  %p15405_p10 = scmp.lt.s32.totalorder %s10667_s24, %s10667_s24 }
0x1d6d   : > { %p15406_p0 = scmp.lt.s32.totalorder %s15398_s1, %s15398_s1 }
0x1d6e   : > { %p15400_p5 = pnand %p15399_p3, %p18434_p4 }
0x1d6f   : > { %p15407_p2 = por %p15406_p0, %p15405_p10 }
0x1d70   : > { %p15401_p8 = pneg %p15400_p5 }
0x1d72   : > { %p15408_p7 = pnand %p15407_p2, %p15401_p8 }
0x1d74   : > { %15411 = shalt.err (!%p15408_p7)
}
0x1d75   : > { %p18435_p9 = pmov %p18434_p4  ;;  %s15536_s25 = smov [#allocation18]  }
0x1d76   : > { %s10679_s0 = sshll.u32 %s15536_s25, 4  ;;  %p18436_p1 = pmov %p18434_p4  ;;  %s10680_s0 = int_to_ptr.vmem [resolvable:$true] %s10679_s0 }
0x1d77   : > { %13754 = dma.vmem_to_hbm [thread:$0]  (%p18435_p9), %s10667_s24, 256, %s18155_s12, [#allocation16], %s15532_s22, %s15532_s22, %s15533_s23  }
0x1d78   : > { %s15422_s16 = scalar_lea.vmem %s10680_s0, 256  ;;  %p15429_p13 = scmp.lt.s32.totalorder %s10680_s0, %s10680_s0 }
0x1d79   : > { %p15423_p12 = scmp.ne.s32.totalorder %s10680_s0, %s15422_s16  ;;  %p15430_p3 = scmp.lt.s32.totalorder %s15422_s16, %s15422_s16 }
0x1d7b   : > { %p15424_p6 = pnand %p15423_p12, %p18436_p1  ;;  %p15431_p4 = por %p15430_p3, %p15429_p13 }
0x1d7d   : > { %p15425_p11 = pneg %p15424_p6 }
0x1d7f   : > { %p15432_p5 = pnand %p15431_p4, %p15425_p11 }
0x1d81   : > { %15435 = shalt.err (!%p15432_p5)
}
0x1d82   : > { %p18437_p8 = pmov %p18436_p1  ;;  %s18438_s19 = sld [smem:[#allocation91_spill]] }
0x1d83   : > { %p18439_p10 = pmov %p18436_p1 }
0x1d88   : > { %13756 = dma.vmem_to_hbm [thread:$0]  (%p18437_p8), %s10680_s0, 256, %s18438_s19, [#allocation19], %s15532_s22, %s15532_s22, %s15533_s23  }
0x1d89   : > { %15485 = dma.done.wait (%p18439_p10), [#allocation16], 256   ;;  %p18440_p0 = pmov %p18436_p1 }
0x1d8b   : > { %15487 = vsyncadd (%p18440_p0), [#allocation16], 4294967040  ;;  %p18441_p2 = pmov %p18440_p0 }
0x1d8c   : > { %p18442_p7 = pmov %p18440_p0 }
0x1d8d   : > { %15489 = dma.done.wait (%p18441_p2), [#allocation19], 256  }
0x1d8e   : > { %15491 = vsyncadd (%p18442_p7), [#allocation19], 4294967040 }
0x1d8f PF: > { %s18443_s27 = sld [smem:[#allocation62_spill]]  ;;  %p18446_p12 = scmp.ge.s32.totalorder %s15514_s28, 2 }
0x1d90   : > { %s18444_s13 = sld [smem:[#allocation66_spill]] }
0x1d95   : > { %s10702_s21 = sand.u32 1, %s18443_s27  }
0x1d96   : > { %p18445_p9 = scmp.ne.s32.totalorder %s18444_s13, 0  ;;  %s10703_s22 = scalar_lea.sflag [#allocation13], %s10702_s21 }
0x1d98   : > { %p13768_p1 = pnand %p18446_p12, %p18445_p9 }
0x1d9a   : > { %p13769_p6 = pneg %p13768_p1 }
0x1d9c   : > { %15493 = dma.done.wait (%p13769_p6), %s10703_s22, 512  }
0x1d9d   : > { %15495 = vsyncadd (%p13769_p6), %s10703_s22, 4294966784  ;;  %s18447_s23 = sadd.s32 4294967294, %s15514_s28  }
0x1d9e   : > { %s10711_s15 = sand.u32 1, %s18447_s23  }
0x1d9f   : > { %s10712_s17 = scalar_lea.sflag [#allocation16], %s10711_s15 }
0x1da0   : > { %15497 = dma.done.wait (%p13769_p6), %s10712_s17, 512  }
0x1da1   : > { %15499 = vsyncadd (%p13769_p6), %s10712_s17, 4294966784  ;;  %s18448_s28 = sld [smem:[#allocation64_spill]]  ;;  %s18451_s25 = smov %s15506_s26 }
0x1da2   : > { %s18449_s29 = sld [smem:[#allocation63_spill]] }
0x1da3   : > { %s18450_s27 = sld [smem:[#allocation65_spill]] }
0x1da7   : > { %p31_p11 = scmp.ge.s32.totalorder %s18448_s28, 4  }
0x1da8   : > { %s18452_s26 = smov %s18449_s29 }
0x1da9   :  { %33 = sbr.rel (!%p31_p11) target bundleno = 12 (0xc), region = 207 }
0x1dae   :  { %10717 = vsyncpa [#allocation12], 1 }
0x1daf   :  { %10719 = vsyncpa [#allocation12 + $0x1], 1 }
0x1db0   :  { %10720 = vsyncpa [#allocation13], 1 }
0x1db1   :  { %10722 = vsyncpa [#allocation13 + $0x1], 1 }
0x1db2   :  { %10723 = vsyncpa [#allocation16], 1 }
0x1db3   :  { %10725 = vsyncpa [#allocation16 + $0x1], 1 }
0x1db4   :  { %10726 = vsyncpa [#allocation19], 1 }

</bundles_post_ra>
